<compile_context>
chip_gen: v7x
topology: tpu7x:2x2x1
jax: 0.10.0
libtpu: 0.0.40
codegen_flags: <defaults>
</compile_context>

<pallas_src>
import jax
import jax.numpy as jnp
from jax import lax
from jax.experimental import pallas as pl
from jax.experimental.pallas import tpu as pltpu


# ----------------------------------------------------------------------------
# Config (small, consistent with the module's structural constraints:
# opacity length must be 256 for the fixed Conv1d stack to reduce to length 1).
# ----------------------------------------------------------------------------
BATCH = 2
IMAGE_SIZE = 16        # opt.imageSize
MIN_SPATIAL = 4        # opt.min_spatial_res
NDF = 16               # opt.ndf
MAX_CHANNELS = 64      # opt.max_channels
NVF = 16               # opt.nvf
NOF = 32               # opt.nof
OPACITY_LEN = 256      # required by the fixed Conv1d stack (5x stride-2 + k=8)
LEAKY_SLOPE = 0.2

# middle opacity conv layers (Cin, Cout, Lin, Lout); all are k=5, s=2, p=2
_OP_MID = ((16, 32, 128, 64), (32, 64, 64, 32), (64, 128, 32, 16),
           (128, 256, 16, 8))

_VMEM = pl.BlockSpec(memory_space=pltpu.MemorySpace.VMEM)


# ----------------------------------------------------------------------------
# In-kernel helpers (only iota / compare / where / dot / add — all supported)
# ----------------------------------------------------------------------------
def _leaky(x):
    return jnp.where(x > 0, x, LEAKY_SLOPE * x)


def _stride2_select(k, lout, lin, batch):
    """(batch*lout, batch*lin) 0/1 matrix: output row (b,l) selects input row
    (b, 2l + k - 2) of a pad=2 / stride=2 / K=5 conv (zero row if the source
    position falls in the zero padding).  Block-diagonal over the batch;
    lin == 2*lout and lout is a power of two."""
    n_out, n_in = batch * lout, batch * lin
    r = lax.broadcasted_iota(jnp.int32, (n_out, n_in), 0)
    c = lax.broadcasted_iota(jnp.int32, (n_out, n_in), 1)
    pos = jnp.bitwise_and(r, lout - 1)          # l within its batch block
    src = 2 * pos + (k - 2)                     # source position within block
    valid = jnp.logical_and(src >= 0, src < lin)
    # global column of the source row: b*lin + src == 2*r + (k-2) since lin=2*lout
    hit = jnp.logical_and(c == 2 * r + (k - 2), valid)
    return jnp.where(hit, 1.0, 0.0)


def _row_select(k, lin, batch):
    """(batch, batch*lin) 0/1 matrix picking input row b*lin + k for batch b."""
    r = lax.broadcasted_iota(jnp.int32, (batch, batch * lin), 0)
    c = lax.broadcasted_iota(jnp.int32, (batch, batch * lin), 1)
    return jnp.where(c == r * lin + k, 1.0, 0.0)


# ----------------------------------------------------------------------------
# Pallas kernels
# ----------------------------------------------------------------------------
def _opacity_kernel(p1_ref, w1_ref, b1_ref, w2_ref, b2_ref, w3_ref, b3_ref,
                    w4_ref, b4_ref, w5_ref, b5_ref, w6_ref, b6_ref, out_ref):
    """Whole 6-layer Conv1d opacity encoder (channels-last, fused)."""
    f32, bf16 = jnp.float32, jnp.bfloat16

    # layer 1: pre-im2col'd patches (B*128, 5) @ (5, 16)
    h = jnp.dot(p1_ref[...].astype(bf16), w1_ref[...],
                preferred_element_type=f32)
    h = _leaky(h + b1_ref[...])                                   # (B*128, 16)

    mid_refs = ((w2_ref, b2_ref), (w3_ref, b3_ref),
                (w4_ref, b4_ref), (w5_ref, b5_ref))
    for (w_ref, b_ref), (_ci, _co, lin, lout) in zip(mid_refs, _OP_MID):
        hb = h.astype(bf16)                                       # (B*lin, ci)
        acc = None
        for k in range(5):
            z = jnp.dot(hb, w_ref[k], preferred_element_type=f32)  # (B*lin, co)
            term = jnp.dot(_stride2_select(k, lout, lin, BATCH), z,
                           preferred_element_type=f32)             # (B*lout, co)
            acc = term if acc is None else acc + term
        h = _leaky(acc + b_ref[...])

    # layer 6: kernel 8, stride 1, no padding -> a single output position
    hb = h.astype(bf16)                                           # (B*8, 256)
    acc = None
    for k in range(8):
        z = jnp.dot(hb, w6_ref[k], preferred_element_type=f32)     # (B*8, 32)
        term = jnp.dot(_row_select(k, 8, BATCH), z,
                       preferred_element_type=f32)                 # (B, 32)
        acc = term if acc is None else acc + term
    out_ref[...] = _leaky(acc + b6_ref[...])                       # (B, NOF)


def _img_conv1_kernel(p_ref, w_ref, b_ref, out_ref):
    """First image conv (4x4 stride-2) as im2col matmul + bias + LeakyReLU."""
    h = jnp.dot(p_ref[...].astype(jnp.bfloat16), w_ref[...],
                preferred_element_type=jnp.float32)
    out_ref[...] = _leaky(h + b_ref[...])


def _head_kernel(view_ref, opac_ref, imgflat_ref,
                 wv1_ref, bv1_ref, wv2_ref, bv2_ref,
                 wi2_ref, bi2_ref,
                 wd1v_ref, wd1o_ref, wd1i_ref, bd1_ref,
                 wd2_ref, bd2_ref, wd3_ref, bd3_ref,
                 raw_ref, dec_ref):
    """view MLP + last image conv + decision MLP + sigmoid, fully fused."""
    f32, bf16 = jnp.float32, jnp.bfloat16

    # view subnet
    vh = _leaky(jnp.dot(view_ref[...].astype(bf16), wv1_ref[...],
                        preferred_element_type=f32) + bv1_ref[...])
    vout = _leaky(jnp.dot(vh.astype(bf16), wv2_ref[...],
                          preferred_element_type=f32) + bv2_ref[...])

    # last image conv (8x8, stride 1, pad 0) == dense layer on flat features
    img = _leaky(jnp.dot(imgflat_ref[...].astype(bf16), wi2_ref[...],
                         preferred_element_type=f32) + bi2_ref[...])

    # decision layer 1 on cat(view, opacity, image): three partial matmuls,
    # so no in-kernel concatenation is needed.
    h1 = _leaky(
        jnp.dot(vout.astype(bf16), wd1v_ref[...], preferred_element_type=f32)
        + jnp.dot(opac_ref[...].astype(bf16), wd1o_ref[...],
                  preferred_element_type=f32)
        + jnp.dot(img.astype(bf16), wd1i_ref[...], preferred_element_type=f32)
        + bd1_ref[...])
    h2 = _leaky(jnp.dot(h1.astype(bf16), wd2_ref[...],
                        preferred_element_type=f32) + bd2_ref[...])
    raw = jnp.dot(h2.astype(bf16), wd3_ref[...],
                  preferred_element_type=f32) + bd3_ref[...]
    raw_ref[...] = raw
    dec_ref[...] = 0.5 * (jnp.tanh(0.5 * raw) + 1.0)   # stable sigmoid (EUP)


# ----------------------------------------------------------------------------
# pallas_call wrappers (whole-array VMEM blocks, no grid)
# ----------------------------------------------------------------------------
def _opacity_call(p1, kp):
    args = (p1, kp["op_w1"], kp["op_b1"], kp["op_w2"], kp["op_b2"],
            kp["op_w3"], kp["op_b3"], kp["op_w4"], kp["op_b4"],
            kp["op_w5"], kp["op_b5"], kp["op_w6"], kp["op_b6"])
    return pl.pallas_call(
        _opacity_kernel,
        out_shape=jax.ShapeDtypeStruct((BATCH, NOF), jnp.float32),
        in_specs=[_VMEM] * len(args),
        out_specs=_VMEM,
    )(*args)


def _img_conv1_call(patches, kp):
    return pl.pallas_call(
        _img_conv1_kernel,
        out_shape=jax.ShapeDtypeStruct((patches.shape[0], NDF), jnp.float32),
        in_specs=[_VMEM] * 3,
        out_specs=_VMEM,
    )(patches, kp["wimg1"], kp["bimg1"])


def _head_call(view_in, opac, imgflat, kp):
    args = (view_in, opac, imgflat,
            kp["wv1"], kp["bv1"], kp["wv2"], kp["bv2"],
            kp["wimg2"], kp["bimg2"],
            kp["wd1_v"], kp["wd1_o"], kp["wd1_i"], kp["bd1"],
            kp["wd2"], kp["bd2"], kp["wd3"], kp["bd3"])
    return pl.pallas_call(
        _head_kernel,
        out_shape=(jax.ShapeDtypeStruct((BATCH, 1), jnp.float32),
                   jax.ShapeDtypeStruct((BATCH, 1), jnp.float32)),
        in_specs=[_VMEM] * len(args),
        out_specs=(_VMEM, _VMEM),
    )(*args)


# ----------------------------------------------------------------------------
# Parameter setup (deterministic, synthetic) — plain JAX, runs once
# ----------------------------------------------------------------------------
def spectral_normalize(w, n_iter=30):
    """Replicates nn.utils.spectral_norm semantics: W / sigma_max(W_2d)."""
    w2 = w.reshape(w.shape[0], -1)
    u = jnp.ones((w2.shape[0],), jnp.float32) / jnp.sqrt(float(w2.shape[0]))
    v = jnp.ones((w2.shape[1],), jnp.float32) / jnp.sqrt(float(w2.shape[1]))
    for _ in range(n_iter):
        v = w2.T @ u
        v = v / (jnp.linalg.norm(v) + 1e-12)
        u = w2 @ v
        u = u / (jnp.linalg.norm(u) + 1e-12)
    sigma = u @ (w2 @ v)
    return w / sigma


def build_channel_plan():
    all_nplanes = [1]
    res = MIN_SPATIAL
    res_mult = 1
    while res != IMAGE_SIZE:
        all_nplanes.append(min(NDF * res_mult, MAX_CHANNELS))
        res_mult *= 2
        res *= 2
    image_specs = []   # (cin, cout, k, stride, pad)
    cur_res = MIN_SPATIAL
    rdx = 0
    while cur_res != IMAGE_SIZE:
        cur_res *= 2
        k, s, p = 4, 2, 1
        if cur_res == IMAGE_SIZE:
            k, s, p = 2 * MIN_SPATIAL, 1, 0
        image_specs.append((all_nplanes[rdx], all_nplanes[rdx + 1], k, s, p))
        rdx += 1
    return all_nplanes, image_specs


def init_params(key):
    key_box = [key]

    def nxt():
        key_box[0], sub = jax.random.split(key_box[0])
        return sub

    def dense(fan_in, fan_out):
        w = jax.random.normal(nxt(), (fan_in, fan_out), jnp.float32)
        w = w / jnp.sqrt(float(fan_in))
        b = 0.01 * jax.random.normal(nxt(), (fan_out,), jnp.float32)
        return w, b

    def conv_w(cout, cin, *kdims):
        fan_in = cin
        for k in kdims:
            fan_in *= k
        w = jax.random.normal(nxt(), (cout, cin) + tuple(kdims), jnp.float32)
        w = w / jnp.sqrt(float(fan_in))
        b = 0.01 * jax.random.normal(nxt(), (cout,), jnp.float32)
        return w, b

    all_nplanes, image_specs = build_channel_plan()
    # The fused kernels assume this exact structure (imageSize 16, min 4):
    assert all_nplanes == [1, NDF, 2 * NDF]
    assert image_specs == [(1, 16, 4, 2, 1), (16, 32, 2 * MIN_SPATIAL, 1, 0)]

    params = {}

    # view_subnet: Linear(5, nvf) -> LReLU -> Linear(nvf, nvf) -> LReLU
    params["view_w1"], params["view_b1"] = dense(5, NVF)
    params["view_w2"], params["view_b2"] = dense(NVF, NVF)

    # opacity_encoder: fixed Conv1d stack (cin, cout, k, stride, pad)
    op_specs = [(1, 16, 5, 2, 2), (16, 32, 5, 2, 2), (32, 64, 5, 2, 2),
                (64, 128, 5, 2, 2), (128, 256, 5, 2, 2), (256, NOF, 8, 1, 0)]
    params["opacity_convs"] = []
    for cin, cout, k, s, p in op_specs:
        w, b = conv_w(cout, cin, k)
        params["opacity_convs"].append((w, b, s, p))

    # encoder_subnet: spectral-normalized Conv2d stack
    params["image_convs"] = []
    for cin, cout, k, s, p in image_specs:
        w, b = conv_w(cout, cin, k, k)
        w = spectral_normalize(w)
        params["image_convs"].append((w, b, s, p))

    # decision_subnet
    c_last = all_nplanes[-1]
    params["dec_w1"], params["dec_b1"] = dense(NVF + NOF + c_last, c_last)
    params["dec_w2"], params["dec_b2"] = dense(c_last, c_last)
    params["dec_w3"], params["dec_b3"] = dense(c_last, 1)
    return params


def prepare_params(p):
    """One-time conversion of PyTorch-layout params into matmul-layout kernel
    operands: bf16 weights (lane-dense output channels), f32 (1, C) biases."""
    bf16 = jnp.bfloat16
    kp = {}

    def bias(bv):
        return bv.reshape(1, -1).astype(jnp.float32)

    # view subnet (dense weights are already (in, out))
    kp["wv1"], kp["bv1"] = p["view_w1"].astype(bf16), bias(p["view_b1"])
    kp["wv2"], kp["bv2"] = p["view_w2"].astype(bf16), bias(p["view_b2"])

    # opacity encoder (PyTorch Conv1d layout (Cout, Cin, K))
    w1, b1 = p["opacity_convs"][0][0], p["opacity_convs"][0][1]
    kp["op_w1"] = w1.reshape(w1.shape[0], -1).T.astype(bf16)        # (5, 16)
    kp["op_b1"] = bias(b1)
    for i in range(1, 6):
        w, bv = p["opacity_convs"][i][0], p["opacity_convs"][i][1]
        kp[f"op_w{i + 1}"] = jnp.transpose(w, (2, 1, 0)).astype(bf16)  # (K,Ci,Co)
        kp[f"op_b{i + 1}"] = bias(bv)

    # image encoder (PyTorch Conv2d layout (Cout, Cin, Kh, Kw))
    wi1, bi1 = p["image_convs"][0][0], p["image_convs"][0][1]
    kp["wimg1"] = wi1.reshape(wi1.shape[0], -1).T.astype(bf16)      # (16, 16)
    kp["bimg1"] = bias(bi1)
    wi2, bi2 = p["image_convs"][1][0], p["image_convs"][1][1]
    kp["wimg2"] = (jnp.transpose(wi2, (2, 3, 1, 0))                 # (kh,kw,ci,co)
                   .reshape(-1, wi2.shape[0]).astype(bf16))         # (1024, 32)
    kp["bimg2"] = bias(bi2)

    # decision subnet: split first layer by input source (view/opacity/image)
    wd1 = p["dec_w1"]
    kp["wd1_v"] = wd1[:NVF].astype(bf16)
    kp["wd1_o"] = wd1[NVF:NVF + NOF].astype(bf16)
    kp["wd1_i"] = wd1[NVF + NOF:].astype(bf16)
    kp["bd1"] = bias(p["dec_b1"])
    kp["wd2"], kp["bd2"] = p["dec_w2"].astype(bf16), bias(p["dec_b2"])
    kp["wd3"], kp["bd3"] = p["dec_w3"].astype(bf16), bias(p["dec_b3"])
    return kp


# ----------------------------------------------------------------------------
# Forward pass (mirrors OpacityNetDiscriminator.forward), fully jitted
# ----------------------------------------------------------------------------
def _forward_impl(kp, view_in, opacity_in, image_in):
    b = BATCH

    # opacity encoder: layer-1 im2col (channels-last, taps on the lane axis)
    x = opacity_in.reshape(b, OPACITY_LEN)
    xp = jnp.pad(x, ((0, 0), (2, 2)))
    l1_out = OPACITY_LEN // 2
    idx = jnp.arange(l1_out)[:, None] * 2 + jnp.arange(5)[None, :]
    p1 = xp[:, idx].reshape(b * l1_out, 5)
    opacity_encoded = _opacity_call(p1, kp)                        # (B, NOF)

    # image encoder conv0 im2col (4x4 patches, stride 2, pad 1)
    img = image_in.reshape(b, IMAGE_SIZE, IMAGE_SIZE)
    imgp = jnp.pad(img, ((0, 0), (1, 1), (1, 1)))
    hw = IMAGE_SIZE // 2
    ih = jnp.arange(hw)[:, None] * 2 + jnp.arange(4)[None, :]
    pat = imgp[:, ih, :][:, :, :, ih]                              # (B,hw,4,hw,4)
    pat = pat.transpose(0, 1, 3, 2, 4).reshape(b * hw * hw, 16)    # (b,ho,wo,kh,kw)
    h_img = _img_conv1_call(pat, kp)                               # (B*64, 16)
    # free row-major view: (B*64, 16) and (B, 1024) share the same HBM layout
    h_img_flat = h_img.reshape(b, hw * hw * NDF)                   # (B, 1024)

    # view MLP + last image conv + decision MLP + sigmoid (one fused kernel)
    raw_decision, decision = _head_call(view_in, opacity_encoded,
                                        h_img_flat, kp)
    return decision, raw_decision


forward = jax.jit(_forward_impl)


if __name__ == "__main__":
    root = jax.random.PRNGKey(0)
    k_params, k_view, k_op, k_img = jax.random.split(root, 4)

    params = init_params(k_params)
    kparams = prepare_params(params)   # weights reshaped/transposed/cast once

    view_in = jax.random.normal(k_view, (BATCH, 5), jnp.float32)
    opacity_in = jax.random.normal(k_op, (BATCH, 1, OPACITY_LEN), jnp.float32)
    image_in = jax.random.normal(k_img, (BATCH, 1, IMAGE_SIZE, IMAGE_SIZE),
                                 jnp.float32)

    decision, raw_decision = forward(kparams, view_in, opacity_in, image_in)
    decision = jax.block_until_ready(decision)
    raw_decision = jax.block_until_ready(raw_decision)

    assert decision.shape == (BATCH, 1) and raw_decision.shape == (BATCH, 1)
    assert bool(jnp.all(jnp.isfinite(decision)))
    assert bool(jnp.all(jnp.isfinite(raw_decision)))
    assert bool(jnp.all((decision > 0.0) & (decision < 1.0)))
    print("KERNEL_OK")
</pallas_src>

<mosaic_0001>
module attributes {stable_mosaic.version = 11 : i64} {
  func.func @_opacity_kernel(%arg0: memref<256x5xf32, #tpu.memory_space<vmem>>, %arg1: memref<5x16xbf16, #tpu.memory_space<vmem>>, %arg2: memref<1x16xf32, #tpu.memory_space<vmem>>, %arg3: memref<5x16x32xbf16, #tpu.memory_space<vmem>>, %arg4: memref<1x32xf32, #tpu.memory_space<vmem>>, %arg5: memref<5x32x64xbf16, #tpu.memory_space<vmem>>, %arg6: memref<1x64xf32, #tpu.memory_space<vmem>>, %arg7: memref<5x64x128xbf16, #tpu.memory_space<vmem>>, %arg8: memref<1x128xf32, #tpu.memory_space<vmem>>, %arg9: memref<5x128x256xbf16, #tpu.memory_space<vmem>>, %arg10: memref<1x256xf32, #tpu.memory_space<vmem>>, %arg11: memref<8x256x32xbf16, #tpu.memory_space<vmem>>, %arg12: memref<1x32xf32, #tpu.memory_space<vmem>>, %arg13: memref<2x32xf32, #tpu.memory_space<vmem>>) attributes {dimension_semantics = [], scalar_prefetch = 0 : i64, scratch_operands = 0 : i64, tpu.core_type = #tpu.core_type<tc>} {
    %c0 = arith.constant 0 : index
    %c0_0 = arith.constant 0 : index
    %0 = vector.load %arg0[%c0, %c0_0] : memref<256x5xf32, #tpu.memory_space<vmem>>, vector<256x5xf32>
    %1 = arith.truncf %0 : vector<256x5xf32> to vector<256x5xbf16>
    %c0_1 = arith.constant 0 : index
    %c0_2 = arith.constant 0 : index
    %2 = vector.load %arg1[%c0_1, %c0_2] : memref<5x16xbf16, #tpu.memory_space<vmem>>, vector<5x16xbf16>
    %cst = arith.constant dense<0.000000e+00> : vector<256x16xf32>
    %3 = tpu.matmul %1, %2, %cst {dimension_numbers = #tpu.dot_dimension_numbers<[1], [0], [0], [1], [0, 0, 1, 1], [], []>} : vector<256x5xbf16>, vector<5x16xbf16>, vector<256x16xf32> -> vector<256x16xf32>
    %c0_3 = arith.constant 0 : index
    %c0_4 = arith.constant 0 : index
    %4 = vector.load %arg2[%c0_3, %c0_4] : memref<1x16xf32, #tpu.memory_space<vmem>>, vector<1x16xf32>
    %5 = vector.broadcast %4 : vector<1x16xf32> to vector<256x16xf32>
    %6 = arith.addf %3, %5 : vector<256x16xf32>
    %cst_5 = arith.constant 0.000000e+00 : f32
    %7 = vector.broadcast %cst_5 : f32 to vector<256x16xf32>
    %8 = arith.cmpf ogt, %6, %7 : vector<256x16xf32>
    %cst_6 = arith.constant 2.000000e-01 : f32
    %9 = vector.broadcast %cst_6 : f32 to vector<256x16xf32>
    %10 = arith.mulf %9, %6 : vector<256x16xf32>
    %11 = arith.select %8, %6, %10 : vector<256x16xi1>, vector<256x16xf32>
    %12 = arith.truncf %11 : vector<256x16xf32> to vector<256x16xbf16>
    %c0_7 = arith.constant 0 : index
    %c0_8 = arith.constant 0 : index
    %c0_9 = arith.constant 0 : index
    %13 = vector.load %arg3[%c0_7, %c0_8, %c0_9] : memref<5x16x32xbf16, #tpu.memory_space<vmem>>, vector<1x16x32xbf16>
    %14 = vector.shape_cast %13 : vector<1x16x32xbf16> to vector<16x32xbf16>
    %cst_10 = arith.constant dense<0.000000e+00> : vector<256x32xf32>
    %15 = tpu.matmul %12, %14, %cst_10 {dimension_numbers = #tpu.dot_dimension_numbers<[1], [0], [0], [1], [0, 0, 1, 1], [], []>} : vector<256x16xbf16>, vector<16x32xbf16>, vector<256x32xf32> -> vector<256x32xf32>
    %16 = tpu.iota {dimensions = array<i32: 0>} : vector<128x256xi32>
    %17 = tpu.iota {dimensions = array<i32: 1>} : vector<128x256xi32>
    %c63_i32 = arith.constant 63 : i32
    %18 = vector.broadcast %c63_i32 : i32 to vector<128x256xi32>
    %19 = arith.andi %16, %18 : vector<128x256xi32>
    %c2_i32 = arith.constant 2 : i32
    %20 = vector.broadcast %c2_i32 : i32 to vector<128x256xi32>
    %21 = arith.muli %20, %19 : vector<128x256xi32>
    %c-2_i32 = arith.constant -2 : i32
    %22 = vector.broadcast %c-2_i32 : i32 to vector<128x256xi32>
    %23 = arith.addi %21, %22 : vector<128x256xi32>
    %c0_i32 = arith.constant 0 : i32
    %24 = vector.broadcast %c0_i32 : i32 to vector<128x256xi32>
    %25 = arith.cmpi sge, %23, %24 : vector<128x256xi32>
    %c128_i32 = arith.constant 128 : i32
    %26 = vector.broadcast %c128_i32 : i32 to vector<128x256xi32>
    %27 = arith.cmpi slt, %23, %26 : vector<128x256xi32>
    %28 = arith.andi %25, %27 : vector<128x256xi1>
    %c2_i32_11 = arith.constant 2 : i32
    %29 = vector.broadcast %c2_i32_11 : i32 to vector<128x256xi32>
    %30 = arith.muli %29, %16 : vector<128x256xi32>
    %c-2_i32_12 = arith.constant -2 : i32
    %31 = vector.broadcast %c-2_i32_12 : i32 to vector<128x256xi32>
    %32 = arith.addi %30, %31 : vector<128x256xi32>
    %33 = arith.cmpi eq, %17, %32 : vector<128x256xi32>
    %34 = arith.andi %33, %28 : vector<128x256xi1>
    %cst_13 = arith.constant 1.000000e+00 : f32
    %cst_14 = arith.constant 0.000000e+00 : f32
    %35 = vector.broadcast %cst_13 : f32 to vector<128x256xf32>
    %36 = vector.broadcast %cst_14 : f32 to vector<128x256xf32>
    %37 = arith.select %34, %35, %36 : vector<128x256xi1>, vector<128x256xf32>
    %cst_15 = arith.constant dense<0.000000e+00> : vector<128x32xf32>
    %38 = tpu.matmul %37, %15, %cst_15 {dimension_numbers = #tpu.dot_dimension_numbers<[1], [0], [0], [1], [0, 0, 1, 1], [], []>} : vector<128x256xf32>, vector<256x32xf32>, vector<128x32xf32> -> vector<128x32xf32>
    %c1 = arith.constant 1 : index
    %c0_16 = arith.constant 0 : index
    %c0_17 = arith.constant 0 : index
    %39 = vector.load %arg3[%c1, %c0_16, %c0_17] : memref<5x16x32xbf16, #tpu.memory_space<vmem>>, vector<1x16x32xbf16>
    %40 = vector.shape_cast %39 : vector<1x16x32xbf16> to vector<16x32xbf16>
    %cst_18 = arith.constant dense<0.000000e+00> : vector<256x32xf32>
    %41 = tpu.matmul %12, %40, %cst_18 {dimension_numbers = #tpu.dot_dimension_numbers<[1], [0], [0], [1], [0, 0, 1, 1], [], []>} : vector<256x16xbf16>, vector<16x32xbf16>, vector<256x32xf32> -> vector<256x32xf32>
    %42 = tpu.iota {dimensions = array<i32: 0>} : vector<128x256xi32>
    %43 = tpu.iota {dimensions = array<i32: 1>} : vector<128x256xi32>
    %c63_i32_19 = arith.constant 63 : i32
    %44 = vector.broadcast %c63_i32_19 : i32 to vector<128x256xi32>
    %45 = arith.andi %42, %44 : vector<128x256xi32>
    %c2_i32_20 = arith.constant 2 : i32
    %46 = vector.broadcast %c2_i32_20 : i32 to vector<128x256xi32>
    %47 = arith.muli %46, %45 : vector<128x256xi32>
    %c-1_i32 = arith.constant -1 : i32
    %48 = vector.broadcast %c-1_i32 : i32 to vector<128x256xi32>
    %49 = arith.addi %47, %48 : vector<128x256xi32>
    %c0_i32_21 = arith.constant 0 : i32
    %50 = vector.broadcast %c0_i32_21 : i32 to vector<128x256xi32>
    %51 = arith.cmpi sge, %49, %50 : vector<128x256xi32>
    %c128_i32_22 = arith.constant 128 : i32
    %52 = vector.broadcast %c128_i32_22 : i32 to vector<128x256xi32>
    %53 = arith.cmpi slt, %49, %52 : vector<128x256xi32>
    %54 = arith.andi %51, %53 : vector<128x256xi1>
    %c2_i32_23 = arith.constant 2 : i32
    %55 = vector.broadcast %c2_i32_23 : i32 to vector<128x256xi32>
    %56 = arith.muli %55, %42 : vector<128x256xi32>
    %c-1_i32_24 = arith.constant -1 : i32
    %57 = vector.broadcast %c-1_i32_24 : i32 to vector<128x256xi32>
    %58 = arith.addi %56, %57 : vector<128x256xi32>
    %59 = arith.cmpi eq, %43, %58 : vector<128x256xi32>
    %60 = arith.andi %59, %54 : vector<128x256xi1>
    %cst_25 = arith.constant 1.000000e+00 : f32
    %cst_26 = arith.constant 0.000000e+00 : f32
    %61 = vector.broadcast %cst_25 : f32 to vector<128x256xf32>
    %62 = vector.broadcast %cst_26 : f32 to vector<128x256xf32>
    %63 = arith.select %60, %61, %62 : vector<128x256xi1>, vector<128x256xf32>
    %cst_27 = arith.constant dense<0.000000e+00> : vector<128x32xf32>
    %64 = tpu.matmul %63, %41, %cst_27 {dimension_numbers = #tpu.dot_dimension_numbers<[1], [0], [0], [1], [0, 0, 1, 1], [], []>} : vector<128x256xf32>, vector<256x32xf32>, vector<128x32xf32> -> vector<128x32xf32>
    %65 = arith.addf %38, %64 : vector<128x32xf32>
    %c2 = arith.constant 2 : index
    %c0_28 = arith.constant 0 : index
    %c0_29 = arith.constant 0 : index
    %66 = vector.load %arg3[%c2, %c0_28, %c0_29] : memref<5x16x32xbf16, #tpu.memory_space<vmem>>, vector<1x16x32xbf16>
    %67 = vector.shape_cast %66 : vector<1x16x32xbf16> to vector<16x32xbf16>
    %cst_30 = arith.constant dense<0.000000e+00> : vector<256x32xf32>
    %68 = tpu.matmul %12, %67, %cst_30 {dimension_numbers = #tpu.dot_dimension_numbers<[1], [0], [0], [1], [0, 0, 1, 1], [], []>} : vector<256x16xbf16>, vector<16x32xbf16>, vector<256x32xf32> -> vector<256x32xf32>
    %69 = tpu.iota {dimensions = array<i32: 0>} : vector<128x256xi32>
    %70 = tpu.iota {dimensions = array<i32: 1>} : vector<128x256xi32>
    %c63_i32_31 = arith.constant 63 : i32
    %71 = vector.broadcast %c63_i32_31 : i32 to vector<128x256xi32>
    %72 = arith.andi %69, %71 : vector<128x256xi32>
    %c2_i32_32 = arith.constant 2 : i32
    %73 = vector.broadcast %c2_i32_32 : i32 to vector<128x256xi32>
    %74 = arith.muli %73, %72 : vector<128x256xi32>
    %c0_i32_33 = arith.constant 0 : i32
    %75 = vector.broadcast %c0_i32_33 : i32 to vector<128x256xi32>
    %76 = arith.addi %74, %75 : vector<128x256xi32>
    %c0_i32_34 = arith.constant 0 : i32
    %77 = vector.broadcast %c0_i32_34 : i32 to vector<128x256xi32>
    %78 = arith.cmpi sge, %76, %77 : vector<128x256xi32>
    %c128_i32_35 = arith.constant 128 : i32
    %79 = vector.broadcast %c128_i32_35 : i32 to vector<128x256xi32>
    %80 = arith.cmpi slt, %76, %79 : vector<128x256xi32>
    %81 = arith.andi %78, %80 : vector<128x256xi1>
    %c2_i32_36 = arith.constant 2 : i32
    %82 = vector.broadcast %c2_i32_36 : i32 to vector<128x256xi32>
    %83 = arith.muli %82, %69 : vector<128x256xi32>
    %c0_i32_37 = arith.constant 0 : i32
    %84 = vector.broadcast %c0_i32_37 : i32 to vector<128x256xi32>
    %85 = arith.addi %83, %84 : vector<128x256xi32>
    %86 = arith.cmpi eq, %70, %85 : vector<128x256xi32>
    %87 = arith.andi %86, %81 : vector<128x256xi1>
    %cst_38 = arith.constant 1.000000e+00 : f32
    %cst_39 = arith.constant 0.000000e+00 : f32
    %88 = vector.broadcast %cst_38 : f32 to vector<128x256xf32>
    %89 = vector.broadcast %cst_39 : f32 to vector<128x256xf32>
    %90 = arith.select %87, %88, %89 : vector<128x256xi1>, vector<128x256xf32>
    %cst_40 = arith.constant dense<0.000000e+00> : vector<128x32xf32>
    %91 = tpu.matmul %90, %68, %cst_40 {dimension_numbers = #tpu.dot_dimension_numbers<[1], [0], [0], [1], [0, 0, 1, 1], [], []>} : vector<128x256xf32>, vector<256x32xf32>, vector<128x32xf32> -> vector<128x32xf32>
    %92 = arith.addf %65, %91 : vector<128x32xf32>
    %c3 = arith.constant 3 : index
    %c0_41 = arith.constant 0 : index
    %c0_42 = arith.constant 0 : index
    %93 = vector.load %arg3[%c3, %c0_41, %c0_42] : memref<5x16x32xbf16, #tpu.memory_space<vmem>>, vector<1x16x32xbf16>
    %94 = vector.shape_cast %93 : vector<1x16x32xbf16> to vector<16x32xbf16>
    %cst_43 = arith.constant dense<0.000000e+00> : vector<256x32xf32>
    %95 = tpu.matmul %12, %94, %cst_43 {dimension_numbers = #tpu.dot_dimension_numbers<[1], [0], [0], [1], [0, 0, 1, 1], [], []>} : vector<256x16xbf16>, vector<16x32xbf16>, vector<256x32xf32> -> vector<256x32xf32>
    %96 = tpu.iota {dimensions = array<i32: 0>} : vector<128x256xi32>
    %97 = tpu.iota {dimensions = array<i32: 1>} : vector<128x256xi32>
    %c63_i32_44 = arith.constant 63 : i32
    %98 = vector.broadcast %c63_i32_44 : i32 to vector<128x256xi32>
    %99 = arith.andi %96, %98 : vector<128x256xi32>
    %c2_i32_45 = arith.constant 2 : i32
    %100 = vector.broadcast %c2_i32_45 : i32 to vector<128x256xi32>
    %101 = arith.muli %100, %99 : vector<128x256xi32>
    %c1_i32 = arith.constant 1 : i32
    %102 = vector.broadcast %c1_i32 : i32 to vector<128x256xi32>
    %103 = arith.addi %101, %102 : vector<128x256xi32>
    %c0_i32_46 = arith.constant 0 : i32
    %104 = vector.broadcast %c0_i32_46 : i32 to vector<128x256xi32>
    %105 = arith.cmpi sge, %103, %104 : vector<128x256xi32>
    %c128_i32_47 = arith.constant 128 : i32
    %106 = vector.broadcast %c128_i32_47 : i32 to vector<128x256xi32>
    %107 = arith.cmpi slt, %103, %106 : vector<128x256xi32>
    %108 = arith.andi %105, %107 : vector<128x256xi1>
    %c2_i32_48 = arith.constant 2 : i32
    %109 = vector.broadcast %c2_i32_48 : i32 to vector<128x256xi32>
    %110 = arith.muli %109, %96 : vector<128x256xi32>
    %c1_i32_49 = arith.constant 1 : i32
    %111 = vector.broadcast %c1_i32_49 : i32 to vector<128x256xi32>
    %112 = arith.addi %110, %111 : vector<128x256xi32>
    %113 = arith.cmpi eq, %97, %112 : vector<128x256xi32>
    %114 = arith.andi %113, %108 : vector<128x256xi1>
    %cst_50 = arith.constant 1.000000e+00 : f32
    %cst_51 = arith.constant 0.000000e+00 : f32
    %115 = vector.broadcast %cst_50 : f32 to vector<128x256xf32>
    %116 = vector.broadcast %cst_51 : f32 to vector<128x256xf32>
    %117 = arith.select %114, %115, %116 : vector<128x256xi1>, vector<128x256xf32>
    %cst_52 = arith.constant dense<0.000000e+00> : vector<128x32xf32>
    %118 = tpu.matmul %117, %95, %cst_52 {dimension_numbers = #tpu.dot_dimension_numbers<[1], [0], [0], [1], [0, 0, 1, 1], [], []>} : vector<128x256xf32>, vector<256x32xf32>, vector<128x32xf32> -> vector<128x32xf32>
    %119 = arith.addf %92, %118 : vector<128x32xf32>
    %c4 = arith.constant 4 : index
    %c0_53 = arith.constant 0 : index
    %c0_54 = arith.constant 0 : index
    %120 = vector.load %arg3[%c4, %c0_53, %c0_54] : memref<5x16x32xbf16, #tpu.memory_space<vmem>>, vector<1x16x32xbf16>
    %121 = vector.shape_cast %120 : vector<1x16x32xbf16> to vector<16x32xbf16>
    %cst_55 = arith.constant dense<0.000000e+00> : vector<256x32xf32>
    %122 = tpu.matmul %12, %121, %cst_55 {dimension_numbers = #tpu.dot_dimension_numbers<[1], [0], [0], [1], [0, 0, 1, 1], [], []>} : vector<256x16xbf16>, vector<16x32xbf16>, vector<256x32xf32> -> vector<256x32xf32>
    %123 = tpu.iota {dimensions = array<i32: 0>} : vector<128x256xi32>
    %124 = tpu.iota {dimensions = array<i32: 1>} : vector<128x256xi32>
    %c63_i32_56 = arith.constant 63 : i32
    %125 = vector.broadcast %c63_i32_56 : i32 to vector<128x256xi32>
    %126 = arith.andi %123, %125 : vector<128x256xi32>
    %c2_i32_57 = arith.constant 2 : i32
    %127 = vector.broadcast %c2_i32_57 : i32 to vector<128x256xi32>
    %128 = arith.muli %127, %126 : vector<128x256xi32>
    %c2_i32_58 = arith.constant 2 : i32
    %129 = vector.broadcast %c2_i32_58 : i32 to vector<128x256xi32>
    %130 = arith.addi %128, %129 : vector<128x256xi32>
    %c0_i32_59 = arith.constant 0 : i32
    %131 = vector.broadcast %c0_i32_59 : i32 to vector<128x256xi32>
    %132 = arith.cmpi sge, %130, %131 : vector<128x256xi32>
    %c128_i32_60 = arith.constant 128 : i32
    %133 = vector.broadcast %c128_i32_60 : i32 to vector<128x256xi32>
    %134 = arith.cmpi slt, %130, %133 : vector<128x256xi32>
    %135 = arith.andi %132, %134 : vector<128x256xi1>
    %c2_i32_61 = arith.constant 2 : i32
    %136 = vector.broadcast %c2_i32_61 : i32 to vector<128x256xi32>
    %137 = arith.muli %136, %123 : vector<128x256xi32>
    %c2_i32_62 = arith.constant 2 : i32
    %138 = vector.broadcast %c2_i32_62 : i32 to vector<128x256xi32>
    %139 = arith.addi %137, %138 : vector<128x256xi32>
    %140 = arith.cmpi eq, %124, %139 : vector<128x256xi32>
    %141 = arith.andi %140, %135 : vector<128x256xi1>
    %cst_63 = arith.constant 1.000000e+00 : f32
    %cst_64 = arith.constant 0.000000e+00 : f32
    %142 = vector.broadcast %cst_63 : f32 to vector<128x256xf32>
    %143 = vector.broadcast %cst_64 : f32 to vector<128x256xf32>
    %144 = arith.select %141, %142, %143 : vector<128x256xi1>, vector<128x256xf32>
    %cst_65 = arith.constant dense<0.000000e+00> : vector<128x32xf32>
    %145 = tpu.matmul %144, %122, %cst_65 {dimension_numbers = #tpu.dot_dimension_numbers<[1], [0], [0], [1], [0, 0, 1, 1], [], []>} : vector<128x256xf32>, vector<256x32xf32>, vector<128x32xf32> -> vector<128x32xf32>
    %146 = arith.addf %119, %145 : vector<128x32xf32>
    %c0_66 = arith.constant 0 : index
    %c0_67 = arith.constant 0 : index
    %147 = vector.load %arg4[%c0_66, %c0_67] : memref<1x32xf32, #tpu.memory_space<vmem>>, vector<1x32xf32>
    %148 = vector.broadcast %147 : vector<1x32xf32> to vector<128x32xf32>
    %149 = arith.addf %146, %148 : vector<128x32xf32>
    %cst_68 = arith.constant 0.000000e+00 : f32
    %150 = vector.broadcast %cst_68 : f32 to vector<128x32xf32>
    %151 = arith.cmpf ogt, %149, %150 : vector<128x32xf32>
    %cst_69 = arith.constant 2.000000e-01 : f32
    %152 = vector.broadcast %cst_69 : f32 to vector<128x32xf32>
    %153 = arith.mulf %152, %149 : vector<128x32xf32>
    %154 = arith.select %151, %149, %153 : vector<128x32xi1>, vector<128x32xf32>
    %155 = arith.truncf %154 : vector<128x32xf32> to vector<128x32xbf16>
    %c0_70 = arith.constant 0 : index
    %c0_71 = arith.constant 0 : index
    %c0_72 = arith.constant 0 : index
    %156 = vector.load %arg5[%c0_70, %c0_71, %c0_72] : memref<5x32x64xbf16, #tpu.memory_space<vmem>>, vector<1x32x64xbf16>
    %157 = vector.shape_cast %156 : vector<1x32x64xbf16> to vector<32x64xbf16>
    %cst_73 = arith.constant dense<0.000000e+00> : vector<128x64xf32>
    %158 = tpu.matmul %155, %157, %cst_73 {dimension_numbers = #tpu.dot_dimension_numbers<[1], [0], [0], [1], [0, 0, 1, 1], [], []>} : vector<128x32xbf16>, vector<32x64xbf16>, vector<128x64xf32> -> vector<128x64xf32>
    %159 = tpu.iota {dimensions = array<i32: 0>} : vector<64x128xi32>
    %160 = tpu.iota {dimensions = array<i32: 1>} : vector<64x128xi32>
    %c31_i32 = arith.constant 31 : i32
    %161 = vector.broadcast %c31_i32 : i32 to vector<64x128xi32>
    %162 = arith.andi %159, %161 : vector<64x128xi32>
    %c2_i32_74 = arith.constant 2 : i32
    %163 = vector.broadcast %c2_i32_74 : i32 to vector<64x128xi32>
    %164 = arith.muli %163, %162 : vector<64x128xi32>
    %c-2_i32_75 = arith.constant -2 : i32
    %165 = vector.broadcast %c-2_i32_75 : i32 to vector<64x128xi32>
    %166 = arith.addi %164, %165 : vector<64x128xi32>
    %c0_i32_76 = arith.constant 0 : i32
    %167 = vector.broadcast %c0_i32_76 : i32 to vector<64x128xi32>
    %168 = arith.cmpi sge, %166, %167 : vector<64x128xi32>
    %c64_i32 = arith.constant 64 : i32
    %169 = vector.broadcast %c64_i32 : i32 to vector<64x128xi32>
    %170 = arith.cmpi slt, %166, %169 : vector<64x128xi32>
    %171 = arith.andi %168, %170 : vector<64x128xi1>
    %c2_i32_77 = arith.constant 2 : i32
    %172 = vector.broadcast %c2_i32_77 : i32 to vector<64x128xi32>
    %173 = arith.muli %172, %159 : vector<64x128xi32>
    %c-2_i32_78 = arith.constant -2 : i32
    %174 = vector.broadcast %c-2_i32_78 : i32 to vector<64x128xi32>
    %175 = arith.addi %173, %174 : vector<64x128xi32>
    %176 = arith.cmpi eq, %160, %175 : vector<64x128xi32>
    %177 = arith.andi %176, %171 : vector<64x128xi1>
    %cst_79 = arith.constant 1.000000e+00 : f32
    %cst_80 = arith.constant 0.000000e+00 : f32
    %178 = vector.broadcast %cst_79 : f32 to vector<64x128xf32>
    %179 = vector.broadcast %cst_80 : f32 to vector<64x128xf32>
    %180 = arith.select %177, %178, %179 : vector<64x128xi1>, vector<64x128xf32>
    %cst_81 = arith.constant dense<0.000000e+00> : vector<64x64xf32>
    %181 = tpu.matmul %180, %158, %cst_81 {dimension_numbers = #tpu.dot_dimension_numbers<[1], [0], [0], [1], [0, 0, 1, 1], [], []>} : vector<64x128xf32>, vector<128x64xf32>, vector<64x64xf32> -> vector<64x64xf32>
    %c1_82 = arith.constant 1 : index
    %c0_83 = arith.constant 0 : index
    %c0_84 = arith.constant 0 : index
    %182 = vector.load %arg5[%c1_82, %c0_83, %c0_84] : memref<5x32x64xbf16, #tpu.memory_space<vmem>>, vector<1x32x64xbf16>
    %183 = vector.shape_cast %182 : vector<1x32x64xbf16> to vector<32x64xbf16>
    %cst_85 = arith.constant dense<0.000000e+00> : vector<128x64xf32>
    %184 = tpu.matmul %155, %183, %cst_85 {dimension_numbers = #tpu.dot_dimension_numbers<[1], [0], [0], [1], [0, 0, 1, 1], [], []>} : vector<128x32xbf16>, vector<32x64xbf16>, vector<128x64xf32> -> vector<128x64xf32>
    %185 = tpu.iota {dimensions = array<i32: 0>} : vector<64x128xi32>
    %186 = tpu.iota {dimensions = array<i32: 1>} : vector<64x128xi32>
    %c31_i32_86 = arith.constant 31 : i32
    %187 = vector.broadcast %c31_i32_86 : i32 to vector<64x128xi32>
    %188 = arith.andi %185, %187 : vector<64x128xi32>
    %c2_i32_87 = arith.constant 2 : i32
    %189 = vector.broadcast %c2_i32_87 : i32 to vector<64x128xi32>
    %190 = arith.muli %189, %188 : vector<64x128xi32>
    %c-1_i32_88 = arith.constant -1 : i32
    %191 = vector.broadcast %c-1_i32_88 : i32 to vector<64x128xi32>
    %192 = arith.addi %190, %191 : vector<64x128xi32>
    %c0_i32_89 = arith.constant 0 : i32
    %193 = vector.broadcast %c0_i32_89 : i32 to vector<64x128xi32>
    %194 = arith.cmpi sge, %192, %193 : vector<64x128xi32>
    %c64_i32_90 = arith.constant 64 : i32
    %195 = vector.broadcast %c64_i32_90 : i32 to vector<64x128xi32>
    %196 = arith.cmpi slt, %192, %195 : vector<64x128xi32>
    %197 = arith.andi %194, %196 : vector<64x128xi1>
    %c2_i32_91 = arith.constant 2 : i32
    %198 = vector.broadcast %c2_i32_91 : i32 to vector<64x128xi32>
    %199 = arith.muli %198, %185 : vector<64x128xi32>
    %c-1_i32_92 = arith.constant -1 : i32
    %200 = vector.broadcast %c-1_i32_92 : i32 to vector<64x128xi32>
    %201 = arith.addi %199, %200 : vector<64x128xi32>
    %202 = arith.cmpi eq, %186, %201 : vector<64x128xi32>
    %203 = arith.andi %202, %197 : vector<64x128xi1>
    %cst_93 = arith.constant 1.000000e+00 : f32
    %cst_94 = arith.constant 0.000000e+00 : f32
    %204 = vector.broadcast %cst_93 : f32 to vector<64x128xf32>
    %205 = vector.broadcast %cst_94 : f32 to vector<64x128xf32>
    %206 = arith.select %203, %204, %205 : vector<64x128xi1>, vector<64x128xf32>
    %cst_95 = arith.constant dense<0.000000e+00> : vector<64x64xf32>
    %207 = tpu.matmul %206, %184, %cst_95 {dimension_numbers = #tpu.dot_dimension_numbers<[1], [0], [0], [1], [0, 0, 1, 1], [], []>} : vector<64x128xf32>, vector<128x64xf32>, vector<64x64xf32> -> vector<64x64xf32>
    %208 = arith.addf %181, %207 : vector<64x64xf32>
    %c2_96 = arith.constant 2 : index
    %c0_97 = arith.constant 0 : index
    %c0_98 = arith.constant 0 : index
    %209 = vector.load %arg5[%c2_96, %c0_97, %c0_98] : memref<5x32x64xbf16, #tpu.memory_space<vmem>>, vector<1x32x64xbf16>
    %210 = vector.shape_cast %209 : vector<1x32x64xbf16> to vector<32x64xbf16>
    %cst_99 = arith.constant dense<0.000000e+00> : vector<128x64xf32>
    %211 = tpu.matmul %155, %210, %cst_99 {dimension_numbers = #tpu.dot_dimension_numbers<[1], [0], [0], [1], [0, 0, 1, 1], [], []>} : vector<128x32xbf16>, vector<32x64xbf16>, vector<128x64xf32> -> vector<128x64xf32>
    %212 = tpu.iota {dimensions = array<i32: 0>} : vector<64x128xi32>
    %213 = tpu.iota {dimensions = array<i32: 1>} : vector<64x128xi32>
    %c31_i32_100 = arith.constant 31 : i32
    %214 = vector.broadcast %c31_i32_100 : i32 to vector<64x128xi32>
    %215 = arith.andi %212, %214 : vector<64x128xi32>
    %c2_i32_101 = arith.constant 2 : i32
    %216 = vector.broadcast %c2_i32_101 : i32 to vector<64x128xi32>
    %217 = arith.muli %216, %215 : vector<64x128xi32>
    %c0_i32_102 = arith.constant 0 : i32
    %218 = vector.broadcast %c0_i32_102 : i32 to vector<64x128xi32>
    %219 = arith.addi %217, %218 : vector<64x128xi32>
    %c0_i32_103 = arith.constant 0 : i32
    %220 = vector.broadcast %c0_i32_103 : i32 to vector<64x128xi32>
    %221 = arith.cmpi sge, %219, %220 : vector<64x128xi32>
    %c64_i32_104 = arith.constant 64 : i32
    %222 = vector.broadcast %c64_i32_104 : i32 to vector<64x128xi32>
    %223 = arith.cmpi slt, %219, %222 : vector<64x128xi32>
    %224 = arith.andi %221, %223 : vector<64x128xi1>
    %c2_i32_105 = arith.constant 2 : i32
    %225 = vector.broadcast %c2_i32_105 : i32 to vector<64x128xi32>
    %226 = arith.muli %225, %212 : vector<64x128xi32>
    %c0_i32_106 = arith.constant 0 : i32
    %227 = vector.broadcast %c0_i32_106 : i32 to vector<64x128xi32>
    %228 = arith.addi %226, %227 : vector<64x128xi32>
    %229 = arith.cmpi eq, %213, %228 : vector<64x128xi32>
    %230 = arith.andi %229, %224 : vector<64x128xi1>
    %cst_107 = arith.constant 1.000000e+00 : f32
    %cst_108 = arith.constant 0.000000e+00 : f32
    %231 = vector.broadcast %cst_107 : f32 to vector<64x128xf32>
    %232 = vector.broadcast %cst_108 : f32 to vector<64x128xf32>
    %233 = arith.select %230, %231, %232 : vector<64x128xi1>, vector<64x128xf32>
    %cst_109 = arith.constant dense<0.000000e+00> : vector<64x64xf32>
    %234 = tpu.matmul %233, %211, %cst_109 {dimension_numbers = #tpu.dot_dimension_numbers<[1], [0], [0], [1], [0, 0, 1, 1], [], []>} : vector<64x128xf32>, vector<128x64xf32>, vector<64x64xf32> -> vector<64x64xf32>
    %235 = arith.addf %208, %234 : vector<64x64xf32>
    %c3_110 = arith.constant 3 : index
    %c0_111 = arith.constant 0 : index
    %c0_112 = arith.constant 0 : index
    %236 = vector.load %arg5[%c3_110, %c0_111, %c0_112] : memref<5x32x64xbf16, #tpu.memory_space<vmem>>, vector<1x32x64xbf16>
    %237 = vector.shape_cast %236 : vector<1x32x64xbf16> to vector<32x64xbf16>
    %cst_113 = arith.constant dense<0.000000e+00> : vector<128x64xf32>
    %238 = tpu.matmul %155, %237, %cst_113 {dimension_numbers = #tpu.dot_dimension_numbers<[1], [0], [0], [1], [0, 0, 1, 1], [], []>} : vector<128x32xbf16>, vector<32x64xbf16>, vector<128x64xf32> -> vector<128x64xf32>
    %239 = tpu.iota {dimensions = array<i32: 0>} : vector<64x128xi32>
    %240 = tpu.iota {dimensions = array<i32: 1>} : vector<64x128xi32>
    %c31_i32_114 = arith.constant 31 : i32
    %241 = vector.broadcast %c31_i32_114 : i32 to vector<64x128xi32>
    %242 = arith.andi %239, %241 : vector<64x128xi32>
    %c2_i32_115 = arith.constant 2 : i32
    %243 = vector.broadcast %c2_i32_115 : i32 to vector<64x128xi32>
    %244 = arith.muli %243, %242 : vector<64x128xi32>
    %c1_i32_116 = arith.constant 1 : i32
    %245 = vector.broadcast %c1_i32_116 : i32 to vector<64x128xi32>
    %246 = arith.addi %244, %245 : vector<64x128xi32>
    %c0_i32_117 = arith.constant 0 : i32
    %247 = vector.broadcast %c0_i32_117 : i32 to vector<64x128xi32>
    %248 = arith.cmpi sge, %246, %247 : vector<64x128xi32>
    %c64_i32_118 = arith.constant 64 : i32
    %249 = vector.broadcast %c64_i32_118 : i32 to vector<64x128xi32>
    %250 = arith.cmpi slt, %246, %249 : vector<64x128xi32>
    %251 = arith.andi %248, %250 : vector<64x128xi1>
    %c2_i32_119 = arith.constant 2 : i32
    %252 = vector.broadcast %c2_i32_119 : i32 to vector<64x128xi32>
    %253 = arith.muli %252, %239 : vector<64x128xi32>
    %c1_i32_120 = arith.constant 1 : i32
    %254 = vector.broadcast %c1_i32_120 : i32 to vector<64x128xi32>
    %255 = arith.addi %253, %254 : vector<64x128xi32>
    %256 = arith.cmpi eq, %240, %255 : vector<64x128xi32>
    %257 = arith.andi %256, %251 : vector<64x128xi1>
    %cst_121 = arith.constant 1.000000e+00 : f32
    %cst_122 = arith.constant 0.000000e+00 : f32
    %258 = vector.broadcast %cst_121 : f32 to vector<64x128xf32>
    %259 = vector.broadcast %cst_122 : f32 to vector<64x128xf32>
    %260 = arith.select %257, %258, %259 : vector<64x128xi1>, vector<64x128xf32>
    %cst_123 = arith.constant dense<0.000000e+00> : vector<64x64xf32>
    %261 = tpu.matmul %260, %238, %cst_123 {dimension_numbers = #tpu.dot_dimension_numbers<[1], [0], [0], [1], [0, 0, 1, 1], [], []>} : vector<64x128xf32>, vector<128x64xf32>, vector<64x64xf32> -> vector<64x64xf32>
    %262 = arith.addf %235, %261 : vector<64x64xf32>
    %c4_124 = arith.constant 4 : index
    %c0_125 = arith.constant 0 : index
    %c0_126 = arith.constant 0 : index
    %263 = vector.load %arg5[%c4_124, %c0_125, %c0_126] : memref<5x32x64xbf16, #tpu.memory_space<vmem>>, vector<1x32x64xbf16>
    %264 = vector.shape_cast %263 : vector<1x32x64xbf16> to vector<32x64xbf16>
    %cst_127 = arith.constant dense<0.000000e+00> : vector<128x64xf32>
    %265 = tpu.matmul %155, %264, %cst_127 {dimension_numbers = #tpu.dot_dimension_numbers<[1], [0], [0], [1], [0, 0, 1, 1], [], []>} : vector<128x32xbf16>, vector<32x64xbf16>, vector<128x64xf32> -> vector<128x64xf32>
    %266 = tpu.iota {dimensions = array<i32: 0>} : vector<64x128xi32>
    %267 = tpu.iota {dimensions = array<i32: 1>} : vector<64x128xi32>
    %c31_i32_128 = arith.constant 31 : i32
    %268 = vector.broadcast %c31_i32_128 : i32 to vector<64x128xi32>
    %269 = arith.andi %266, %268 : vector<64x128xi32>
    %c2_i32_129 = arith.constant 2 : i32
    %270 = vector.broadcast %c2_i32_129 : i32 to vector<64x128xi32>
    %271 = arith.muli %270, %269 : vector<64x128xi32>
    %c2_i32_130 = arith.constant 2 : i32
    %272 = vector.broadcast %c2_i32_130 : i32 to vector<64x128xi32>
    %273 = arith.addi %271, %272 : vector<64x128xi32>
    %c0_i32_131 = arith.constant 0 : i32
    %274 = vector.broadcast %c0_i32_131 : i32 to vector<64x128xi32>
    %275 = arith.cmpi sge, %273, %274 : vector<64x128xi32>
    %c64_i32_132 = arith.constant 64 : i32
    %276 = vector.broadcast %c64_i32_132 : i32 to vector<64x128xi32>
    %277 = arith.cmpi slt, %273, %276 : vector<64x128xi32>
    %278 = arith.andi %275, %277 : vector<64x128xi1>
    %c2_i32_133 = arith.constant 2 : i32
    %279 = vector.broadcast %c2_i32_133 : i32 to vector<64x128xi32>
    %280 = arith.muli %279, %266 : vector<64x128xi32>
    %c2_i32_134 = arith.constant 2 : i32
    %281 = vector.broadcast %c2_i32_134 : i32 to vector<64x128xi32>
    %282 = arith.addi %280, %281 : vector<64x128xi32>
    %283 = arith.cmpi eq, %267, %282 : vector<64x128xi32>
    %284 = arith.andi %283, %278 : vector<64x128xi1>
    %cst_135 = arith.constant 1.000000e+00 : f32
    %cst_136 = arith.constant 0.000000e+00 : f32
    %285 = vector.broadcast %cst_135 : f32 to vector<64x128xf32>
    %286 = vector.broadcast %cst_136 : f32 to vector<64x128xf32>
    %287 = arith.select %284, %285, %286 : vector<64x128xi1>, vector<64x128xf32>
    %cst_137 = arith.constant dense<0.000000e+00> : vector<64x64xf32>
    %288 = tpu.matmul %287, %265, %cst_137 {dimension_numbers = #tpu.dot_dimension_numbers<[1], [0], [0], [1], [0, 0, 1, 1], [], []>} : vector<64x128xf32>, vector<128x64xf32>, vector<64x64xf32> -> vector<64x64xf32>
    %289 = arith.addf %262, %288 : vector<64x64xf32>
    %c0_138 = arith.constant 0 : index
    %c0_139 = arith.constant 0 : index
    %290 = vector.load %arg6[%c0_138, %c0_139] : memref<1x64xf32, #tpu.memory_space<vmem>>, vector<1x64xf32>
    %291 = vector.broadcast %290 : vector<1x64xf32> to vector<64x64xf32>
    %292 = arith.addf %289, %291 : vector<64x64xf32>
    %cst_140 = arith.constant 0.000000e+00 : f32
    %293 = vector.broadcast %cst_140 : f32 to vector<64x64xf32>
    %294 = arith.cmpf ogt, %292, %293 : vector<64x64xf32>
    %cst_141 = arith.constant 2.000000e-01 : f32
    %295 = vector.broadcast %cst_141 : f32 to vector<64x64xf32>
    %296 = arith.mulf %295, %292 : vector<64x64xf32>
    %297 = arith.select %294, %292, %296 : vector<64x64xi1>, vector<64x64xf32>
    %298 = arith.truncf %297 : vector<64x64xf32> to vector<64x64xbf16>
    %c0_142 = arith.constant 0 : index
    %c0_143 = arith.constant 0 : index
    %c0_144 = arith.constant 0 : index
    %299 = vector.load %arg7[%c0_142, %c0_143, %c0_144] : memref<5x64x128xbf16, #tpu.memory_space<vmem>>, vector<1x64x128xbf16>
    %300 = vector.shape_cast %299 : vector<1x64x128xbf16> to vector<64x128xbf16>
    %cst_145 = arith.constant dense<0.000000e+00> : vector<64x128xf32>
    %301 = tpu.matmul %298, %300, %cst_145 {dimension_numbers = #tpu.dot_dimension_numbers<[1], [0], [0], [1], [0, 0, 1, 1], [], []>} : vector<64x64xbf16>, vector<64x128xbf16>, vector<64x128xf32> -> vector<64x128xf32>
    %302 = tpu.iota {dimensions = array<i32: 0>} : vector<32x64xi32>
    %303 = tpu.iota {dimensions = array<i32: 1>} : vector<32x64xi32>
    %c15_i32 = arith.constant 15 : i32
    %304 = vector.broadcast %c15_i32 : i32 to vector<32x64xi32>
    %305 = arith.andi %302, %304 : vector<32x64xi32>
    %c2_i32_146 = arith.constant 2 : i32
    %306 = vector.broadcast %c2_i32_146 : i32 to vector<32x64xi32>
    %307 = arith.muli %306, %305 : vector<32x64xi32>
    %c-2_i32_147 = arith.constant -2 : i32
    %308 = vector.broadcast %c-2_i32_147 : i32 to vector<32x64xi32>
    %309 = arith.addi %307, %308 : vector<32x64xi32>
    %c0_i32_148 = arith.constant 0 : i32
    %310 = vector.broadcast %c0_i32_148 : i32 to vector<32x64xi32>
    %311 = arith.cmpi sge, %309, %310 : vector<32x64xi32>
    %c32_i32 = arith.constant 32 : i32
    %312 = vector.broadcast %c32_i32 : i32 to vector<32x64xi32>
    %313 = arith.cmpi slt, %309, %312 : vector<32x64xi32>
    %314 = arith.andi %311, %313 : vector<32x64xi1>
    %c2_i32_149 = arith.constant 2 : i32
    %315 = vector.broadcast %c2_i32_149 : i32 to vector<32x64xi32>
    %316 = arith.muli %315, %302 : vector<32x64xi32>
    %c-2_i32_150 = arith.constant -2 : i32
    %317 = vector.broadcast %c-2_i32_150 : i32 to vector<32x64xi32>
    %318 = arith.addi %316, %317 : vector<32x64xi32>
    %319 = arith.cmpi eq, %303, %318 : vector<32x64xi32>
    %320 = arith.andi %319, %314 : vector<32x64xi1>
    %cst_151 = arith.constant 1.000000e+00 : f32
    %cst_152 = arith.constant 0.000000e+00 : f32
    %321 = vector.broadcast %cst_151 : f32 to vector<32x64xf32>
    %322 = vector.broadcast %cst_152 : f32 to vector<32x64xf32>
    %323 = arith.select %320, %321, %322 : vector<32x64xi1>, vector<32x64xf32>
    %cst_153 = arith.constant dense<0.000000e+00> : vector<32x128xf32>
    %324 = tpu.matmul %323, %301, %cst_153 {dimension_numbers = #tpu.dot_dimension_numbers<[1], [0], [0], [1], [0, 0, 1, 1], [], []>} : vector<32x64xf32>, vector<64x128xf32>, vector<32x128xf32> -> vector<32x128xf32>
    %c1_154 = arith.constant 1 : index
    %c0_155 = arith.constant 0 : index
    %c0_156 = arith.constant 0 : index
    %325 = vector.load %arg7[%c1_154, %c0_155, %c0_156] : memref<5x64x128xbf16, #tpu.memory_space<vmem>>, vector<1x64x128xbf16>
    %326 = vector.shape_cast %325 : vector<1x64x128xbf16> to vector<64x128xbf16>
    %cst_157 = arith.constant dense<0.000000e+00> : vector<64x128xf32>
    %327 = tpu.matmul %298, %326, %cst_157 {dimension_numbers = #tpu.dot_dimension_numbers<[1], [0], [0], [1], [0, 0, 1, 1], [], []>} : vector<64x64xbf16>, vector<64x128xbf16>, vector<64x128xf32> -> vector<64x128xf32>
    %328 = tpu.iota {dimensions = array<i32: 0>} : vector<32x64xi32>
    %329 = tpu.iota {dimensions = array<i32: 1>} : vector<32x64xi32>
    %c15_i32_158 = arith.constant 15 : i32
    %330 = vector.broadcast %c15_i32_158 : i32 to vector<32x64xi32>
    %331 = arith.andi %328, %330 : vector<32x64xi32>
    %c2_i32_159 = arith.constant 2 : i32
    %332 = vector.broadcast %c2_i32_159 : i32 to vector<32x64xi32>
    %333 = arith.muli %332, %331 : vector<32x64xi32>
    %c-1_i32_160 = arith.constant -1 : i32
    %334 = vector.broadcast %c-1_i32_160 : i32 to vector<32x64xi32>
    %335 = arith.addi %333, %334 : vector<32x64xi32>
    %c0_i32_161 = arith.constant 0 : i32
    %336 = vector.broadcast %c0_i32_161 : i32 to vector<32x64xi32>
    %337 = arith.cmpi sge, %335, %336 : vector<32x64xi32>
    %c32_i32_162 = arith.constant 32 : i32
    %338 = vector.broadcast %c32_i32_162 : i32 to vector<32x64xi32>
    %339 = arith.cmpi slt, %335, %338 : vector<32x64xi32>
    %340 = arith.andi %337, %339 : vector<32x64xi1>
    %c2_i32_163 = arith.constant 2 : i32
    %341 = vector.broadcast %c2_i32_163 : i32 to vector<32x64xi32>
    %342 = arith.muli %341, %328 : vector<32x64xi32>
    %c-1_i32_164 = arith.constant -1 : i32
    %343 = vector.broadcast %c-1_i32_164 : i32 to vector<32x64xi32>
    %344 = arith.addi %342, %343 : vector<32x64xi32>
    %345 = arith.cmpi eq, %329, %344 : vector<32x64xi32>
    %346 = arith.andi %345, %340 : vector<32x64xi1>
    %cst_165 = arith.constant 1.000000e+00 : f32
    %cst_166 = arith.constant 0.000000e+00 : f32
    %347 = vector.broadcast %cst_165 : f32 to vector<32x64xf32>
    %348 = vector.broadcast %cst_166 : f32 to vector<32x64xf32>
    %349 = arith.select %346, %347, %348 : vector<32x64xi1>, vector<32x64xf32>
    %cst_167 = arith.constant dense<0.000000e+00> : vector<32x128xf32>
    %350 = tpu.matmul %349, %327, %cst_167 {dimension_numbers = #tpu.dot_dimension_numbers<[1], [0], [0], [1], [0, 0, 1, 1], [], []>} : vector<32x64xf32>, vector<64x128xf32>, vector<32x128xf32> -> vector<32x128xf32>
    %351 = arith.addf %324, %350 : vector<32x128xf32>
    %c2_168 = arith.constant 2 : index
    %c0_169 = arith.constant 0 : index
    %c0_170 = arith.constant 0 : index
    %352 = vector.load %arg7[%c2_168, %c0_169, %c0_170] : memref<5x64x128xbf16, #tpu.memory_space<vmem>>, vector<1x64x128xbf16>
    %353 = vector.shape_cast %352 : vector<1x64x128xbf16> to vector<64x128xbf16>
    %cst_171 = arith.constant dense<0.000000e+00> : vector<64x128xf32>
    %354 = tpu.matmul %298, %353, %cst_171 {dimension_numbers = #tpu.dot_dimension_numbers<[1], [0], [0], [1], [0, 0, 1, 1], [], []>} : vector<64x64xbf16>, vector<64x128xbf16>, vector<64x128xf32> -> vector<64x128xf32>
    %355 = tpu.iota {dimensions = array<i32: 0>} : vector<32x64xi32>
    %356 = tpu.iota {dimensions = array<i32: 1>} : vector<32x64xi32>
    %c15_i32_172 = arith.constant 15 : i32
    %357 = vector.broadcast %c15_i32_172 : i32 to vector<32x64xi32>
    %358 = arith.andi %355, %357 : vector<32x64xi32>
    %c2_i32_173 = arith.constant 2 : i32
    %359 = vector.broadcast %c2_i32_173 : i32 to vector<32x64xi32>
    %360 = arith.muli %359, %358 : vector<32x64xi32>
    %c0_i32_174 = arith.constant 0 : i32
    %361 = vector.broadcast %c0_i32_174 : i32 to vector<32x64xi32>
    %362 = arith.addi %360, %361 : vector<32x64xi32>
    %c0_i32_175 = arith.constant 0 : i32
    %363 = vector.broadcast %c0_i32_175 : i32 to vector<32x64xi32>
    %364 = arith.cmpi sge, %362, %363 : vector<32x64xi32>
    %c32_i32_176 = arith.constant 32 : i32
    %365 = vector.broadcast %c32_i32_176 : i32 to vector<32x64xi32>
    %366 = arith.cmpi slt, %362, %365 : vector<32x64xi32>
    %367 = arith.andi %364, %366 : vector<32x64xi1>
    %c2_i32_177 = arith.constant 2 : i32
    %368 = vector.broadcast %c2_i32_177 : i32 to vector<32x64xi32>
    %369 = arith.muli %368, %355 : vector<32x64xi32>
    %c0_i32_178 = arith.constant 0 : i32
    %370 = vector.broadcast %c0_i32_178 : i32 to vector<32x64xi32>
    %371 = arith.addi %369, %370 : vector<32x64xi32>
    %372 = arith.cmpi eq, %356, %371 : vector<32x64xi32>
    %373 = arith.andi %372, %367 : vector<32x64xi1>
    %cst_179 = arith.constant 1.000000e+00 : f32
    %cst_180 = arith.constant 0.000000e+00 : f32
    %374 = vector.broadcast %cst_179 : f32 to vector<32x64xf32>
    %375 = vector.broadcast %cst_180 : f32 to vector<32x64xf32>
    %376 = arith.select %373, %374, %375 : vector<32x64xi1>, vector<32x64xf32>
    %cst_181 = arith.constant dense<0.000000e+00> : vector<32x128xf32>
    %377 = tpu.matmul %376, %354, %cst_181 {dimension_numbers = #tpu.dot_dimension_numbers<[1], [0], [0], [1], [0, 0, 1, 1], [], []>} : vector<32x64xf32>, vector<64x128xf32>, vector<32x128xf32> -> vector<32x128xf32>
    %378 = arith.addf %351, %377 : vector<32x128xf32>
    %c3_182 = arith.constant 3 : index
    %c0_183 = arith.constant 0 : index
    %c0_184 = arith.constant 0 : index
    %379 = vector.load %arg7[%c3_182, %c0_183, %c0_184] : memref<5x64x128xbf16, #tpu.memory_space<vmem>>, vector<1x64x128xbf16>
    %380 = vector.shape_cast %379 : vector<1x64x128xbf16> to vector<64x128xbf16>
    %cst_185 = arith.constant dense<0.000000e+00> : vector<64x128xf32>
    %381 = tpu.matmul %298, %380, %cst_185 {dimension_numbers = #tpu.dot_dimension_numbers<[1], [0], [0], [1], [0, 0, 1, 1], [], []>} : vector<64x64xbf16>, vector<64x128xbf16>, vector<64x128xf32> -> vector<64x128xf32>
    %382 = tpu.iota {dimensions = array<i32: 0>} : vector<32x64xi32>
    %383 = tpu.iota {dimensions = array<i32: 1>} : vector<32x64xi32>
    %c15_i32_186 = arith.constant 15 : i32
    %384 = vector.broadcast %c15_i32_186 : i32 to vector<32x64xi32>
    %385 = arith.andi %382, %384 : vector<32x64xi32>
    %c2_i32_187 = arith.constant 2 : i32
    %386 = vector.broadcast %c2_i32_187 : i32 to vector<32x64xi32>
    %387 = arith.muli %386, %385 : vector<32x64xi32>
    %c1_i32_188 = arith.constant 1 : i32
    %388 = vector.broadcast %c1_i32_188 : i32 to vector<32x64xi32>
    %389 = arith.addi %387, %388 : vector<32x64xi32>
    %c0_i32_189 = arith.constant 0 : i32
    %390 = vector.broadcast %c0_i32_189 : i32 to vector<32x64xi32>
    %391 = arith.cmpi sge, %389, %390 : vector<32x64xi32>
    %c32_i32_190 = arith.constant 32 : i32
    %392 = vector.broadcast %c32_i32_190 : i32 to vector<32x64xi32>
    %393 = arith.cmpi slt, %389, %392 : vector<32x64xi32>
    %394 = arith.andi %391, %393 : vector<32x64xi1>
    %c2_i32_191 = arith.constant 2 : i32
    %395 = vector.broadcast %c2_i32_191 : i32 to vector<32x64xi32>
    %396 = arith.muli %395, %382 : vector<32x64xi32>
    %c1_i32_192 = arith.constant 1 : i32
    %397 = vector.broadcast %c1_i32_192 : i32 to vector<32x64xi32>
    %398 = arith.addi %396, %397 : vector<32x64xi32>
    %399 = arith.cmpi eq, %383, %398 : vector<32x64xi32>
    %400 = arith.andi %399, %394 : vector<32x64xi1>
    %cst_193 = arith.constant 1.000000e+00 : f32
    %cst_194 = arith.constant 0.000000e+00 : f32
    %401 = vector.broadcast %cst_193 : f32 to vector<32x64xf32>
    %402 = vector.broadcast %cst_194 : f32 to vector<32x64xf32>
    %403 = arith.select %400, %401, %402 : vector<32x64xi1>, vector<32x64xf32>
    %cst_195 = arith.constant dense<0.000000e+00> : vector<32x128xf32>
    %404 = tpu.matmul %403, %381, %cst_195 {dimension_numbers = #tpu.dot_dimension_numbers<[1], [0], [0], [1], [0, 0, 1, 1], [], []>} : vector<32x64xf32>, vector<64x128xf32>, vector<32x128xf32> -> vector<32x128xf32>
    %405 = arith.addf %378, %404 : vector<32x128xf32>
    %c4_196 = arith.constant 4 : index
    %c0_197 = arith.constant 0 : index
    %c0_198 = arith.constant 0 : index
    %406 = vector.load %arg7[%c4_196, %c0_197, %c0_198] : memref<5x64x128xbf16, #tpu.memory_space<vmem>>, vector<1x64x128xbf16>
    %407 = vector.shape_cast %406 : vector<1x64x128xbf16> to vector<64x128xbf16>
    %cst_199 = arith.constant dense<0.000000e+00> : vector<64x128xf32>
    %408 = tpu.matmul %298, %407, %cst_199 {dimension_numbers = #tpu.dot_dimension_numbers<[1], [0], [0], [1], [0, 0, 1, 1], [], []>} : vector<64x64xbf16>, vector<64x128xbf16>, vector<64x128xf32> -> vector<64x128xf32>
    %409 = tpu.iota {dimensions = array<i32: 0>} : vector<32x64xi32>
    %410 = tpu.iota {dimensions = array<i32: 1>} : vector<32x64xi32>
    %c15_i32_200 = arith.constant 15 : i32
    %411 = vector.broadcast %c15_i32_200 : i32 to vector<32x64xi32>
    %412 = arith.andi %409, %411 : vector<32x64xi32>
    %c2_i32_201 = arith.constant 2 : i32
    %413 = vector.broadcast %c2_i32_201 : i32 to vector<32x64xi32>
    %414 = arith.muli %413, %412 : vector<32x64xi32>
    %c2_i32_202 = arith.constant 2 : i32
    %415 = vector.broadcast %c2_i32_202 : i32 to vector<32x64xi32>
    %416 = arith.addi %414, %415 : vector<32x64xi32>
    %c0_i32_203 = arith.constant 0 : i32
    %417 = vector.broadcast %c0_i32_203 : i32 to vector<32x64xi32>
    %418 = arith.cmpi sge, %416, %417 : vector<32x64xi32>
    %c32_i32_204 = arith.constant 32 : i32
    %419 = vector.broadcast %c32_i32_204 : i32 to vector<32x64xi32>
    %420 = arith.cmpi slt, %416, %419 : vector<32x64xi32>
    %421 = arith.andi %418, %420 : vector<32x64xi1>
    %c2_i32_205 = arith.constant 2 : i32
    %422 = vector.broadcast %c2_i32_205 : i32 to vector<32x64xi32>
    %423 = arith.muli %422, %409 : vector<32x64xi32>
    %c2_i32_206 = arith.constant 2 : i32
    %424 = vector.broadcast %c2_i32_206 : i32 to vector<32x64xi32>
    %425 = arith.addi %423, %424 : vector<32x64xi32>
    %426 = arith.cmpi eq, %410, %425 : vector<32x64xi32>
    %427 = arith.andi %426, %421 : vector<32x64xi1>
    %cst_207 = arith.constant 1.000000e+00 : f32
    %cst_208 = arith.constant 0.000000e+00 : f32
    %428 = vector.broadcast %cst_207 : f32 to vector<32x64xf32>
    %429 = vector.broadcast %cst_208 : f32 to vector<32x64xf32>
    %430 = arith.select %427, %428, %429 : vector<32x64xi1>, vector<32x64xf32>
    %cst_209 = arith.constant dense<0.000000e+00> : vector<32x128xf32>
    %431 = tpu.matmul %430, %408, %cst_209 {dimension_numbers = #tpu.dot_dimension_numbers<[1], [0], [0], [1], [0, 0, 1, 1], [], []>} : vector<32x64xf32>, vector<64x128xf32>, vector<32x128xf32> -> vector<32x128xf32>
    %432 = arith.addf %405, %431 : vector<32x128xf32>
    %c0_210 = arith.constant 0 : index
    %c0_211 = arith.constant 0 : index
    %433 = vector.load %arg8[%c0_210, %c0_211] : memref<1x128xf32, #tpu.memory_space<vmem>>, vector<1x128xf32>
    %434 = vector.broadcast %433 : vector<1x128xf32> to vector<32x128xf32>
    %435 = arith.addf %432, %434 : vector<32x128xf32>
    %cst_212 = arith.constant 0.000000e+00 : f32
    %436 = vector.broadcast %cst_212 : f32 to vector<32x128xf32>
    %437 = arith.cmpf ogt, %435, %436 : vector<32x128xf32>
    %cst_213 = arith.constant 2.000000e-01 : f32
    %438 = vector.broadcast %cst_213 : f32 to vector<32x128xf32>
    %439 = arith.mulf %438, %435 : vector<32x128xf32>
    %440 = arith.select %437, %435, %439 : vector<32x128xi1>, vector<32x128xf32>
    %441 = arith.truncf %440 : vector<32x128xf32> to vector<32x128xbf16>
    %c0_214 = arith.constant 0 : index
    %c0_215 = arith.constant 0 : index
    %c0_216 = arith.constant 0 : index
    %442 = vector.load %arg9[%c0_214, %c0_215, %c0_216] : memref<5x128x256xbf16, #tpu.memory_space<vmem>>, vector<1x128x256xbf16>
    %443 = vector.shape_cast %442 : vector<1x128x256xbf16> to vector<128x256xbf16>
    %cst_217 = arith.constant dense<0.000000e+00> : vector<32x256xf32>
    %444 = tpu.matmul %441, %443, %cst_217 {dimension_numbers = #tpu.dot_dimension_numbers<[1], [0], [0], [1], [0, 0, 1, 1], [], []>} : vector<32x128xbf16>, vector<128x256xbf16>, vector<32x256xf32> -> vector<32x256xf32>
    %445 = tpu.iota {dimensions = array<i32: 0>} : vector<16x32xi32>
    %446 = tpu.iota {dimensions = array<i32: 1>} : vector<16x32xi32>
    %c7_i32 = arith.constant 7 : i32
    %447 = vector.broadcast %c7_i32 : i32 to vector<16x32xi32>
    %448 = arith.andi %445, %447 : vector<16x32xi32>
    %c2_i32_218 = arith.constant 2 : i32
    %449 = vector.broadcast %c2_i32_218 : i32 to vector<16x32xi32>
    %450 = arith.muli %449, %448 : vector<16x32xi32>
    %c-2_i32_219 = arith.constant -2 : i32
    %451 = vector.broadcast %c-2_i32_219 : i32 to vector<16x32xi32>
    %452 = arith.addi %450, %451 : vector<16x32xi32>
    %c0_i32_220 = arith.constant 0 : i32
    %453 = vector.broadcast %c0_i32_220 : i32 to vector<16x32xi32>
    %454 = arith.cmpi sge, %452, %453 : vector<16x32xi32>
    %c16_i32 = arith.constant 16 : i32
    %455 = vector.broadcast %c16_i32 : i32 to vector<16x32xi32>
    %456 = arith.cmpi slt, %452, %455 : vector<16x32xi32>
    %457 = arith.andi %454, %456 : vector<16x32xi1>
    %c2_i32_221 = arith.constant 2 : i32
    %458 = vector.broadcast %c2_i32_221 : i32 to vector<16x32xi32>
    %459 = arith.muli %458, %445 : vector<16x32xi32>
    %c-2_i32_222 = arith.constant -2 : i32
    %460 = vector.broadcast %c-2_i32_222 : i32 to vector<16x32xi32>
    %461 = arith.addi %459, %460 : vector<16x32xi32>
    %462 = arith.cmpi eq, %446, %461 : vector<16x32xi32>
    %463 = arith.andi %462, %457 : vector<16x32xi1>
    %cst_223 = arith.constant 1.000000e+00 : f32
    %cst_224 = arith.constant 0.000000e+00 : f32
    %464 = vector.broadcast %cst_223 : f32 to vector<16x32xf32>
    %465 = vector.broadcast %cst_224 : f32 to vector<16x32xf32>
    %466 = arith.select %463, %464, %465 : vector<16x32xi1>, vector<16x32xf32>
    %cst_225 = arith.constant dense<0.000000e+00> : vector<16x256xf32>
    %467 = tpu.matmul %466, %444, %cst_225 {dimension_numbers = #tpu.dot_dimension_numbers<[1], [0], [0], [1], [0, 0, 1, 1], [], []>} : vector<16x32xf32>, vector<32x256xf32>, vector<16x256xf32> -> vector<16x256xf32>
    %c1_226 = arith.constant 1 : index
    %c0_227 = arith.constant 0 : index
    %c0_228 = arith.constant 0 : index
    %468 = vector.load %arg9[%c1_226, %c0_227, %c0_228] : memref<5x128x256xbf16, #tpu.memory_space<vmem>>, vector<1x128x256xbf16>
    %469 = vector.shape_cast %468 : vector<1x128x256xbf16> to vector<128x256xbf16>
    %cst_229 = arith.constant dense<0.000000e+00> : vector<32x256xf32>
    %470 = tpu.matmul %441, %469, %cst_229 {dimension_numbers = #tpu.dot_dimension_numbers<[1], [0], [0], [1], [0, 0, 1, 1], [], []>} : vector<32x128xbf16>, vector<128x256xbf16>, vector<32x256xf32> -> vector<32x256xf32>
    %471 = tpu.iota {dimensions = array<i32: 0>} : vector<16x32xi32>
    %472 = tpu.iota {dimensions = array<i32: 1>} : vector<16x32xi32>
    %c7_i32_230 = arith.constant 7 : i32
    %473 = vector.broadcast %c7_i32_230 : i32 to vector<16x32xi32>
    %474 = arith.andi %471, %473 : vector<16x32xi32>
    %c2_i32_231 = arith.constant 2 : i32
    %475 = vector.broadcast %c2_i32_231 : i32 to vector<16x32xi32>
    %476 = arith.muli %475, %474 : vector<16x32xi32>
    %c-1_i32_232 = arith.constant -1 : i32
    %477 = vector.broadcast %c-1_i32_232 : i32 to vector<16x32xi32>
    %478 = arith.addi %476, %477 : vector<16x32xi32>
    %c0_i32_233 = arith.constant 0 : i32
    %479 = vector.broadcast %c0_i32_233 : i32 to vector<16x32xi32>
    %480 = arith.cmpi sge, %478, %479 : vector<16x32xi32>
    %c16_i32_234 = arith.constant 16 : i32
    %481 = vector.broadcast %c16_i32_234 : i32 to vector<16x32xi32>
    %482 = arith.cmpi slt, %478, %481 : vector<16x32xi32>
    %483 = arith.andi %480, %482 : vector<16x32xi1>
    %c2_i32_235 = arith.constant 2 : i32
    %484 = vector.broadcast %c2_i32_235 : i32 to vector<16x32xi32>
    %485 = arith.muli %484, %471 : vector<16x32xi32>
    %c-1_i32_236 = arith.constant -1 : i32
    %486 = vector.broadcast %c-1_i32_236 : i32 to vector<16x32xi32>
    %487 = arith.addi %485, %486 : vector<16x32xi32>
    %488 = arith.cmpi eq, %472, %487 : vector<16x32xi32>
    %489 = arith.andi %488, %483 : vector<16x32xi1>
    %cst_237 = arith.constant 1.000000e+00 : f32
    %cst_238 = arith.constant 0.000000e+00 : f32
    %490 = vector.broadcast %cst_237 : f32 to vector<16x32xf32>
    %491 = vector.broadcast %cst_238 : f32 to vector<16x32xf32>
    %492 = arith.select %489, %490, %491 : vector<16x32xi1>, vector<16x32xf32>
    %cst_239 = arith.constant dense<0.000000e+00> : vector<16x256xf32>
    %493 = tpu.matmul %492, %470, %cst_239 {dimension_numbers = #tpu.dot_dimension_numbers<[1], [0], [0], [1], [0, 0, 1, 1], [], []>} : vector<16x32xf32>, vector<32x256xf32>, vector<16x256xf32> -> vector<16x256xf32>
    %494 = arith.addf %467, %493 : vector<16x256xf32>
    %c2_240 = arith.constant 2 : index
    %c0_241 = arith.constant 0 : index
    %c0_242 = arith.constant 0 : index
    %495 = vector.load %arg9[%c2_240, %c0_241, %c0_242] : memref<5x128x256xbf16, #tpu.memory_space<vmem>>, vector<1x128x256xbf16>
    %496 = vector.shape_cast %495 : vector<1x128x256xbf16> to vector<128x256xbf16>
    %cst_243 = arith.constant dense<0.000000e+00> : vector<32x256xf32>
    %497 = tpu.matmul %441, %496, %cst_243 {dimension_numbers = #tpu.dot_dimension_numbers<[1], [0], [0], [1], [0, 0, 1, 1], [], []>} : vector<32x128xbf16>, vector<128x256xbf16>, vector<32x256xf32> -> vector<32x256xf32>
    %498 = tpu.iota {dimensions = array<i32: 0>} : vector<16x32xi32>
    %499 = tpu.iota {dimensions = array<i32: 1>} : vector<16x32xi32>
    %c7_i32_244 = arith.constant 7 : i32
    %500 = vector.broadcast %c7_i32_244 : i32 to vector<16x32xi32>
    %501 = arith.andi %498, %500 : vector<16x32xi32>
    %c2_i32_245 = arith.constant 2 : i32
    %502 = vector.broadcast %c2_i32_245 : i32 to vector<16x32xi32>
    %503 = arith.muli %502, %501 : vector<16x32xi32>
    %c0_i32_246 = arith.constant 0 : i32
    %504 = vector.broadcast %c0_i32_246 : i32 to vector<16x32xi32>
    %505 = arith.addi %503, %504 : vector<16x32xi32>
    %c0_i32_247 = arith.constant 0 : i32
    %506 = vector.broadcast %c0_i32_247 : i32 to vector<16x32xi32>
    %507 = arith.cmpi sge, %505, %506 : vector<16x32xi32>
    %c16_i32_248 = arith.constant 16 : i32
    %508 = vector.broadcast %c16_i32_248 : i32 to vector<16x32xi32>
    %509 = arith.cmpi slt, %505, %508 : vector<16x32xi32>
    %510 = arith.andi %507, %509 : vector<16x32xi1>
    %c2_i32_249 = arith.constant 2 : i32
    %511 = vector.broadcast %c2_i32_249 : i32 to vector<16x32xi32>
    %512 = arith.muli %511, %498 : vector<16x32xi32>
    %c0_i32_250 = arith.constant 0 : i32
    %513 = vector.broadcast %c0_i32_250 : i32 to vector<16x32xi32>
    %514 = arith.addi %512, %513 : vector<16x32xi32>
    %515 = arith.cmpi eq, %499, %514 : vector<16x32xi32>
    %516 = arith.andi %515, %510 : vector<16x32xi1>
    %cst_251 = arith.constant 1.000000e+00 : f32
    %cst_252 = arith.constant 0.000000e+00 : f32
    %517 = vector.broadcast %cst_251 : f32 to vector<16x32xf32>
    %518 = vector.broadcast %cst_252 : f32 to vector<16x32xf32>
    %519 = arith.select %516, %517, %518 : vector<16x32xi1>, vector<16x32xf32>
    %cst_253 = arith.constant dense<0.000000e+00> : vector<16x256xf32>
    %520 = tpu.matmul %519, %497, %cst_253 {dimension_numbers = #tpu.dot_dimension_numbers<[1], [0], [0], [1], [0, 0, 1, 1], [], []>} : vector<16x32xf32>, vector<32x256xf32>, vector<16x256xf32> -> vector<16x256xf32>
    %521 = arith.addf %494, %520 : vector<16x256xf32>
    %c3_254 = arith.constant 3 : index
    %c0_255 = arith.constant 0 : index
    %c0_256 = arith.constant 0 : index
    %522 = vector.load %arg9[%c3_254, %c0_255, %c0_256] : memref<5x128x256xbf16, #tpu.memory_space<vmem>>, vector<1x128x256xbf16>
    %523 = vector.shape_cast %522 : vector<1x128x256xbf16> to vector<128x256xbf16>
    %cst_257 = arith.constant dense<0.000000e+00> : vector<32x256xf32>
    %524 = tpu.matmul %441, %523, %cst_257 {dimension_numbers = #tpu.dot_dimension_numbers<[1], [0], [0], [1], [0, 0, 1, 1], [], []>} : vector<32x128xbf16>, vector<128x256xbf16>, vector<32x256xf32> -> vector<32x256xf32>
    %525 = tpu.iota {dimensions = array<i32: 0>} : vector<16x32xi32>
    %526 = tpu.iota {dimensions = array<i32: 1>} : vector<16x32xi32>
    %c7_i32_258 = arith.constant 7 : i32
    %527 = vector.broadcast %c7_i32_258 : i32 to vector<16x32xi32>
    %528 = arith.andi %525, %527 : vector<16x32xi32>
    %c2_i32_259 = arith.constant 2 : i32
    %529 = vector.broadcast %c2_i32_259 : i32 to vector<16x32xi32>
    %530 = arith.muli %529, %528 : vector<16x32xi32>
    %c1_i32_260 = arith.constant 1 : i32
    %531 = vector.broadcast %c1_i32_260 : i32 to vector<16x32xi32>
    %532 = arith.addi %530, %531 : vector<16x32xi32>
    %c0_i32_261 = arith.constant 0 : i32
    %533 = vector.broadcast %c0_i32_261 : i32 to vector<16x32xi32>
    %534 = arith.cmpi sge, %532, %533 : vector<16x32xi32>
    %c16_i32_262 = arith.constant 16 : i32
    %535 = vector.broadcast %c16_i32_262 : i32 to vector<16x32xi32>
    %536 = arith.cmpi slt, %532, %535 : vector<16x32xi32>
    %537 = arith.andi %534, %536 : vector<16x32xi1>
    %c2_i32_263 = arith.constant 2 : i32
    %538 = vector.broadcast %c2_i32_263 : i32 to vector<16x32xi32>
    %539 = arith.muli %538, %525 : vector<16x32xi32>
    %c1_i32_264 = arith.constant 1 : i32
    %540 = vector.broadcast %c1_i32_264 : i32 to vector<16x32xi32>
    %541 = arith.addi %539, %540 : vector<16x32xi32>
    %542 = arith.cmpi eq, %526, %541 : vector<16x32xi32>
    %543 = arith.andi %542, %537 : vector<16x32xi1>
    %cst_265 = arith.constant 1.000000e+00 : f32
    %cst_266 = arith.constant 0.000000e+00 : f32
    %544 = vector.broadcast %cst_265 : f32 to vector<16x32xf32>
    %545 = vector.broadcast %cst_266 : f32 to vector<16x32xf32>
    %546 = arith.select %543, %544, %545 : vector<16x32xi1>, vector<16x32xf32>
    %cst_267 = arith.constant dense<0.000000e+00> : vector<16x256xf32>
    %547 = tpu.matmul %546, %524, %cst_267 {dimension_numbers = #tpu.dot_dimension_numbers<[1], [0], [0], [1], [0, 0, 1, 1], [], []>} : vector<16x32xf32>, vector<32x256xf32>, vector<16x256xf32> -> vector<16x256xf32>
    %548 = arith.addf %521, %547 : vector<16x256xf32>
    %c4_268 = arith.constant 4 : index
    %c0_269 = arith.constant 0 : index
    %c0_270 = arith.constant 0 : index
    %549 = vector.load %arg9[%c4_268, %c0_269, %c0_270] : memref<5x128x256xbf16, #tpu.memory_space<vmem>>, vector<1x128x256xbf16>
    %550 = vector.shape_cast %549 : vector<1x128x256xbf16> to vector<128x256xbf16>
    %cst_271 = arith.constant dense<0.000000e+00> : vector<32x256xf32>
    %551 = tpu.matmul %441, %550, %cst_271 {dimension_numbers = #tpu.dot_dimension_numbers<[1], [0], [0], [1], [0, 0, 1, 1], [], []>} : vector<32x128xbf16>, vector<128x256xbf16>, vector<32x256xf32> -> vector<32x256xf32>
    %552 = tpu.iota {dimensions = array<i32: 0>} : vector<16x32xi32>
    %553 = tpu.iota {dimensions = array<i32: 1>} : vector<16x32xi32>
    %c7_i32_272 = arith.constant 7 : i32
    %554 = vector.broadcast %c7_i32_272 : i32 to vector<16x32xi32>
    %555 = arith.andi %552, %554 : vector<16x32xi32>
    %c2_i32_273 = arith.constant 2 : i32
    %556 = vector.broadcast %c2_i32_273 : i32 to vector<16x32xi32>
    %557 = arith.muli %556, %555 : vector<16x32xi32>
    %c2_i32_274 = arith.constant 2 : i32
    %558 = vector.broadcast %c2_i32_274 : i32 to vector<16x32xi32>
    %559 = arith.addi %557, %558 : vector<16x32xi32>
    %c0_i32_275 = arith.constant 0 : i32
    %560 = vector.broadcast %c0_i32_275 : i32 to vector<16x32xi32>
    %561 = arith.cmpi sge, %559, %560 : vector<16x32xi32>
    %c16_i32_276 = arith.constant 16 : i32
    %562 = vector.broadcast %c16_i32_276 : i32 to vector<16x32xi32>
    %563 = arith.cmpi slt, %559, %562 : vector<16x32xi32>
    %564 = arith.andi %561, %563 : vector<16x32xi1>
    %c2_i32_277 = arith.constant 2 : i32
    %565 = vector.broadcast %c2_i32_277 : i32 to vector<16x32xi32>
    %566 = arith.muli %565, %552 : vector<16x32xi32>
    %c2_i32_278 = arith.constant 2 : i32
    %567 = vector.broadcast %c2_i32_278 : i32 to vector<16x32xi32>
    %568 = arith.addi %566, %567 : vector<16x32xi32>
    %569 = arith.cmpi eq, %553, %568 : vector<16x32xi32>
    %570 = arith.andi %569, %564 : vector<16x32xi1>
    %cst_279 = arith.constant 1.000000e+00 : f32
    %cst_280 = arith.constant 0.000000e+00 : f32
    %571 = vector.broadcast %cst_279 : f32 to vector<16x32xf32>
    %572 = vector.broadcast %cst_280 : f32 to vector<16x32xf32>
    %573 = arith.select %570, %571, %572 : vector<16x32xi1>, vector<16x32xf32>
    %cst_281 = arith.constant dense<0.000000e+00> : vector<16x256xf32>
    %574 = tpu.matmul %573, %551, %cst_281 {dimension_numbers = #tpu.dot_dimension_numbers<[1], [0], [0], [1], [0, 0, 1, 1], [], []>} : vector<16x32xf32>, vector<32x256xf32>, vector<16x256xf32> -> vector<16x256xf32>
    %575 = arith.addf %548, %574 : vector<16x256xf32>
    %c0_282 = arith.constant 0 : index
    %c0_283 = arith.constant 0 : index
    %576 = vector.load %arg10[%c0_282, %c0_283] : memref<1x256xf32, #tpu.memory_space<vmem>>, vector<1x256xf32>
    %577 = vector.broadcast %576 : vector<1x256xf32> to vector<16x256xf32>
    %578 = arith.addf %575, %577 : vector<16x256xf32>
    %cst_284 = arith.constant 0.000000e+00 : f32
    %579 = vector.broadcast %cst_284 : f32 to vector<16x256xf32>
    %580 = arith.cmpf ogt, %578, %579 : vector<16x256xf32>
    %cst_285 = arith.constant 2.000000e-01 : f32
    %581 = vector.broadcast %cst_285 : f32 to vector<16x256xf32>
    %582 = arith.mulf %581, %578 : vector<16x256xf32>
    %583 = arith.select %580, %578, %582 : vector<16x256xi1>, vector<16x256xf32>
    %584 = arith.truncf %583 : vector<16x256xf32> to vector<16x256xbf16>
    %c0_286 = arith.constant 0 : index
    %c0_287 = arith.constant 0 : index
    %c0_288 = arith.constant 0 : index
    %585 = vector.load %arg11[%c0_286, %c0_287, %c0_288] : memref<8x256x32xbf16, #tpu.memory_space<vmem>>, vector<1x256x32xbf16>
    %586 = vector.shape_cast %585 : vector<1x256x32xbf16> to vector<256x32xbf16>
    %cst_289 = arith.constant dense<0.000000e+00> : vector<16x32xf32>
    %587 = tpu.matmul %584, %586, %cst_289 {dimension_numbers = #tpu.dot_dimension_numbers<[1], [0], [0], [1], [0, 0, 1, 1], [], []>} : vector<16x256xbf16>, vector<256x32xbf16>, vector<16x32xf32> -> vector<16x32xf32>
    %588 = tpu.iota {dimensions = array<i32: 0>} : vector<2x16xi32>
    %589 = tpu.iota {dimensions = array<i32: 1>} : vector<2x16xi32>
    %c8_i32 = arith.constant 8 : i32
    %590 = vector.broadcast %c8_i32 : i32 to vector<2x16xi32>
    %591 = arith.muli %588, %590 : vector<2x16xi32>
    %c0_i32_290 = arith.constant 0 : i32
    %592 = vector.broadcast %c0_i32_290 : i32 to vector<2x16xi32>
    %593 = arith.addi %591, %592 : vector<2x16xi32>
    %594 = arith.cmpi eq, %589, %593 : vector<2x16xi32>
    %cst_291 = arith.constant 1.000000e+00 : f32
    %cst_292 = arith.constant 0.000000e+00 : f32
    %595 = vector.broadcast %cst_291 : f32 to vector<2x16xf32>
    %596 = vector.broadcast %cst_292 : f32 to vector<2x16xf32>
    %597 = arith.select %594, %595, %596 : vector<2x16xi1>, vector<2x16xf32>
    %cst_293 = arith.constant dense<0.000000e+00> : vector<2x32xf32>
    %598 = tpu.matmul %597, %587, %cst_293 {dimension_numbers = #tpu.dot_dimension_numbers<[1], [0], [0], [1], [0, 0, 1, 1], [], []>} : vector<2x16xf32>, vector<16x32xf32>, vector<2x32xf32> -> vector<2x32xf32>
    %c1_294 = arith.constant 1 : index
    %c0_295 = arith.constant 0 : index
    %c0_296 = arith.constant 0 : index
    %599 = vector.load %arg11[%c1_294, %c0_295, %c0_296] : memref<8x256x32xbf16, #tpu.memory_space<vmem>>, vector<1x256x32xbf16>
    %600 = vector.shape_cast %599 : vector<1x256x32xbf16> to vector<256x32xbf16>
    %cst_297 = arith.constant dense<0.000000e+00> : vector<16x32xf32>
    %601 = tpu.matmul %584, %600, %cst_297 {dimension_numbers = #tpu.dot_dimension_numbers<[1], [0], [0], [1], [0, 0, 1, 1], [], []>} : vector<16x256xbf16>, vector<256x32xbf16>, vector<16x32xf32> -> vector<16x32xf32>
    %602 = tpu.iota {dimensions = array<i32: 0>} : vector<2x16xi32>
    %603 = tpu.iota {dimensions = array<i32: 1>} : vector<2x16xi32>
    %c8_i32_298 = arith.constant 8 : i32
    %604 = vector.broadcast %c8_i32_298 : i32 to vector<2x16xi32>
    %605 = arith.muli %602, %604 : vector<2x16xi32>
    %c1_i32_299 = arith.constant 1 : i32
    %606 = vector.broadcast %c1_i32_299 : i32 to vector<2x16xi32>
    %607 = arith.addi %605, %606 : vector<2x16xi32>
    %608 = arith.cmpi eq, %603, %607 : vector<2x16xi32>
    %cst_300 = arith.constant 1.000000e+00 : f32
    %cst_301 = arith.constant 0.000000e+00 : f32
    %609 = vector.broadcast %cst_300 : f32 to vector<2x16xf32>
    %610 = vector.broadcast %cst_301 : f32 to vector<2x16xf32>
    %611 = arith.select %608, %609, %610 : vector<2x16xi1>, vector<2x16xf32>
    %cst_302 = arith.constant dense<0.000000e+00> : vector<2x32xf32>
    %612 = tpu.matmul %611, %601, %cst_302 {dimension_numbers = #tpu.dot_dimension_numbers<[1], [0], [0], [1], [0, 0, 1, 1], [], []>} : vector<2x16xf32>, vector<16x32xf32>, vector<2x32xf32> -> vector<2x32xf32>
    %613 = arith.addf %598, %612 : vector<2x32xf32>
    %c2_303 = arith.constant 2 : index
    %c0_304 = arith.constant 0 : index
    %c0_305 = arith.constant 0 : index
    %614 = vector.load %arg11[%c2_303, %c0_304, %c0_305] : memref<8x256x32xbf16, #tpu.memory_space<vmem>>, vector<1x256x32xbf16>
    %615 = vector.shape_cast %614 : vector<1x256x32xbf16> to vector<256x32xbf16>
    %cst_306 = arith.constant dense<0.000000e+00> : vector<16x32xf32>
    %616 = tpu.matmul %584, %615, %cst_306 {dimension_numbers = #tpu.dot_dimension_numbers<[1], [0], [0], [1], [0, 0, 1, 1], [], []>} : vector<16x256xbf16>, vector<256x32xbf16>, vector<16x32xf32> -> vector<16x32xf32>
    %617 = tpu.iota {dimensions = array<i32: 0>} : vector<2x16xi32>
    %618 = tpu.iota {dimensions = array<i32: 1>} : vector<2x16xi32>
    %c8_i32_307 = arith.constant 8 : i32
    %619 = vector.broadcast %c8_i32_307 : i32 to vector<2x16xi32>
    %620 = arith.muli %617, %619 : vector<2x16xi32>
    %c2_i32_308 = arith.constant 2 : i32
    %621 = vector.broadcast %c2_i32_308 : i32 to vector<2x16xi32>
    %622 = arith.addi %620, %621 : vector<2x16xi32>
    %623 = arith.cmpi eq, %618, %622 : vector<2x16xi32>
    %cst_309 = arith.constant 1.000000e+00 : f32
    %cst_310 = arith.constant 0.000000e+00 : f32
    %624 = vector.broadcast %cst_309 : f32 to vector<2x16xf32>
    %625 = vector.broadcast %cst_310 : f32 to vector<2x16xf32>
    %626 = arith.select %623, %624, %625 : vector<2x16xi1>, vector<2x16xf32>
    %cst_311 = arith.constant dense<0.000000e+00> : vector<2x32xf32>
    %627 = tpu.matmul %626, %616, %cst_311 {dimension_numbers = #tpu.dot_dimension_numbers<[1], [0], [0], [1], [0, 0, 1, 1], [], []>} : vector<2x16xf32>, vector<16x32xf32>, vector<2x32xf32> -> vector<2x32xf32>
    %628 = arith.addf %613, %627 : vector<2x32xf32>
    %c3_312 = arith.constant 3 : index
    %c0_313 = arith.constant 0 : index
    %c0_314 = arith.constant 0 : index
    %629 = vector.load %arg11[%c3_312, %c0_313, %c0_314] : memref<8x256x32xbf16, #tpu.memory_space<vmem>>, vector<1x256x32xbf16>
    %630 = vector.shape_cast %629 : vector<1x256x32xbf16> to vector<256x32xbf16>
    %cst_315 = arith.constant dense<0.000000e+00> : vector<16x32xf32>
    %631 = tpu.matmul %584, %630, %cst_315 {dimension_numbers = #tpu.dot_dimension_numbers<[1], [0], [0], [1], [0, 0, 1, 1], [], []>} : vector<16x256xbf16>, vector<256x32xbf16>, vector<16x32xf32> -> vector<16x32xf32>
    %632 = tpu.iota {dimensions = array<i32: 0>} : vector<2x16xi32>
    %633 = tpu.iota {dimensions = array<i32: 1>} : vector<2x16xi32>
    %c8_i32_316 = arith.constant 8 : i32
    %634 = vector.broadcast %c8_i32_316 : i32 to vector<2x16xi32>
    %635 = arith.muli %632, %634 : vector<2x16xi32>
    %c3_i32 = arith.constant 3 : i32
    %636 = vector.broadcast %c3_i32 : i32 to vector<2x16xi32>
    %637 = arith.addi %635, %636 : vector<2x16xi32>
    %638 = arith.cmpi eq, %633, %637 : vector<2x16xi32>
    %cst_317 = arith.constant 1.000000e+00 : f32
    %cst_318 = arith.constant 0.000000e+00 : f32
    %639 = vector.broadcast %cst_317 : f32 to vector<2x16xf32>
    %640 = vector.broadcast %cst_318 : f32 to vector<2x16xf32>
    %641 = arith.select %638, %639, %640 : vector<2x16xi1>, vector<2x16xf32>
    %cst_319 = arith.constant dense<0.000000e+00> : vector<2x32xf32>
    %642 = tpu.matmul %641, %631, %cst_319 {dimension_numbers = #tpu.dot_dimension_numbers<[1], [0], [0], [1], [0, 0, 1, 1], [], []>} : vector<2x16xf32>, vector<16x32xf32>, vector<2x32xf32> -> vector<2x32xf32>
    %643 = arith.addf %628, %642 : vector<2x32xf32>
    %c4_320 = arith.constant 4 : index
    %c0_321 = arith.constant 0 : index
    %c0_322 = arith.constant 0 : index
    %644 = vector.load %arg11[%c4_320, %c0_321, %c0_322] : memref<8x256x32xbf16, #tpu.memory_space<vmem>>, vector<1x256x32xbf16>
    %645 = vector.shape_cast %644 : vector<1x256x32xbf16> to vector<256x32xbf16>
    %cst_323 = arith.constant dense<0.000000e+00> : vector<16x32xf32>
    %646 = tpu.matmul %584, %645, %cst_323 {dimension_numbers = #tpu.dot_dimension_numbers<[1], [0], [0], [1], [0, 0, 1, 1], [], []>} : vector<16x256xbf16>, vector<256x32xbf16>, vector<16x32xf32> -> vector<16x32xf32>
    %647 = tpu.iota {dimensions = array<i32: 0>} : vector<2x16xi32>
    %648 = tpu.iota {dimensions = array<i32: 1>} : vector<2x16xi32>
    %c8_i32_324 = arith.constant 8 : i32
    %649 = vector.broadcast %c8_i32_324 : i32 to vector<2x16xi32>
    %650 = arith.muli %647, %649 : vector<2x16xi32>
    %c4_i32 = arith.constant 4 : i32
    %651 = vector.broadcast %c4_i32 : i32 to vector<2x16xi32>
    %652 = arith.addi %650, %651 : vector<2x16xi32>
    %653 = arith.cmpi eq, %648, %652 : vector<2x16xi32>
    %cst_325 = arith.constant 1.000000e+00 : f32
    %cst_326 = arith.constant 0.000000e+00 : f32
    %654 = vector.broadcast %cst_325 : f32 to vector<2x16xf32>
    %655 = vector.broadcast %cst_326 : f32 to vector<2x16xf32>
    %656 = arith.select %653, %654, %655 : vector<2x16xi1>, vector<2x16xf32>
    %cst_327 = arith.constant dense<0.000000e+00> : vector<2x32xf32>
    %657 = tpu.matmul %656, %646, %cst_327 {dimension_numbers = #tpu.dot_dimension_numbers<[1], [0], [0], [1], [0, 0, 1, 1], [], []>} : vector<2x16xf32>, vector<16x32xf32>, vector<2x32xf32> -> vector<2x32xf32>
    %658 = arith.addf %643, %657 : vector<2x32xf32>
    %c5 = arith.constant 5 : index
    %c0_328 = arith.constant 0 : index
    %c0_329 = arith.constant 0 : index
    %659 = vector.load %arg11[%c5, %c0_328, %c0_329] : memref<8x256x32xbf16, #tpu.memory_space<vmem>>, vector<1x256x32xbf16>
    %660 = vector.shape_cast %659 : vector<1x256x32xbf16> to vector<256x32xbf16>
    %cst_330 = arith.constant dense<0.000000e+00> : vector<16x32xf32>
    %661 = tpu.matmul %584, %660, %cst_330 {dimension_numbers = #tpu.dot_dimension_numbers<[1], [0], [0], [1], [0, 0, 1, 1], [], []>} : vector<16x256xbf16>, vector<256x32xbf16>, vector<16x32xf32> -> vector<16x32xf32>
    %662 = tpu.iota {dimensions = array<i32: 0>} : vector<2x16xi32>
    %663 = tpu.iota {dimensions = array<i32: 1>} : vector<2x16xi32>
    %c8_i32_331 = arith.constant 8 : i32
    %664 = vector.broadcast %c8_i32_331 : i32 to vector<2x16xi32>
    %665 = arith.muli %662, %664 : vector<2x16xi32>
    %c5_i32 = arith.constant 5 : i32
    %666 = vector.broadcast %c5_i32 : i32 to vector<2x16xi32>
    %667 = arith.addi %665, %666 : vector<2x16xi32>
    %668 = arith.cmpi eq, %663, %667 : vector<2x16xi32>
    %cst_332 = arith.constant 1.000000e+00 : f32
    %cst_333 = arith.constant 0.000000e+00 : f32
    %669 = vector.broadcast %cst_332 : f32 to vector<2x16xf32>
    %670 = vector.broadcast %cst_333 : f32 to vector<2x16xf32>
    %671 = arith.select %668, %669, %670 : vector<2x16xi1>, vector<2x16xf32>
    %cst_334 = arith.constant dense<0.000000e+00> : vector<2x32xf32>
    %672 = tpu.matmul %671, %661, %cst_334 {dimension_numbers = #tpu.dot_dimension_numbers<[1], [0], [0], [1], [0, 0, 1, 1], [], []>} : vector<2x16xf32>, vector<16x32xf32>, vector<2x32xf32> -> vector<2x32xf32>
    %673 = arith.addf %658, %672 : vector<2x32xf32>
    %c6 = arith.constant 6 : index
    %c0_335 = arith.constant 0 : index
    %c0_336 = arith.constant 0 : index
    %674 = vector.load %arg11[%c6, %c0_335, %c0_336] : memref<8x256x32xbf16, #tpu.memory_space<vmem>>, vector<1x256x32xbf16>
    %675 = vector.shape_cast %674 : vector<1x256x32xbf16> to vector<256x32xbf16>
    %cst_337 = arith.constant dense<0.000000e+00> : vector<16x32xf32>
    %676 = tpu.matmul %584, %675, %cst_337 {dimension_numbers = #tpu.dot_dimension_numbers<[1], [0], [0], [1], [0, 0, 1, 1], [], []>} : vector<16x256xbf16>, vector<256x32xbf16>, vector<16x32xf32> -> vector<16x32xf32>
    %677 = tpu.iota {dimensions = array<i32: 0>} : vector<2x16xi32>
    %678 = tpu.iota {dimensions = array<i32: 1>} : vector<2x16xi32>
    %c8_i32_338 = arith.constant 8 : i32
    %679 = vector.broadcast %c8_i32_338 : i32 to vector<2x16xi32>
    %680 = arith.muli %677, %679 : vector<2x16xi32>
    %c6_i32 = arith.constant 6 : i32
    %681 = vector.broadcast %c6_i32 : i32 to vector<2x16xi32>
    %682 = arith.addi %680, %681 : vector<2x16xi32>
    %683 = arith.cmpi eq, %678, %682 : vector<2x16xi32>
    %cst_339 = arith.constant 1.000000e+00 : f32
    %cst_340 = arith.constant 0.000000e+00 : f32
    %684 = vector.broadcast %cst_339 : f32 to vector<2x16xf32>
    %685 = vector.broadcast %cst_340 : f32 to vector<2x16xf32>
    %686 = arith.select %683, %684, %685 : vector<2x16xi1>, vector<2x16xf32>
    %cst_341 = arith.constant dense<0.000000e+00> : vector<2x32xf32>
    %687 = tpu.matmul %686, %676, %cst_341 {dimension_numbers = #tpu.dot_dimension_numbers<[1], [0], [0], [1], [0, 0, 1, 1], [], []>} : vector<2x16xf32>, vector<16x32xf32>, vector<2x32xf32> -> vector<2x32xf32>
    %688 = arith.addf %673, %687 : vector<2x32xf32>
    %c7 = arith.constant 7 : index
    %c0_342 = arith.constant 0 : index
    %c0_343 = arith.constant 0 : index
    %689 = vector.load %arg11[%c7, %c0_342, %c0_343] : memref<8x256x32xbf16, #tpu.memory_space<vmem>>, vector<1x256x32xbf16>
    %690 = vector.shape_cast %689 : vector<1x256x32xbf16> to vector<256x32xbf16>
    %cst_344 = arith.constant dense<0.000000e+00> : vector<16x32xf32>
    %691 = tpu.matmul %584, %690, %cst_344 {dimension_numbers = #tpu.dot_dimension_numbers<[1], [0], [0], [1], [0, 0, 1, 1], [], []>} : vector<16x256xbf16>, vector<256x32xbf16>, vector<16x32xf32> -> vector<16x32xf32>
    %692 = tpu.iota {dimensions = array<i32: 0>} : vector<2x16xi32>
    %693 = tpu.iota {dimensions = array<i32: 1>} : vector<2x16xi32>
    %c8_i32_345 = arith.constant 8 : i32
    %694 = vector.broadcast %c8_i32_345 : i32 to vector<2x16xi32>
    %695 = arith.muli %692, %694 : vector<2x16xi32>
    %c7_i32_346 = arith.constant 7 : i32
    %696 = vector.broadcast %c7_i32_346 : i32 to vector<2x16xi32>
    %697 = arith.addi %695, %696 : vector<2x16xi32>
    %698 = arith.cmpi eq, %693, %697 : vector<2x16xi32>
    %cst_347 = arith.constant 1.000000e+00 : f32
    %cst_348 = arith.constant 0.000000e+00 : f32
    %699 = vector.broadcast %cst_347 : f32 to vector<2x16xf32>
    %700 = vector.broadcast %cst_348 : f32 to vector<2x16xf32>
    %701 = arith.select %698, %699, %700 : vector<2x16xi1>, vector<2x16xf32>
    %cst_349 = arith.constant dense<0.000000e+00> : vector<2x32xf32>
    %702 = tpu.matmul %701, %691, %cst_349 {dimension_numbers = #tpu.dot_dimension_numbers<[1], [0], [0], [1], [0, 0, 1, 1], [], []>} : vector<2x16xf32>, vector<16x32xf32>, vector<2x32xf32> -> vector<2x32xf32>
    %703 = arith.addf %688, %702 : vector<2x32xf32>
    %c0_350 = arith.constant 0 : index
    %c0_351 = arith.constant 0 : index
    %704 = vector.load %arg12[%c0_350, %c0_351] : memref<1x32xf32, #tpu.memory_space<vmem>>, vector<1x32xf32>
    %705 = vector.broadcast %704 : vector<1x32xf32> to vector<2x32xf32>
    %706 = arith.addf %703, %705 : vector<2x32xf32>
    %cst_352 = arith.constant 0.000000e+00 : f32
    %707 = vector.broadcast %cst_352 : f32 to vector<2x32xf32>
    %708 = arith.cmpf ogt, %706, %707 : vector<2x32xf32>
    %cst_353 = arith.constant 2.000000e-01 : f32
    %709 = vector.broadcast %cst_353 : f32 to vector<2x32xf32>
    %710 = arith.mulf %709, %706 : vector<2x32xf32>
    %711 = arith.select %708, %706, %710 : vector<2x32xi1>, vector<2x32xf32>
    %c0_354 = arith.constant 0 : index
    %c0_355 = arith.constant 0 : index
    %712 = vector.load %arg13[%c0_354, %c0_355] : memref<2x32xf32, #tpu.memory_space<vmem>>, vector<2x32xf32>
    tpu.vector_store %arg13[%c0_354, %c0_355], %711 {strides = array<i32>} : memref<2x32xf32, #tpu.memory_space<vmem>>, vector<2x32xf32>,
    return
  }
}

module attributes {stable_mosaic.version = 11 : i64} {
  func.func @_img_conv1_kernel(%arg0: memref<128x16xf32, #tpu.memory_space<vmem>>, %arg1: memref<16x16xbf16, #tpu.memory_space<vmem>>, %arg2: memref<1x16xf32, #tpu.memory_space<vmem>>, %arg3: memref<128x16xf32, #tpu.memory_space<vmem>>) attributes {dimension_semantics = [], scalar_prefetch = 0 : i64, scratch_operands = 0 : i64, tpu.core_type = #tpu.core_type<tc>} {
    %c0 = arith.constant 0 : index
    %c0_0 = arith.constant 0 : index
    %0 = vector.load %arg0[%c0, %c0_0] : memref<128x16xf32, #tpu.memory_space<vmem>>, vector<128x16xf32>
    %1 = arith.truncf %0 : vector<128x16xf32> to vector<128x16xbf16>
    %c0_1 = arith.constant 0 : index
    %c0_2 = arith.constant 0 : index
    %2 = vector.load %arg1[%c0_1, %c0_2] : memref<16x16xbf16, #tpu.memory_space<vmem>>, vector<16x16xbf16>
    %cst = arith.constant dense<0.000000e+00> : vector<128x16xf32>
    %3 = tpu.matmul %1, %2, %cst {dimension_numbers = #tpu.dot_dimension_numbers<[1], [0], [0], [1], [0, 0, 1, 1], [], []>} : vector<128x16xbf16>, vector<16x16xbf16>, vector<128x16xf32> -> vector<128x16xf32>
    %c0_3 = arith.constant 0 : index
    %c0_4 = arith.constant 0 : index
    %4 = vector.load %arg2[%c0_3, %c0_4] : memref<1x16xf32, #tpu.memory_space<vmem>>, vector<1x16xf32>
    %5 = vector.broadcast %4 : vector<1x16xf32> to vector<128x16xf32>
    %6 = arith.addf %3, %5 : vector<128x16xf32>
    %cst_5 = arith.constant 0.000000e+00 : f32
    %7 = vector.broadcast %cst_5 : f32 to vector<128x16xf32>
    %8 = arith.cmpf ogt, %6, %7 : vector<128x16xf32>
    %cst_6 = arith.constant 2.000000e-01 : f32
    %9 = vector.broadcast %cst_6 : f32 to vector<128x16xf32>
    %10 = arith.mulf %9, %6 : vector<128x16xf32>
    %11 = arith.select %8, %6, %10 : vector<128x16xi1>, vector<128x16xf32>
    %c0_7 = arith.constant 0 : index
    %c0_8 = arith.constant 0 : index
    %12 = vector.load %arg3[%c0_7, %c0_8] : memref<128x16xf32, #tpu.memory_space<vmem>>, vector<128x16xf32>
    tpu.vector_store %arg3[%c0_7, %c0_8], %11 {strides = array<i32>} : memref<128x16xf32, #tpu.memory_space<vmem>>, vector<128x16xf32>,
    return
  }
}

module attributes {stable_mosaic.version = 11 : i64} {
  func.func @_head_kernel(%arg0: memref<2x5xf32, #tpu.memory_space<vmem>>, %arg1: memref<2x32xf32, #tpu.memory_space<vmem>>, %arg2: memref<2x1024xf32, #tpu.memory_space<vmem>>, %arg3: memref<5x16xbf16, #tpu.memory_space<vmem>>, %arg4: memref<1x16xf32, #tpu.memory_space<vmem>>, %arg5: memref<16x16xbf16, #tpu.memory_space<vmem>>, %arg6: memref<1x16xf32, #tpu.memory_space<vmem>>, %arg7: memref<1024x32xbf16, #tpu.memory_space<vmem>>, %arg8: memref<1x32xf32, #tpu.memory_space<vmem>>, %arg9: memref<16x32xbf16, #tpu.memory_space<vmem>>, %arg10: memref<32x32xbf16, #tpu.memory_space<vmem>>, %arg11: memref<32x32xbf16, #tpu.memory_space<vmem>>, %arg12: memref<1x32xf32, #tpu.memory_space<vmem>>, %arg13: memref<32x32xbf16, #tpu.memory_space<vmem>>, %arg14: memref<1x32xf32, #tpu.memory_space<vmem>>, %arg15: memref<32x1xbf16, #tpu.memory_space<vmem>>, %arg16: memref<1x1xf32, #tpu.memory_space<vmem>>, %arg17: memref<2x1xf32, #tpu.memory_space<vmem>>, %arg18: memref<2x1xf32, #tpu.memory_space<vmem>>) attributes {dimension_semantics = [], scalar_prefetch = 0 : i64, scratch_operands = 0 : i64, tpu.core_type = #tpu.core_type<tc>} {
    %c0 = arith.constant 0 : index
    %c0_0 = arith.constant 0 : index
    %0 = vector.load %arg0[%c0, %c0_0] : memref<2x5xf32, #tpu.memory_space<vmem>>, vector<2x5xf32>
    %1 = arith.truncf %0 : vector<2x5xf32> to vector<2x5xbf16>
    %c0_1 = arith.constant 0 : index
    %c0_2 = arith.constant 0 : index
    %2 = vector.load %arg3[%c0_1, %c0_2] : memref<5x16xbf16, #tpu.memory_space<vmem>>, vector<5x16xbf16>
    %cst = arith.constant dense<0.000000e+00> : vector<2x16xf32>
    %3 = tpu.matmul %1, %2, %cst {dimension_numbers = #tpu.dot_dimension_numbers<[1], [0], [0], [1], [0, 0, 1, 1], [], []>} : vector<2x5xbf16>, vector<5x16xbf16>, vector<2x16xf32> -> vector<2x16xf32>
    %c0_3 = arith.constant 0 : index
    %c0_4 = arith.constant 0 : index
    %4 = vector.load %arg4[%c0_3, %c0_4] : memref<1x16xf32, #tpu.memory_space<vmem>>, vector<1x16xf32>
    %5 = vector.broadcast %4 : vector<1x16xf32> to vector<2x16xf32>
    %6 = arith.addf %3, %5 : vector<2x16xf32>
    %cst_5 = arith.constant 0.000000e+00 : f32
    %7 = vector.broadcast %cst_5 : f32 to vector<2x16xf32>
    %8 = arith.cmpf ogt, %6, %7 : vector<2x16xf32>
    %cst_6 = arith.constant 2.000000e-01 : f32
    %9 = vector.broadcast %cst_6 : f32 to vector<2x16xf32>
    %10 = arith.mulf %9, %6 : vector<2x16xf32>
    %11 = arith.select %8, %6, %10 : vector<2x16xi1>, vector<2x16xf32>
    %12 = arith.truncf %11 : vector<2x16xf32> to vector<2x16xbf16>
    %c0_7 = arith.constant 0 : index
    %c0_8 = arith.constant 0 : index
    %13 = vector.load %arg5[%c0_7, %c0_8] : memref<16x16xbf16, #tpu.memory_space<vmem>>, vector<16x16xbf16>
    %cst_9 = arith.constant dense<0.000000e+00> : vector<2x16xf32>
    %14 = tpu.matmul %12, %13, %cst_9 {dimension_numbers = #tpu.dot_dimension_numbers<[1], [0], [0], [1], [0, 0, 1, 1], [], []>} : vector<2x16xbf16>, vector<16x16xbf16>, vector<2x16xf32> -> vector<2x16xf32>
    %c0_10 = arith.constant 0 : index
    %c0_11 = arith.constant 0 : index
    %15 = vector.load %arg6[%c0_10, %c0_11] : memref<1x16xf32, #tpu.memory_space<vmem>>, vector<1x16xf32>
    %16 = vector.broadcast %15 : vector<1x16xf32> to vector<2x16xf32>
    %17 = arith.addf %14, %16 : vector<2x16xf32>
    %cst_12 = arith.constant 0.000000e+00 : f32
    %18 = vector.broadcast %cst_12 : f32 to vector<2x16xf32>
    %19 = arith.cmpf ogt, %17, %18 : vector<2x16xf32>
    %cst_13 = arith.constant 2.000000e-01 : f32
    %20 = vector.broadcast %cst_13 : f32 to vector<2x16xf32>
    %21 = arith.mulf %20, %17 : vector<2x16xf32>
    %22 = arith.select %19, %17, %21 : vector<2x16xi1>, vector<2x16xf32>
    %c0_14 = arith.constant 0 : index
    %c0_15 = arith.constant 0 : index
    %23 = vector.load %arg2[%c0_14, %c0_15] : memref<2x1024xf32, #tpu.memory_space<vmem>>, vector<2x1024xf32>
    %24 = arith.truncf %23 : vector<2x1024xf32> to vector<2x1024xbf16>
    %c0_16 = arith.constant 0 : index
    %c0_17 = arith.constant 0 : index
    %25 = vector.load %arg7[%c0_16, %c0_17] : memref<1024x32xbf16, #tpu.memory_space<vmem>>, vector<1024x32xbf16>
    %cst_18 = arith.constant dense<0.000000e+00> : vector<2x32xf32>
    %26 = tpu.matmul %24, %25, %cst_18 {dimension_numbers = #tpu.dot_dimension_numbers<[1], [0], [0], [1], [0, 0, 1, 1], [], []>} : vector<2x1024xbf16>, vector<1024x32xbf16>, vector<2x32xf32> -> vector<2x32xf32>
    %c0_19 = arith.constant 0 : index
    %c0_20 = arith.constant 0 : index
    %27 = vector.load %arg8[%c0_19, %c0_20] : memref<1x32xf32, #tpu.memory_space<vmem>>, vector<1x32xf32>
    %28 = vector.broadcast %27 : vector<1x32xf32> to vector<2x32xf32>
    %29 = arith.addf %26, %28 : vector<2x32xf32>
    %cst_21 = arith.constant 0.000000e+00 : f32
    %30 = vector.broadcast %cst_21 : f32 to vector<2x32xf32>
    %31 = arith.cmpf ogt, %29, %30 : vector<2x32xf32>
    %cst_22 = arith.constant 2.000000e-01 : f32
    %32 = vector.broadcast %cst_22 : f32 to vector<2x32xf32>
    %33 = arith.mulf %32, %29 : vector<2x32xf32>
    %34 = arith.select %31, %29, %33 : vector<2x32xi1>, vector<2x32xf32>
    %35 = arith.truncf %22 : vector<2x16xf32> to vector<2x16xbf16>
    %c0_23 = arith.constant 0 : index
    %c0_24 = arith.constant 0 : index
    %36 = vector.load %arg9[%c0_23, %c0_24] : memref<16x32xbf16, #tpu.memory_space<vmem>>, vector<16x32xbf16>
    %cst_25 = arith.constant dense<0.000000e+00> : vector<2x32xf32>
    %37 = tpu.matmul %35, %36, %cst_25 {dimension_numbers = #tpu.dot_dimension_numbers<[1], [0], [0], [1], [0, 0, 1, 1], [], []>} : vector<2x16xbf16>, vector<16x32xbf16>, vector<2x32xf32> -> vector<2x32xf32>
    %c0_26 = arith.constant 0 : index
    %c0_27 = arith.constant 0 : index
    %38 = vector.load %arg1[%c0_26, %c0_27] : memref<2x32xf32, #tpu.memory_space<vmem>>, vector<2x32xf32>
    %39 = arith.truncf %38 : vector<2x32xf32> to vector<2x32xbf16>
    %c0_28 = arith.constant 0 : index
    %c0_29 = arith.constant 0 : index
    %40 = vector.load %arg10[%c0_28, %c0_29] : memref<32x32xbf16, #tpu.memory_space<vmem>>, vector<32x32xbf16>
    %cst_30 = arith.constant dense<0.000000e+00> : vector<2x32xf32>
    %41 = tpu.matmul %39, %40, %cst_30 {dimension_numbers = #tpu.dot_dimension_numbers<[1], [0], [0], [1], [0, 0, 1, 1], [], []>} : vector<2x32xbf16>, vector<32x32xbf16>, vector<2x32xf32> -> vector<2x32xf32>
    %42 = arith.addf %37, %41 : vector<2x32xf32>
    %43 = arith.truncf %34 : vector<2x32xf32> to vector<2x32xbf16>
    %c0_31 = arith.constant 0 : index
    %c0_32 = arith.constant 0 : index
    %44 = vector.load %arg11[%c0_31, %c0_32] : memref<32x32xbf16, #tpu.memory_space<vmem>>, vector<32x32xbf16>
    %cst_33 = arith.constant dense<0.000000e+00> : vector<2x32xf32>
    %45 = tpu.matmul %43, %44, %cst_33 {dimension_numbers = #tpu.dot_dimension_numbers<[1], [0], [0], [1], [0, 0, 1, 1], [], []>} : vector<2x32xbf16>, vector<32x32xbf16>, vector<2x32xf32> -> vector<2x32xf32>
    %46 = arith.addf %42, %45 : vector<2x32xf32>
    %c0_34 = arith.constant 0 : index
    %c0_35 = arith.constant 0 : index
    %47 = vector.load %arg12[%c0_34, %c0_35] : memref<1x32xf32, #tpu.memory_space<vmem>>, vector<1x32xf32>
    %48 = vector.broadcast %47 : vector<1x32xf32> to vector<2x32xf32>
    %49 = arith.addf %46, %48 : vector<2x32xf32>
    %cst_36 = arith.constant 0.000000e+00 : f32
    %50 = vector.broadcast %cst_36 : f32 to vector<2x32xf32>
    %51 = arith.cmpf ogt, %49, %50 : vector<2x32xf32>
    %cst_37 = arith.constant 2.000000e-01 : f32
    %52 = vector.broadcast %cst_37 : f32 to vector<2x32xf32>
    %53 = arith.mulf %52, %49 : vector<2x32xf32>
    %54 = arith.select %51, %49, %53 : vector<2x32xi1>, vector<2x32xf32>
    %55 = arith.truncf %54 : vector<2x32xf32> to vector<2x32xbf16>
    %c0_38 = arith.constant 0 : index
    %c0_39 = arith.constant 0 : index
    %56 = vector.load %arg13[%c0_38, %c0_39] : memref<32x32xbf16, #tpu.memory_space<vmem>>, vector<32x32xbf16>
    %cst_40 = arith.constant dense<0.000000e+00> : vector<2x32xf32>
    %57 = tpu.matmul %55, %56, %cst_40 {dimension_numbers = #tpu.dot_dimension_numbers<[1], [0], [0], [1], [0, 0, 1, 1], [], []>} : vector<2x32xbf16>, vector<32x32xbf16>, vector<2x32xf32> -> vector<2x32xf32>
    %c0_41 = arith.constant 0 : index
    %c0_42 = arith.constant 0 : index
    %58 = vector.load %arg14[%c0_41, %c0_42] : memref<1x32xf32, #tpu.memory_space<vmem>>, vector<1x32xf32>
    %59 = vector.broadcast %58 : vector<1x32xf32> to vector<2x32xf32>
    %60 = arith.addf %57, %59 : vector<2x32xf32>
    %cst_43 = arith.constant 0.000000e+00 : f32
    %61 = vector.broadcast %cst_43 : f32 to vector<2x32xf32>
    %62 = arith.cmpf ogt, %60, %61 : vector<2x32xf32>
    %cst_44 = arith.constant 2.000000e-01 : f32
    %63 = vector.broadcast %cst_44 : f32 to vector<2x32xf32>
    %64 = arith.mulf %63, %60 : vector<2x32xf32>
    %65 = arith.select %62, %60, %64 : vector<2x32xi1>, vector<2x32xf32>
    %66 = arith.truncf %65 : vector<2x32xf32> to vector<2x32xbf16>
    %c0_45 = arith.constant 0 : index
    %c0_46 = arith.constant 0 : index
    %67 = vector.load %arg15[%c0_45, %c0_46] : memref<32x1xbf16, #tpu.memory_space<vmem>>, vector<32x1xbf16>
    %cst_47 = arith.constant dense<0.000000e+00> : vector<2x1xf32>
    %68 = tpu.matmul %66, %67, %cst_47 {dimension_numbers = #tpu.dot_dimension_numbers<[1], [0], [0], [1], [0, 0, 1, 1], [], []>} : vector<2x32xbf16>, vector<32x1xbf16>, vector<2x1xf32> -> vector<2x1xf32>
    %c0_48 = arith.constant 0 : index
    %c0_49 = arith.constant 0 : index
    %69 = vector.load %arg16[%c0_48, %c0_49] : memref<1x1xf32, #tpu.memory_space<vmem>>, vector<1x1xf32>
    %70 = vector.broadcast %69 : vector<1x1xf32> to vector<2x1xf32>
    %71 = arith.addf %68, %70 : vector<2x1xf32>
    %c0_50 = arith.constant 0 : index
    %c0_51 = arith.constant 0 : index
    %72 = vector.load %arg17[%c0_50, %c0_51] : memref<2x1xf32, #tpu.memory_space<vmem>>, vector<2x1xf32>
    tpu.vector_store %arg17[%c0_50, %c0_51], %71 {strides = array<i32>} : memref<2x1xf32, #tpu.memory_space<vmem>>, vector<2x1xf32>,
    %cst_52 = arith.constant 5.000000e-01 : f32
    %73 = vector.broadcast %cst_52 : f32 to vector<2x1xf32>
    %74 = arith.mulf %73, %71 : vector<2x1xf32>
    %75 = math.tanh %74 : vector<2x1xf32>
    %cst_53 = arith.constant 1.000000e+00 : f32
    %76 = vector.broadcast %cst_53 : f32 to vector<2x1xf32>
    %77 = arith.addf %75, %76 : vector<2x1xf32>
    %cst_54 = arith.constant 5.000000e-01 : f32
    %78 = vector.broadcast %cst_54 : f32 to vector<2x1xf32>
    %79 = arith.mulf %78, %77 : vector<2x1xf32>
    %c0_55 = arith.constant 0 : index
    %c0_56 = arith.constant 0 : index
    %80 = vector.load %arg18[%c0_55, %c0_56] : memref<2x1xf32, #tpu.memory_space<vmem>>, vector<2x1xf32>
    tpu.vector_store %arg18[%c0_55, %c0_56], %79 {strides = array<i32>} : memref<2x1xf32, #tpu.memory_space<vmem>>, vector<2x1xf32>,
    return
  }
}

</mosaic_0001>

<bundles_post_ra>
// kernel: _forward_impl.4
= control target key start
LH: loop header
LB: loop body
LE: loop exit
PB: predicated region body
PF: predicated region fallthrough
CT: control target
= control target key end

     0   :  { %vm54_vm0 = vcmask 130048   ;;  %s448_s1 = inlined_call_operand.vmem [shape: bf16[16,16], index: 1, kind: input, shape index: {}]   ;;  %s449_s0 = inlined_call_operand.vmem [shape: f32[128,16], index: 0, kind: input, shape index: {}]   ;;  %s450_s2 = inlined_call_operand.vmem [shape: f32[1,16], index: 2, kind: input, shape index: {}]   ;;  %s451_s3 = inlined_call_operand.vmem [shape: f32[128,16], index: 3, kind: output, shape index: {}]  }
   0x1   :  { %v283_v0 = vld [vmem:[%s448_s1] sm:$0xff]   ;;  %v16_v2 = vld [vmem:[%s449_s0 + $0x8] sm:$0xff]  ;;  %v17_v6 = vld [vmem:[%s449_s0 + $0x10] sm:$0xff] }
   0x2   :  { %v15_v1 = vld [vmem:[%s449_s0] sm:$0xff]  ;;  %263 = vmatprep.subr.bf16.mxu0 %v283_v0  ;;  %281 = vmatprep.subr.bf16.mxu1 %v283_v0  ;;  %v24_v5 = vld [vmem:[%s449_s0 + $0x48] sm:$0xff]  ;;  %v18_v7 = vld [vmem:[%s449_s0 + $0x18] sm:$0xff] }
   0x3   :  { %v23_v3 = vld [vmem:[%s449_s0 + $0x40] sm:$0xff]  ;;  %v31_v4 = vpack.c.bf16 %v16_v2, %v15_v1  ;;  %264 = vmatpush3.bf16.msra.mxu0 %v283_v0  ;;  %282 = vmatpush3.bf16.msra.mxu1 %v283_v0  ;;  %v32_v9 = vpack.c.bf16 %v18_v7, %v17_v6  ;;  %v25_v10 = vld [vmem:[%s449_s0 + $0x50] sm:$0xff]  ;;  %v26_v11 = vld [vmem:[%s449_s0 + $0x58] sm:$0xff] }
   0x4   :  { %v35_v8 = vpack.c.bf16 %v24_v5, %v23_v3  ;;  %v19_v12 = vld [vmem:[%s449_s0 + $0x20] sm:$0xff]  ;;  %v36_v13 = vpack.c.bf16 %v26_v11, %v25_v10  ;;  %v20_v14 = vld [vmem:[%s449_s0 + $0x28] sm:$0xff]  ;;  %v21_v19 = vld [vmem:[%s449_s0 + $0x30] sm:$0xff] }
   0x5   :  { %265 = vmatprep.mubr.msk.bf16.mxu0 %vm54_vm0, %v31_v4  ;;  %v27_v15 = vld [vmem:[%s449_s0 + $0x60] sm:$0xff]  ;;  %v28_v16 = vld [vmem:[%s449_s0 + $0x68] sm:$0xff]  ;;  %v33_v17 = vpack.c.bf16 %v20_v14, %v19_v12  ;;  %v22_v20 = vld [vmem:[%s449_s0 + $0x38] sm:$0xff] }
   0x6   :  { %273 = vmatprep.mubr.msk.bf16.mxu1 %vm54_vm0, %v35_v8  ;;  %v37_v18 = vpack.c.bf16 %v28_v16, %v27_v15  ;;  %266 = vmatmul.mubr.msk.bf16.vlgmr.msra.gmra.mrb[0].mxu0 %vm54_vm0, %v32_v9  ;;  %v29_v21 = vld [vmem:[%s449_s0 + $0x70] sm:$0xff]  ;;  %v30_v22 = vld [vmem:[%s449_s0 + $0x78] sm:$0xff]  ;;  %v34_v23 = vpack.c.bf16 %v22_v20, %v21_v19  ;;  %v366_v25 = vld [vmem:[%s450_s2] ss:$0 sm:$0xff] }
   0x7   :  { %274 = vmatmul.mubr.msk.bf16.vlgmr.msra.gmra.mrb[0].mxu1 %vm54_vm0, %v36_v13  ;;  %269 = vmatprep.mubr.msk.bf16.mxu0 %vm54_vm0, %v33_v17  ;;  %v38_v24 = vpack.c.bf16 %v30_v22, %v29_v21 }
   0x8   :  { %277 = vmatprep.mubr.msk.bf16.mxu1 %vm54_vm0, %v37_v18 }
   0xe   :  { %270 = vmatmul.mubr.msk.bf16.gmra.mrb[4].mxu0 %vm54_vm0, %v34_v23 }
   0xf   :  { %278 = vmatmul.mubr.msk.bf16.gmra.mrb[4].mxu1 %vm54_vm0, %v38_v24 }
  0xd9   :  { %v267_v26 = vpop.f32.mrb[0].mxu0 }
  0xda   :  { %v275_v27 = vpop.f32.mrb[0].mxu1  ;;  %v122_v28 = vadd.f32 %v267_v26, %v366_v25  ;;  %v113_v30 = vpop.f32.mrb[1].mxu0 }
  0xdb   :  { %v154_v29 = vadd.f32 %v275_v27, %v366_v25  ;;  %v145_v31 = vpop.f32.mrb[1].mxu1  ;;  %v114_v32 = vadd.f32 %v366_v25, %v113_v30  ;;  %v268_v34 = vpop.f32.mrb[2].mxu0 }
  0xdc   :  { %v146_v33 = vadd.f32 %v366_v25, %v145_v31  ;;  %v276_v35 = vpop.f32.mrb[2].mxu1  ;;  %vm178_vm1 = vcmp.gt.f32.partialorder %v122_v28, 0.0  ;;  %v194_v36 = vmul.f32 0.2, %v122_v28  ;;  %v125_v42 = vadd.f32 %v268_v34, %v366_v25  ;;  %v116_v44 = vpop.f32.mrb[3].mxu0 }
  0xdd   :  { %vm186_vm2 = vcmp.gt.f32.partialorder %v154_v29, 0.0  ;;  %v202_v37 = vmul.f32 0.2, %v154_v29  ;;  %vm176_vm3 = vcmp.gt.f32.partialorder %v114_v32, 0.0  ;;  %v192_v38 = vmul.f32 0.2, %v114_v32 }
  0xde   :  { %vm184_vm4 = vcmp.gt.f32.partialorder %v146_v33, 0.0  ;;  %v200_v39 = vmul.f32 0.2, %v146_v33  ;;  %v210_v40 = vsel %vm178_vm1, %v122_v28, %v194_v36  ;;  %v157_v43 = vadd.f32 %v276_v35, %v366_v25  ;;  %v148_v45 = vpop.f32.mrb[3].mxu1 }
  0xdf   :  { %v218_v41 = vsel %vm186_vm2, %v154_v29, %v202_v37  ;;  %226 = vst.msk [vmem:[%s451_s3 + $0x10] sm:$0xff] %vm54_vm0, %v210_v40  ;;  %v208_v46 = vsel %vm176_vm3, %v114_v32, %v192_v38  ;;  %v117_v48 = vadd.f32 %v366_v25, %v116_v44  ;;  %v149_v49 = vadd.f32 %v366_v25, %v148_v45 }
  0xe0   :  { %234 = vst.msk [vmem:[%s451_s3 + $0x50] sm:$0xff] %vm54_vm0, %v218_v41  ;;  %v216_v47 = vsel %vm184_vm4, %v146_v33, %v200_v39  ;;  %224 = vst.msk [vmem:[%s451_s3] sm:$0xff] %vm54_vm0, %v208_v46  ;;  %vm179_vm5 = vcmp.gt.f32.partialorder %v125_v42, 0.0  ;;  %v195_v50 = vmul.f32 0.2, %v125_v42  ;;  %vm187_vm6 = vcmp.gt.f32.partialorder %v157_v43, 0.0 }
  0xe1   :  { %232 = vst.msk [vmem:[%s451_s3 + $0x40] sm:$0xff] %vm54_vm0, %v216_v47  ;;  %v203_v51 = vmul.f32 0.2, %v157_v43  ;;  %vm177_vm7 = vcmp.gt.f32.partialorder %v117_v48, 0.0  ;;  %v193_v52 = vmul.f32 0.2, %v117_v48 }
  0xe2   :  { %vm185_vm8 = vcmp.gt.f32.partialorder %v149_v49, 0.0  ;;  %v201_v53 = vmul.f32 0.2, %v149_v49  ;;  %v211_v54 = vsel %vm179_vm5, %v125_v42, %v195_v50  ;;  %v271_v56 = vpop.f32.mrb[4].mxu0  ;;  %v279_v57 = vpop.f32.mrb[4].mxu1 }
  0xe3   :  { %v219_v55 = vsel %vm187_vm6, %v157_v43, %v203_v51  ;;  %227 = vst.msk [vmem:[%s451_s3 + $0x18] sm:$0xff] %vm54_vm0, %v211_v54  ;;  %v209_v58 = vsel %vm177_vm7, %v117_v48, %v193_v52  ;;  %v138_v60 = vadd.f32 %v271_v56, %v366_v25  ;;  %v170_v61 = vadd.f32 %v279_v57, %v366_v25  ;;  %v129_v62 = vpop.f32.mrb[5].mxu0  ;;  %v161_v63 = vpop.f32.mrb[5].mxu1 }
  0xe4   :  { %235 = vst.msk [vmem:[%s451_s3 + $0x58] sm:$0xff] %vm54_vm0, %v219_v55  ;;  %v217_v59 = vsel %vm185_vm8, %v149_v49, %v201_v53  ;;  %225 = vst.msk [vmem:[%s451_s3 + $0x8] sm:$0xff] %vm54_vm0, %v209_v58  ;;  %v130_v0 = vadd.f32 %v366_v25, %v129_v62  ;;  %v162_v1 = vadd.f32 %v366_v25, %v161_v63  ;;  %v272_v2 = vpop.f32.mrb[6].mxu0  ;;  %v280_v3 = vpop.f32.mrb[6].mxu1 }
  0xe5   :  { %233 = vst.msk [vmem:[%s451_s3 + $0x48] sm:$0xff] %vm54_vm0, %v217_v59  ;;  %vm182_vm9 = vcmp.gt.f32.partialorder %v138_v60, 0.0  ;;  %v198_v4 = vmul.f32 0.2, %v138_v60  ;;  %vm190_vm10 = vcmp.gt.f32.partialorder %v170_v61, 0.0  ;;  %v141_v10 = vadd.f32 %v272_v2, %v366_v25  ;;  %v132_v12 = vpop.f32.mrb[7].mxu0 }
  0xe6   :  { %v206_v5 = vmul.f32 0.2, %v170_v61  ;;  %vm180_vm11 = vcmp.gt.f32.partialorder %v130_v0, 0.0  ;;  %v196_v6 = vmul.f32 0.2, %v130_v0  ;;  %vm188_vm12 = vcmp.gt.f32.partialorder %v162_v1, 0.0 }
  0xe7   :  { %v204_v7 = vmul.f32 0.2, %v162_v1  ;;  %v214_v8 = vsel %vm182_vm9, %v138_v60, %v198_v4  ;;  %v173_v11 = vadd.f32 %v280_v3, %v366_v25  ;;  %v164_v13 = vpop.f32.mrb[7].mxu1  ;;  %v133_v16 = vadd.f32 %v366_v25, %v132_v12 }
  0xe8   :  { %v222_v9 = vsel %vm190_vm10, %v170_v61, %v206_v5  ;;  %230 = vst.msk [vmem:[%s451_s3 + $0x30] sm:$0xff] %vm54_vm0, %v214_v8  ;;  %v212_v14 = vsel %vm180_vm11, %v130_v0, %v196_v6  ;;  %v165_v17 = vadd.f32 %v366_v25, %v164_v13  ;;  %vm183_vm13 = vcmp.gt.f32.partialorder %v141_v10, 0.0 }
  0xe9   :  { %238 = vst.msk [vmem:[%s451_s3 + $0x70] sm:$0xff] %vm54_vm0, %v222_v9  ;;  %v220_v15 = vsel %vm188_vm12, %v162_v1, %v204_v7  ;;  %228 = vst.msk [vmem:[%s451_s3 + $0x20] sm:$0xff] %vm54_vm0, %v212_v14  ;;  %v199_v18 = vmul.f32 0.2, %v141_v10  ;;  %vm191_vm14 = vcmp.gt.f32.partialorder %v173_v11, 0.0  ;;  %vm181_vm15 = vcmp.gt.f32.partialorder %v133_v16, 0.0 }
  0xea   :  { %236 = vst.msk [vmem:[%s451_s3 + $0x60] sm:$0xff] %vm54_vm0, %v220_v15  ;;  %v207_v19 = vmul.f32 0.2, %v173_v11  ;;  %v197_v20 = vmul.f32 0.2, %v133_v16  ;;  %vm189_vm1 = vcmp.gt.f32.partialorder %v165_v17, 0.0 }
  0xeb   :  { %v205_v21 = vmul.f32 0.2, %v165_v17  ;;  %v215_v22 = vsel %vm183_vm13, %v141_v10, %v199_v18 }
  0xec   :  { %v223_v23 = vsel %vm191_vm14, %v173_v11, %v207_v19  ;;  %231 = vst.msk [vmem:[%s451_s3 + $0x38] sm:$0xff] %vm54_vm0, %v215_v22  ;;  %v213_v24 = vsel %vm181_vm15, %v133_v16, %v197_v20 }
  0xed   :  { %239 = vst.msk [vmem:[%s451_s3 + $0x78] sm:$0xff] %vm54_vm0, %v223_v23  ;;  %v221_v25 = vsel %vm189_vm1, %v165_v17, %v205_v21  ;;  %229 = vst.msk [vmem:[%s451_s3 + $0x28] sm:$0xff] %vm54_vm0, %v213_v24 }
  0xee   :  { %237 = vst.msk [vmem:[%s451_s3 + $0x68] sm:$0xff] %vm54_vm0, %v221_v25 }

// kernel: _forward_impl.5
= control target key start
LH: loop header
LB: loop body
LE: loop exit
PB: predicated region body
PF: predicated region fallthrough
CT: control target
= control target key end

     0   :  { %vm75_vm0 = vcmask 1041408   ;;  %vm76_vm1 = vcmask 1042432   ;;  %v1587_v0 = vmov 0.0   ;;  %v1588_v2 = vmov 65535   ;;  %s1990_s3 = inlined_call_operand.vmem [shape: bf16[5,16], index: 3, kind: input, shape index: {}]   ;;  %s1991_s0 = inlined_call_operand.vmem [shape: f32[2,5], index: 0, kind: input, shape index: {}]   ;;  %s1992_s7 = inlined_call_operand.vmem [shape: bf16[1024,32], index: 7, kind: input, shape index: {}]   ;;  %s1993_s5 = inlined_call_operand.vmem [shape: bf16[16,16], index: 5, kind: input, shape index: {}]   ;;  %s1994_s2 = inlined_call_operand.vmem [shape: f32[2,1024], index: 2, kind: input, shape index: {}]   ;;  %s1995_s4 = inlined_call_operand.vmem [shape: f32[1,16], index: 4, kind: input, shape index: {}]   ;;  %s1996_s10 = inlined_call_operand.vmem [shape: bf16[32,32], index: 10, kind: input, shape index: {}]   ;;  %s1997_s9 = inlined_call_operand.vmem [shape: bf16[16,32], index: 9, kind: input, shape index: {}]   ;;  %s1998_s1 = inlined_call_operand.vmem [shape: f32[2,32], index: 1, kind: input, shape index: {}]   ;;  %s1999_s11 = inlined_call_operand.vmem [shape: bf16[32,32], index: 11, kind: input, shape index: {}]   ;;  %s2000_s6 = inlined_call_operand.vmem [shape: f32[1,16], index: 6, kind: input, shape index: {}]   ;;  %s2001_s8 = inlined_call_operand.vmem [shape: f32[1,32], index: 8, kind: input, shape index: {}]   ;;  %s2002_s13 = inlined_call_operand.vmem [shape: bf16[32,32], index: 13, kind: input, shape index: {}]   ;;  %s2003_s12 = inlined_call_operand.vmem [shape: f32[1,32], index: 12, kind: input, shape index: {}]   ;;  %s2004_s15 = inlined_call_operand.vmem [shape: bf16[32,1], index: 15, kind: input, shape index: {}]   ;;  %s2005_s16 = inlined_call_operand.<no memory space> [shape: f32[1,1], index: 16, kind: input, shape index: {}]   ;;  %s2006_s14 = inlined_call_operand.vmem [shape: f32[1,32], index: 14, kind: input, shape index: {}]   ;;  %s2007_s17 = inlined_call_operand.vmem [shape: f32[2,1], index: 17, kind: output, shape index: {0}]   ;;  %s2008_s18 = inlined_call_operand.vmem [shape: f32[2,1], index: 18, kind: output, shape index: {1}]  }
   0x1   :  { %2010 = sst [smem:[#allocation3_spill]] %s1990_s3  ;;  %1455 = vmatprep.subr.bf16.mxu0 %v1587_v0  ;;  %v77_v3 = vsel %vm75_vm0, 4294967295, %v1588_v2  ;;  %1461 = vmatprep.subr.bf16.mxu1 %v1587_v0  ;;  %vm1589_vm2 = vmmov 0   ;;  %vm71_vm3 = vcmask 39936   ;;  %v1590_v20 = vmov 1983009808  }
   0x2   :  { %2011 = sst [smem:[#allocation4_spill]] %s1991_s0  ;;  %s2013_s29 = sld [smem:[#allocation3_spill]]  ;;  %v78_v5 = vsel %vm76_vm1, %v77_v3, 0  ;;  %1457 = vmatprep.mubr.msk.bf16.mxu0 %vm1589_vm2, %v1587_v0  ;;  %1463 = vmatprep.mubr.msk.bf16.mxu1 %vm1589_vm2, %v1587_v0  ;;  %v194_v21 = vunpack.c.l.s4 %v1590_v20  ;;  %v196_v22 = vlaneseq  ;;  %v1523_v27 = vld [vmem:[%s1993_s5] sm:$0xff]   ;;  %v189_v53 = vld [vmem:[%s1994_s2 + $0x8] sm:$0xff]  ;;  %vm141_vm5 = vcmask 130048  }
   0x3   :  { %2012 = sst [smem:[#allocation5_spill]] %s1992_s7  ;;  %s2014_s19 = sld [smem:[#allocation4_spill]]  ;;  %v188_v30 = vld [vmem:[%s1994_s2] sm:$0xff]  ;;  %1462 = vmatpush3.bf16.msra.mxu1 %v1523_v27  ;;  %v209_v60 = vcombine.high %v189_v53, %v189_v53  ;;  %vm945_vm6 = vcmask 261120   ;;  %vm1247_vm11 = vcmask 1024  }
   0x4   :  { %s2015_s21 = sld [smem:[#allocation5_spill]]  ;;  %v195_v25 = vunpack.c.0.s8 %v194_v21  ;;  %v197_v26 = vshrl.u32 %v196_v22, 7  ;;  %v192_v49 = vcombine.high %v188_v30, %v188_v30  ;;  %v1262_v62 = vld [vmem:[%s1995_s4] ss:$0 sm:$0xff] }
   0x6   :  { %v198_v28 = vsub.s32 %v195_v25, %v197_v26 }
   0x8   :  { %v63_v1 = vld [vmem:[%s2013_s29] sm:$0x7]  ;;  %v199_v32 = vrot.slane %v188_v30, %v198_v28  ;;  %v1797_v52 = vrot.slane %v192_v49, %v198_v28  ;;  %v216_v54 = vrot.slane %v189_v53, %v198_v28  ;;  %v1811_v61 = vrot.slane %v209_v60, %v198_v28 }
   0x9   :  { %v61_v4 = vld [vmem:[%s2014_s19] sm:$0x3]  ;;  %v80_v6 = vand.u32 %v78_v5, %v63_v1 }
   0xa   :  { %v1509_v7 = vld [vmem:[%s2015_s21 + $0x40] sm:$0xff]   ;;  %v62_v8 = vpack.c.bf16 %v61_v4, %v61_v4  ;;  %v1511_v10 = vld [vmem:[%s2015_s21 + $0x48] sm:$0xff]   ;;  %v1513_v12 = vld [vmem:[%s2015_s21 + $0x50] sm:$0xff]   ;;  %v207_v34 = vcombine.high %v199_v32, %v199_v32  ;;  %v234_v37 = vpack.c.bf16 %v199_v32, %v199_v32  ;;  %v224_v57 = vcombine.high %v216_v54, %v216_v54 }
   0xb   :  { %1456 = vmatpush3.bf16.msra.mxu0 %v80_v6  ;;  %v1510_v9 = vld [vmem:[%s2015_s21] sm:$0xff]   ;;  %v1512_v11 = vld [vmem:[%s2015_s21 + $0x8] sm:$0xff]   ;;  %v1514_v13 = vld [vmem:[%s2015_s21 + $0x10] sm:$0xff]   ;;  %v238_v59 = vpack.c.bf16 %v216_v54, %v216_v54  ;;  %v208_v3 = vcombine.high %v1797_v52, %v1797_v52  ;;  %v225_v25 = vcombine.high %v1811_v61, %v1811_v61  ;;  %v236_v27 = vpack.c.bf16 %v1797_v52, %v1797_v52 }
   0xc   :  { %1353 = vmatprep.subr.bf16.mxu0 %v1509_v7  ;;  %v1515_v14 = vld [vmem:[%s2015_s21 + $0x58] sm:$0xff]   ;;  %v1517_v16 = vld [vmem:[%s2015_s21 + $0x60] sm:$0xff]   ;;  %v1519_v18 = vld [vmem:[%s2015_s21 + $0x68] sm:$0xff]   ;;  %v235_v35 = vpack.c.bf16 %v207_v34, %v207_v34  ;;  %v239_v58 = vpack.c.bf16 %v224_v57, %v224_v57 }
   0xd   :  { %v1516_v15 = vld [vmem:[%s2015_s21 + $0x18] sm:$0xff]   ;;  %v1518_v17 = vld [vmem:[%s2015_s21 + $0x20] sm:$0xff]   ;;  %v1520_v19 = vld [vmem:[%s2015_s21 + $0x28] sm:$0xff]  }
   0xe   :  { %1458 = vmatmul.mubr.msk.bf16.vlgmr.msra.gmra.mrb[0].mxu0 %vm71_vm3, %v62_v8  ;;  %v1521_v23 = vld [vmem:[%s2015_s21 + $0x70] sm:$0xff]   ;;  %v1524_v29 = vld [vmem:[%s2015_s21 + $0x78] sm:$0xff]   ;;  %v1526_v33 = vld [vmem:[%s2015_s21 + $0xc0] sm:$0xff]  }
   0xf   :  { %1354 = vmatpush3.bf16.msra.mxu0 %v1510_v9  ;;  %v1522_v24 = vld [vmem:[%s2015_s21 + $0x30] sm:$0xff]   ;;  %v1525_v31 = vld [vmem:[%s2015_s21 + $0x38] sm:$0xff]   ;;  %1375 = vmatprep.subr.bf16.mxu1 %v1526_v33  ;;  %v1528_v36 = vld [vmem:[%s2015_s21 + $0x140] sm:$0xff]   ;;  %v237_v9 = vpack.c.bf16 %v208_v3, %v208_v3 }
  0x10   :  { %1355 = vmatprep.subr.bf16.mxu0 %v1511_v10  ;;  %v1529_v38 = vld [vmem:[%s2015_s21 + $0x100] sm:$0xff]   ;;  %793 = vmatprep.mubr.bf16.mxu0 %v235_v35  ;;  %v1532_v39 = vld [vmem:[%s2015_s21 + $0x148] sm:$0xff]   ;;  %v1536_v41 = vld [vmem:[%s2015_s21 + $0x150] sm:$0xff]  }
  0x11   :  { %v1533_v40 = vld [vmem:[%s2015_s21 + $0x108] sm:$0xff]   ;;  %v1537_v42 = vld [vmem:[%s2015_s21 + $0x110] sm:$0xff]   ;;  %v1540_v43 = vld [vmem:[%s2015_s21 + $0x158] sm:$0xff]  }
  0x12   :  { %v1541_v44 = vld [vmem:[%s2015_s21 + $0x118] sm:$0xff]   ;;  %v1544_v45 = vld [vmem:[%s2015_s21 + $0x160] sm:$0xff]   ;;  %v1548_v47 = vld [vmem:[%s2015_s21 + $0x168] sm:$0xff]  }
  0x13   :  { %1356 = vmatpush3.bf16.msra.mxu0 %v1512_v11  ;;  %v1545_v46 = vld [vmem:[%s2015_s21 + $0x120] sm:$0xff]   ;;  %v1549_v48 = vld [vmem:[%s2015_s21 + $0x128] sm:$0xff]   ;;  %v1552_v50 = vld [vmem:[%s2015_s21 + $0x170] sm:$0xff]  }
  0x14   :  { %1357 = vmatprep.subr.bf16.mxu0 %v1513_v12  ;;  %v1553_v51 = vld [vmem:[%s2015_s21 + $0x130] sm:$0xff]   ;;  %v1556_v55 = vld [vmem:[%s2015_s21 + $0x178] sm:$0xff]   ;;  %v1527_v8 = vld [vmem:[%s2015_s21 + $0x80] sm:$0xff]  }
  0x15   :  { %v1558_v56 = vld [vmem:[%s2015_s21 + $0x138] sm:$0xff]   ;;  %v1530_v11 = vld [vmem:[%s2015_s21 + $0xc8] sm:$0xff]   ;;  %v1550_v21 = vld [vmem:[%s2015_s21 + $0xf0] sm:$0xff]  }
  0x16   :  { %v1531_v12 = vld [vmem:[%s2015_s21 + $0x88] sm:$0xff]   ;;  %v1551_v22 = vld [vmem:[%s2015_s21 + $0xb0] sm:$0xff]   ;;  %v1559_v26 = vld [vmem:[%s2015_s21 + $0x1c0] sm:$0xff]  }
  0x17   :  { %1358 = vmatpush3.bf16.msra.mxu0 %v1514_v13  ;;  %v1534_v13 = vld [vmem:[%s2015_s21 + $0xd0] sm:$0xff]   ;;  %v1547_v20 = vld [vmem:[%s2015_s21 + $0xa8] sm:$0xff]   ;;  %v1560_v28 = vld [vmem:[%s2015_s21 + $0x180] sm:$0xff]  }
  0x18   :  { %1359 = vmatprep.subr.bf16.mxu0 %v1515_v14  ;;  %v1535_v14 = vld [vmem:[%s2015_s21 + $0x90] sm:$0xff]   ;;  %v1561_v30 = vld [vmem:[%s2015_s21 + $0x1c8] sm:$0xff]   ;;  %v1565_v34 = vld [vmem:[%s2015_s21 + $0x1d8] sm:$0xff]  }
  0x19   :  { %v1563_v32 = vld [vmem:[%s2015_s21 + $0x1d0] sm:$0xff]   ;;  %v1566_v35 = vld [vmem:[%s2015_s21 + $0x198] sm:$0xff]   ;;  %v1579_v60 = vld [vmem:[%s1999_s11] sm:$0xff]  }
  0x1a   :  { %v1564_v33 = vld [vmem:[%s2015_s21 + $0x190] sm:$0xff]  }
  0x1b   :  { %1360 = vmatpush3.bf16.msra.mxu0 %v1516_v15  ;;  %v1538_v15 = vld [vmem:[%s2015_s21 + $0xd8] sm:$0xff]  }
  0x1c   :  { %1361 = vmatprep.subr.bf16.mxu0 %v1517_v16  ;;  %v1539_v16 = vld [vmem:[%s2015_s21 + $0x98] sm:$0xff]  }
  0x1f   :  { %1362 = vmatpush3.bf16.msra.mxu0 %v1518_v17  ;;  %v1542_v17 = vld [vmem:[%s2015_s21 + $0xe0] sm:$0xff]  }
  0x20   :  { %1363 = vmatprep.subr.bf16.mxu0 %v1519_v18  ;;  %v1543_v18 = vld [vmem:[%s2015_s21 + $0xa0] sm:$0xff]  }
  0x23   :  { %1364 = vmatpush3.bf16.msra.mxu0 %v1520_v19  ;;  %v1546_v19 = vld [vmem:[%s2015_s21 + $0xe8] sm:$0xff]  }
  0x24   :  { %1365 = vmatprep.subr.bf16.mxu0 %v1521_v23  ;;  %v1554_v23 = vld [vmem:[%s2015_s21 + $0xf8] sm:$0xff]  }
  0x27   :  { %1366 = vmatpush3.bf16.msra.mxu0 %v1522_v24  ;;  %v1555_v24 = vld [vmem:[%s2015_s21 + $0xb8] sm:$0xff]  }
  0x28   :  { %1367 = vmatprep.subr.bf16.mxu0 %v1524_v29  ;;  %v241_v29 = vpack.c.bf16 %v225_v25, %v225_v25 }
  0x2b   :  { %1368 = vmatpush3.bf16.msra.mxu0 %v1525_v31  ;;  %v1562_v31 = vld [vmem:[%s2015_s21 + $0x188] sm:$0xff]  }
  0x2c   :  { %1397 = vmatprep.subr.bf16.mxu0 %v1528_v36  ;;  %v1567_v36 = vld [vmem:[%s2015_s21 + $0x1e0] sm:$0xff]  }
  0x2e   :  { %794 = vmatmul.mubr.bf16.vlgmr.msra.gmra.mrb[4].mxu0 %v234_v37  ;;  %v1568_v37 = vld [vmem:[%s2015_s21 + $0x1a0] sm:$0xff]  }
  0x2f   :  { %1398 = vmatpush3.bf16.msra.mxu0 %v1529_v38  ;;  %873 = vmatprep.mubr.bf16.mxu0 %v239_v58  ;;  %v1569_v38 = vld [vmem:[%s2015_s21 + $0x1e8] sm:$0xff]  }
  0x30   :  { %1399 = vmatprep.subr.bf16.mxu0 %v1532_v39  ;;  %v1570_v39 = vld [vmem:[%s2015_s21 + $0x1a8] sm:$0xff]  }
  0x33   :  { %1400 = vmatpush3.bf16.msra.mxu0 %v1533_v40  ;;  %v1571_v40 = vld [vmem:[%s2015_s21 + $0x1f0] sm:$0xff]  }
  0x34   :  { %1401 = vmatprep.subr.bf16.mxu0 %v1536_v41  ;;  %v1572_v41 = vld [vmem:[%s2015_s21 + $0x1b0] sm:$0xff]  }
  0x37   :  { %1402 = vmatpush3.bf16.msra.mxu0 %v1537_v42  ;;  %v1573_v42 = vld [vmem:[%s2015_s21 + $0x1f8] sm:$0xff]  }
  0x38   :  { %1403 = vmatprep.subr.bf16.mxu0 %v1540_v43  ;;  %v1574_v43 = vld [vmem:[%s2015_s21 + $0x1b8] sm:$0xff]  }
  0x3b   :  { %1404 = vmatpush3.bf16.msra.mxu0 %v1541_v44  ;;  %v240_v44 = vpack.c.bf16 %v1811_v61, %v1811_v61  ;;  %v1580_v61 = vld [vmem:[%s1999_s11 + $0x8] sm:$0xff]  }
  0x3c   :  { %1405 = vmatprep.subr.bf16.mxu0 %v1544_v45  ;;  %v1576_v45 = vld [vmem:[%s1996_s10] sm:$0xff]  }
  0x3f   :  { %1406 = vmatpush3.bf16.msra.mxu0 %v1545_v46  ;;  %v1577_v46 = vld [vmem:[%s1996_s10 + $0x8] sm:$0xff]  }
  0x40   :  { %1407 = vmatprep.subr.bf16.mxu0 %v1548_v47  ;;  %v1578_v47 = vld [vmem:[%s1997_s9] sm:$0xff]  }
  0x43   :  { %1408 = vmatpush3.bf16.msra.mxu0 %v1549_v48  ;;  %v927_v48 = vld [vmem:[%s1998_s1] sm:$0x3] }
  0x44   :  { %1409 = vmatprep.subr.bf16.mxu0 %v1552_v50  ;;  %v928_v49 = vpack.c.bf16 %v927_v48, %v927_v48  ;;  %v1584_v48 = vld [vmem:[%s2004_s15 + $0x8] sm:$0xff]  }
  0x47   :  { %1410 = vmatpush3.bf16.msra.mxu0 %v1553_v51 }
  0x48   :  { %1411 = vmatprep.subr.bf16.mxu0 %v1556_v55 }
  0x4b   :  { %1412 = vmatpush3.bf16.msra.mxu0 %v1558_v56 }
  0x4c   :  { %1467 = vmatprep.subr.bf16.mxu0 %v1587_v0 }
  0x4e   :  { %874 = vmatmul.mubr.bf16.vlgmr.msra.gmra.mrb[8].mxu0 %v238_v59 }
  0x4f   :  { %1471 = vmatprep.mubr.msk.bf16.mxu0 %vm1589_vm2, %v1587_v0  ;;  %1468 = vmatpush3.bf16.msra.mxu0 %v1576_v45 }
  0x50   :  { %1469 = vmatprep.subr.bf16.mxu0 %v1587_v0 }
  0x53   :  { %1470 = vmatpush3.bf16.msra.mxu0 %v1577_v46 }
  0x54   :  { %1481 = vmatprep.subr.bf16.mxu0 %v1587_v0 }
  0x56   :  { %1472 = vmatmul.mubr.msk.bf16.vlgmr.msra.gmra.mrb[12].mxu0 %vm945_vm6, %v928_v49  ;;  %v24_v49 = vstv %s2005_s16 }
  0x57   :  { %1485 = vmatprep.mubr.msk.bf16.mxu0 %vm1589_vm2, %v1587_v0  ;;  %1482 = vmatpush3.bf16.msra.mxu0 %v1579_v60  ;;  %25 = vst [vmem:[#allocation2] sm:$0x1] %v24_v49 }
  0x58   :  { %1483 = vmatprep.subr.bf16.mxu0 %v1587_v0 }
  0x5b   :  { %1484 = vmatpush3.bf16.msra.mxu0 %v1580_v61 }
  0x5c   :  { %1497 = vmatprep.subr.bf16.mxu0 %v1587_v0 }
  0xe1   :  { %v116_v63 = vpop.f32.mrb[0].mxu0 }
  0xe2   :  { %v117_v1 = vadd.f32 %v1262_v62, %v116_v63  ;;  %v1459_v2 = vpop.f32.mrb[1].mxu0  ;;  %v1264_v62 = vld [vmem:[%s2000_s6] ss:$0 sm:$0xff] }
  0xe3   :  { %v119_v4 = vpop.f32.mrb[2].mxu0 }
  0xe4   :  { %vm122_vm4 = vcmp.gt.f32.partialorder %v117_v1, 0.0  ;;  %v123_v5 = vmul.f32 0.2, %v117_v1  ;;  %v1460_v6 = vpop.f32.mrb[3].mxu0 }
  0xe6   :  { %v124_v7 = vsel %vm122_vm4, %v117_v1, %v123_v5 }
  0xe7   :  { %v125_v10 = vpack.c.bf16 %v124_v7, %v124_v7 }
  0xe9   :  { %1464 = vmatmul.mubr.msk.bf16.vlgmr.msra.gmra.mrb[0].mxu1 %vm141_vm5, %v125_v10 }
  0xea   :  { %1376 = vmatpush3.bf16.msra.mxu1 %v1527_v8  ;;  %833 = vmatprep.mubr.bf16.mxu1 %v237_v9  ;;  %v1267_v8 = vld [vmem:[%s2001_s8] ss:$0 sm:$0xff] }
  0xeb   :  { %1377 = vmatprep.subr.bf16.mxu1 %v1530_v11 }
  0xee   :  { %1378 = vmatpush3.bf16.msra.mxu1 %v1531_v12 }
  0xef   :  { %1379 = vmatprep.subr.bf16.mxu1 %v1534_v13 }
  0xf2   :  { %1380 = vmatpush3.bf16.msra.mxu1 %v1535_v14 }
  0xf3   :  { %1381 = vmatprep.subr.bf16.mxu1 %v1538_v15 }
  0xf6   :  { %1382 = vmatpush3.bf16.msra.mxu1 %v1539_v16 }
  0xf7   :  { %1383 = vmatprep.subr.bf16.mxu1 %v1542_v17 }
  0xfa   :  { %1384 = vmatpush3.bf16.msra.mxu1 %v1543_v18 }
  0xfb   :  { %1385 = vmatprep.subr.bf16.mxu1 %v1546_v19 }
  0xfe   :  { %1386 = vmatpush3.bf16.msra.mxu1 %v1547_v20 }
  0xff   :  { %1387 = vmatprep.subr.bf16.mxu1 %v1550_v21 }
 0x101   :  { %v1369_v50 = vpop.f32.mrb[4].mxu0 }
 0x102   :  { %1388 = vmatpush3.bf16.msra.mxu1 %v1551_v22  ;;  %v1370_v51 = vpop.f32.mrb[5].mxu0 }
 0x103   :  { %1389 = vmatprep.subr.bf16.mxu1 %v1554_v23  ;;  %v1371_v52 = vadd.f32 %v1370_v51, %v1369_v50  ;;  %v1372_v53 = vpop.f32.mrb[6].mxu0  ;;  %v1341_v50 = vld [vmem:[%s2006_s14] ss:$0 sm:$0xff] }
 0x104   :  { %v1373_v54 = vpop.f32.mrb[7].mxu0 }
 0x105   :  { %v796_v9 = vadd.f32 %v1371_v52, %v1267_v8 }
 0x106   :  { %1390 = vmatpush3.bf16.msra.mxu1 %v1555_v24 }
 0x107   :  { %1419 = vmatprep.subr.bf16.mxu1 %v1559_v26 }
 0x109   :  { %834 = vmatmul.mubr.bf16.vlgmr.msra.gmra.mrb[4].mxu1 %v236_v27 }
 0x10a   :  { %1420 = vmatpush3.bf16.msra.mxu1 %v1560_v28  ;;  %913 = vmatprep.mubr.bf16.mxu1 %v241_v29 }
 0x10b   :  { %1421 = vmatprep.subr.bf16.mxu1 %v1561_v30  ;;  %v1581_v30 = vld [vmem:[%s2002_s13] sm:$0xff]  }
 0x10e   :  { %1422 = vmatpush3.bf16.msra.mxu1 %v1562_v31  ;;  %v1582_v31 = vld [vmem:[%s2002_s13 + $0x8] sm:$0xff]  }
 0x10f   :  { %1423 = vmatprep.subr.bf16.mxu1 %v1563_v32 }
 0x112   :  { %1424 = vmatpush3.bf16.msra.mxu1 %v1564_v33 }
 0x113   :  { %1425 = vmatprep.subr.bf16.mxu1 %v1565_v34 }
 0x116   :  { %1426 = vmatpush3.bf16.msra.mxu1 %v1566_v35 }
 0x117   :  { %1427 = vmatprep.subr.bf16.mxu1 %v1567_v36 }
 0x11a   :  { %1428 = vmatpush3.bf16.msra.mxu1 %v1568_v37 }
 0x11b   :  { %1429 = vmatprep.subr.bf16.mxu1 %v1569_v38  ;;  %v1340_v38 = vld [vmem:[%s2003_s12] ss:$0 sm:$0xff] }
 0x11e   :  { %1430 = vmatpush3.bf16.msra.mxu1 %v1570_v39 }
 0x11f   :  { %1431 = vmatprep.subr.bf16.mxu1 %v1571_v40 }
 0x121   :  { %v1413_v55 = vpop.f32.mrb[8].mxu0 }
 0x122   :  { %1432 = vmatpush3.bf16.msra.mxu1 %v1572_v41  ;;  %v1414_v56 = vpop.f32.mrb[9].mxu0 }
 0x123   :  { %1433 = vmatprep.subr.bf16.mxu1 %v1573_v42  ;;  %v1415_v57 = vadd.f32 %v1414_v56, %v1413_v55  ;;  %v1416_v58 = vpop.f32.mrb[10].mxu0 }
 0x124   :  { %v1417_v59 = vpop.f32.mrb[11].mxu0  ;;  %v1345_v58 = vld [vmem:[#allocation2] ss:$0 sm:$0xff] }
 0x126   :  { %1434 = vmatpush3.bf16.msra.mxu1 %v1574_v43 }
 0x127   :  { %1475 = vmatprep.subr.bf16.mxu1 %v1587_v0 }
 0x129   :  { %914 = vmatmul.mubr.bf16.vlgmr.msra.gmra.mrb[8].mxu1 %v240_v44  ;;  %v983_v26 = vpop.f32.mrb[12].mxu0 }
 0x12a   :  { %1477 = vmatprep.mubr.msk.bf16.mxu1 %vm1589_vm2, %v1587_v0  ;;  %1476 = vmatpush3.bf16.msra.mxu1 %v1578_v47  ;;  %v1473_v27 = vpop.f32.mrb[13].mxu0  ;;  %v1583_v47 = vld [vmem:[%s2004_s15] sm:$0xff]  }
 0x12b   :  { %1489 = vmatprep.subr.bf16.mxu1 %v1587_v0  ;;  %v986_v28 = vpop.f32.mrb[14].mxu0 }
 0x12c   :  { %v1474_v29 = vpop.f32.mrb[15].mxu0 }
 0x1bc   :  { %v179_v63 = vpop.f32.mrb[0].mxu1 }
 0x1bd   :  { %v180_v1 = vadd.f32 %v1264_v62, %v179_v63  ;;  %v1465_v2 = vpop.f32.mrb[1].mxu1 }
 0x1be   :  { %v182_v3 = vpop.f32.mrb[2].mxu1 }
 0x1bf   :  { %vm185_vm7 = vcmp.gt.f32.partialorder %v180_v1, 0.0  ;;  %v186_v4 = vmul.f32 0.2, %v180_v1  ;;  %v1466_v5 = vpop.f32.mrb[3].mxu1 }
 0x1c1   :  { %v187_v6 = vsel %vm185_vm7, %v180_v1, %v186_v4 }
 0x1c2   :  { %v924_v7 = vpack.c.bf16 %v187_v6, %v187_v6 }
 0x1c4   :  { %1478 = vmatmul.mubr.msk.bf16.vlgmr.msra.gmra.mrb[12].mxu1 %vm141_vm5, %v924_v7 }
 0x1c5   :  { %1493 = vmatprep.mubr.msk.bf16.mxu1 %vm1589_vm2, %v1587_v0  ;;  %1490 = vmatpush3.bf16.msra.mxu1 %v1581_v30 }
 0x1c6   :  { %1491 = vmatprep.subr.bf16.mxu1 %v1587_v0 }
 0x1c9   :  { %1492 = vmatpush3.bf16.msra.mxu1 %v1582_v31 }
 0x1dc   :  { %v1391_v10 = vpop.f32.mrb[4].mxu1 }
 0x1dd   :  { %v1392_v11 = vpop.f32.mrb[5].mxu1 }
 0x1de   :  { %v1393_v12 = vadd.f32 %v1392_v11, %v1391_v10  ;;  %v1394_v13 = vpop.f32.mrb[6].mxu1 }
 0x1df   :  { %v1395_v14 = vpop.f32.mrb[7].mxu1 }
 0x1e0   :  { %v836_v15 = vadd.f32 %v1393_v12, %v796_v9 }
 0x1e2   :  { %v876_v16 = vadd.f32 %v1415_v57, %v836_v15 }
 0x1fc   :  { %v1435_v17 = vpop.f32.mrb[8].mxu1 }
 0x1fd   :  { %v1436_v18 = vpop.f32.mrb[9].mxu1 }
 0x1fe   :  { %v1437_v19 = vadd.f32 %v1436_v18, %v1435_v17  ;;  %v1438_v20 = vpop.f32.mrb[10].mxu1 }
 0x1ff   :  { %v1439_v21 = vpop.f32.mrb[11].mxu1 }
 0x200   :  { %v916_v22 = vadd.f32 %v1437_v19, %v876_v16 }
 0x202   :  { %vm921_vm8 = vcmp.gt.f32.partialorder %v916_v22, 0.0  ;;  %v922_v23 = vmul.f32 0.2, %v916_v22 }
 0x204   :  { %v923_v24 = vsel %vm921_vm8, %v916_v22, %v922_v23 }
 0x205   :  { %v1038_v25 = vpack.c.bf16 %v923_v24, %v923_v24 }
 0x207   :  { %1486 = vmatmul.mubr.msk.bf16.vlgmr.msra.gmra.mrb[16].mxu0 %vm945_vm6, %v1038_v25 }
 0x208   :  { %1501 = vmatprep.mubr.msk.bf16.mxu0 %vm1589_vm2, %v1587_v0  ;;  %1498 = vmatpush3.bf16.msra.mxu0 %v1583_v47 }
 0x209   :  { %1499 = vmatprep.subr.bf16.mxu0 %v1587_v0 }
 0x20c   :  { %1500 = vmatpush3.bf16.msra.mxu0 %v1584_v48 }
 0x297   :  { %v1032_v32 = vpop.f32.mrb[12].mxu1 }
 0x298   :  { %v1033_v33 = vadd.f32 %v1032_v32, %v983_v26  ;;  %v1479_v34 = vpop.f32.mrb[13].mxu1 }
 0x299   :  { %v1035_v35 = vpop.f32.mrb[14].mxu1 }
 0x29a   :  { %v1480_v36 = vpop.f32.mrb[15].mxu1 }
 0x2da   :  { %v1092_v37 = vpop.f32.mrb[16].mxu0 }
 0x2db   :  { %v1098_v39 = vadd.f32 %v1092_v37, %v1033_v33  ;;  %v1487_v40 = vpop.f32.mrb[17].mxu0 }
 0x2dc   :  { %v1095_v41 = vpop.f32.mrb[18].mxu0 }
 0x2dd   :  { %v1106_v42 = vadd.f32 %v1340_v38, %v1098_v39  ;;  %v1488_v43 = vpop.f32.mrb[19].mxu0 }
 0x2df   :  { %vm1107_vm9 = vcmp.gt.f32.partialorder %v1106_v42, 0.0  ;;  %v1108_v44 = vmul.f32 0.2, %v1106_v42 }
 0x2e1   :  { %v1109_v45 = vsel %vm1107_vm9, %v1106_v42, %v1108_v44 }
 0x2e2   :  { %v1110_v46 = vpack.c.bf16 %v1109_v45, %v1109_v45 }
 0x2e4   :  { %1494 = vmatmul.mubr.msk.bf16.vlgmr.msra.gmra.mrb[16].mxu1 %vm945_vm6, %v1110_v46 }
 0x3b7   :  { %v1171_v51 = vpop.f32.mrb[16].mxu1 }
 0x3b8   :  { %v1172_v52 = vadd.f32 %v1341_v50, %v1171_v51  ;;  %v1495_v53 = vpop.f32.mrb[17].mxu1 }
 0x3b9   :  { %v1174_v54 = vpop.f32.mrb[18].mxu1 }
 0x3ba   :  { %vm1177_vm10 = vcmp.gt.f32.partialorder %v1172_v52, 0.0  ;;  %v1178_v0 = vmul.f32 0.2, %v1172_v52  ;;  %v1496_v55 = vpop.f32.mrb[19].mxu1 }
 0x3bc   :  { %v1179_v56 = vsel %vm1177_vm10, %v1172_v52, %v1178_v0 }
 0x3bd   :  { %v1180_v57 = vpack.c.bf16 %v1179_v56, %v1179_v56 }
 0x3bf   :  { %1502 = vmatmul.mubr.msk.bf16.vlgmr.msra.gmra.mrb[20].mxu0 %vm945_vm6, %v1180_v57 }
 0x492   :  { %v1241_v59 = vpop.f32.mrb[20].mxu0 }
 0x493   :  { %v1242_v60 = vadd.f32 %v1345_v58, %v1241_v59  ;;  %v1503_v61 = vpop.f32.mrb[21].mxu0 }
 0x494   :  { %v1244_v62 = vpop.f32.mrb[22].mxu0 }
 0x495   :  { %1248 = vst.msk [vmem:[%s2007_s17] sm:$0x3] %vm1247_vm11, %v1242_v60  ;;  %v1249_v63 = vmul.f32 0.5, %v1242_v60  ;;  %v1504_v1 = vpop.f32.mrb[23].mxu0 }
 0x497   :  { %1585 = vtanh.f32 %v1249_v63 }
 0x4a1   :  { %v1586_v2 = vpop.eup %1585 }
 0x4a2   :  { %v1251_v3 = vadd.f32 1.0, %v1586_v2 }
 0x4a4   :  { %v1252_v4 = vmul.f32 0.5, %v1251_v3 }
 0x4a6   :  { %1253 = vst.msk [vmem:[%s2008_s18] sm:$0x3] %vm1247_vm11, %v1252_v4 }

// kernel: _forward_impl.3
= control target key start
LH: loop header
LB: loop body
LE: loop exit
PB: predicated region body
PF: predicated region fallthrough
CT: control target
= control target key end

     0   :  { %vm150_vm0 = vcmask 1041408   ;;  %vm151_vm1 = vcmask 1042432   ;;  %v12481_v1 = vmov 65535   ;;  %vm101_vm2 = vcmask 39936   ;;  %s17050_s1 = inlined_call_operand.vmem [shape: bf16[5,16], index: 1, kind: input, shape index: {}]   ;;  %s17051_s0 = inlined_call_operand.vmem [shape: f32[256,5], index: 0, kind: input, shape index: {}]   ;;  %s17052_s3 = inlined_call_operand.vmem [shape: bf16[5,16,32], index: 3, kind: input, shape index: {}]   ;;  %s17053_s2 = inlined_call_operand.vmem [shape: f32[1,16], index: 2, kind: input, shape index: {}]   ;;  %s17054_s5 = inlined_call_operand.vmem [shape: bf16[5,32,64], index: 5, kind: input, shape index: {}]   ;;  %s17055_s4 = inlined_call_operand.vmem [shape: f32[1,32], index: 4, kind: input, shape index: {}]   ;;  %s17056_s7 = inlined_call_operand.vmem [shape: bf16[5,64,128], index: 7, kind: input, shape index: {}]   ;;  %s17057_s6 = inlined_call_operand.vmem [shape: f32[1,64], index: 6, kind: input, shape index: {}]   ;;  %s17058_s9 = inlined_call_operand.vmem [shape: bf16[5,128,256], index: 9, kind: input, shape index: {}]   ;;  %s17059_s8 = inlined_call_operand.vmem [shape: f32[1,128], index: 8, kind: input, shape index: {}]   ;;  %s17060_s11 = inlined_call_operand.vmem [shape: bf16[8,256,32], index: 11, kind: input, shape index: {}]   ;;  %s17061_s10 = inlined_call_operand.vmem [shape: f32[1,256], index: 10, kind: input, shape index: {}]   ;;  %s17062_s12 = inlined_call_operand.vmem [shape: f32[1,32], index: 12, kind: input, shape index: {}]   ;;  %s17063_s13 = inlined_call_operand.vmem [shape: f32[2,32], index: 13, kind: output, shape index: {}]  }
   0x1   :  { %v93_v0 = vld [vmem:[%s17050_s1] sm:$0x7]  ;;  %v152_v2 = vsel %vm150_vm0, 4294967295, %v12481_v1  ;;  %v46_v4 = vld [vmem:[%s17051_s0 + $0x8] sm:$0xff]  ;;  %v47_v7 = vld [vmem:[%s17051_s0 + $0x10] sm:$0xff]  ;;  %vm17084_vm7 = vcmask 130048  }
   0x2   :  { %v45_v3 = vld [vmem:[%s17051_s0] sm:$0xff]  ;;  %v153_v5 = vsel %vm151_vm1, %v152_v2, 0  ;;  %v48_v8 = vld [vmem:[%s17051_s0 + $0x18] sm:$0xff]  ;;  %v50_v11 = vld [vmem:[%s17051_s0 + $0x28] sm:$0xff] }
   0x3   :  { %v77_v6 = vpack.c.bf16 %v46_v4, %v45_v3  ;;  %v155_v9 = vand.u32 %v153_v5, %v93_v0  ;;  %v49_v10 = vld [vmem:[%s17051_s0 + $0x20] sm:$0xff]  ;;  %v78_v12 = vpack.c.bf16 %v48_v8, %v47_v7  ;;  %v51_v14 = vld [vmem:[%s17051_s0 + $0x30] sm:$0xff]  ;;  %v52_v15 = vld [vmem:[%s17051_s0 + $0x38] sm:$0xff] }
   0x4   :  { %v79_v13 = vpack.c.bf16 %v50_v11, %v49_v10  ;;  %v53_v16 = vld [vmem:[%s17051_s0 + $0x40] sm:$0xff]  ;;  %v54_v17 = vld [vmem:[%s17051_s0 + $0x48] sm:$0xff]  ;;  %v80_v19 = vpack.c.bf16 %v52_v15, %v51_v14  ;;  %v55_v21 = vld [vmem:[%s17051_s0 + $0x50] sm:$0xff] }
   0x5   :  { %10896 = vmatprep.mubr.msk.bf16.mxu0 %vm101_vm2, %v77_v6  ;;  %10894 = vmatprep.subr.bf16.mxu0 %v155_v9  ;;  %v12198_v18 = vld [vmem:[%s17052_s3 + $0x8] sm:$0xff]   ;;  %v81_v20 = vpack.c.bf16 %v54_v17, %v53_v16  ;;  %v56_v22 = vld [vmem:[%s17051_s0 + $0x58] sm:$0xff]  ;;  %v57_v23 = vld [vmem:[%s17051_s0 + $0x60] sm:$0xff] }
   0x6   :  { %10895 = vmatpush3.bf16.msra.mxu0 %v155_v9  ;;  %v58_v24 = vld [vmem:[%s17051_s0 + $0x68] sm:$0xff]  ;;  %v82_v25 = vpack.c.bf16 %v56_v22, %v55_v21  ;;  %v59_v27 = vld [vmem:[%s17051_s0 + $0x70] sm:$0xff]  ;;  %v60_v28 = vld [vmem:[%s17051_s0 + $0x78] sm:$0xff] }
   0x7   :  { %10962 = vmatprep.subr.bf16.mxu0 %v12198_v18  ;;  %v83_v26 = vpack.c.bf16 %v58_v24, %v57_v23  ;;  %v61_v29 = vld [vmem:[%s17051_s0 + $0x80] sm:$0xff]  ;;  %v62_v30 = vld [vmem:[%s17051_s0 + $0x88] sm:$0xff]  ;;  %v84_v31 = vpack.c.bf16 %v60_v28, %v59_v27  ;;  %v63_v33 = vld [vmem:[%s17051_s0 + $0x90] sm:$0xff] }
   0x8   :  { %v85_v32 = vpack.c.bf16 %v62_v30, %v61_v29  ;;  %v64_v34 = vld [vmem:[%s17051_s0 + $0x98] sm:$0xff]  ;;  %v65_v35 = vld [vmem:[%s17051_s0 + $0xa0] sm:$0xff]  ;;  %v66_v36 = vld [vmem:[%s17051_s0 + $0xa8] sm:$0xff] }
   0x9   :  { %10897 = vmatmul.mubr.msk.bf16.vlgmr.msra.gmra.mrb[0].mxu0 %vm101_vm2, %v78_v12  ;;  %v86_v37 = vpack.c.bf16 %v64_v34, %v63_v33  ;;  %v87_v38 = vpack.c.bf16 %v66_v36, %v65_v35  ;;  %v67_v39 = vld [vmem:[%s17051_s0 + $0xb0] sm:$0xff]  ;;  %v68_v40 = vld [vmem:[%s17051_s0 + $0xb8] sm:$0xff]  ;;  %v69_v41 = vld [vmem:[%s17051_s0 + $0xc0] sm:$0xff] }
   0xa   :  { %10900 = vmatprep.mubr.msk.bf16.mxu0 %vm101_vm2, %v79_v13  ;;  %10963 = vmatpush3.bf16.msra.mxu0 %v12198_v18  ;;  %v70_v42 = vld [vmem:[%s17051_s0 + $0xc8] sm:$0xff]  ;;  %v88_v43 = vpack.c.bf16 %v68_v40, %v67_v39  ;;  %v71_v45 = vld [vmem:[%s17051_s0 + $0xd0] sm:$0xff]  ;;  %v72_v46 = vld [vmem:[%s17051_s0 + $0xd8] sm:$0xff] }
   0xb   :  { %v89_v44 = vpack.c.bf16 %v70_v42, %v69_v41  ;;  %v73_v47 = vld [vmem:[%s17051_s0 + $0xe0] sm:$0xff]  ;;  %v74_v48 = vld [vmem:[%s17051_s0 + $0xe8] sm:$0xff]  ;;  %v90_v49 = vpack.c.bf16 %v72_v46, %v71_v45  ;;  %v75_v51 = vld [vmem:[%s17051_s0 + $0xf0] sm:$0xff] }
   0xc   :  { %v91_v50 = vpack.c.bf16 %v74_v48, %v73_v47  ;;  %v76_v52 = vld [vmem:[%s17051_s0 + $0xf8] sm:$0xff]  ;;  %v12199_v54 = vld [vmem:[%s17052_s3] sm:$0xff]  }
   0xd   :  { %v92_v53 = vpack.c.bf16 %v76_v52, %v75_v51  ;;  %10928 = vmatprep.subr.bf16.mxu1 %v12199_v54  ;;  %v12681_v55 = vld [vmem:[%s17053_s2] ss:$0 sm:$0xff] }
   0xe   :  { %10929 = vmatpush3.bf16.msra.mxu1 %v12199_v54 }
  0x11   :  { %10901 = vmatmul.mubr.msk.bf16.gmra.mrb[4].mxu0 %vm101_vm2, %v80_v19 }
  0x12   :  { %10904 = vmatprep.mubr.msk.bf16.mxu0 %vm101_vm2, %v81_v20 }
  0x19   :  { %10905 = vmatmul.mubr.msk.bf16.gmra.mrb[8].mxu0 %vm101_vm2, %v82_v25 }
  0x1a   :  { %10908 = vmatprep.mubr.msk.bf16.mxu0 %vm101_vm2, %v83_v26 }
  0x21   :  { %10909 = vmatmul.mubr.msk.bf16.gmra.mrb[12].mxu0 %vm101_vm2, %v84_v31 }
  0x22   :  { %10912 = vmatprep.mubr.msk.bf16.mxu0 %vm101_vm2, %v85_v32 }
  0x29   :  { %10913 = vmatmul.mubr.msk.bf16.gmra.mrb[16].mxu0 %vm101_vm2, %v86_v37 }
  0x2a   :  { %10916 = vmatprep.mubr.msk.bf16.mxu0 %vm101_vm2, %v87_v38 }
  0x31   :  { %10917 = vmatmul.mubr.msk.bf16.gmra.mrb[20].mxu0 %vm101_vm2, %v88_v43 }
  0x32   :  { %10920 = vmatprep.mubr.msk.bf16.mxu0 %vm101_vm2, %v89_v44 }
  0x39   :  { %10921 = vmatmul.mubr.msk.bf16.gmra.mrb[24].mxu0 %vm101_vm2, %v90_v49 }
  0x3a   :  { %10924 = vmatprep.mubr.msk.bf16.mxu0 %vm101_vm2, %v91_v50 }
  0x41   :  { %10925 = vmatmul.mubr.msk.bf16.gmra.mrb[28].mxu0 %vm101_vm2, %v92_v53 }
  0xdc   :  { %v10898_v56 = vpop.f32.mrb[0].mxu0 }
  0xdd   :  { %v200_v57 = vadd.f32 %v10898_v56, %v12681_v55  ;;  %v191_v58 = vpop.f32.mrb[1].mxu0 }
  0xde   :  { %v192_v59 = vadd.f32 %v12681_v55, %v191_v58  ;;  %v10899_v60 = vpop.f32.mrb[2].mxu0 }
  0xdf   :  { %v352_v61 = vmul.f32 0.2, %v200_v57  ;;  %v203_v62 = vadd.f32 %v10899_v60, %v12681_v55  ;;  %v194_v63 = vpop.f32.mrb[3].mxu0  ;;  %vm320_vm3 = vcmp.gt.f32.partialorder %v200_v57, 0.0 }
  0xe0   :  { %v350_v0 = vmul.f32 0.2, %v192_v59  ;;  %v195_v1 = vadd.f32 %v12681_v55, %v194_v63  ;;  %vm318_vm4 = vcmp.gt.f32.partialorder %v192_v59, 0.0 }
  0xe1   :  { %vm321_vm5 = vcmp.gt.f32.partialorder %v203_v62, 0.0  ;;  %v353_v2 = vmul.f32 0.2, %v203_v62  ;;  %v384_v4 = vsel %vm320_vm3, %v200_v57, %v352_v61 }
  0xe2   :  { %vm319_vm6 = vcmp.gt.f32.partialorder %v195_v1, 0.0  ;;  %v351_v3 = vmul.f32 0.2, %v195_v1  ;;  %v382_v6 = vsel %vm318_vm4, %v192_v59, %v350_v0 }
  0xe3   :  { %v385_v5 = vsel %vm321_vm5, %v203_v62, %v353_v2 }
  0xe4   :  { %v12687_v7 = vpack.c.bf16 %v385_v5, %v384_v4  ;;  %v383_v8 = vsel %vm319_vm6, %v195_v1, %v351_v3  ;;  %v10902_v9 = vpop.f32.mrb[4].mxu0 }
  0xe5   :  { %v12689_v10 = vpack.c.bf16 %v383_v8, %v382_v6  ;;  %v216_v11 = vadd.f32 %v10902_v9, %v12681_v55  ;;  %v207_v12 = vpop.f32.mrb[5].mxu0 }
  0xe6   :  { %v208_v13 = vadd.f32 %v12681_v55, %v207_v12  ;;  %v10903_v14 = vpop.f32.mrb[6].mxu0 }
  0xe7   :  { %v356_v15 = vmul.f32 0.2, %v216_v11  ;;  %v219_v16 = vadd.f32 %v10903_v14, %v12681_v55  ;;  %v210_v17 = vpop.f32.mrb[7].mxu0  ;;  %10930 = vmatprep.mubr.msk.bf16.mxu1 %vm17084_vm7, %v12689_v10  ;;  %10964 = vmatprep.mubr.msk.bf16.mxu0 %vm17084_vm7, %v12689_v10  ;;  %vm324_vm8 = vcmp.gt.f32.partialorder %v216_v11, 0.0 }
  0xe8   :  { %v354_v18 = vmul.f32 0.2, %v208_v13  ;;  %v211_v19 = vadd.f32 %v12681_v55, %v210_v17  ;;  %10931 = vmatmul.mubr.msk.bf16.vlgmr.msra.gmra.mrb[0].mxu1 %vm17084_vm7, %v12687_v7  ;;  %10965 = vmatmul.mubr.msk.bf16.vlgmr.msra.gmra.mrb[32].mxu0 %vm17084_vm7, %v12687_v7  ;;  %vm322_vm9 = vcmp.gt.f32.partialorder %v208_v13, 0.0 }
  0xe9   :  { %vm325_vm10 = vcmp.gt.f32.partialorder %v219_v16, 0.0  ;;  %v357_v20 = vmul.f32 0.2, %v219_v16  ;;  %v388_v22 = vsel %vm324_vm8, %v216_v11, %v356_v15 }
  0xea   :  { %vm323_vm11 = vcmp.gt.f32.partialorder %v211_v19, 0.0  ;;  %v355_v21 = vmul.f32 0.2, %v211_v19  ;;  %v386_v24 = vsel %vm322_vm9, %v208_v13, %v354_v18 }
  0xeb   :  { %v389_v23 = vsel %vm325_vm10, %v219_v16, %v357_v20 }
  0xec   :  { %v12703_v25 = vpack.c.bf16 %v389_v23, %v388_v22  ;;  %v387_v26 = vsel %vm323_vm11, %v211_v19, %v355_v21  ;;  %v10906_v27 = vpop.f32.mrb[8].mxu0 }
  0xed   :  { %v12705_v28 = vpack.c.bf16 %v387_v26, %v386_v24  ;;  %v232_v29 = vadd.f32 %v10906_v27, %v12681_v55  ;;  %v223_v30 = vpop.f32.mrb[9].mxu0 }
  0xee   :  { %v224_v31 = vadd.f32 %v12681_v55, %v223_v30  ;;  %v10907_v32 = vpop.f32.mrb[10].mxu0 }
  0xef   :  { %v360_v33 = vmul.f32 0.2, %v232_v29  ;;  %v235_v34 = vadd.f32 %v10907_v32, %v12681_v55  ;;  %v226_v35 = vpop.f32.mrb[11].mxu0  ;;  %10934 = vmatprep.mubr.msk.bf16.mxu1 %vm17084_vm7, %v12705_v28  ;;  %10968 = vmatprep.mubr.msk.bf16.mxu0 %vm17084_vm7, %v12705_v28  ;;  %vm328_vm12 = vcmp.gt.f32.partialorder %v232_v29, 0.0 }
  0xf0   :  { %v358_v36 = vmul.f32 0.2, %v224_v31  ;;  %v227_v37 = vadd.f32 %v12681_v55, %v226_v35  ;;  %10935 = vmatmul.mubr.msk.bf16.gmra.mrb[4].mxu1 %vm17084_vm7, %v12703_v25  ;;  %10969 = vmatmul.mubr.msk.bf16.gmra.mrb[36].mxu0 %vm17084_vm7, %v12703_v25  ;;  %vm326_vm13 = vcmp.gt.f32.partialorder %v224_v31, 0.0 }
  0xf1   :  { %vm329_vm14 = vcmp.gt.f32.partialorder %v235_v34, 0.0  ;;  %v361_v38 = vmul.f32 0.2, %v235_v34  ;;  %v392_v40 = vsel %vm328_vm12, %v232_v29, %v360_v33 }
  0xf2   :  { %vm327_vm15 = vcmp.gt.f32.partialorder %v227_v37, 0.0  ;;  %v359_v39 = vmul.f32 0.2, %v227_v37  ;;  %v390_v43 = vsel %vm326_vm13, %v224_v31, %v358_v36 }
  0xf3   :  { %v393_v41 = vsel %vm329_vm14, %v235_v34, %v361_v38 }
  0xf4   :  { %v12719_v42 = vpack.c.bf16 %v393_v41, %v392_v40  ;;  %v391_v44 = vsel %vm327_vm15, %v227_v37, %v359_v39  ;;  %v10910_v45 = vpop.f32.mrb[12].mxu0 }
  0xf5   :  { %v12721_v46 = vpack.c.bf16 %v391_v44, %v390_v43  ;;  %v248_v47 = vadd.f32 %v10910_v45, %v12681_v55  ;;  %v239_v48 = vpop.f32.mrb[13].mxu0 }
  0xf6   :  { %v240_v49 = vadd.f32 %v12681_v55, %v239_v48  ;;  %v10911_v50 = vpop.f32.mrb[14].mxu0 }
  0xf7   :  { %v364_v51 = vmul.f32 0.2, %v248_v47  ;;  %v251_v52 = vadd.f32 %v10911_v50, %v12681_v55  ;;  %v242_v53 = vpop.f32.mrb[15].mxu0  ;;  %10938 = vmatprep.mubr.msk.bf16.mxu1 %vm17084_vm7, %v12721_v46  ;;  %10972 = vmatprep.mubr.msk.bf16.mxu0 %vm17084_vm7, %v12721_v46  ;;  %vm332_vm0 = vcmp.gt.f32.partialorder %v248_v47, 0.0 }
  0xf8   :  { %v362_v54 = vmul.f32 0.2, %v240_v49  ;;  %v243_v56 = vadd.f32 %v12681_v55, %v242_v53  ;;  %10939 = vmatmul.mubr.msk.bf16.gmra.mrb[8].mxu1 %vm17084_vm7, %v12719_v42  ;;  %10973 = vmatmul.mubr.msk.bf16.gmra.mrb[40].mxu0 %vm17084_vm7, %v12719_v42  ;;  %vm330_vm1 = vcmp.gt.f32.partialorder %v240_v49, 0.0 }
  0xf9   :  { %vm333_vm2 = vcmp.gt.f32.partialorder %v251_v52, 0.0  ;;  %v365_v57 = vmul.f32 0.2, %v251_v52  ;;  %v396_v59 = vsel %vm332_vm0, %v248_v47, %v364_v51 }
  0xfa   :  { %vm331_vm3 = vcmp.gt.f32.partialorder %v243_v56, 0.0  ;;  %v363_v58 = vmul.f32 0.2, %v243_v56  ;;  %v394_v61 = vsel %vm330_vm1, %v240_v49, %v362_v54 }
  0xfb   :  { %v397_v60 = vsel %vm333_vm2, %v251_v52, %v365_v57 }
  0xfc   :  { %v12735_v62 = vpack.c.bf16 %v397_v60, %v396_v59  ;;  %v395_v63 = vsel %vm331_vm3, %v243_v56, %v363_v58  ;;  %v10914_v0 = vpop.f32.mrb[16].mxu0 }
  0xfd   :  { %v12737_v1 = vpack.c.bf16 %v395_v63, %v394_v61  ;;  %v264_v2 = vadd.f32 %v10914_v0, %v12681_v55  ;;  %v255_v3 = vpop.f32.mrb[17].mxu0 }
  0xfe   :  { %v256_v4 = vadd.f32 %v12681_v55, %v255_v3  ;;  %v10915_v5 = vpop.f32.mrb[18].mxu0 }
  0xff   :  { %v368_v6 = vmul.f32 0.2, %v264_v2  ;;  %v267_v8 = vadd.f32 %v10915_v5, %v12681_v55  ;;  %v258_v9 = vpop.f32.mrb[19].mxu0  ;;  %10942 = vmatprep.mubr.msk.bf16.mxu1 %vm17084_vm7, %v12737_v1  ;;  %10976 = vmatprep.mubr.msk.bf16.mxu0 %vm17084_vm7, %v12737_v1  ;;  %vm336_vm4 = vcmp.gt.f32.partialorder %v264_v2, 0.0 }
 0x100   :  { %v366_v11 = vmul.f32 0.2, %v256_v4  ;;  %v259_v12 = vadd.f32 %v12681_v55, %v258_v9  ;;  %10943 = vmatmul.mubr.msk.bf16.gmra.mrb[12].mxu1 %vm17084_vm7, %v12735_v62  ;;  %10977 = vmatmul.mubr.msk.bf16.gmra.mrb[44].mxu0 %vm17084_vm7, %v12735_v62  ;;  %vm334_vm5 = vcmp.gt.f32.partialorder %v256_v4, 0.0 }
 0x101   :  { %vm337_vm6 = vcmp.gt.f32.partialorder %v267_v8, 0.0  ;;  %v369_v13 = vmul.f32 0.2, %v267_v8  ;;  %v400_v15 = vsel %vm336_vm4, %v264_v2, %v368_v6 }
 0x102   :  { %vm335_vm8 = vcmp.gt.f32.partialorder %v259_v12, 0.0  ;;  %v367_v14 = vmul.f32 0.2, %v259_v12  ;;  %v398_v17 = vsel %vm334_vm5, %v256_v4, %v366_v11 }
 0x103   :  { %v401_v16 = vsel %vm337_vm6, %v267_v8, %v369_v13 }
 0x104   :  { %v12751_v18 = vpack.c.bf16 %v401_v16, %v400_v15  ;;  %v399_v19 = vsel %vm335_vm8, %v259_v12, %v367_v14  ;;  %v10918_v20 = vpop.f32.mrb[20].mxu0 }
 0x105   :  { %v12753_v21 = vpack.c.bf16 %v399_v19, %v398_v17  ;;  %v280_v22 = vadd.f32 %v10918_v20, %v12681_v55  ;;  %v271_v23 = vpop.f32.mrb[21].mxu0 }
 0x106   :  { %17164 = vst [vmem:[#allocation2_spill] sm:$0xff] %v12751_v18  ;;  %v272_v24 = vadd.f32 %v12681_v55, %v271_v23  ;;  %v10919_v26 = vpop.f32.mrb[22].mxu0 }
 0x107   :  { %v372_v27 = vmul.f32 0.2, %v280_v22  ;;  %v283_v29 = vadd.f32 %v10919_v26, %v12681_v55  ;;  %v274_v30 = vpop.f32.mrb[23].mxu0  ;;  %10946 = vmatprep.mubr.msk.bf16.mxu1 %vm17084_vm7, %v12753_v21  ;;  %10980 = vmatprep.mubr.msk.bf16.mxu0 %vm17084_vm7, %v12753_v21  ;;  %vm340_vm9 = vcmp.gt.f32.partialorder %v280_v22, 0.0 }
 0x108   :  { %v370_v31 = vmul.f32 0.2, %v272_v24  ;;  %v275_v32 = vadd.f32 %v12681_v55, %v274_v30  ;;  %10947 = vmatmul.mubr.msk.bf16.gmra.mrb[16].mxu1 %vm17084_vm7, %v12751_v18  ;;  %10981 = vmatmul.mubr.msk.bf16.gmra.mrb[48].mxu0 %vm17084_vm7, %v12751_v18  ;;  %vm338_vm10 = vcmp.gt.f32.partialorder %v272_v24, 0.0 }
 0x109   :  { %vm341_vm11 = vcmp.gt.f32.partialorder %v283_v29, 0.0  ;;  %v373_v33 = vmul.f32 0.2, %v283_v29  ;;  %v404_v35 = vsel %vm340_vm9, %v280_v22, %v372_v27 }
 0x10a   :  { %vm339_vm12 = vcmp.gt.f32.partialorder %v275_v32, 0.0  ;;  %v371_v34 = vmul.f32 0.2, %v275_v32  ;;  %v402_v37 = vsel %vm338_vm10, %v272_v24, %v370_v31 }
 0x10b   :  { %v405_v36 = vsel %vm341_vm11, %v283_v29, %v373_v33 }
 0x10c   :  { %v12767_v38 = vpack.c.bf16 %v405_v36, %v404_v35  ;;  %v403_v39 = vsel %vm339_vm12, %v275_v32, %v371_v34  ;;  %v10922_v40 = vpop.f32.mrb[24].mxu0  ;;  %v17064_v35 = vmov 1.0  }
 0x10d   :  { %v12769_v41 = vpack.c.bf16 %v403_v39, %v402_v37  ;;  %v296_v43 = vadd.f32 %v10922_v40, %v12681_v55  ;;  %v287_v44 = vpop.f32.mrb[25].mxu0 }
 0x10e   :  { %17165 = vst [vmem:[#allocation3_spill] sm:$0xff] %v12767_v38  ;;  %v288_v45 = vadd.f32 %v12681_v55, %v287_v44  ;;  %v10923_v47 = vpop.f32.mrb[26].mxu0 }
 0x10f   :  { %17166 = vst [vmem:[#allocation4_spill] sm:$0xff] %v12769_v41  ;;  %v376_v48 = vmul.f32 0.2, %v296_v43  ;;  %v299_v49 = vadd.f32 %v10923_v47, %v12681_v55  ;;  %v290_v50 = vpop.f32.mrb[27].mxu0  ;;  %10950 = vmatprep.mubr.msk.bf16.mxu1 %vm17084_vm7, %v12769_v41  ;;  %10984 = vmatprep.mubr.msk.bf16.mxu0 %vm17084_vm7, %v12769_v41  ;;  %vm344_vm13 = vcmp.gt.f32.partialorder %v296_v43, 0.0 }
 0x110   :  { %v374_v51 = vmul.f32 0.2, %v288_v45  ;;  %v291_v52 = vadd.f32 %v12681_v55, %v290_v50  ;;  %10951 = vmatmul.mubr.msk.bf16.gmra.mrb[20].mxu1 %vm17084_vm7, %v12767_v38  ;;  %10985 = vmatmul.mubr.msk.bf16.gmra.mrb[52].mxu0 %vm17084_vm7, %v12767_v38  ;;  %vm342_vm14 = vcmp.gt.f32.partialorder %v288_v45, 0.0 }
 0x111   :  { %vm345_vm15 = vcmp.gt.f32.partialorder %v299_v49, 0.0  ;;  %v377_v53 = vmul.f32 0.2, %v299_v49  ;;  %v408_v56 = vsel %vm344_vm13, %v296_v43, %v376_v48 }
 0x112   :  { %vm343_vm0 = vcmp.gt.f32.partialorder %v291_v52, 0.0  ;;  %v375_v54 = vmul.f32 0.2, %v291_v52  ;;  %v406_v58 = vsel %vm342_vm14, %v288_v45, %v374_v51 }
 0x113   :  { %v409_v57 = vsel %vm345_vm15, %v299_v49, %v377_v53 }
 0x114   :  { %v12783_v59 = vpack.c.bf16 %v409_v57, %v408_v56  ;;  %v407_v60 = vsel %vm343_vm0, %v291_v52, %v375_v54  ;;  %v10926_v61 = vpop.f32.mrb[28].mxu0 }
 0x115   :  { %v12785_v63 = vpack.c.bf16 %v407_v60, %v406_v58  ;;  %v312_v0 = vadd.f32 %v10926_v61, %v12681_v55  ;;  %v303_v2 = vpop.f32.mrb[29].mxu0 }
 0x116   :  { %17167 = vst [vmem:[#allocation5_spill] sm:$0xff] %v12783_v59  ;;  %v304_v3 = vadd.f32 %v12681_v55, %v303_v2  ;;  %v10927_v4 = vpop.f32.mrb[30].mxu0 }
 0x117   :  { %17168 = vst [vmem:[#allocation6_spill] sm:$0xff] %v12785_v63  ;;  %v380_v5 = vmul.f32 0.2, %v312_v0  ;;  %v315_v6 = vadd.f32 %v10927_v4, %v12681_v55  ;;  %v306_v8 = vpop.f32.mrb[31].mxu0  ;;  %10954 = vmatprep.mubr.msk.bf16.mxu1 %vm17084_vm7, %v12785_v63  ;;  %10988 = vmatprep.mubr.msk.bf16.mxu0 %vm17084_vm7, %v12785_v63  ;;  %vm348_vm1 = vcmp.gt.f32.partialorder %v312_v0, 0.0 }
 0x118   :  { %v378_v9 = vmul.f32 0.2, %v304_v3  ;;  %v307_v11 = vadd.f32 %v12681_v55, %v306_v8  ;;  %10955 = vmatmul.mubr.msk.bf16.gmra.mrb[24].mxu1 %vm17084_vm7, %v12783_v59  ;;  %10989 = vmatmul.mubr.msk.bf16.gmra.mrb[56].mxu0 %vm17084_vm7, %v12783_v59  ;;  %vm346_vm2 = vcmp.gt.f32.partialorder %v304_v3, 0.0  ;;  %v648_v55 = vlaneseq }
 0x119   :  { %vm349_vm3 = vcmp.gt.f32.partialorder %v315_v6, 0.0  ;;  %v381_v12 = vmul.f32 0.2, %v315_v6  ;;  %v412_v14 = vsel %vm348_vm1, %v312_v0, %v380_v5 }
 0x11a   :  { %vm347_vm4 = vcmp.gt.f32.partialorder %v307_v11, 0.0  ;;  %v379_v13 = vmul.f32 0.2, %v307_v11  ;;  %v410_v16 = vsel %vm346_vm2, %v304_v3, %v378_v9  ;;  %v12811_v22 = vshrl.u32 %v648_v55, 7 }
 0x11b   :  { %v413_v15 = vsel %vm349_vm3, %v315_v6, %v381_v12  ;;  %v12816_v26 = vand.u32 127, %v648_v55 }
 0x11c   :  { %v12799_v17 = vpack.c.bf16 %v413_v15, %v412_v14  ;;  %v411_v19 = vsel %vm347_vm4, %v307_v11, %v379_v13  ;;  %17171 = vst [vmem:[#allocation9_spill] sm:$0xff] %v12811_v22  ;;  %v668_v23 = vand.u32 63, %v12811_v22  ;;  %v12819_v27 = vmul.u32 2, %v12811_v22 }
 0x11d   :  { %v12801_v20 = vpack.c.bf16 %v411_v19, %v410_v16  ;;  %v12824_v31 = vadd.s32 128, %v12816_v26  ;;  %v12935_v63 = vadd.s32 8, %v12811_v22  ;;  %v12951_v18 = vadd.s32 24, %v12811_v22 }
 0x11e   :  { %17169 = vst [vmem:[#allocation7_spill] sm:$0xff] %v12799_v17  ;;  %v12814_v24 = vmul.u32 2, %v668_v23  ;;  %17173 = vst [vmem:[#allocation11_spill] sm:$0xff] %v12819_v27  ;;  %v12827_v32 = vadd.s32 4294967295, %v12819_v27  ;;  %v12830_v33 = vadd.s32 4294967294, %v12819_v27 }
 0x11f   :  { %17170 = vst [vmem:[#allocation8_spill] sm:$0xff] %v12801_v20  ;;  %10958 = vmatprep.mubr.msk.bf16.mxu1 %vm17084_vm7, %v12801_v20  ;;  %10992 = vmatprep.mubr.msk.bf16.mxu0 %vm17084_vm7, %v12801_v20  ;;  %17180 = vst [vmem:[#allocation14_spill] sm:$0xff] %v12935_v63 }
 0x120   :  { %10959 = vmatmul.mubr.msk.bf16.gmra.mrb[28].mxu1 %vm17084_vm7, %v12799_v17  ;;  %10993 = vmatmul.mubr.msk.bf16.gmra.mrb[60].mxu0 %vm17084_vm7, %v12799_v17  ;;  %17172 = vst [vmem:[#allocation10_spill] sm:$0xff] %v12814_v24  ;;  %v1062_v29 = vadd.s32 4294967295, %v12814_v24  ;;  %v700_v30 = vadd.s32 4294967294, %v12814_v24  ;;  %17174 = vst [vmem:[#allocation12_spill] sm:$0xff] %v12827_v32  ;;  %vm1143_vm9 = vcmp.eq.s32.totalorder %v12824_v31, %v12827_v32 }
 0x121   :  { %17175 = vst [vmem:[#allocation13_spill] sm:$0xff] %v12830_v33  ;;  %vm797_vm13 = vcmp.eq.s32.totalorder %v12824_v31, %v12830_v33  ;;  %17184 = vst [vmem:[#allocation16_spill] sm:$0xff] %v12951_v18  ;;  %vm17086_vm0 = vcmp.eq.s32.totalorder %v12816_v26, %v12827_v32  ;;  %vm17085_vm1 = vcmp.eq.s32.totalorder %v12816_v26, %v12830_v33  ;;  %v17239_v33 = vmov 0 }
 0x122   :  { %vm1078_vm5 = vcmp.ge.s32.totalorder %v1062_v29, 0  ;;  %vm1094_vm6 = vcmp.lt.s32.totalorder %v1062_v29, 128  ;;  %vm716_vm10 = vcmp.ge.s32.totalorder %v700_v30, 0  ;;  %vm732_vm11 = vcmp.lt.s32.totalorder %v700_v30, 128 }
 0x123   :  { %vm12832_vm8 = vmand %vm1078_vm5, %vm1094_vm6  ;;  %v13676_v32 = vadd.s32 104, %v12811_v22 }
 0x124   :  { %vm1175_vm12 = vmand %vm1143_vm9, %vm12832_vm8 }
 0x125   :  { %8989 = vmatprep.mubr.msk.f32.mxu1 %vm1175_vm12, %v17064_v35  ;;  %vm12843_vm14 = vmand %vm716_vm10, %vm732_vm11 }
 0x126   :  { %vm829_vm15 = vmand %vm797_vm13, %vm12843_vm14 }
 0x127   :  { %9021 = vmatprep.mubr.msk.f32.mxu0 %vm829_vm15, %v17064_v35 }
 0x1bb   :  { %v12850_v37 = vpop.f32.mrb[0].mxu1  ;;  %v12852_v39 = vpop.f32.mrb[32].mxu0 }
 0x1bc   :  { %v521_v40 = vpop.f32.mrb[1].mxu1  ;;  %v935_v43 = vpop.f32.mrb[33].mxu0 }
 0x1bd   :  { %v12854_v44 = vpop.f32.mrb[2].mxu1  ;;  %v12856_v45 = vpop.f32.mrb[34].mxu0 }
 0x1be   :  { %v524_v48 = vpop.f32.mrb[3].mxu1  ;;  %v938_v49 = vpop.f32.mrb[35].mxu0 }
 0x1bf   :  { %v11666_v51 = vpack.c.bf16 %v938_v49, %v935_v43  ;;  %v11698_v52 = vpack.c.bf16 %v524_v48, %v521_v40 }
 0x1c3   :  { %v12862_v53 = vpop.f32.mrb[4].mxu1  ;;  %v12864_v54 = vpop.f32.mrb[36].mxu0 }
 0x1c4   :  { %v12866_v56 = vpop.f32.mrb[5].mxu1  ;;  %v12868_v57 = vpop.f32.mrb[37].mxu0 }
 0x1c5   :  { %v12870_v58 = vpop.f32.mrb[6].mxu1  ;;  %v12872_v60 = vpop.f32.mrb[38].mxu0 }
 0x1c6   :  { %v12878_v2 = vpop.f32.mrb[7].mxu1  ;;  %v12880_v3 = vpop.f32.mrb[39].mxu0 }
 0x1cb   :  { %v12886_v6 = vpop.f32.mrb[8].mxu1  ;;  %v12888_v8 = vpop.f32.mrb[40].mxu0 }
 0x1cc   :  { %v12890_v9 = vpop.f32.mrb[9].mxu1  ;;  %v12892_v11 = vpop.f32.mrb[41].mxu0 }
 0x1cd   :  { %v12894_v12 = vpop.f32.mrb[10].mxu1  ;;  %v12896_v13 = vpop.f32.mrb[42].mxu0 }
 0x1ce   :  { %v12902_v16 = vpop.f32.mrb[11].mxu1  ;;  %v12904_v19 = vpop.f32.mrb[43].mxu0 }
 0x1d3   :  { %v12910_v29 = vpop.f32.mrb[12].mxu1  ;;  %v12912_v30 = vpop.f32.mrb[44].mxu0 }
 0x1d4   :  { %v12914_v40 = vpop.f32.mrb[13].mxu1  ;;  %v12916_v43 = vpop.f32.mrb[45].mxu0 }
 0x1d5   :  { %v12918_v48 = vpop.f32.mrb[14].mxu1  ;;  %v12920_v49 = vpop.f32.mrb[46].mxu0 }
 0x1d6   :  { %v12926_v15 = vpop.f32.mrb[15].mxu1  ;;  %v12928_v55 = vpop.f32.mrb[47].mxu0 }
 0x1db   :  { %v10948_v0 = vpop.f32.mrb[16].mxu1  ;;  %v10982_v4 = vpop.f32.mrb[48].mxu0 }
 0x1dc   :  { %v585_v5 = vpop.f32.mrb[17].mxu1  ;;  %v999_v50 = vpop.f32.mrb[49].mxu0 }
 0x1dd   :  { %v10949_v47 = vpop.f32.mrb[18].mxu1  ;;  %v10983_v27 = vpop.f32.mrb[50].mxu0 }
 0x1de   :  { %v11700_v35 = vpack.c.bf16 %v10949_v47, %v10948_v0  ;;  %v11668_v24 = vpack.c.bf16 %v10983_v27, %v10982_v4  ;;  %v588_v17 = vpop.f32.mrb[19].mxu1  ;;  %v1002_v14 = vpop.f32.mrb[51].mxu0  ;;  %v669_v47 = vand.u32 63, %v12935_v63  ;;  %v12939_v27 = vadd.s32 16, %v12811_v22 }
 0x1df   :  { %v11696_v20 = vpack.c.bf16 %v588_v17, %v585_v5  ;;  %v11664_v59 = vpack.c.bf16 %v1002_v14, %v999_v50 }
 0x1e0   :  { %17181 = vst [vmem:[#allocation15_spill] sm:$0xff] %v12939_v27  ;;  %v670_v14 = vand.u32 63, %v12939_v27 }
 0x1e1   :  { %11665 = vmatprep.subr.bf16.mxu1 %v11664_v59  ;;  %11697 = vmatprep.subr.bf16.mxu0 %v11696_v20  ;;  %v17182_v20 = vpack.c.bf16 %v12856_v45, %v12852_v39  ;;  %v17186_v39 = vpack.c.bf16 %v12878_v2, %v12866_v56 }
 0x1e2   :  { %11667 = vmatpush3.bf16.msra.mxu1 %v11666_v51  ;;  %11699 = vmatpush3.bf16.msra.mxu0 %v11698_v52  ;;  %v12947_v52 = vmul.u32 2, %v669_v47  ;;  %v12963_v47 = vmul.u32 2, %v670_v14 }
 0x1e3   :  { %v10952_v23 = vpop.f32.mrb[20].mxu1  ;;  %v10986_v61 = vpop.f32.mrb[52].mxu0  ;;  %11669 = vmatprep.subr.bf16.mxu1 %v11668_v24  ;;  %11701 = vmatprep.subr.bf16.mxu0 %v11700_v35  ;;  %v17183_v24 = vpack.c.bf16 %v12854_v44, %v12850_v37 }
 0x1e4   :  { %v601_v38 = vpop.f32.mrb[21].mxu1  ;;  %v1015_v41 = vpop.f32.mrb[53].mxu0 }
 0x1e5   :  { %v10953_v17 = vpop.f32.mrb[22].mxu1  ;;  %v10987_v50 = vpop.f32.mrb[54].mxu0 }
 0x1e6   :  { %v11708_v0 = vpack.c.bf16 %v10953_v17, %v10952_v23  ;;  %v11676_v4 = vpack.c.bf16 %v10987_v50, %v10986_v61  ;;  %v604_v5 = vpop.f32.mrb[23].mxu1  ;;  %v1018_v59 = vpop.f32.mrb[55].mxu0  ;;  %11671 = vmatpush3.bf16.msra.mxu1 %v17182_v20  ;;  %11703 = vmatpush3.bf16.msra.mxu0 %v17183_v24  ;;  %v17185_v61 = vpack.c.bf16 %v12880_v3, %v12868_v57  ;;  %v1063_v23 = vadd.s32 4294967295, %v12947_v52 }
 0x1e7   :  { %v11704_v35 = vpack.c.bf16 %v604_v5, %v601_v38  ;;  %v11672_v51 = vpack.c.bf16 %v1018_v59, %v1015_v41  ;;  %v12960_v38 = vmul.u32 2, %v12935_v63  ;;  %v12966_v57 = vmul.u32 2, %v12939_v27 }
 0x1e8   :  { %v671_v3 = vand.u32 63, %v12951_v18  ;;  %v12972_v17 = vadd.s32 32, %v12811_v22  ;;  %v17188_v59 = vpack.c.bf16 %v12872_v60, %v12864_v54  ;;  %v17189_v20 = vpack.c.bf16 %v12870_v58, %v12862_v53 }
 0x1e9   :  { %11673 = vmatprep.subr.bf16.mxu1 %v11672_v51  ;;  %11705 = vmatprep.subr.bf16.mxu0 %v11704_v35  ;;  %v12981_v24 = vadd.s32 4294967295, %v12960_v38  ;;  %v701_v35 = vadd.s32 4294967294, %v12947_v52  ;;  %vm1079_vm2 = vcmp.ge.s32.totalorder %v1063_v23, 0  ;;  %v1064_v54 = vadd.s32 4294967295, %v12963_v47 }
 0x1ea   :  { %11675 = vmatpush3.bf16.msra.mxu1 %v17185_v61  ;;  %11707 = vmatpush3.bf16.msra.mxu0 %v17186_v39  ;;  %17187 = vst [vmem:[#allocation17_spill] sm:$0xff] %v12972_v17  ;;  %v12987_v61 = vadd.s32 4294967294, %v12960_v38  ;;  %v12991_v60 = vadd.s32 4294967295, %v12966_v57  ;;  %v12993_v53 = vmul.u32 2, %v671_v3  ;;  %vm1095_vm3 = vcmp.lt.s32.totalorder %v1063_v23, 128 }
 0x1eb   :  { %v10956_v41 = vpop.f32.mrb[24].mxu1  ;;  %v10990_v37 = vpop.f32.mrb[56].mxu0  ;;  %11677 = vmatprep.subr.bf16.mxu1 %v11676_v4  ;;  %11709 = vmatprep.subr.bf16.mxu0 %v11708_v0  ;;  %17190 = vst [vmem:[#allocation18_spill] sm:$0xff] %v12981_v24  ;;  %v702_v58 = vadd.s32 4294967294, %v12963_v47  ;;  %v672_v39 = vand.u32 63, %v12972_v17  ;;  %vm1145_vm4 = vcmp.eq.s32.totalorder %v12824_v31, %v12981_v24  ;;  %vm717_vm5 = vcmp.ge.s32.totalorder %v701_v35, 0  ;;  %vm13022_vm12 = vmand %vm1079_vm2, %vm1095_vm3 }
 0x1ec   :  { %v617_v44 = vpop.f32.mrb[25].mxu1  ;;  %v1031_v45 = vpop.f32.mrb[57].mxu0  ;;  %17191 = vst [vmem:[#allocation19_spill] sm:$0xff] %v12987_v61  ;;  %17192 = vst [vmem:[#allocation20_spill] sm:$0xff] %v12991_v60  ;;  %vm733_vm6 = vcmp.lt.s32.totalorder %v701_v35, 128  ;;  %vm799_vm9 = vcmp.eq.s32.totalorder %v12824_v31, %v12987_v61  ;;  %vm17087_vm10 = vcmp.eq.s32.totalorder %v12816_v26, %v12981_v24  ;;  %vm1080_vm13 = vcmp.ge.s32.totalorder %v1064_v54, 0 }
 0x1ed   :  { %v10957_v56 = vpop.f32.mrb[26].mxu1  ;;  %v10991_v2 = vpop.f32.mrb[58].mxu0  ;;  %vm1096_vm15 = vcmp.lt.s32.totalorder %v1064_v54, 128  ;;  %vm718_vm11 = vcmp.ge.s32.totalorder %v702_v58, 0  ;;  %v13033_v23 = vadd.s32 48, %v12811_v22  ;;  %vm13046_vm2 = vmand %vm17086_vm0, %vm12832_vm8  ;;  %v703_v35 = vadd.s32 4294967294, %v12993_v53 }
 0x1ee   :  { %v11716_v50 = vpack.c.bf16 %v10957_v56, %v10956_v41  ;;  %v11684_v0 = vpack.c.bf16 %v10991_v2, %v10990_v37  ;;  %v620_v4 = vpop.f32.mrb[27].mxu1  ;;  %v1034_v5 = vpop.f32.mrb[59].mxu0  ;;  %11679 = vmatpush3.bf16.msra.mxu1 %v17188_v59  ;;  %11711 = vmatpush3.bf16.msra.mxu0 %v17189_v20  ;;  %v12998_v41 = vadd.s32 40, %v12811_v22  ;;  %v17194_v37 = vpack.c.bf16 %v12904_v19, %v12892_v11  ;;  %vm13055_vm3 = vmand %vm17085_vm1, %vm12843_vm14 }
 0x1ef   :  { %v11712_v51 = vpack.c.bf16 %v620_v4, %v617_v44  ;;  %v11680_v14 = vpack.c.bf16 %v1034_v5, %v1031_v45  ;;  %v17195_v44 = vpack.c.bf16 %v12902_v16, %v12890_v9  ;;  %v13009_v45 = vmul.u32 2, %v12951_v18  ;;  %17199 = vst [vmem:[#allocation23_spill] sm:$0xff] %v13033_v23  ;;  %vm13061_vm7 = vmand %vm717_vm5, %vm733_vm6 }
 0x1f0   :  { %17193 = vst [vmem:[#allocation21_spill] sm:$0xff] %v12998_v41  ;;  %v13018_v9 = vadd.s32 4294967294, %v12966_v57  ;;  %v1065_v2 = vadd.s32 4294967295, %v12993_v53  ;;  %v13029_v4 = vmul.u32 2, %v672_v39  ;;  %v673_v5 = vand.u32 63, %v12998_v41  ;;  %vm13076_vm8 = vmand %vm1145_vm4, %vm13022_vm12 }
 0x1f1   :  { %11681 = vmatprep.subr.bf16.mxu1 %v11680_v14  ;;  %11713 = vmatprep.subr.bf16.mxu0 %v11712_v51  ;;  %vm734_vm14 = vcmp.lt.s32.totalorder %v702_v58, 128  ;;  %vm13083_vm5 = vmand %vm1080_vm13, %vm1096_vm15  ;;  %vm17220_vm15 = vcmp.eq.s32.totalorder %v12816_v26, %v12987_v61  ;;  %v17228_v58 = vmov 0  ;;  %v17237_v61 = vpack.c.bf16 %v12918_v48, %v12910_v29 }
 0x1f2   :  { %11683 = vmatpush3.bf16.msra.mxu1 %v17194_v37  ;;  %11715 = vmatpush3.bf16.msra.mxu0 %v17195_v44  ;;  %17196 = vst [vmem:[#allocation22_spill] sm:$0xff] %v13018_v9  ;;  %v17200_v37 = vpack.c.bf16 %v12896_v13, %v12888_v8  ;;  %v17201_v44 = vpack.c.bf16 %v12894_v12, %v12886_v6  ;;  %v13066_v6 = vadd.s32 4294967295, %v13009_v45  ;;  %v13069_v12 = vmul.u32 2, %v12972_v17  ;;  %vm13099_vm4 = vmand %vm799_vm9, %vm13061_vm7 }
 0x1f3   :  { %v10960_v3 = vpop.f32.mrb[28].mxu1  ;;  %v10994_v56 = vpop.f32.mrb[60].mxu0  ;;  %11685 = vmatprep.subr.bf16.mxu1 %v11684_v0  ;;  %11717 = vmatprep.subr.bf16.mxu0 %v11716_v50  ;;  %vm1081_vm0 = vcmp.ge.s32.totalorder %v1065_v2, 0  ;;  %vm1097_vm13 = vcmp.lt.s32.totalorder %v1065_v2, 128  ;;  %vm13118_vm9 = vmand %vm17087_vm10, %vm13022_vm12  ;;  %vm17092_vm12 = vcmp.eq.s32.totalorder %v12816_v26, %v13018_v9  ;;  %v704_v19 = vadd.s32 4294967294, %v13029_v4 }
 0x1f4   :  { %v633_v11 = vpop.f32.mrb[29].mxu1  ;;  %v1047_v16 = vpop.f32.mrb[61].mxu0  ;;  %17208 = vst [vmem:[#allocation24_spill] sm:$0xff] %v13066_v6  ;;  %vm13127_vm1 = vmand %vm17220_vm15, %vm13061_vm7  ;;  %vm17227_vm7 = vcmp.eq.s32.totalorder %v12824_v31, %v12991_v60  ;;  %v17234_v2 = vmov 0  ;;  %vm17243_vm15 = vcmp.lt.s32.totalorder %v703_v35, 128  ;;  %v13227_v48 = vmul.u32 2, %v13033_v23 }
 0x1f5   :  { %v10961_v50 = vpop.f32.mrb[30].mxu1  ;;  %v10995_v0 = vpop.f32.mrb[62].mxu0  ;;  %vm13133_vm6 = vmand %vm718_vm11, %vm734_vm14  ;;  %vm17233_vm14 = vcmp.eq.s32.totalorder %v12824_v31, %v13018_v9  ;;  %v13259_v9 = vld [vmem:[%s17052_s3 + $0x18] sm:$0xff]   ;;  %v13278_v39 = vadd.s32 72, %v12811_v22  ;;  %v17323_v8 = vmov 0 }
 0x1f6   :  { %v11724_v59 = vpack.c.bf16 %v10961_v50, %v10960_v3  ;;  %v11692_v20 = vpack.c.bf16 %v10995_v0, %v10994_v56  ;;  %v636_v51 = vpop.f32.mrb[31].mxu1  ;;  %v1050_v14 = vpop.f32.mrb[63].mxu0  ;;  %11687 = vmatpush3.bf16.msra.mxu1 %v17200_v37  ;;  %11719 = vmatpush3.bf16.msra.mxu0 %v17201_v44  ;;  %v13104_v50 = vmul.u32 2, %v673_v5  ;;  %v674_v0 = vand.u32 63, %v13033_v23  ;;  %vm13152_vm11 = vmand %vm17227_vm7, %vm13083_vm5 }
 0x1f7   :  { %v11720_v36 = vpack.c.bf16 %v636_v51, %v633_v11  ;;  %v11688_v13 = vpack.c.bf16 %v1050_v14, %v1047_v16  ;;  %v13092_v11 = vadd.s32 56, %v12811_v22  ;;  %v1066_v16 = vadd.s32 4294967295, %v13029_v4  ;;  %vm13165_vm10 = vmand %vm1081_vm0, %vm1097_vm13 }
 0x1f8   :  { %v17216_v51 = vpack.c.bf16 %v12928_v55, %v12916_v43  ;;  %v17217_v14 = vpack.c.bf16 %v12926_v15, %v12914_v40  ;;  %v13142_v40 = vadd.s32 4294967294, %v13009_v45  ;;  %v13145_v43 = vadd.s32 4294967295, %v13069_v12  ;;  %vm13183_vm0 = vmand %vm17233_vm14, %vm13133_vm6 }
 0x1f9   :  { %17213 = vst [vmem:[#allocation25_spill] sm:$0xff] %v13092_v11  ;;  %11689 = vmatprep.subr.bf16.mxu1 %v11688_v13  ;;  %11721 = vmatprep.subr.bf16.mxu0 %v11720_v36  ;;  %v17229_v58 = vsel %vm13152_vm11, 4294967295, %v17228_v58  ;;  %v13158_v5 = vmul.u32 2, %v12998_v41  ;;  %v13172_v44 = vadd.s32 4294967294, %v13069_v12  ;;  %v675_v34 = vand.u32 63, %v13092_v11  ;;  %vm13210_vm13 = vmand %vm17092_vm12, %vm13133_vm6 }
 0x1fa   :  { %11691 = vmatpush3.bf16.msra.mxu1 %v17216_v51  ;;  %11723 = vmatpush3.bf16.msra.mxu0 %v17217_v14  ;;  %17225 = vst [vmem:[#allocation26_spill] sm:$0xff] %v13142_v40  ;;  %17226 = vst [vmem:[#allocation27_spill] sm:$0xff] %v13145_v43  ;;  %v13176_v36 = vadd.s32 64, %v12811_v22  ;;  %v17235_v2 = vsel %vm13183_vm0, 4294967295, %v17234_v2  ;;  %v1067_v13 = vadd.s32 4294967295, %v13104_v50  ;;  %v13188_v51 = vmul.u32 2, %v674_v0 }
 0x1fb   :  { %11693 = vmatprep.subr.bf16.mxu1 %v11692_v20  ;;  %11725 = vmatprep.subr.bf16.mxu0 %v11724_v59  ;;  %v12200_v59 = vld [vmem:[%s17052_s3 + $0x10] sm:$0xff]   ;;  %17232 = vst [vmem:[#allocation28_spill] sm:$0xff] %v13172_v44  ;;  %v17236_v14 = vpack.c.bf16 %v12920_v49, %v12912_v30  ;;  %vm17238_vm14 = vcmp.eq.s32.totalorder %v12816_v26, %v12991_v60  ;;  %vm17244_vm0 = vcmp.ge.s32.totalorder %v703_v35, 0  ;;  %vm736_vm12 = vcmp.lt.s32.totalorder %v704_v19, 128 }
 0x1fc   :  { %vm13201_vm7 = vmand %vm17238_vm14, %vm13083_vm5  ;;  %vm17247_vm6 = vcmp.eq.s32.totalorder %v12824_v31, %v13066_v6  ;;  %v705_v35 = vadd.s32 4294967294, %v13104_v50  ;;  %vm17252_vm14 = vcmp.ge.s32.totalorder %v1066_v16, 0  ;;  %v13251_v0 = vadd.s32 4294967294, %v13158_v5 }
 0x1fd   :  { %v17240_v33 = vsel %vm13201_vm7, 4294967295, %v17239_v33  ;;  %vm13216_vm11 = vmand %vm17244_vm0, %vm17243_vm15  ;;  %vm17251_vm7 = vcmp.lt.s32.totalorder %v1066_v16, 128  ;;  %v13253_v15 = vmul.u32 2, %v675_v34  ;;  %v17256_v16 = vmov 1.0  }
 0x1fe   :  { %11695 = vmatpush3.bf16.msra.mxu1 %v17236_v14  ;;  %11727 = vmatpush3.bf16.msra.mxu0 %v17237_v61  ;;  %vm13234_vm15 = vmand %vm17247_vm6, %vm13165_vm10  ;;  %v13239_v61 = vadd.s32 4294967295, %v13158_v5  ;;  %17255 = vst [vmem:[#allocation30_spill] sm:$0xff] %v13251_v0  ;;  %v676_v14 = vand.u32 63, %v13176_v36  ;;  %vm1099_vm0 = vcmp.lt.s32.totalorder %v1067_v13, 128  ;;  %v1068_v60 = vadd.s32 4294967295, %v13188_v51 }
 0x1ff   :  { %10996 = vmatprep.subr.bf16.mxu1 %v12200_v59  ;;  %vm13244_vm5 = vmand %vm17252_vm14, %vm17251_vm7  ;;  %vm17257_vm7 = vcmp.eq.s32.totalorder %v12824_v31, %v13142_v40  ;;  %v17264_v3 = vmov 0  ;;  %v13315_v20 = vadd.s32 4294967295, %v13227_v48  ;;  %v13318_v29 = vmul.u32 2, %v13092_v11 }
 0x200   :  { %17250 = vst [vmem:[#allocation29_spill] sm:$0xff] %v13239_v61  ;;  %vm13272_vm14 = vmand %vm17257_vm7, %vm13216_vm11  ;;  %vm17263_vm7 = vcmp.eq.s32.totalorder %v12816_v26, %v13142_v40  ;;  %v706_v40 = vadd.s32 4294967294, %v13188_v51  ;;  %v1069_v24 = vadd.s32 4294967295, %v13253_v15  ;;  %v13344_v11 = vadd.s32 80, %v12811_v22 }
 0x201   :  { %8990 = vmatmul.mubr.msk.f32.vlgmr.msra.gmra.mrb[32].mxu1 %vm13046_vm2, %v17256_v16  ;;  %9022 = vmatmul.mubr.msk.f32.vlgmr.msra.gmra.mrb[64].mxu0 %vm13055_vm3, %v17256_v16  ;;  %vm17260_vm2 = vcmp.eq.s32.totalorder %v12816_v26, %v13066_v6  ;;  %vm13300_vm6 = vmand %vm17263_vm7, %vm13216_vm11  ;;  %17269 = vst [vmem:[#allocation31_spill] sm:$0xff] %v13315_v20  ;;  %v677_v37 = vand.u32 63, %v13278_v39  ;;  %v17282_v55 = vmov 0  ;;  %v13400_v56 = vadd.s32 4294967294, %v13227_v48 }
 0x202   :  { %8991 = vmatprep.mubr.msk.f32.mxu1 %vm13076_vm8, %v17256_v16  ;;  %9023 = vmatprep.mubr.msk.f32.mxu0 %vm13099_vm4, %v17256_v16  ;;  %vm13291_vm3 = vmand %vm17260_vm2, %vm13165_vm10  ;;  %v17265_v3 = vsel %vm13300_vm6, 4294967295, %v17264_v3  ;;  %vm17266_vm8 = vcmp.ge.s32.totalorder %v704_v19, 0  ;;  %v17271_v19 = vmov 0  ;;  %vm737_vm2 = vcmp.lt.s32.totalorder %v705_v35, 128 }
 0x203   :  { %vm13306_vm4 = vmand %vm17266_vm8, %vm736_vm12  ;;  %vm17270_vm12 = vcmp.eq.s32.totalorder %v12824_v31, %v13145_v43  ;;  %vm721_vm8 = vcmp.ge.s32.totalorder %v705_v35, 0  ;;  %10997 = vmatpush3.bf16.msra.mxu1 %v12200_v59  ;;  %vm17273_vm10 = vcmp.ge.s32.totalorder %v1067_v13, 0  ;;  %v13362_v13 = vmul.u32 2, %v676_v14  ;;  %17289 = vst [vmem:[#allocation32_spill] sm:$0xff] %v13400_v56 }
 0x204   :  { %vm13325_vm11 = vmand %vm17270_vm12, %vm13244_vm5  ;;  %11030 = vmatprep.subr.bf16.mxu1 %v13259_v9  ;;  %v13403_v14 = vadd.s32 4294967295, %v13318_v29  ;;  %v707_v54 = vadd.s32 4294967294, %v13253_v15  ;;  %v13427_v23 = vmul.u32 2, %v13176_v36  ;;  %v678_v41 = vand.u32 63, %v13344_v11 }
 0x205   :  { %v17272_v19 = vsel %vm13325_vm11, 4294967295, %v17271_v19  ;;  %vm13334_vm6 = vmand %vm17273_vm10, %vm1099_vm0  ;;  %8992 = vmatmul.mubr.msk.f32.gmra.mrb[34].mxu1 %vm13118_vm9, %v17256_v16  ;;  %9024 = vmatmul.mubr.msk.f32.gmra.mrb[66].mxu0 %vm13127_vm1, %v17256_v16  ;;  %vm17276_vm0 = vcmp.eq.s32.totalorder %v12824_v31, %v13172_v44  ;;  %vm17279_vm9 = vnez %v17229_v58  ;;  %vm17280_vm1 = vnez %v17235_v2 }
 0x206   :  { %vm13358_vm10 = vmand %vm17276_vm0, %vm13306_vm4  ;;  %8993 = vmatprep.mubr.msk.f32.mxu1 %vm17279_vm9, %v17256_v16  ;;  %9025 = vmatprep.mubr.msk.f32.mxu0 %vm17280_vm1, %v17256_v16  ;;  %vm17281_vm0 = vcmp.eq.s32.totalorder %v12816_v26, %v13145_v43  ;;  %vm17284_vm11 = vcmp.eq.s32.totalorder %v12816_v26, %v13172_v44  ;;  %v17285_v58 = vmov 0  ;;  %17290 = vst [vmem:[#allocation33_spill] sm:$0xff] %v13403_v14  ;;  %vm17294_vm1 = vcmp.lt.s32.totalorder %v1068_v60, 128 }
 0x207   :  { %vm13376_vm7 = vmand %vm17281_vm0, %vm13244_vm5  ;;  %vm17295_vm5 = vcmp.ge.s32.totalorder %v1068_v60, 0  ;;  %v13424_v43 = vadd.s32 4294967294, %v13318_v29  ;;  %vm1101_vm0 = vcmp.lt.s32.totalorder %v1069_v24, 128  ;;  %v1070_v36 = vadd.s32 4294967295, %v13362_v13 }
 0x208   :  { %v17283_v55 = vsel %vm13376_vm7, 4294967295, %v17282_v55  ;;  %vm13385_vm12 = vmand %vm17284_vm11, %vm13306_vm4  ;;  %vm17291_vm4 = vcmp.eq.s32.totalorder %v12824_v31, %v13239_v61  ;;  %vm722_vm11 = vcmp.ge.s32.totalorder %v706_v40, 0  ;;  %v13446_v17 = vmul.u32 2, %v677_v37 }
 0x209   :  { %v17286_v58 = vsel %vm13385_vm12, 4294967295, %v17285_v58  ;;  %vm13391_vm9 = vmand %vm721_vm8, %vm737_vm2  ;;  %vm738_vm8 = vcmp.lt.s32.totalorder %v706_v40, 128  ;;  %17298 = vst [vmem:[#allocation34_spill] sm:$0xff] %v13424_v43  ;;  %9026 = vmatmul.mubr.msk.f32.gmra.mrb[68].mxu0 %vm13210_vm13, %v17256_v16  ;;  %vm17303_vm13 = vcmp.eq.s32.totalorder %v12816_v26, %v13239_v61  ;;  %v708_v34 = vadd.s32 4294967294, %v13362_v13 }
 0x20a   :  { %vm13410_vm2 = vmand %vm17291_vm4, %vm13334_vm6  ;;  %vm17299_vm4 = vnez %v17240_v33  ;;  %v13449_v33 = vadd.s32 88, %v12811_v22  ;;  %9027 = vmatprep.mubr.msk.f32.mxu0 %vm13272_vm14, %v17256_v16  ;;  %v13498_v37 = vmul.u32 2, %v13278_v39  ;;  %vm17314_vm14 = vcmp.ge.s32.totalorder %v1069_v24, 0 }
 0x20b   :  { %vm13419_vm12 = vmand %vm17295_vm5, %vm17294_vm1  ;;  %8994 = vmatmul.mubr.msk.f32.gmra.mrb[36].mxu1 %vm17299_vm4, %v17256_v16  ;;  %vm17300_vm5 = vcmp.eq.s32.totalorder %v12824_v31, %v13251_v0  ;;  %v13512_v61 = vadd.s32 4294967294, %v13427_v23  ;;  %v13514_v18 = vmul.u32 2, %v678_v41  ;;  %v1071_v41 = vadd.s32 4294967295, %v13446_v17 }
 0x20c   :  { %vm13441_vm1 = vmand %vm17300_vm5, %vm13391_vm9  ;;  %8995 = vmatprep.mubr.msk.f32.mxu1 %vm13234_vm15, %v17256_v16  ;;  %vm17306_vm5 = vcmp.eq.s32.totalorder %v12816_v26, %v13251_v0  ;;  %v13509_v0 = vadd.s32 4294967295, %v13427_v23  ;;  %v679_v39 = vand.u32 63, %v13449_v33  ;;  %v13571_v59 = vadd.s32 96, %v12811_v22 }
 0x20d   :  { %vm13462_vm4 = vmand %vm17303_vm13, %vm13334_vm6  ;;  %vm17325_vm13 = vcmp.eq.s32.totalorder %v12816_v26, %v13400_v56  ;;  %v13583_v6 = vadd.s32 4294967295, %v13498_v37  ;;  %v710_v27 = vadd.s32 4294967294, %v13514_v18  ;;  %v789_v60 = vadd.s32 4294967294, %v13498_v37 }
 0x20e   :  { %vm13471_vm7 = vmand %vm17306_vm5, %vm13391_vm9  ;;  %vm17311_vm9 = vcmp.eq.s32.totalorder %v12824_v31, %v13315_v20  ;;  %v13615_v63 = vmul.u32 2, %v679_v39  ;;  %v680_v39 = vand.u32 63, %v13571_v59  ;;  %v17368_v49 = vmov 0 }
 0x20f   :  { %vm13477_vm15 = vmand %vm722_vm11, %vm738_vm8  ;;  %vm739_vm8 = vcmp.lt.s32.totalorder %v707_v54, 128  ;;  %8996 = vmatmul.mubr.msk.f32.gmra.mrb[38].mxu1 %vm13291_vm3, %v17256_v16  ;;  %vm17321_vm3 = vnez %v17272_v19  ;;  %v13568_v19 = vmul.u32 2, %v13344_v11  ;;  %v709_v11 = vadd.s32 4294967294, %v13446_v17 }
 0x210   :  { %vm13492_vm5 = vmand %vm17311_vm9, %vm13419_vm12  ;;  %8997 = vmatprep.mubr.msk.f32.mxu1 %vm17321_vm3, %v17256_v16  ;;  %17343 = vst [vmem:[#allocation35_spill] sm:$0xff] %v13615_v63  ;;  %v13726_v40 = vmul.u32 2, %v680_v39  ;;  %v681_v39 = vand.u32 63, %v13676_v32  ;;  %v17409_v24 = vmov 0 }
 0x211   :  { %vm13502_vm6 = vmand %vm17314_vm14, %vm1101_vm0  ;;  %vm17317_vm0 = vnez %v17265_v3  ;;  %vm17318_vm14 = vcmp.eq.s32.totalorder %v12824_v31, %v13400_v56  ;;  %v17326_v3 = vmov 0  ;;  %v13651_v2 = vadd.s32 4294967295, %v13568_v19 }
 0x212   :  { %9028 = vmatmul.mubr.msk.f32.gmra.mrb[70].mxu0 %vm17317_vm0, %v17256_v16  ;;  %vm13527_vm9 = vmand %vm17318_vm14, %vm13477_vm15  ;;  %vm17322_vm0 = vcmp.eq.s32.totalorder %v12816_v26, %v13315_v20  ;;  %v1072_v20 = vadd.s32 4294967295, %v13514_v18  ;;  %v790_v44 = vadd.s32 4294967294, %v13568_v19  ;;  %v13826_v56 = vmul.u32 2, %v681_v39 }
 0x213   :  { %9029 = vmatprep.mubr.msk.f32.mxu0 %vm13358_vm10, %v17256_v16  ;;  %vm13544_vm14 = vmand %vm17322_vm0, %vm13419_vm12  ;;  %vm17328_vm10 = vcmp.ge.s32.totalorder %v707_v54, 0  ;;  %v17332_v54 = vmov 0  ;;  %vm17334_vm0 = vcmp.lt.s32.totalorder %v1070_v36, 128  ;;  %vm17335_vm12 = vcmp.ge.s32.totalorder %v1070_v36, 0 }
 0x214   :  { %v17324_v8 = vsel %vm13544_vm14, 4294967295, %v17323_v8  ;;  %vm13553_vm11 = vmand %vm17325_vm13, %vm13477_vm15  ;;  %vm17331_vm15 = vcmp.eq.s32.totalorder %v12824_v31, %v13403_v14  ;;  %v17341_v36 = vmov 0  ;;  %v664_v39 = vadd.s32 120, %v12811_v22 }
 0x215   :  { %v17327_v3 = vsel %vm13553_vm11, 4294967295, %v17326_v3  ;;  %vm13559_vm3 = vmand %vm17328_vm10, %vm739_vm8  ;;  %vm17338_vm10 = vnez %v17283_v55  ;;  %v17345_v55 = vmov 0 }
 0x216   :  { %vm13578_vm13 = vmand %vm17331_vm15, %vm13502_vm6  ;;  %8998 = vmatmul.mubr.msk.f32.gmra.mrb[40].mxu1 %vm17338_vm10, %v17256_v16  ;;  %vm17344_vm10 = vcmp.eq.s32.totalorder %v12816_v26, %v13403_v14  ;;  %v13673_v14 = vmul.u32 2, %v13449_v33  ;;  %v1073_v33 = vadd.s32 4294967295, %v13615_v63 }
 0x217   :  { %v17333_v54 = vsel %vm13578_vm13, 4294967295, %v17332_v54  ;;  %vm13588_vm11 = vmand %vm17335_vm12, %vm17334_vm0  ;;  %vm17339_vm12 = vnez %v17286_v58  ;;  %vm17340_vm0 = vcmp.eq.s32.totalorder %v12824_v31, %v13424_v43  ;;  %8999 = vmatprep.mubr.msk.f32.mxu1 %vm13410_vm2, %v17256_v16  ;;  %v17348_v58 = vmov 0 }
 0x218   :  { %9030 = vmatmul.mubr.msk.f32.gmra.mrb[72].mxu0 %vm17339_vm12, %v17256_v16  ;;  %vm13610_vm14 = vmand %vm17340_vm0, %vm13559_vm3  ;;  %vm17347_vm0 = vcmp.eq.s32.totalorder %v12816_v26, %v13424_v43  ;;  %vm17350_vm2 = vcmp.lt.s32.totalorder %v708_v34, 128  ;;  %vm1104_vm13 = vcmp.lt.s32.totalorder %v1072_v20, 128  ;;  %v1137_v35 = vadd.s32 4294967295, %v13673_v14 }
 0x219   :  { %v17342_v36 = vsel %vm13610_vm14, 4294967295, %v17341_v36  ;;  %9031 = vmatprep.mubr.msk.f32.mxu0 %vm13441_vm1, %v17256_v16  ;;  %vm13628_vm12 = vmand %vm17344_vm10, %vm13502_vm6  ;;  %vm17351_vm1 = vcmp.ge.s32.totalorder %v708_v34, 0  ;;  %vm17357_vm6 = vcmp.lt.s32.totalorder %v1071_v41, 128  ;;  %vm742_vm14 = vcmp.lt.s32.totalorder %v710_v27, 128 }
 0x21a   :  { %v17346_v55 = vsel %vm13628_vm12, 4294967295, %v17345_v55  ;;  %vm13637_vm8 = vmand %vm17347_vm0, %vm13559_vm3  ;;  %vm17354_vm3 = vcmp.eq.s32.totalorder %v12824_v31, %v13509_v0  ;;  %vm1161_vm0 = vcmp.eq.s32.totalorder %v12824_v31, %v13583_v6  ;;  %9000 = vmatmul.mubr.msk.f32.gmra.mrb[42].mxu1 %vm13462_vm4, %v17256_v16  ;;  %v663_v43 = vadd.s32 112, %v12811_v22 }
 0x21b   :  { %v17349_v58 = vsel %vm13637_vm8, 4294967295, %v17348_v58  ;;  %vm13643_vm15 = vmand %vm17351_vm1, %vm17350_vm2  ;;  %vm725_vm2 = vcmp.ge.s32.totalorder %v709_v11, 0  ;;  %vm741_vm1 = vcmp.lt.s32.totalorder %v709_v11, 128  ;;  %vm17358_vm8 = vcmp.ge.s32.totalorder %v1071_v41, 0  ;;  %9001 = vmatprep.mubr.msk.f32.mxu1 %vm13492_vm5, %v17256_v16 }
 0x21c   :  { %vm13659_vm10 = vmand %vm17354_vm3, %vm13588_vm11  ;;  %9032 = vmatmul.mubr.msk.f32.gmra.mrb[74].mxu0 %vm13471_vm7, %v17256_v16  ;;  %vm17364_vm7 = vcmp.eq.s32.totalorder %v12816_v26, %v13509_v0  ;;  %v711_v0 = vadd.s32 4294967294, %v13615_v63  ;;  %v13771_v63 = vmul.u32 2, %v13571_v59  ;;  %v1074_v59 = vadd.s32 4294967295, %v13726_v40 }
 0x21d   :  { %vm13668_vm12 = vmand %vm17358_vm8, %vm17357_vm6  ;;  %vm17361_vm8 = vcmp.eq.s32.totalorder %v12824_v31, %v13512_v61  ;;  %9033 = vmatprep.mubr.msk.f32.mxu0 %vm13527_vm9, %v17256_v16  ;;  %v1075_v11 = vadd.s32 4294967295, %v13826_v56  ;;  %v14009_v41 = vmul.u32 2, %v664_v39 }
 0x21e   :  { %vm13689_vm6 = vmand %vm17361_vm8, %vm13643_vm15  ;;  %vm17367_vm8 = vcmp.eq.s32.totalorder %v12816_v26, %v13512_v61  ;;  %v17372_v61 = vmov 0  ;;  %v792_v34 = vadd.s32 4294967294, %v13771_v63 }
 0x21f   :  { %vm13705_vm4 = vmand %vm17364_vm7, %vm13588_vm11  ;;  %vm815_vm11 = vcmp.eq.s32.totalorder %v12824_v31, %v789_v60 }
 0x220   :  { %vm13714_vm3 = vmand %vm17367_vm8, %vm13643_vm15  ;;  %vm1160_vm15 = vcmp.eq.s32.totalorder %v12816_v26, %v13583_v6  ;;  %vm1163_vm8 = vcmp.eq.s32.totalorder %v12824_v31, %v13651_v2  ;;  %v17393_v6 = vmov 0 }
 0x221   :  { %v17369_v49 = vsel %vm13714_vm3, 4294967295, %v17368_v49  ;;  %vm13720_vm5 = vmand %vm725_vm2, %vm741_vm1  ;;  %vm814_vm2 = vcmp.eq.s32.totalorder %v12816_v26, %v789_v60  ;;  %vm17374_vm1 = vcmp.ge.s32.totalorder %v1072_v20, 0  ;;  %vm17377_vm3 = vcmp.ge.s32.totalorder %v710_v27, 0 }
 0x222   :  { %vm13733_vm9 = vmand %vm1161_vm0, %vm13668_vm12  ;;  %v17382_v27 = vmov 0  ;;  %v791_v20 = vadd.s32 4294967294, %v13673_v14  ;;  %v683_v60 = vand.u32 63, %v664_v39 }
 0x223   :  { %v17373_v61 = vsel %vm13733_vm9, 4294967295, %v17372_v61  ;;  %vm13742_vm7 = vmand %vm17374_vm1, %vm1104_vm13  ;;  %vm17380_vm13 = vnez %v17324_v8  ;;  %vm17381_vm1 = vnez %v17327_v3  ;;  %v17386_v8 = vmov 0 }
 0x224   :  { %vm13750_vm0 = vmand %vm17377_vm3, %vm742_vm14  ;;  %9002 = vmatmul.mubr.msk.f32.gmra.mrb[44].mxu1 %vm17380_vm13, %v17256_v16  ;;  %9034 = vmatmul.mubr.msk.f32.gmra.mrb[76].mxu0 %vm17381_vm1, %v17256_v16  ;;  %vm17384_vm13 = vnez %v17333_v54  ;;  %vm17385_vm1 = vnez %v17342_v36  ;;  %v17388_v3 = vmov 0  ;;  %vm743_vm9 = vcmp.lt.s32.totalorder %v711_v0, 128 }
 0x225   :  { %vm13765_vm14 = vmand %vm815_vm11, %vm13720_vm5  ;;  %9003 = vmatprep.mubr.msk.f32.mxu1 %vm17384_vm13, %v17256_v16  ;;  %9035 = vmatprep.mubr.msk.f32.mxu0 %vm17385_vm1, %v17256_v16  ;;  %vm727_vm13 = vcmp.ge.s32.totalorder %v711_v0, 0  ;;  %v17390_v54 = vmov 0  ;;  %vm816_vm1 = vcmp.eq.s32.totalorder %v12816_v26, %v790_v44  ;;  %v712_v36 = vadd.s32 4294967294, %v13726_v40 }
 0x226   :  { %v17383_v27 = vsel %vm13765_vm14, 4294967295, %v17382_v27  ;;  %vm13784_vm11 = vmand %vm1160_vm15, %vm13668_vm12  ;;  %v13869_v0 = vmul.u32 2, %v13676_v32 }
 0x227   :  { %v17387_v8 = vsel %vm13784_vm11, 4294967295, %v17386_v8  ;;  %vm13792_vm3 = vmand %vm814_vm2, %vm13720_vm5  ;;  %vm17392_vm5 = vcmp.eq.s32.totalorder %v12824_v31, %v790_v44  ;;  %vm1162_vm2 = vcmp.eq.s32.totalorder %v12816_v26, %v13651_v2  ;;  %v1138_v44 = vadd.s32 4294967295, %v13771_v63 }
 0x228   :  { %v17389_v3 = vsel %vm13792_vm3, 4294967295, %v17388_v3  ;;  %vm13803_vm12 = vmand %vm1163_vm8, %vm13742_vm7  ;;  %vm17395_vm3 = vcmp.lt.s32.totalorder %v1073_v33, 128  ;;  %vm17396_vm8 = vcmp.ge.s32.totalorder %v1073_v33, 0  ;;  %v682_v33 = vand.u32 63, %v663_v43 }
 0x229   :  { %v17391_v54 = vsel %vm13803_vm12, 4294967295, %v17390_v54  ;;  %vm13811_vm15 = vmand %vm17392_vm5, %vm13750_vm0  ;;  %vm1165_vm12 = vcmp.eq.s32.totalorder %v12824_v31, %v1137_v35  ;;  %vm17399_vm5 = vnez %v17346_v55  ;;  %v17427_v2 = vmov 0 }
 0x22a   :  { %v17394_v6 = vsel %vm13811_vm15, 4294967295, %v17393_v6  ;;  %vm13821_vm11 = vmand %vm17396_vm8, %vm17395_vm3  ;;  %9004 = vmatmul.mubr.msk.f32.gmra.mrb[46].mxu1 %vm17399_vm5, %v17256_v16  ;;  %vm17400_vm15 = vnez %v17349_v58  ;;  %vm819_vm3 = vcmp.eq.s32.totalorder %v12824_v31, %v791_v20 }
 0x22b   :  { %9036 = vmatmul.mubr.msk.f32.gmra.mrb[78].mxu0 %vm17400_vm15, %v17256_v16  ;;  %vm13834_vm14 = vmand %vm727_vm13, %vm743_vm9  ;;  %9005 = vmatprep.mubr.msk.f32.mxu1 %vm13659_vm10, %v17256_v16  ;;  %vm1090_vm13 = vcmp.ge.s32.totalorder %v1074_v59, 0  ;;  %vm1106_vm15 = vcmp.lt.s32.totalorder %v1074_v59, 128  ;;  %v17423_v59 = vmov 0 }
 0x22c   :  { %9037 = vmatprep.mubr.msk.f32.mxu0 %vm13689_vm6, %v17256_v16  ;;  %vm13848_vm8 = vmand %vm1162_vm2, %vm13742_vm7  ;;  %vm1164_vm6 = vcmp.eq.s32.totalorder %v12816_v26, %v1137_v35  ;;  %vm17414_vm7 = vnez %v17373_v61  ;;  %v13915_v61 = vmul.u32 2, %v682_v33  ;;  %v1139_v35 = vadd.s32 4294967295, %v13869_v0 }
 0x22d   :  { %vm13854_vm9 = vmand %vm816_vm1, %vm13750_vm0  ;;  %vm744_vm0 = vcmp.lt.s32.totalorder %v712_v36, 128  ;;  %vm17411_vm1 = vnez %v17369_v49  ;;  %v13944_v33 = vmul.u32 2, %v663_v43  ;;  %v17478_v43 = vld [vmem:[#allocation3_spill] sm:$0xff] }
 0x22e   :  { %vm13863_vm10 = vmand %vm1165_vm12, %vm13821_vm11  ;;  %vm818_vm12 = vcmp.eq.s32.totalorder %v12816_v26, %v791_v20  ;;  %9006 = vmatmul.mubr.msk.f32.gmra.mrb[48].mxu1 %vm13705_vm4, %v17256_v16  ;;  %v713_v20 = vadd.s32 4294967294, %v13826_v56  ;;  %vm17415_vm4 = vnez %v17383_v27  ;;  %v17421_v27 = vmov 0 }
 0x22f   :  { %vm13875_vm2 = vmand %vm819_vm3, %vm13834_vm14  ;;  %9038 = vmatmul.mubr.msk.f32.gmra.mrb[80].mxu0 %vm17411_vm1, %v17256_v16  ;;  %vm1167_vm3 = vcmp.eq.s32.totalorder %v12824_v31, %v1138_v44  ;;  %9007 = vmatprep.mubr.msk.f32.mxu1 %vm17414_vm7, %v17256_v16  ;;  %v794_v58 = vadd.s32 4294967294, %v13944_v33 }
 0x230   :  { %v17410_v24 = vsel %vm13875_vm2, 4294967295, %v17409_v24  ;;  %vm13889_vm5 = vmand %vm1090_vm13, %vm1106_vm15  ;;  %9039 = vmatprep.mubr.msk.f32.mxu0 %vm17415_vm4, %v17256_v16  ;;  %vm17418_vm15 = vcmp.ge.s32.totalorder %v712_v36, 0  ;;  %vm821_vm2 = vcmp.eq.s32.totalorder %v12824_v31, %v792_v34  ;;  %vm1107_vm4 = vcmp.lt.s32.totalorder %v1075_v11, 128 }
 0x231   :  { %vm13905_vm13 = vmand %vm1164_vm6, %vm13821_vm11  ;;  %v793_v36 = vadd.s32 4294967294, %v13869_v0  ;;  %vm17429_vm11 = vnez %v17391_v54  ;;  %v714_v54 = vadd.s32 4294967294, %v13915_v61 }
 0x232   :  { %vm13910_vm1 = vmand %vm17418_vm15, %vm744_vm0  ;;  %vm745_vm0 = vcmp.lt.s32.totalorder %v713_v20, 128 }
 0x233   :  { %vm13919_vm7 = vmand %vm818_vm12, %vm13834_vm14  ;;  %vm17425_vm14 = vnez %v17387_v8  ;;  %vm17426_vm12 = vnez %v17389_v3  ;;  %v1076_v3 = vadd.s32 4294967295, %v13915_v61  ;;  %v12202_v8 = vld [vmem:[%s17052_s3 + $0x20] sm:$0xff]  }
 0x234   :  { %v17422_v27 = vsel %vm13919_vm7, 4294967295, %v17421_v27  ;;  %vm13927_vm6 = vmand %vm1167_vm3, %vm13889_vm5  ;;  %9008 = vmatmul.mubr.msk.f32.gmra.mrb[50].mxu1 %vm17425_vm14, %v17256_v16  ;;  %9040 = vmatmul.mubr.msk.f32.gmra.mrb[82].mxu0 %vm17426_vm12, %v17256_v16  ;;  %vm729_vm3 = vcmp.ge.s32.totalorder %v713_v20, 0  ;;  %vm17430_vm14 = vnez %v17394_v6  ;;  %vm17431_vm12 = vcmp.eq.s32.totalorder %v12816_v26, %v1138_v44  ;;  %v17482_v6 = vld [vmem:[#allocation5_spill] sm:$0xff] }
 0x235   :  { %v17424_v59 = vsel %vm13927_vm6, 4294967295, %v17423_v59  ;;  %vm13940_vm15 = vmand %vm821_vm2, %vm13910_vm1  ;;  %9009 = vmatprep.mubr.msk.f32.mxu1 %vm17429_vm11, %v17256_v16  ;;  %9041 = vmatprep.mubr.msk.f32.mxu0 %vm17430_vm14, %v17256_v16  ;;  %vm17434_vm6 = vcmp.ge.s32.totalorder %v1075_v11, 0  ;;  %vm1169_vm11 = vcmp.eq.s32.totalorder %v12824_v31, %v1139_v35  ;;  %v13974_v44 = vmul.u32 2, %v683_v60 }
 0x236   :  { %v17428_v2 = vsel %vm13940_vm15, 4294967295, %v17427_v2  ;;  %vm13956_vm2 = vmand %vm17431_vm12, %vm13889_vm5  ;;  %vm820_vm15 = vcmp.eq.s32.totalorder %v12816_v26, %v792_v34  ;;  %vm823_vm5 = vcmp.eq.s32.totalorder %v12824_v31, %v793_v36  ;;  %v1140_v11 = vadd.s32 4294967295, %v13944_v33  ;;  %v17484_v34 = vld [vmem:[#allocation8_spill] sm:$0xff] }
 0x237   :  { %vm13963_vm7 = vmand %vm17434_vm6, %vm1107_vm4  ;;  %vm1108_vm4 = vcmp.lt.s32.totalorder %v1076_v3, 128  ;;  %v1077_v20 = vadd.s32 4294967295, %v13974_v44  ;;  %v715_v49 = vadd.s32 4294967294, %v13974_v44 }
 0x238   :  { %vm13969_vm14 = vmand %vm729_vm3, %vm745_vm0  ;;  %9010 = vmatmul.mubr.msk.f32.gmra.mrb[52].mxu1 %vm13848_vm8, %v17256_v16  ;;  %9042 = vmatmul.mubr.msk.f32.gmra.mrb[84].mxu0 %vm13854_vm9, %v17256_v16  ;;  %vm1168_vm0 = vcmp.eq.s32.totalorder %v12816_v26, %v1139_v35  ;;  %vm17441_vm8 = vnez %v17410_v24  ;;  %vm746_vm3 = vcmp.lt.s32.totalorder %v714_v54, 128  ;;  %v17446_v24 = vmov 0 }
 0x239   :  { %vm13984_vm6 = vmand %vm820_vm15, %vm13910_vm1  ;;  %9011 = vmatprep.mubr.msk.f32.mxu1 %vm13863_vm10, %v17256_v16  ;;  %9043 = vmatprep.mubr.msk.f32.mxu0 %vm17441_vm8, %v17256_v16  ;;  %vm1092_vm1 = vcmp.ge.s32.totalorder %v1076_v3, 0  ;;  %vm730_vm10 = vcmp.ge.s32.totalorder %v714_v54, 0  ;;  %v1141_v35 = vadd.s32 4294967295, %v14009_v41  ;;  %v17476_v3 = vld [vmem:[#allocation4_spill] sm:$0xff]  ;;  %v17480_v54 = vld [vmem:[#allocation6_spill] sm:$0xff] }
 0x23a   :  { %vm13998_vm9 = vmand %vm1169_vm11, %vm13963_vm7  ;;  %vm822_vm11 = vcmp.eq.s32.totalorder %v12816_v26, %v793_v36  ;;  %v795_v36 = vadd.s32 4294967294, %v14009_v41 }
 0x23b   :  { %vm14005_vm15 = vmand %vm823_vm5, %vm13969_vm14  ;;  %vm17448_vm5 = vnez %v17422_v27 }
 0x23c   :  { %vm14013_vm12 = vmand %vm1168_vm0, %vm13963_vm7  ;;  %9012 = vmatmul.mubr.msk.f32.gmra.mrb[54].mxu1 %vm13905_vm13, %v17256_v16  ;;  %9044 = vmatmul.mubr.msk.f32.gmra.mrb[86].mxu0 %vm17448_vm5, %v17256_v16  ;;  %vm1171_vm7 = vcmp.eq.s32.totalorder %v12824_v31, %v1140_v11  ;;  %vm17451_vm0 = vnez %v17424_v59  ;;  %vm1170_vm5 = vcmp.eq.s32.totalorder %v12816_v26, %v1140_v11  ;;  %v17457_v59 = vmov 0  ;;  %v17486_v11 = vld [vmem:[#allocation7_spill] sm:$0xff] }
 0x23d   :  { %v17447_v24 = vsel %vm14013_vm12, 4294967295, %v17446_v24  ;;  %vm14025_vm8 = vmand %vm1092_vm1, %vm1108_vm4  ;;  %9013 = vmatprep.mubr.msk.f32.mxu1 %vm17451_vm0, %v17256_v16  ;;  %vm17452_vm12 = vnez %v17428_v2  ;;  %vm825_vm1 = vcmp.eq.s32.totalorder %v12824_v31, %v794_v58 }
 0x23e   :  { %9045 = vmatprep.mubr.msk.f32.mxu0 %vm17452_vm12, %v17256_v16  ;;  %vm14037_vm13 = vmand %vm730_vm10, %vm746_vm3  ;;  %vm1093_vm10 = vcmp.ge.s32.totalorder %v1077_v20, 0  ;;  %vm1109_vm3 = vcmp.lt.s32.totalorder %v1077_v20, 128  ;;  %vm731_vm12 = vcmp.ge.s32.totalorder %v715_v49, 0  ;;  %v17509_v20 = vld [vmem:[#allocation10_spill] sm:$0xff] }
 0x23f   :  { %vm14044_vm4 = vmand %vm822_vm11, %vm13969_vm14  ;;  %vm747_vm11 = vcmp.lt.s32.totalorder %v715_v49, 128 }
 0x240   :  { %vm14052_vm0 = vmand %vm1171_vm7, %vm14025_vm8  ;;  %9014 = vmatmul.mubr.msk.f32.gmra.mrb[56].mxu1 %vm13956_vm2, %v17256_v16  ;;  %9046 = vmatmul.mubr.msk.f32.gmra.mrb[88].mxu0 %vm13984_vm6, %v17256_v16  ;;  %vm824_vm7 = vcmp.eq.s32.totalorder %v12816_v26, %v794_v58  ;;  %vm1173_vm6 = vcmp.eq.s32.totalorder %v12824_v31, %v1141_v35 }
 0x241   :  { %v17458_v59 = vsel %vm14052_vm0, 4294967295, %v17457_v59  ;;  %vm857_vm14 = vmand %vm825_vm1, %vm14037_vm13  ;;  %9015 = vmatprep.mubr.msk.f32.mxu1 %vm13998_vm9, %v17256_v16  ;;  %9047 = vmatprep.mubr.msk.f32.mxu0 %vm14005_vm15, %v17256_v16  ;;  %vm827_vm9 = vcmp.eq.s32.totalorder %v12824_v31, %v795_v36  ;;  %vm17463_vm15 = vnez %v17447_v24 }
 0x242   :  { %vm1202_vm2 = vmand %vm1170_vm5, %vm14025_vm8  ;;  %vm17464_vm5 = vnez %v17458_v59 }
 0x243   :  { %vm14074_vm0 = vmand %vm1093_vm10, %vm1109_vm3  ;;  %vm1172_vm3 = vcmp.eq.s32.totalorder %v12816_v26, %v1141_v35 }
 0x244   :  { %vm14079_vm1 = vmand %vm731_vm12, %vm747_vm11  ;;  %9016 = vmatmul.mubr.msk.f32.gmra.mrb[58].mxu1 %vm17463_vm15, %v17256_v16  ;;  %9048 = vmatmul.mubr.msk.f32.gmra.mrb[90].mxu0 %vm14044_vm4, %v17256_v16  ;;  %vm826_vm11 = vcmp.eq.s32.totalorder %v12816_v26, %v795_v36 }
 0x245   :  { %vm856_vm8 = vmand %vm824_vm7, %vm14037_vm13  ;;  %9017 = vmatprep.mubr.msk.f32.mxu1 %vm17464_vm5, %v17256_v16  ;;  %9049 = vmatprep.mubr.msk.f32.mxu0 %vm857_vm14, %v17256_v16  ;;  %vm17465_vm14 = vcmask 130048  }
 0x246   :  { %vm1205_vm10 = vmand %vm1173_vm6, %vm14074_vm0 }
 0x247   :  { %vm859_vm12 = vmand %vm827_vm9, %vm14079_vm1 }
 0x248   :  { %9018 = vmatmul.mubr.msk.f32.gmra.mrb[60].mxu1 %vm1202_vm2, %v17256_v16  ;;  %9050 = vmatmul.mubr.msk.f32.gmra.mrb[92].mxu0 %vm856_vm8, %v17256_v16  ;;  %vm1204_vm13 = vmand %vm1172_vm3, %vm14074_vm0 }
 0x249   :  { %9019 = vmatprep.mubr.msk.f32.mxu1 %vm1205_vm10, %v17256_v16  ;;  %9051 = vmatprep.mubr.msk.f32.mxu0 %vm859_vm12, %v17256_v16  ;;  %vm858_vm4 = vmand %vm826_vm11, %vm14079_vm1 }
 0x24a   :  { %vm17466_vm0 = vmmov %vm17465_vm14 }
 0x24b   :  { %vm17467_vm2 = vmmov %vm17466_vm0 }
 0x24c   :  { %9020 = vmatmul.mubr.msk.f32.gmra.mrb[62].mxu1 %vm1204_vm13, %v17256_v16  ;;  %9052 = vmatmul.mubr.msk.f32.gmra.mrb[94].mxu0 %vm858_vm4, %v17256_v16  ;;  %vm17468_vm7 = vmmov %vm17466_vm0 }
 0x24d   :  { %10998 = vmatprep.mubr.msk.bf16.mxu1 %vm17465_vm14, %v12689_v10  ;;  %vm17469_vm6 = vmmov %vm17466_vm0 }
 0x24e   :  { %vm17470_vm1 = vmmov %vm17466_vm0 }
 0x24f   :  { %vm17471_vm9 = vmmov %vm17466_vm0 }
 0x250   :  { %10999 = vmatmul.mubr.msk.bf16.vlgmr.msra.gmra.mrb[64].mxu1 %vm17466_vm0, %v12687_v7  ;;  %vm17472_vm15 = vmmov %vm17466_vm0 }
 0x251   :  { %11002 = vmatprep.mubr.msk.bf16.mxu1 %vm17467_vm2, %v12705_v28  ;;  %11031 = vmatpush3.bf16.msra.mxu1 %v13259_v9  ;;  %vm17473_vm8 = vmmov %vm17466_vm0  ;;  %v17474_v9 = vld [vmem:[#allocation2_spill] sm:$0xff] }
 0x252   :  { %11064 = vmatprep.subr.bf16.mxu1 %v12202_v8  ;;  %vm17475_vm5 = vmmov %vm17466_vm0 }
 0x253   :  { %vm17477_vm10 = vmmov %vm17466_vm0 }
 0x254   :  { %vm17479_vm3 = vmmov %vm17466_vm0 }
 0x255   :  { %vm17481_vm12 = vmmov %vm17466_vm0 }
 0x256   :  { %vm17483_vm11 = vmmov %vm17466_vm0 }
 0x257   :  { %vm17485_vm13 = vmmov %vm17466_vm0 }
 0x258   :  { %11003 = vmatmul.mubr.msk.bf16.gmra.mrb[68].mxu1 %vm17468_vm7, %v12703_v25  ;;  %vm17487_vm4 = vmmov %vm17466_vm0 }
 0x259   :  { %11006 = vmatprep.mubr.msk.bf16.mxu1 %vm17469_vm6, %v12721_v46  ;;  %vm17488_vm14 = vmmov %vm17466_vm0 }
 0x25a   :  { %vm17489_vm2 = vmmov %vm17466_vm0 }
 0x25b   :  { %vm17490_vm7 = vmmov %vm17466_vm0 }
 0x25c   :  { %vm17491_vm6 = vmmov %vm17466_vm0 }
 0x260   :  { %11007 = vmatmul.mubr.msk.bf16.gmra.mrb[72].mxu1 %vm17470_vm1, %v12719_v42  ;;  %vm17492_vm1 = vmmov %vm17466_vm0 }
 0x261   :  { %11010 = vmatprep.mubr.msk.bf16.mxu1 %vm17471_vm9, %v12737_v1  ;;  %vm17493_vm9 = vmmov %vm17466_vm0 }
 0x268   :  { %11011 = vmatmul.mubr.msk.bf16.gmra.mrb[76].mxu1 %vm17472_vm15, %v12735_v62  ;;  %vm17494_vm15 = vmmov %vm17466_vm0 }
 0x269   :  { %11014 = vmatprep.mubr.msk.bf16.mxu1 %vm17473_vm8, %v12753_v21  ;;  %vm17495_vm8 = vmmov %vm17466_vm0 }
 0x270   :  { %11015 = vmatmul.mubr.msk.bf16.gmra.mrb[80].mxu1 %vm17475_vm5, %v17474_v9  ;;  %vm17496_vm5 = vmmov %vm17466_vm0 }
 0x271   :  { %11018 = vmatprep.mubr.msk.bf16.mxu1 %vm17477_vm10, %v17476_v3  ;;  %vm17497_vm10 = vmmov %vm17466_vm0 }
 0x278   :  { %11019 = vmatmul.mubr.msk.bf16.gmra.mrb[84].mxu1 %vm17479_vm3, %v17478_v43  ;;  %vm17498_vm3 = vmmov %vm17466_vm0 }
 0x279   :  { %11022 = vmatprep.mubr.msk.bf16.mxu1 %vm17481_vm12, %v17480_v54  ;;  %vm17499_vm12 = vmmov %vm17466_vm0 }
 0x280   :  { %11023 = vmatmul.mubr.msk.bf16.gmra.mrb[88].mxu1 %vm17483_vm11, %v17482_v6  ;;  %vm17500_vm11 = vmmov %vm17466_vm0 }
 0x281   :  { %11026 = vmatprep.mubr.msk.bf16.mxu1 %vm17485_vm13, %v17484_v34  ;;  %vm17501_vm13 = vmmov %vm17466_vm0 }
 0x288   :  { %11027 = vmatmul.mubr.msk.bf16.gmra.mrb[92].mxu1 %vm17487_vm4, %v17486_v11  ;;  %vm17502_vm4 = vmmov %vm17466_vm0 }
 0x289   :  { %11032 = vmatprep.mubr.msk.bf16.mxu1 %vm17488_vm14, %v12689_v10  ;;  %vm17503_vm14 = vmmov %vm17466_vm0 }
 0x290   :  { %11033 = vmatmul.mubr.msk.bf16.vlgmr.msra.gmra.mrb[96].mxu1 %vm17466_vm0, %v12687_v7 }
 0x291   :  { %11036 = vmatprep.mubr.msk.bf16.mxu1 %vm17489_vm2, %v12705_v28  ;;  %11065 = vmatpush3.bf16.msra.mxu1 %v12202_v8  ;;  %vm17504_vm2 = vmmov %vm17466_vm0 }
 0x298   :  { %11037 = vmatmul.mubr.msk.bf16.gmra.mrb[100].mxu1 %vm17490_vm7, %v12703_v25  ;;  %vm17505_vm7 = vmmov %vm17466_vm0 }
 0x299   :  { %11040 = vmatprep.mubr.msk.bf16.mxu1 %vm17491_vm6, %v12721_v46  ;;  %vm17506_vm6 = vmmov %vm17466_vm0 }
 0x2a0   :  { %11041 = vmatmul.mubr.msk.bf16.gmra.mrb[104].mxu1 %vm17492_vm1, %v12719_v42  ;;  %vm17507_vm1 = vmmov %vm17466_vm0 }
 0x2a1   :  { %11044 = vmatprep.mubr.msk.bf16.mxu1 %vm17493_vm9, %v12737_v1  ;;  %vm17508_vm9 = vmmov %vm17466_vm0 }
 0x2a8   :  { %11045 = vmatmul.mubr.msk.bf16.gmra.mrb[108].mxu1 %vm17494_vm15, %v12735_v62  ;;  %vm1698_vm15 = vcmp.ge.s32.totalorder %v17509_v20, 0 }
 0x2a9   :  { %11048 = vmatprep.mubr.msk.bf16.mxu1 %vm17495_vm8, %v12753_v21  ;;  %vm1714_vm8 = vcmp.lt.s32.totalorder %v17509_v20, 128 }
 0x2b0   :  { %11049 = vmatmul.mubr.msk.bf16.gmra.mrb[112].mxu1 %vm17496_vm5, %v17474_v9  ;;  %vm14196_vm5 = vmand %vm1698_vm15, %vm1714_vm8 }
 0x2b1   :  { %11052 = vmatprep.mubr.msk.bf16.mxu1 %vm17497_vm10, %v17476_v3 }
 0x2b8   :  { %11053 = vmatmul.mubr.msk.bf16.gmra.mrb[116].mxu1 %vm17498_vm3, %v17478_v43 }
 0x2b9   :  { %11056 = vmatprep.mubr.msk.bf16.mxu1 %vm17499_vm12, %v17480_v54  ;;  %vm17514_vm12 = vmmov %vm17466_vm0 }
 0x2c0   :  { %11057 = vmatmul.mubr.msk.bf16.gmra.mrb[120].mxu1 %vm17500_vm11, %v17482_v6  ;;  %vm17515_vm11 = vmmov %vm17466_vm0 }
 0x2c1   :  { %11060 = vmatprep.mubr.msk.bf16.mxu1 %vm17501_vm13, %v17484_v34  ;;  %vm17518_vm13 = vmmov %vm17466_vm0 }
 0x2c8   :  { %11061 = vmatmul.mubr.msk.bf16.gmra.mrb[124].mxu1 %vm17502_vm4, %v17486_v11  ;;  %vm17519_vm4 = vmmov %vm17466_vm0 }
 0x2c9   :  { %11066 = vmatprep.mubr.msk.bf16.mxu1 %vm17503_vm14, %v12689_v10  ;;  %vm17522_vm14 = vmmov %vm17466_vm0 }
 0x2d0   :  { %11067 = vmatmul.mubr.msk.bf16.vlgmr.msra.gmra.mrb[128].mxu1 %vm17466_vm0, %v12687_v7 }
 0x2d1   :  { %11070 = vmatprep.mubr.msk.bf16.mxu1 %vm17504_vm2, %v12705_v28  ;;  %v17512_v28 = vld [vmem:[#allocation11_spill] sm:$0xff]  ;;  %vm17525_vm2 = vmmov %vm17466_vm0 }
 0x2d2   :  { %vm1747_vm10 = vcmp.eq.s32.totalorder %v12824_v31, %v17512_v28  ;;  %vm17163_vm15 = vcmp.eq.s32.totalorder %v12816_v26, %v17512_v28 }
 0x2d3   :  { %vm1779_vm3 = vmand %vm1747_vm10, %vm14196_vm5  ;;  %vm1749_vm10 = vcmp.eq.s32.totalorder %v12824_v31, %v12960_v38 }
 0x2d4   :  { %v10005_v55 = vpop.f32.mrb[32].mxu1  ;;  %v10085_v10 = vpop.f32.mrb[64].mxu0  ;;  %9072 = vmatprep.mubr.msk.f32.mxu0 %vm1779_vm3, %v17256_v16  ;;  %vm1700_vm3 = vcmp.ge.s32.totalorder %v12963_v47, 0 }
 0x2d5   :  { %v10006_v58 = vpop.f32.mrb[33].mxu1  ;;  %v10086_v32 = vpop.f32.mrb[65].mxu0 }
 0x2d6   :  { %v10007_v7 = vadd.f32 %v10006_v58, %v10005_v55  ;;  %v10087_v24 = vadd.f32 %v10086_v32, %v10085_v10 }
 0x2d8   :  { %11071 = vmatmul.mubr.msk.bf16.gmra.mrb[132].mxu1 %vm17505_vm7, %v12703_v25  ;;  %vm17526_vm7 = vmmov %vm17466_vm0 }
 0x2d9   :  { %11074 = vmatprep.mubr.msk.bf16.mxu1 %vm17506_vm6, %v12721_v46  ;;  %v10008_v46 = vpop.f32.mrb[34].mxu1  ;;  %vm17529_vm6 = vmmov %vm17466_vm0 }
 0x2da   :  { %v10009_v39 = vpop.f32.mrb[35].mxu1 }
 0x2db   :  { %v10010_v30 = vadd.f32 %v10009_v39, %v10008_v46 }
 0x2de   :  { %v10011_v59 = vpop.f32.mrb[36].mxu1 }
 0x2df   :  { %v10012_v60 = vpop.f32.mrb[37].mxu1 }
 0x2e0   :  { %11075 = vmatmul.mubr.msk.bf16.gmra.mrb[136].mxu1 %vm17507_vm1, %v12719_v42  ;;  %v14202_v42 = vadd.f32 %v10087_v24, %v10007_v7  ;;  %v10013_v8 = vadd.f32 %v10012_v60, %v10011_v59  ;;  %vm1699_vm1 = vcmp.ge.s32.totalorder %v12947_v52, 0 }
 0x2e1   :  { %11078 = vmatprep.mubr.msk.bf16.mxu1 %vm17508_vm9, %v12737_v1  ;;  %v10088_v1 = vpop.f32.mrb[66].mxu0  ;;  %vm1715_vm9 = vcmp.lt.s32.totalorder %v12947_v52, 128 }
 0x2e2   :  { %17513 = vst [vmem:[#allocation2_spill] sm:$0xff] %v14202_v42  ;;  %v10089_v49 = vpop.f32.mrb[67].mxu0  ;;  %v10014_v58 = vpop.f32.mrb[38].mxu1  ;;  %vm14263_vm8 = vmand %vm1699_vm1, %vm1715_vm9  ;;  %vm17160_vm1 = vcmp.eq.s32.totalorder %v12816_v26, %v12966_v57  ;;  %v2187_v42 = vadd.s32 1, %v13915_v61 }
 0x2e3   :  { %v10090_v27 = vadd.f32 %v10089_v49, %v10088_v1  ;;  %v10091_v36 = vpop.f32.mrb[68].mxu0 }
 0x2e4   :  { %v10092_v2 = vpop.f32.mrb[69].mxu0 }
 0x2e5   :  { %v14211_v35 = vadd.f32 %v10090_v27, %v10010_v30  ;;  %v10093_v55 = vadd.f32 %v10092_v2, %v10091_v36  ;;  %v10094_v32 = vpop.f32.mrb[70].mxu0 }
 0x2e6   :  { %v10095_v7 = vpop.f32.mrb[71].mxu0 }
 0x2e7   :  { %17516 = vst [vmem:[#allocation4_spill] sm:$0xff] %v14211_v35  ;;  %v14213_v10 = vadd.f32 %v10093_v55, %v10013_v8  ;;  %v10096_v46 = vadd.f32 %v10095_v7, %v10094_v32 }
 0x2e8   :  { %11079 = vmatmul.mubr.msk.bf16.gmra.mrb[140].mxu1 %vm17514_vm12, %v12735_v62  ;;  %v10015_v62 = vpop.f32.mrb[39].mxu1  ;;  %vm1716_vm12 = vcmp.lt.s32.totalorder %v12963_v47, 128 }
 0x2e9   :  { %11082 = vmatprep.mubr.msk.bf16.mxu1 %vm17515_vm11, %v12753_v21  ;;  %17517 = vst [vmem:[#allocation3_spill] sm:$0xff] %v14213_v10  ;;  %v10016_v24 = vadd.f32 %v10015_v62, %v10014_v58  ;;  %v10017_v1 = vpop.f32.mrb[40].mxu1  ;;  %vm1778_vm11 = vmand %vm17163_vm15, %vm14196_vm5  ;;  %vm1701_vm5 = vcmp.ge.s32.totalorder %v12993_v53, 0 }
 0x2ea   :  { %v10018_v49 = vpop.f32.mrb[41].mxu1 }
 0x2eb   :  { %v14219_v21 = vadd.f32 %v10096_v46, %v10016_v24  ;;  %v10097_v39 = vpop.f32.mrb[72].mxu0  ;;  %v10019_v27 = vadd.f32 %v10018_v49, %v10017_v1 }
 0x2ec   :  { %v10098_v30 = vpop.f32.mrb[73].mxu0 }
 0x2ed   :  { %17520 = vst [vmem:[#allocation6_spill] sm:$0xff] %v14219_v21  ;;  %v10099_v59 = vadd.f32 %v10098_v30, %v10097_v39  ;;  %v10020_v60 = vpop.f32.mrb[42].mxu1 }
 0x2ee   :  { %v10021_v8 = vpop.f32.mrb[43].mxu1 }
 0x2ef   :  { %v14221_v36 = vadd.f32 %v10099_v59, %v10019_v27  ;;  %v10100_v2 = vpop.f32.mrb[74].mxu0 }
 0x2f0   :  { %11083 = vmatmul.mubr.msk.bf16.gmra.mrb[144].mxu1 %vm17518_vm13, %v17474_v9  ;;  %v10101_v55 = vpop.f32.mrb[75].mxu0  ;;  %v10022_v9 = vadd.f32 %v10021_v8, %v10020_v60  ;;  %vm1781_vm13 = vmand %vm1749_vm10, %vm14263_vm8  ;;  %vm1753_vm10 = vcmp.eq.s32.totalorder %v12824_v31, %v13009_v45 }
 0x2f1   :  { %11086 = vmatprep.mubr.msk.bf16.mxu1 %vm17519_vm4, %v17476_v3  ;;  %17521 = vst [vmem:[#allocation5_spill] sm:$0xff] %v14221_v36  ;;  %v10102_v58 = vadd.f32 %v10101_v55, %v10100_v2  ;;  %vm17161_vm4 = vcmp.eq.s32.totalorder %v12816_v26, %v12960_v38 }
 0x2f3   :  { %v14227_v3 = vadd.f32 %v10102_v58, %v10022_v9 }
 0x2f5   :  { %17523 = vst [vmem:[#allocation8_spill] sm:$0xff] %v14227_v3 }
 0x2f7   :  { %v10023_v32 = vpop.f32.mrb[44].mxu1  ;;  %v10103_v62 = vpop.f32.mrb[76].mxu0 }
 0x2f8   :  { %11087 = vmatmul.mubr.msk.bf16.gmra.mrb[148].mxu1 %vm17522_vm14, %v17478_v43  ;;  %v10024_v7 = vpop.f32.mrb[45].mxu1  ;;  %v10104_v24 = vpop.f32.mrb[77].mxu0  ;;  %vm14288_vm14 = vmand %vm1700_vm3, %vm1716_vm12  ;;  %vm1718_vm3 = vcmp.lt.s32.totalorder %v13029_v4, 128 }
 0x2f9   :  { %11090 = vmatprep.mubr.msk.bf16.mxu1 %vm17466_vm0, %v17480_v54  ;;  %v10025_v46 = vadd.f32 %v10024_v7, %v10023_v32  ;;  %v10105_v1 = vadd.f32 %v10104_v24, %v10103_v62  ;;  %vm1751_vm0 = vcmp.eq.s32.totalorder %v12824_v31, %v12966_v57  ;;  %vm1782_vm12 = vmand %vm17160_vm1, %vm14288_vm14 }
 0x2fb   :  { %v14229_v39 = vadd.f32 %v10105_v1, %v10025_v46 }
 0x2fd   :  { %17524 = vst [vmem:[#allocation7_spill] sm:$0xff] %v14229_v39  ;;  %v10026_v49 = vpop.f32.mrb[46].mxu1 }
 0x2fe   :  { %v10106_v30 = vpop.f32.mrb[78].mxu0  ;;  %v10027_v27 = vpop.f32.mrb[47].mxu1 }
 0x2ff   :  { %v10107_v59 = vpop.f32.mrb[79].mxu0  ;;  %v10028_v43 = vadd.f32 %v10027_v27, %v10026_v49 }
 0x300   :  { %11091 = vmatmul.mubr.msk.bf16.gmra.mrb[152].mxu1 %vm17525_vm2, %v17482_v6  ;;  %v10108_v60 = vadd.f32 %v10107_v59, %v10106_v30  ;;  %vm1717_vm2 = vcmp.lt.s32.totalorder %v12993_v53, 128 }
 0x301   :  { %11094 = vmatprep.mubr.msk.bf16.mxu1 %vm17526_vm7, %v17484_v34  ;;  %v10029_v2 = vpop.f32.mrb[48].mxu1  ;;  %vm1780_vm7 = vmand %vm17161_vm4, %vm14263_vm8  ;;  %vm1702_vm8 = vcmp.ge.s32.totalorder %v13029_v4, 0 }
 0x302   :  { %v14235_v54 = vadd.f32 %v10108_v60, %v10028_v43  ;;  %v10109_v8 = vpop.f32.mrb[80].mxu0  ;;  %v10030_v55 = vpop.f32.mrb[49].mxu1  ;;  %vm14311_vm9 = vmand %vm1701_vm5, %vm1717_vm2  ;;  %vm1755_vm5 = vcmp.eq.s32.totalorder %v12824_v31, %v13069_v12  ;;  %vm1719_vm2 = vcmp.lt.s32.totalorder %v13104_v50, 128 }
 0x303   :  { %v10110_v9 = vpop.f32.mrb[81].mxu0  ;;  %v10031_v58 = vadd.f32 %v10030_v55, %v10029_v2 }
 0x304   :  { %17527 = vst [vmem:[#allocation10_spill] sm:$0xff] %v14235_v54  ;;  %v10111_v32 = vadd.f32 %v10110_v9, %v10109_v8 }
 0x306   :  { %v14237_v62 = vadd.f32 %v10111_v32, %v10031_v58 }
 0x307   :  { %v10032_v7 = vpop.f32.mrb[50].mxu1  ;;  %v10112_v24 = vpop.f32.mrb[82].mxu0 }
 0x308   :  { %17528 = vst [vmem:[#allocation11_spill] sm:$0xff] %v14237_v62  ;;  %v10033_v46 = vpop.f32.mrb[51].mxu1  ;;  %v10113_v1 = vpop.f32.mrb[83].mxu0  ;;  %11095 = vmatmul.mubr.msk.bf16.gmra.mrb[156].mxu1 %vm17529_vm6, %v17486_v11  ;;  %vm1783_vm6 = vmand %vm1751_vm0, %vm14288_vm14  ;;  %vm1703_vm14 = vcmp.ge.s32.totalorder %v13104_v50, 0 }
 0x309   :  { %v10034_v6 = vadd.f32 %v10033_v46, %v10032_v7  ;;  %v10114_v49 = vadd.f32 %v10113_v1, %v10112_v24  ;;  %vm14338_vm0 = vmand %vm1702_vm8, %vm1718_vm3  ;;  %vm1757_vm3 = vcmp.eq.s32.totalorder %v12824_v31, %v13158_v5 }
 0x30a   :  { %vm14361_vm8 = vmand %vm1703_vm14, %vm1719_vm2  ;;  %vm17127_vm14 = vcmp.eq.s32.totalorder %v12816_v26, %v13158_v5 }
 0x30b   :  { %v14241_v34 = vadd.f32 %v10114_v49, %v10034_v6  ;;  %v10035_v30 = vpop.f32.mrb[52].mxu1  ;;  %v10115_v27 = vpop.f32.mrb[84].mxu0 }
 0x30c   :  { %v10036_v59 = vpop.f32.mrb[53].mxu1  ;;  %v10116_v43 = vpop.f32.mrb[85].mxu0 }
 0x30d   :  { %17530 = vst [vmem:[#allocation36_spill] sm:$0xff] %v14241_v34  ;;  %v10037_v60 = vadd.f32 %v10036_v59, %v10035_v30  ;;  %v10117_v2 = vadd.f32 %v10116_v43, %v10115_v27 }
 0x30f   :  { %v14243_v8 = vadd.f32 %v10117_v2, %v10037_v60  ;;  %v10038_v55 = vpop.f32.mrb[54].mxu1  ;;  %v10118_v9 = vpop.f32.mrb[86].mxu0 }
 0x310   :  { %v10039_v58 = vpop.f32.mrb[55].mxu1  ;;  %v10119_v32 = vpop.f32.mrb[87].mxu0 }
 0x311   :  { %17531 = vst [vmem:[#allocation37_spill] sm:$0xff] %v14243_v8  ;;  %v10040_v22 = vadd.f32 %v10039_v58, %v10038_v55  ;;  %v10120_v62 = vadd.f32 %v10119_v32, %v10118_v9 }
 0x313   :  { %v14245_v54 = vadd.f32 %v10120_v62, %v10040_v22  ;;  %v10041_v11 = vpop.f32.mrb[56].mxu1  ;;  %v10121_v7 = vpop.f32.mrb[88].mxu0 }
 0x314   :  { %v10042_v24 = vpop.f32.mrb[57].mxu1  ;;  %v10122_v46 = vpop.f32.mrb[89].mxu0 }
 0x315   :  { %17532 = vst [vmem:[#allocation38_spill] sm:$0xff] %v14245_v54  ;;  %v10043_v1 = vadd.f32 %v10042_v24, %v10041_v11  ;;  %v10123_v6 = vadd.f32 %v10122_v46, %v10121_v7 }
 0x317   :  { %v14247_v49 = vadd.f32 %v10123_v6, %v10043_v1  ;;  %v10044_v30 = vpop.f32.mrb[58].mxu1  ;;  %v10124_v27 = vpop.f32.mrb[90].mxu0 }
 0x318   :  { %v10045_v59 = vpop.f32.mrb[59].mxu1  ;;  %v10125_v43 = vpop.f32.mrb[91].mxu0 }
 0x319   :  { %17533 = vst [vmem:[#allocation39_spill] sm:$0xff] %v14247_v49  ;;  %v10046_v60 = vadd.f32 %v10045_v59, %v10044_v30  ;;  %v10126_v2 = vadd.f32 %v10125_v43, %v10124_v27 }
 0x31b   :  { %v14249_v8 = vadd.f32 %v10126_v2, %v10046_v60  ;;  %v10047_v55 = vpop.f32.mrb[60].mxu1  ;;  %v10127_v9 = vpop.f32.mrb[92].mxu0 }
 0x31c   :  { %v10048_v22 = vpop.f32.mrb[61].mxu1  ;;  %v10128_v62 = vpop.f32.mrb[93].mxu0 }
 0x31d   :  { %17534 = vst [vmem:[#allocation40_spill] sm:$0xff] %v14249_v8  ;;  %v10049_v58 = vadd.f32 %v10048_v22, %v10047_v55  ;;  %v10129_v32 = vadd.f32 %v10128_v62, %v10127_v9 }
 0x31f   :  { %v14251_v54 = vadd.f32 %v10129_v32, %v10049_v58  ;;  %v10050_v11 = vpop.f32.mrb[62].mxu1  ;;  %v10130_v7 = vpop.f32.mrb[94].mxu0 }
 0x320   :  { %v10051_v24 = vpop.f32.mrb[63].mxu1  ;;  %v10131_v46 = vpop.f32.mrb[95].mxu0 }
 0x321   :  { %17535 = vst [vmem:[#allocation41_spill] sm:$0xff] %v14251_v54  ;;  %v10052_v1 = vadd.f32 %v10051_v24, %v10050_v11  ;;  %v10132_v6 = vadd.f32 %v10131_v46, %v10130_v7 }
 0x323   :  { %v14253_v49 = vadd.f32 %v10132_v6, %v10052_v1  ;;  %v11000_v30 = vpop.f32.mrb[64].mxu1 }
 0x324   :  { %v1571_v27 = vpop.f32.mrb[65].mxu1 }
 0x325   :  { %17536 = vst [vmem:[#allocation42_spill] sm:$0xff] %v14253_v49  ;;  %v11001_v59 = vpop.f32.mrb[66].mxu1 }
 0x326   :  { %v11734_v43 = vpack.c.bf16 %v11001_v59, %v11000_v30  ;;  %v1574_v60 = vpop.f32.mrb[67].mxu1 }
 0x327   :  { %v11730_v2 = vpack.c.bf16 %v1574_v60, %v1571_v27 }
 0x32b   :  { %v11004_v8 = vpop.f32.mrb[68].mxu1 }
 0x32c   :  { %v1587_v34 = vpop.f32.mrb[69].mxu1 }
 0x32d   :  { %v11005_v55 = vpop.f32.mrb[70].mxu1 }
 0x32e   :  { %v11742_v9 = vpack.c.bf16 %v11005_v55, %v11004_v8  ;;  %v1590_v22 = vpop.f32.mrb[71].mxu1 }
 0x32f   :  { %v11738_v62 = vpack.c.bf16 %v1590_v22, %v1587_v34 }
 0x333   :  { %v11008_v58 = vpop.f32.mrb[72].mxu1 }
 0x334   :  { %v1603_v32 = vpop.f32.mrb[73].mxu1 }
 0x335   :  { %v11009_v54 = vpop.f32.mrb[74].mxu1 }
 0x336   :  { %v11750_v39 = vpack.c.bf16 %v11009_v54, %v11008_v58  ;;  %v1606_v11 = vpop.f32.mrb[75].mxu1 }
 0x337   :  { %v11746_v7 = vpack.c.bf16 %v1606_v11, %v1603_v32 }
 0x33b   :  { %v11012_v24 = vpop.f32.mrb[76].mxu1 }
 0x33c   :  { %v1619_v46 = vpop.f32.mrb[77].mxu1 }
 0x33d   :  { %v11013_v1 = vpop.f32.mrb[78].mxu1 }
 0x33e   :  { %v11758_v6 = vpack.c.bf16 %v11013_v1, %v11012_v24  ;;  %v1622_v49 = vpop.f32.mrb[79].mxu1 }
 0x33f   :  { %v11754_v30 = vpack.c.bf16 %v1622_v49, %v1619_v46 }
 0x343   :  { %v11016_v59 = vpop.f32.mrb[80].mxu1 }
 0x344   :  { %v1635_v27 = vpop.f32.mrb[81].mxu1 }
 0x345   :  { %v11017_v60 = vpop.f32.mrb[82].mxu1 }
 0x346   :  { %v11732_v3 = vpack.c.bf16 %v11017_v60, %v11016_v59  ;;  %v1638_v36 = vpop.f32.mrb[83].mxu1 }
 0x347   :  { %v11728_v8 = vpack.c.bf16 %v1638_v36, %v1635_v27 }
 0x349   :  { %11729 = vmatprep.subr.bf16.mxu0 %v11728_v8 }
 0x34a   :  { %11731 = vmatpush3.bf16.msra.mxu0 %v11730_v2 }
 0x34b   :  { %v11020_v34 = vpop.f32.mrb[84].mxu1  ;;  %11733 = vmatprep.subr.bf16.mxu0 %v11732_v3 }
 0x34c   :  { %v1651_v55 = vpop.f32.mrb[85].mxu1 }
 0x34d   :  { %v11021_v54 = vpop.f32.mrb[86].mxu1 }
 0x34e   :  { %v11740_v22 = vpack.c.bf16 %v11021_v54, %v11020_v34  ;;  %v1654_v58 = vpop.f32.mrb[87].mxu1  ;;  %11735 = vmatpush3.bf16.msra.mxu0 %v11734_v43 }
 0x34f   :  { %v11736_v32 = vpack.c.bf16 %v1654_v58, %v1651_v55 }
 0x351   :  { %11737 = vmatprep.subr.bf16.mxu0 %v11736_v32 }
 0x352   :  { %11739 = vmatpush3.bf16.msra.mxu0 %v11738_v62 }
 0x353   :  { %v11024_v11 = vpop.f32.mrb[88].mxu1  ;;  %11741 = vmatprep.subr.bf16.mxu0 %v11740_v22 }
 0x354   :  { %v1667_v49 = vpop.f32.mrb[89].mxu1 }
 0x355   :  { %v11025_v24 = vpop.f32.mrb[90].mxu1 }
 0x356   :  { %v11748_v46 = vpack.c.bf16 %v11025_v24, %v11024_v11  ;;  %v1670_v1 = vpop.f32.mrb[91].mxu1  ;;  %11743 = vmatpush3.bf16.msra.mxu0 %v11742_v9 }
 0x357   :  { %v11744_v36 = vpack.c.bf16 %v1670_v1, %v1667_v49 }
 0x359   :  { %11745 = vmatprep.subr.bf16.mxu0 %v11744_v36 }
 0x35a   :  { %11747 = vmatpush3.bf16.msra.mxu0 %v11746_v7 }
 0x35b   :  { %v11028_v2 = vpop.f32.mrb[92].mxu1  ;;  %11749 = vmatprep.subr.bf16.mxu0 %v11748_v46 }
 0x35c   :  { %v1683_v3 = vpop.f32.mrb[93].mxu1 }
 0x35d   :  { %v11029_v59 = vpop.f32.mrb[94].mxu1 }
 0x35e   :  { %v11756_v27 = vpack.c.bf16 %v11029_v59, %v11028_v2  ;;  %v1686_v60 = vpop.f32.mrb[95].mxu1  ;;  %11751 = vmatpush3.bf16.msra.mxu0 %v11750_v39 }
 0x35f   :  { %v11752_v43 = vpack.c.bf16 %v1686_v60, %v1683_v3 }
 0x361   :  { %11753 = vmatprep.subr.bf16.mxu0 %v11752_v43 }
 0x362   :  { %11755 = vmatpush3.bf16.msra.mxu0 %v11754_v30 }
 0x363   :  { %11757 = vmatprep.subr.bf16.mxu0 %v11756_v27  ;;  %v14257_v62 = vpop.f32.mrb[96].mxu1 }
 0x364   :  { %v14261_v9 = vpop.f32.mrb[97].mxu1 }
 0x365   :  { %v14269_v39 = vpop.f32.mrb[98].mxu1 }
 0x366   :  { %11759 = vmatpush3.bf16.msra.mxu0 %v11758_v6  ;;  %v14275_v8 = vpop.f32.mrb[99].mxu1  ;;  %v17560_v2 = vpack.c.bf16 %v14269_v39, %v14257_v62 }
 0x367   :  { %v11762_v34 = vpack.c.bf16 %v14275_v8, %v14261_v9 }
 0x369   :  { %9073 = vmatmul.mubr.msk.f32.vlgmr.msra.gmra.mrb[96].mxu0 %vm1778_vm11, %v17256_v16  ;;  %vm1785_vm11 = vmand %vm1753_vm10, %vm14311_vm9  ;;  %vm17130_vm10 = vcmp.eq.s32.totalorder %v12816_v26, %v13069_v12 }
 0x36a   :  { %9074 = vmatprep.mubr.msk.f32.mxu0 %vm1781_vm13, %v17256_v16  ;;  %vm17151_vm13 = vcmp.eq.s32.totalorder %v12816_v26, %v13009_v45 }
 0x36b   :  { %v14303_v25 = vpop.f32.mrb[100].mxu1 }
 0x36c   :  { %v14309_v6 = vpop.f32.mrb[101].mxu1 }
 0x36d   :  { %9075 = vmatmul.mubr.msk.f32.gmra.mrb[98].mxu0 %vm1780_vm7, %v17256_v16  ;;  %v14318_v22 = vpop.f32.mrb[102].mxu1  ;;  %vm1784_vm7 = vmand %vm17151_vm13, %vm14311_vm9  ;;  %vm1704_vm9 = vcmp.ge.s32.totalorder %v13188_v51, 0 }
 0x36e   :  { %v14324_v32 = vpop.f32.mrb[103].mxu1  ;;  %9076 = vmatprep.mubr.msk.f32.mxu0 %vm1783_vm6, %v17256_v16  ;;  %vm1787_vm6 = vmand %vm1755_vm5, %vm14338_vm0 }
 0x36f   :  { %vm1789_vm5 = vmand %vm1757_vm3, %vm14361_vm8  ;;  %v17563_v62 = vpack.c.bf16 %v14324_v32, %v14309_v6 }
 0x370   :  { %vm1788_vm3 = vmand %vm17127_vm14, %vm14361_vm8  ;;  %vm1706_vm8 = vcmp.ge.s32.totalorder %v13362_v13, 0 }
 0x371   :  { %9077 = vmatmul.mubr.msk.f32.gmra.mrb[100].mxu0 %vm1782_vm12, %v17256_v16  ;;  %vm1720_vm12 = vcmp.lt.s32.totalorder %v13188_v51, 128 }
 0x372   :  { %9078 = vmatprep.mubr.msk.f32.mxu0 %vm1785_vm11, %v17256_v16  ;;  %vm1786_vm11 = vmand %vm17130_vm10, %vm14338_vm0  ;;  %vm1705_vm0 = vcmp.ge.s32.totalorder %v13253_v15, 0  ;;  %vm1767_vm10 = vcmp.eq.s32.totalorder %v12824_v31, %v13568_v19 }
 0x373   :  { %v14353_v24 = vpop.f32.mrb[104].mxu1  ;;  %vm14388_vm2 = vmand %vm1704_vm9, %vm1720_vm12  ;;  %vm17128_vm12 = vcmp.eq.s32.totalorder %v12816_v26, %v13227_v48 }
 0x374   :  { %v14359_v46 = vpop.f32.mrb[105].mxu1 }
 0x375   :  { %9079 = vmatmul.mubr.msk.f32.gmra.mrb[102].mxu0 %vm1784_vm7, %v17256_v16  ;;  %v14368_v36 = vpop.f32.mrb[106].mxu1  ;;  %vm1759_vm7 = vcmp.eq.s32.totalorder %v12824_v31, %v13227_v48 }
 0x376   :  { %v14374_v3 = vpop.f32.mrb[107].mxu1  ;;  %9080 = vmatprep.mubr.msk.f32.mxu0 %vm1787_vm6, %v17256_v16  ;;  %vm1721_vm6 = vcmp.lt.s32.totalorder %v13253_v15, 128  ;;  %vm1791_vm9 = vmand %vm1759_vm7, %vm14388_vm2  ;;  %vm1722_vm7 = vcmp.lt.s32.totalorder %v13362_v13, 128 }
 0x377   :  { %vm14438_vm14 = vmand %vm1706_vm8, %vm1722_vm7  ;;  %vm1762_vm7 = vcmp.eq.s32.totalorder %v12816_v26, %v13427_v23 }
 0x379   :  { %9081 = vmatmul.mubr.msk.f32.gmra.mrb[104].mxu0 %vm1786_vm11, %v17256_v16  ;;  %vm14411_vm11 = vmand %vm1705_vm0, %vm1721_vm6 }
 0x37a   :  { %9082 = vmatprep.mubr.msk.f32.mxu0 %vm1789_vm5, %v17256_v16  ;;  %vm1761_vm5 = vcmp.eq.s32.totalorder %v12824_v31, %v13318_v29  ;;  %vm1790_vm0 = vmand %vm17128_vm12, %vm14388_vm2  ;;  %vm1707_vm2 = vcmp.ge.s32.totalorder %v13446_v17, 0  ;;  %vm1723_vm12 = vcmp.lt.s32.totalorder %v13446_v17, 128 }
 0x37b   :  { %v14403_v60 = vpop.f32.mrb[108].mxu1  ;;  %vm1793_vm6 = vmand %vm1761_vm5, %vm14411_vm11 }
 0x37c   :  { %v14409_v43 = vpop.f32.mrb[109].mxu1 }
 0x37d   :  { %9083 = vmatmul.mubr.msk.f32.gmra.mrb[106].mxu0 %vm1788_vm3, %v17256_v16  ;;  %v14418_v55 = vpop.f32.mrb[110].mxu1  ;;  %vm17129_vm3 = vcmp.eq.s32.totalorder %v12816_v26, %v13318_v29 }
 0x37e   :  { %v14424_v49 = vpop.f32.mrb[111].mxu1  ;;  %9084 = vmatprep.mubr.msk.f32.mxu0 %vm1791_vm9, %v17256_v16  ;;  %vm1763_vm9 = vcmp.eq.s32.totalorder %v12824_v31, %v13427_v23  ;;  %vm1792_vm5 = vmand %vm17129_vm3, %vm14411_vm11  ;;  %vm1708_vm11 = vcmp.ge.s32.totalorder %v13514_v18, 0  ;;  %vm1724_vm3 = vcmp.lt.s32.totalorder %v13514_v18, 128 }
 0x37f   :  { %vm1795_vm8 = vmand %vm1763_vm9, %vm14438_vm14 }
 0x381   :  { %9085 = vmatmul.mubr.msk.f32.gmra.mrb[108].mxu0 %vm1790_vm0, %v17256_v16  ;;  %vm14457_vm0 = vmand %vm1707_vm2, %vm1723_vm12  ;;  %vm1764_vm2 = vcmp.eq.s32.totalorder %v12816_v26, %v13498_v37 }
 0x382   :  { %9086 = vmatprep.mubr.msk.f32.mxu0 %vm1793_vm6, %v17256_v16  ;;  %vm1765_vm6 = vcmp.eq.s32.totalorder %v12824_v31, %v13498_v37  ;;  %vm1794_vm12 = vmand %vm1762_vm7, %vm14438_vm14 }
 0x383   :  { %v11050_v27 = vpop.f32.mrb[112].mxu1  ;;  %vm1797_vm9 = vmand %vm1765_vm6, %vm14457_vm0  ;;  %vm1766_vm6 = vcmp.eq.s32.totalorder %v12816_v26, %v13568_v19 }
 0x384   :  { %v2110_v1 = vpop.f32.mrb[113].mxu1 }
 0x385   :  { %9087 = vmatmul.mubr.msk.f32.gmra.mrb[110].mxu0 %vm1792_vm5, %v17256_v16  ;;  %v11051_v7 = vpop.f32.mrb[114].mxu1  ;;  %vm14473_vm5 = vmand %vm1708_vm11, %vm1724_vm3 }
 0x386   :  { %v11764_v59 = vpack.c.bf16 %v11051_v7, %v11050_v27  ;;  %v2113_v58 = vpop.f32.mrb[115].mxu1  ;;  %9088 = vmatprep.mubr.msk.f32.mxu0 %vm1795_vm8, %v17256_v16  ;;  %v17557_v27 = vld [vmem:[#allocation35_spill] sm:$0xff]  ;;  %vm1796_vm3 = vmand %vm1764_vm2, %vm14457_vm0  ;;  %vm1710_vm0 = vcmp.ge.s32.totalorder %v13726_v40, 0 }
 0x387   :  { %v11760_v11 = vpack.c.bf16 %v2113_v58, %v2110_v1  ;;  %vm1709_vm8 = vcmp.ge.s32.totalorder %v17557_v27, 0  ;;  %vm1725_vm14 = vcmp.lt.s32.totalorder %v17557_v27, 128  ;;  %vm1799_vm7 = vmand %vm1767_vm10, %vm14473_vm5 }
 0x388   :  { %vm14492_vm11 = vmand %vm1709_vm8, %vm1725_vm14  ;;  %vm1768_vm8 = vcmp.eq.s32.totalorder %v12816_v26, %v13673_v14 }
 0x389   :  { %9089 = vmatmul.mubr.msk.f32.gmra.mrb[112].mxu0 %vm1794_vm12, %v17256_v16  ;;  %11761 = vmatprep.subr.bf16.mxu0 %v11760_v11  ;;  %vm1769_vm12 = vcmp.eq.s32.totalorder %v12824_v31, %v13673_v14  ;;  %vm1798_vm10 = vmand %vm1766_vm6, %vm14473_vm5  ;;  %vm1727_vm5 = vcmp.lt.s32.totalorder %v13826_v56, 128 }
 0x38a   :  { %11763 = vmatpush3.bf16.msra.mxu0 %v11762_v34  ;;  %9090 = vmatprep.mubr.msk.f32.mxu0 %vm1797_vm9, %v17256_v16  ;;  %vm1726_vm9 = vcmp.lt.s32.totalorder %v13726_v40, 128  ;;  %vm1801_vm2 = vmand %vm1769_vm12, %vm14492_vm11 }
 0x38b   :  { %v11054_v58 = vpop.f32.mrb[116].mxu1  ;;  %11765 = vmatprep.subr.bf16.mxu0 %v11764_v59  ;;  %vm14511_vm14 = vmand %vm1710_vm0, %vm1726_vm9  ;;  %vm1770_vm0 = vcmp.eq.s32.totalorder %v12816_v26, %v13771_v63 }
 0x38c   :  { %v2126_v11 = vpop.f32.mrb[117].mxu1  ;;  %vm1800_vm6 = vmand %vm1768_vm8, %vm14492_vm11  ;;  %vm1712_vm11 = vcmp.ge.s32.totalorder %v13915_v61, 0 }
 0x38d   :  { %9091 = vmatmul.mubr.msk.f32.gmra.mrb[114].mxu0 %vm1796_vm3, %v17256_v16  ;;  %v11055_v9 = vpop.f32.mrb[118].mxu1  ;;  %vm1771_vm3 = vcmp.eq.s32.totalorder %v12824_v31, %v13771_v63  ;;  %vm1802_vm8 = vmand %vm1770_vm0, %vm14511_vm14 }
 0x38e   :  { %v11772_v8 = vpack.c.bf16 %v11055_v9, %v11054_v58  ;;  %v2129_v34 = vpop.f32.mrb[119].mxu1  ;;  %11767 = vmatpush3.bf16.msra.mxu0 %v17560_v2  ;;  %9092 = vmatprep.mubr.msk.f32.mxu0 %vm1799_vm7, %v17256_v16  ;;  %vm1711_vm7 = vcmp.ge.s32.totalorder %v13826_v56, 0  ;;  %vm1803_vm12 = vmand %vm1771_vm3, %vm14511_vm14  ;;  %vm1729_vm14 = vcmp.lt.s32.totalorder %v13974_v44, 128 }
 0x38f   :  { %v11768_v59 = vpack.c.bf16 %v2129_v34, %v2126_v11  ;;  %vm14530_vm9 = vmand %vm1711_vm7, %vm1727_vm5  ;;  %v17566_v11 = vpack.c.bf16 %v14318_v22, %v14303_v25  ;;  %vm1772_vm7 = vcmp.eq.s32.totalorder %v12816_v26, %v13869_v0  ;;  %v2173_v25 = vadd.s32 1, %v17509_v20 }
 0x390   :  { %v17569_v22 = vpack.c.bf16 %v14374_v3, %v14359_v46  ;;  %vm1804_vm0 = vmand %vm1772_vm7, %vm14530_vm9  ;;  %v14576_v46 = vadd.s32 1, %v17512_v28 }
 0x391   :  { %9093 = vmatmul.mubr.msk.f32.gmra.mrb[116].mxu0 %vm1798_vm10, %v17256_v16  ;;  %11769 = vmatprep.subr.bf16.mxu0 %v11768_v59  ;;  %vm1773_vm10 = vcmp.eq.s32.totalorder %v12824_v31, %v13869_v0  ;;  %v2174_v59 = vadd.s32 1, %v12947_v52 }
 0x392   :  { %11771 = vmatpush3.bf16.msra.mxu0 %v17563_v62  ;;  %9094 = vmatprep.mubr.msk.f32.mxu0 %vm1801_vm2, %v17256_v16  ;;  %vm1728_vm2 = vcmp.lt.s32.totalorder %v13915_v61, 128  ;;  %vm1805_vm3 = vmand %vm1773_vm10, %vm14530_vm9  ;;  %17572 = vst [vmem:[#allocation35_spill] sm:$0xff] %v14576_v46  ;;  %vm2189_vm9 = vcmp.ge.s32.totalorder %v2173_v25, 0 }
 0x393   :  { %v11058_v39 = vpop.f32.mrb[120].mxu1  ;;  %11773 = vmatprep.subr.bf16.mxu0 %v11772_v8  ;;  %vm14549_vm5 = vmand %vm1712_vm11, %vm1728_vm2  ;;  %vm1774_vm11 = vcmp.eq.s32.totalorder %v12816_v26, %v13944_v33 }
 0x394   :  { %v2142_v30 = vpop.f32.mrb[121].mxu1  ;;  %vm1806_vm7 = vmand %vm1774_vm11, %vm14549_vm5 }
 0x395   :  { %9095 = vmatmul.mubr.msk.f32.gmra.mrb[118].mxu0 %vm1800_vm6, %v17256_v16  ;;  %v11059_v6 = vpop.f32.mrb[122].mxu1  ;;  %vm1775_vm6 = vcmp.eq.s32.totalorder %v12824_v31, %v13944_v33 }
 0x396   :  { %v11780_v32 = vpack.c.bf16 %v11059_v6, %v11058_v39  ;;  %v2145_v58 = vpop.f32.mrb[123].mxu1  ;;  %11775 = vmatpush3.bf16.msra.mxu0 %v17566_v11  ;;  %9096 = vmatprep.mubr.msk.f32.mxu0 %vm1803_vm12, %v17256_v16  ;;  %vm1713_vm12 = vcmp.ge.s32.totalorder %v13974_v44, 0  ;;  %vm1807_vm10 = vmand %vm1775_vm6, %vm14549_vm5  ;;  %v17573_v39 = vpack.c.bf16 %v14368_v36, %v14353_v24  ;;  %v14597_v24 = vadd.s32 1, %v12960_v38 }
 0x397   :  { %v11776_v54 = vpack.c.bf16 %v2145_v58, %v2142_v30  ;;  %vm14569_vm2 = vmand %vm1713_vm12, %vm1729_vm14  ;;  %vm1776_vm12 = vcmp.eq.s32.totalorder %v12816_v26, %v14009_v41  ;;  %vm2190_vm5 = vcmp.ge.s32.totalorder %v2174_v59, 0  ;;  %v2175_v36 = vadd.s32 1, %v12963_v47 }
 0x398   :  { %17576 = vst [vmem:[#allocation43_spill] sm:$0xff] %v14597_v24  ;;  %v17577_v6 = vpack.c.bf16 %v14424_v49, %v14409_v43  ;;  %vm1808_vm11 = vmand %vm1776_vm12, %vm14569_vm2  ;;  %v14622_v43 = vadd.s32 1, %v12966_v57  ;;  %v14708_v11 = vadd.s32 1, %v13158_v5 }
 0x399   :  { %9097 = vmatmul.mubr.msk.f32.gmra.mrb[120].mxu0 %vm1802_vm8, %v17256_v16  ;;  %11777 = vmatprep.subr.bf16.mxu0 %v11776_v54  ;;  %vm1777_vm8 = vcmp.eq.s32.totalorder %v12824_v31, %v14009_v41  ;;  %v2176_v54 = vadd.s32 1, %v12993_v53 }
 0x39a   :  { %11779 = vmatpush3.bf16.msra.mxu0 %v17569_v22  ;;  %9098 = vmatprep.mubr.msk.f32.mxu0 %vm1805_vm3, %v17256_v16  ;;  %vm2205_vm3 = vcmp.lt.s32.totalorder %v2173_v25, 128  ;;  %vm1809_vm6 = vmand %vm1777_vm8, %vm14569_vm2  ;;  %vm17148_vm8 = vcmp.eq.s32.totalorder %v12816_v26, %v14576_v46  ;;  %17580 = vst [vmem:[#allocation44_spill] sm:$0xff] %v14622_v43  ;;  %vm2191_vm2 = vcmp.ge.s32.totalorder %v2175_v36, 0  ;;  %v17581_v25 = vpack.c.bf16 %v14418_v55, %v14403_v60 }
 0x39b   :  { %v11062_v8 = vpop.f32.mrb[124].mxu1  ;;  %11781 = vmatprep.subr.bf16.mxu0 %v11780_v32  ;;  %vm14590_vm14 = vmand %vm2189_vm9, %vm2205_vm3  ;;  %v14654_v55 = vadd.s32 1, %v13009_v45  ;;  %17590 = vst [vmem:[#allocation47_spill] sm:$0xff] %v14708_v11 }
 0x39c   :  { %v2158_v34 = vpop.f32.mrb[125].mxu1  ;;  %vm2285_vm12 = vmand %vm17148_vm8, %vm14590_vm14 }
 0x39d   :  { %9099 = vmatmul.mubr.msk.f32.gmra.mrb[122].mxu0 %vm1804_vm0, %v17256_v16  ;;  %v11063_v3 = vpop.f32.mrb[126].mxu1  ;;  %vm2254_vm0 = vcmp.eq.s32.totalorder %v12824_v31, %v14576_v46  ;;  %17584 = vst [vmem:[#allocation45_spill] sm:$0xff] %v14654_v55 }
 0x39e   :  { %v11788_v1 = vpack.c.bf16 %v11063_v3, %v11062_v8  ;;  %v2161_v62 = vpop.f32.mrb[127].mxu1  ;;  %11783 = vmatpush3.bf16.msra.mxu0 %v17573_v39  ;;  %9100 = vmatprep.mubr.msk.f32.mxu0 %vm1807_vm10, %v17256_v16  ;;  %vm2206_vm10 = vcmp.lt.s32.totalorder %v2174_v59, 128  ;;  %vm2286_vm9 = vmand %vm2254_vm0, %vm14590_vm14  ;;  %vm2192_vm14 = vcmp.ge.s32.totalorder %v2176_v54, 0  ;;  %v2178_v39 = vadd.s32 1, %v13104_v50 }
 0x39f   :  { %v11784_v30 = vpack.c.bf16 %v2161_v62, %v2158_v34  ;;  %vm14615_vm3 = vmand %vm2190_vm5, %vm2206_vm10  ;;  %vm17131_vm5 = vcmp.eq.s32.totalorder %v12816_v26, %v14597_v24  ;;  %v2177_v34 = vadd.s32 1, %v13029_v4  ;;  %v14733_v59 = vadd.s32 1, %v13227_v48 }
 0x3a1   :  { %9101 = vmatmul.mubr.msk.f32.gmra.mrb[124].mxu0 %vm1806_vm7, %v17256_v16  ;;  %11785 = vmatprep.subr.bf16.mxu0 %v11784_v30  ;;  %vm2256_vm7 = vcmp.eq.s32.totalorder %v12824_v31, %v14597_v24  ;;  %17593 = vst [vmem:[#allocation48_spill] sm:$0xff] %v14733_v59  ;;  %v2180_v30 = vadd.s32 1, %v13253_v15 }
 0x3a2   :  { %11787 = vmatpush3.bf16.msra.mxu0 %v17577_v6  ;;  %9102 = vmatprep.mubr.msk.f32.mxu0 %vm1809_vm6, %v17256_v16  ;;  %vm2207_vm6 = vcmp.lt.s32.totalorder %v2175_v36, 128  ;;  %vm2288_vm0 = vmand %vm2256_vm7, %vm14615_vm3  ;;  %v14762_v6 = vadd.s32 1, %v13318_v29  ;;  %v2181_v36 = vadd.s32 1, %v13362_v13 }
 0x3a3   :  { %11789 = vmatprep.subr.bf16.mxu0 %v11788_v1  ;;  %v14607_v32 = vpop.f32.mrb[128].mxu1  ;;  %vm14647_vm10 = vmand %vm2191_vm2, %vm2207_vm6  ;;  %vm17132_vm6 = vcmp.eq.s32.totalorder %v12816_v26, %v14622_v43  ;;  %v14679_v1 = vadd.s32 1, %v13069_v12 }
 0x3a4   :  { %v14613_v58 = vpop.f32.mrb[129].mxu1  ;;  %vm2287_vm7 = vmand %vm17131_vm5, %vm14615_vm3  ;;  %vm2193_vm3 = vcmp.ge.s32.totalorder %v2177_v34, 0  ;;  %17596 = vst [vmem:[#allocation49_spill] sm:$0xff] %v14762_v6 }
 0x3a5   :  { %9103 = vmatmul.mubr.msk.f32.gmra.mrb[126].mxu0 %vm1808_vm11, %v17256_v16  ;;  %v14625_v49 = vpop.f32.mrb[130].mxu1  ;;  %vm2258_vm11 = vcmp.eq.s32.totalorder %v12824_v31, %v14622_v43  ;;  %17587 = vst [vmem:[#allocation46_spill] sm:$0xff] %v14679_v1  ;;  %v2183_v43 = vadd.s32 1, %v13514_v18 }
 0x3a6   :  { %11791 = vmatpush3.bf16.msra.mxu0 %v17581_v25  ;;  %v14633_v22 = vpop.f32.mrb[131].mxu1  ;;  %9123 = vmatprep.mubr.msk.f32.mxu0 %vm2286_vm9, %v17256_v16  ;;  %vm2208_vm9 = vcmp.lt.s32.totalorder %v2176_v54, 128  ;;  %vm2290_vm2 = vmand %vm2258_vm11, %vm14647_vm10  ;;  %vm2209_vm11 = vcmp.lt.s32.totalorder %v2177_v34, 128  ;;  %v2179_v54 = vadd.s32 1, %v13188_v51  ;;  %v2245_v34 = vadd.s32 1, %v13427_v23 }
 0x3a7   :  { %vm14701_vm5 = vmand %vm2193_vm3, %vm2209_vm11  ;;  %vm17134_vm11 = vcmp.eq.s32.totalorder %v12816_v26, %v14679_v1 }
 0x3a9   :  { %9124 = vmatmul.mubr.msk.f32.vlgmr.msra.gmra.mrb[128].mxu0 %vm2285_vm12, %v17256_v16  ;;  %vm14672_vm12 = vmand %vm2192_vm14, %vm2208_vm9 }
 0x3aa   :  { %9125 = vmatprep.mubr.msk.f32.mxu0 %vm2288_vm0, %v17256_v16  ;;  %vm2260_vm0 = vcmp.eq.s32.totalorder %v12824_v31, %v14654_v55  ;;  %vm2289_vm14 = vmand %vm17132_vm6, %vm14647_vm10  ;;  %vm2194_vm10 = vcmp.ge.s32.totalorder %v2178_v39, 0  ;;  %vm2210_vm6 = vcmp.lt.s32.totalorder %v2178_v39, 128 }
 0x3ab   :  { %v14664_v2 = vpop.f32.mrb[132].mxu1  ;;  %vm2292_vm9 = vmand %vm2260_vm0, %vm14672_vm12 }
 0x3ac   :  { %v14670_v3 = vpop.f32.mrb[133].mxu1 }
 0x3ad   :  { %9126 = vmatmul.mubr.msk.f32.gmra.mrb[130].mxu0 %vm2287_vm7, %v17256_v16  ;;  %v14682_v62 = vpop.f32.mrb[134].mxu1  ;;  %vm17133_vm7 = vcmp.eq.s32.totalorder %v12816_v26, %v14654_v55  ;;  %v2182_v55 = vadd.s32 1, %v13446_v17 }
 0x3ae   :  { %v14687_v7 = vpop.f32.mrb[135].mxu1  ;;  %9127 = vmatprep.mubr.msk.f32.mxu0 %vm2290_vm2, %v17256_v16  ;;  %vm2262_vm2 = vcmp.eq.s32.totalorder %v12824_v31, %v14679_v1  ;;  %vm2291_vm0 = vmand %vm17133_vm7, %vm14672_vm12  ;;  %vm2195_vm12 = vcmp.ge.s32.totalorder %v2179_v54, 0 }
 0x3af   :  { %vm2294_vm3 = vmand %vm2262_vm2, %vm14701_vm5  ;;  %vm2211_vm2 = vcmp.lt.s32.totalorder %v2179_v54, 128  ;;  %v2246_v54 = vadd.s32 1, %v13498_v37 }
 0x3b0   :  { %vm14755_vm7 = vmand %vm2195_vm12, %vm2211_vm2  ;;  %vm17146_vm2 = vcmp.eq.s32.totalorder %v12816_v26, %v14733_v59 }
 0x3b1   :  { %9128 = vmatmul.mubr.msk.f32.gmra.mrb[132].mxu0 %vm2289_vm14, %v17256_v16  ;;  %vm14726_vm14 = vmand %vm2194_vm10, %vm2210_vm6  ;;  %vm2272_vm8 = vcmp.eq.s32.totalorder %v12824_v31, %v2246_v54 }
 0x3b2   :  { %9129 = vmatprep.mubr.msk.f32.mxu0 %vm2292_vm9, %v17256_v16  ;;  %vm2264_vm9 = vcmp.eq.s32.totalorder %v12824_v31, %v14708_v11  ;;  %vm2293_vm6 = vmand %vm17134_vm11, %vm14701_vm5  ;;  %vm2196_vm5 = vcmp.ge.s32.totalorder %v2180_v30, 0  ;;  %vm2212_vm11 = vcmp.lt.s32.totalorder %v2180_v30, 128 }
 0x3b3   :  { %v14718_v25 = vpop.f32.mrb[136].mxu1  ;;  %vm2296_vm10 = vmand %vm2264_vm9, %vm14726_vm14 }
 0x3b4   :  { %v14724_v60 = vpop.f32.mrb[137].mxu1 }
 0x3b5   :  { %9130 = vmatmul.mubr.msk.f32.gmra.mrb[134].mxu0 %vm2291_vm0, %v17256_v16  ;;  %v14736_v39 = vpop.f32.mrb[138].mxu1  ;;  %vm17145_vm0 = vcmp.eq.s32.totalorder %v12816_v26, %v14708_v11 }
 0x3b6   :  { %v14741_v9 = vpop.f32.mrb[139].mxu1  ;;  %9131 = vmatprep.mubr.msk.f32.mxu0 %vm2294_vm3, %v17256_v16  ;;  %vm2266_vm3 = vcmp.eq.s32.totalorder %v12824_v31, %v14733_v59  ;;  %vm2295_vm9 = vmand %vm17145_vm0, %vm14726_vm14  ;;  %vm2197_vm14 = vcmp.ge.s32.totalorder %v2181_v36, 0 }
 0x3b7   :  { %vm2298_vm12 = vmand %vm2266_vm3, %vm14755_vm7  ;;  %vm2213_vm3 = vcmp.lt.s32.totalorder %v2181_v36, 128 }
 0x3b8   :  { %vm14807_vm0 = vmand %vm2197_vm14, %vm2213_vm3  ;;  %vm2269_vm3 = vcmp.eq.s32.totalorder %v12816_v26, %v2245_v34 }
 0x3b9   :  { %9132 = vmatmul.mubr.msk.f32.gmra.mrb[136].mxu0 %vm2293_vm6, %v17256_v16  ;;  %vm14780_vm6 = vmand %vm2196_vm5, %vm2212_vm11 }
 0x3ba   :  { %9133 = vmatprep.mubr.msk.f32.mxu0 %vm2296_vm10, %v17256_v16  ;;  %vm2268_vm10 = vcmp.eq.s32.totalorder %v12824_v31, %v14762_v6  ;;  %vm2297_vm11 = vmand %vm17146_vm2, %vm14755_vm7  ;;  %vm2198_vm7 = vcmp.ge.s32.totalorder %v2182_v55, 0  ;;  %vm2214_vm2 = vcmp.lt.s32.totalorder %v2182_v55, 128  ;;  %v2247_v55 = vadd.s32 1, %v13568_v19 }
 0x3bb   :  { %v14772_v8 = vpop.f32.mrb[140].mxu1  ;;  %vm2300_vm5 = vmand %vm2268_vm10, %vm14780_vm6 }
 0x3bc   :  { %v14778_v1 = vpop.f32.mrb[141].mxu1 }
 0x3bd   :  { %9134 = vmatmul.mubr.msk.f32.gmra.mrb[138].mxu0 %vm2295_vm9, %v17256_v16  ;;  %v14788_v11 = vpop.f32.mrb[142].mxu1  ;;  %vm17150_vm9 = vcmp.eq.s32.totalorder %v12816_v26, %v14762_v6  ;;  %v2184_v6 = vadd.s32 1, %v17557_v27 }
 0x3be   :  { %v14793_v24 = vpop.f32.mrb[143].mxu1  ;;  %9135 = vmatprep.mubr.msk.f32.mxu0 %vm2298_vm12, %v17256_v16  ;;  %vm2270_vm12 = vcmp.eq.s32.totalorder %v12824_v31, %v2245_v34  ;;  %vm2299_vm10 = vmand %vm17150_vm9, %vm14780_vm6  ;;  %vm2215_vm6 = vcmp.lt.s32.totalorder %v2183_v43, 128 }
 0x3bf   :  { %vm2302_vm14 = vmand %vm2270_vm12, %vm14807_vm0  ;;  %vm2216_vm13 = vcmp.lt.s32.totalorder %v2184_v6, 128 }
 0x3c1   :  { %9136 = vmatmul.mubr.msk.f32.gmra.mrb[140].mxu0 %vm2297_vm11, %v17256_v16  ;;  %vm14824_vm11 = vmand %vm2198_vm7, %vm2214_vm2  ;;  %vm2271_vm7 = vcmp.eq.s32.totalorder %v12816_v26, %v2246_v54 }
 0x3c2   :  { %9137 = vmatprep.mubr.msk.f32.mxu0 %vm2300_vm5, %v17256_v16  ;;  %vm2199_vm5 = vcmp.ge.s32.totalorder %v2183_v43, 0  ;;  %vm2301_vm2 = vmand %vm2269_vm3, %vm14807_vm0  ;;  %v17605_v43 = vpack.c.bf16 %v14633_v22, %v14613_v58  ;;  %vm2273_vm3 = vcmp.eq.s32.totalorder %v12816_v26, %v2247_v55  ;;  %v2249_v58 = vadd.s32 1, %v13771_v63 }
 0x3c3   :  { %v11084_v46 = vpop.f32.mrb[144].mxu1  ;;  %vm2304_vm12 = vmand %vm2272_vm8, %vm14824_vm11 }
 0x3c4   :  { %v2617_v59 = vpop.f32.mrb[145].mxu1  ;;  %vm14838_vm9 = vmand %vm2199_vm5, %vm2215_vm6 }
 0x3c5   :  { %9138 = vmatmul.mubr.msk.f32.gmra.mrb[142].mxu0 %vm2299_vm10, %v17256_v16  ;;  %v11085_v30 = vpop.f32.mrb[146].mxu1  ;;  %vm2274_vm10 = vcmp.eq.s32.totalorder %v12824_v31, %v2247_v55  ;;  %vm2303_vm8 = vmand %vm2271_vm7, %vm14824_vm11  ;;  %v17608_v55 = vpack.c.bf16 %v14625_v49, %v14607_v32  ;;  %v2250_v32 = vadd.s32 1, %v13869_v0  ;;  %v17611_v49 = vpack.c.bf16 %v14687_v7, %v14670_v3 }
 0x3c6   :  { %v11796_v10 = vpack.c.bf16 %v11085_v30, %v11084_v46  ;;  %v2620_v35 = vpop.f32.mrb[147].mxu1  ;;  %9139 = vmatprep.mubr.msk.f32.mxu0 %vm2302_vm14, %v17256_v16  ;;  %v2248_v46 = vadd.s32 1, %v13673_v14  ;;  %vm2200_vm14 = vcmp.ge.s32.totalorder %v2184_v6, 0  ;;  %vm2306_vm0 = vmand %vm2274_vm10, %vm14838_vm9  ;;  %v2251_v3 = vadd.s32 1, %v13944_v33 }
 0x3c7   :  { %v11792_v34 = vpack.c.bf16 %v2620_v35, %v2617_v59  ;;  %v2185_v35 = vadd.s32 1, %v13726_v40  ;;  %vm14855_vm5 = vmand %vm2200_vm14, %vm2216_vm13  ;;  %vm2278_vm14 = vcmp.eq.s32.totalorder %v12824_v31, %v2249_v58 }
 0x3c8   :  { %vm2276_vm6 = vcmp.eq.s32.totalorder %v12824_v31, %v2248_v46  ;;  %vm2305_vm13 = vmand %vm2273_vm3, %vm14838_vm9  ;;  %vm2275_vm7 = vcmp.eq.s32.totalorder %v12816_v26, %v2248_v46 }
 0x3c9   :  { %9140 = vmatmul.mubr.msk.f32.gmra.mrb[144].mxu0 %vm2301_vm2, %v17256_v16  ;;  %11793 = vmatprep.subr.bf16.mxu0 %v11792_v34  ;;  %vm2201_vm11 = vcmp.ge.s32.totalorder %v2185_v35, 0  ;;  %vm2217_vm2 = vcmp.lt.s32.totalorder %v2185_v35, 128  ;;  %vm2307_vm9 = vmand %vm2275_vm7, %vm14855_vm5 }
 0x3ca   :  { %11795 = vmatpush3.bf16.msra.mxu0 %v17605_v43  ;;  %9141 = vmatprep.mubr.msk.f32.mxu0 %vm2304_vm12, %v17256_v16  ;;  %vm2308_vm12 = vmand %vm2276_vm6, %vm14855_vm5  ;;  %vm2277_vm6 = vcmp.eq.s32.totalorder %v12816_v26, %v2249_v58  ;;  %vm2203_vm5 = vcmp.ge.s32.totalorder %v2187_v42, 0  ;;  %v17614_v58 = vpack.c.bf16 %v14682_v62, %v14664_v2  ;;  %v2252_v2 = vadd.s32 1, %v14009_v41 }
 0x3cb   :  { %v11088_v59 = vpop.f32.mrb[148].mxu1  ;;  %11797 = vmatprep.subr.bf16.mxu0 %v11796_v10  ;;  %v2186_v10 = vadd.s32 1, %v13826_v56  ;;  %vm14872_vm10 = vmand %vm2201_vm11, %vm2217_vm2  ;;  %vm2280_vm2 = vcmp.eq.s32.totalorder %v12824_v31, %v2250_v32  ;;  %v2680_v62 = vadd.s32 2, %v17509_v20  ;;  %v14929_v20 = vadd.s32 2, %v17512_v28 }
 0x3cc   :  { %v2633_v36 = vpop.f32.mrb[149].mxu1  ;;  %vm2310_vm3 = vmand %vm2278_vm14, %vm14872_vm10  ;;  %vm2279_vm14 = vcmp.eq.s32.totalorder %v12816_v26, %v2250_v32 }
 0x3cd   :  { %9142 = vmatmul.mubr.msk.f32.gmra.mrb[146].mxu0 %vm2303_vm8, %v17256_v16  ;;  %v11089_v21 = vpop.f32.mrb[150].mxu1  ;;  %vm2202_vm8 = vcmp.ge.s32.totalorder %v2186_v10, 0 }
 0x3ce   :  { %v11804_v22 = vpack.c.bf16 %v11089_v21, %v11088_v59  ;;  %v2636_v54 = vpop.f32.mrb[151].mxu1  ;;  %11799 = vmatpush3.bf16.msra.mxu0 %v17608_v55  ;;  %9143 = vmatprep.mubr.msk.f32.mxu0 %vm2306_vm0, %v17256_v16  ;;  %vm2218_vm0 = vcmp.lt.s32.totalorder %v2186_v10, 128  ;;  %v2188_v59 = vadd.s32 1, %v13974_v44  ;;  %v12204_v10 = vld [vmem:[%s17054_s5 + $0x8] sm:$0xff]  }
 0x3cf   :  { %v11800_v30 = vpack.c.bf16 %v2636_v54, %v2633_v36  ;;  %vm14889_vm11 = vmand %vm2202_vm8, %vm2218_vm0  ;;  %vm2282_vm0 = vcmp.eq.s32.totalorder %v12824_v31, %v2251_v3 }
 0x3d0   :  { %vm2312_vm7 = vmand %vm2280_vm2, %vm14889_vm11  ;;  %vm2281_vm2 = vcmp.eq.s32.totalorder %v12816_v26, %v2251_v3  ;;  %v2685_v3 = vadd.s32 2, %v13104_v50  ;;  %v15036_v50 = vadd.s32 2, %v13158_v5 }
 0x3d1   :  { %9144 = vmatmul.mubr.msk.f32.gmra.mrb[148].mxu0 %vm2305_vm13, %v17256_v16  ;;  %11801 = vmatprep.subr.bf16.mxu0 %v11800_v30  ;;  %vm2219_vm13 = vcmp.lt.s32.totalorder %v2187_v42, 128  ;;  %v17620_v42 = vpack.c.bf16 %v14736_v39, %v14718_v25  ;;  %v2682_v25 = vadd.s32 2, %v12963_v47  ;;  %v17623_v39 = vpack.c.bf16 %v14793_v24, %v14778_v1 }
 0x3d2   :  { %11803 = vmatpush3.bf16.msra.mxu0 %v17611_v49  ;;  %9145 = vmatprep.mubr.msk.f32.mxu0 %vm2308_vm12, %v17256_v16  ;;  %vm2309_vm12 = vmand %vm2277_vm6, %vm14872_vm10  ;;  %v14970_v47 = vadd.s32 2, %v12966_v57  ;;  %v2683_v24 = vadd.s32 2, %v12993_v53  ;;  %v17626_v1 = vpack.c.bf16 %v14788_v11, %v14772_v8  ;;  %v14994_v8 = vadd.s32 2, %v13009_v45 }
 0x3d3   :  { %v11092_v46 = vpop.f32.mrb[152].mxu1  ;;  %11805 = vmatprep.subr.bf16.mxu0 %v11804_v22  ;;  %vm14906_vm8 = vmand %vm2203_vm5, %vm2219_vm13  ;;  %v17617_v22 = vpack.c.bf16 %v14741_v9, %v14724_v60  ;;  %vm2284_vm13 = vcmp.eq.s32.totalorder %v12824_v31, %v2252_v2  ;;  %v2681_v60 = vadd.s32 2, %v12947_v52  ;;  %v14949_v52 = vadd.s32 2, %v12960_v38 }
 0x3d4   :  { %v2649_v35 = vpop.f32.mrb[153].mxu1  ;;  %vm2311_vm10 = vmand %vm2279_vm14, %vm14889_vm11  ;;  %vm2696_vm11 = vcmp.ge.s32.totalorder %v2680_v62, 0  ;;  %v2684_v11 = vadd.s32 2, %v13029_v4  ;;  %v15015_v4 = vadd.s32 2, %v13069_v12 }
 0x3d5   :  { %9146 = vmatmul.mubr.msk.f32.gmra.mrb[150].mxu0 %vm2307_vm9, %v17256_v16  ;;  %v11093_v7 = vpop.f32.mrb[154].mxu1  ;;  %vm2204_vm9 = vcmp.ge.s32.totalorder %v2188_v59, 0  ;;  %vm2314_vm6 = vmand %vm2282_vm0, %vm14906_vm8  ;;  %vm2283_vm0 = vcmp.eq.s32.totalorder %v12816_v26, %v2252_v2  ;;  %v2689_v2 = vadd.s32 2, %v13446_v17  ;;  %v2753_v17 = vadd.s32 2, %v13498_v37  ;;  %v17656_v37 = vld [vmem:[#allocation8_spill] sm:$0xff] }
 0x3d6   :  { %v11812_v36 = vpack.c.bf16 %v11093_v7, %v11092_v46  ;;  %v2652_v6 = vpop.f32.mrb[155].mxu1  ;;  %11807 = vmatpush3.bf16.msra.mxu0 %v17614_v58  ;;  %9147 = vmatprep.mubr.msk.f32.mxu0 %vm2310_vm3, %v17256_v16  ;;  %vm2220_vm3 = vcmp.lt.s32.totalorder %v2188_v59, 128  ;;  %v2686_v59 = vadd.s32 2, %v13188_v51  ;;  %v15057_v51 = vadd.s32 2, %v13227_v48  ;;  %v17652_v46 = vld [vmem:[#allocation4_spill] sm:$0xff]  ;;  %v12203_v7 = vld [vmem:[%s17054_s5] sm:$0xff]  }
 0x3d7   :  { %v11808_v21 = vpack.c.bf16 %v2652_v6, %v2649_v35  ;;  %vm14923_vm5 = vmand %vm2204_vm9, %vm2220_vm3  ;;  %vm2761_vm3 = vcmp.eq.s32.totalorder %v12824_v31, %v14929_v20  ;;  %v2687_v6 = vadd.s32 2, %v13253_v15  ;;  %v15078_v15 = vadd.s32 2, %v13318_v29  ;;  %11098 = vmatprep.subr.bf16.mxu1 %v12203_v7 }
 0x3d8   :  { %vm2316_vm14 = vmand %vm2284_vm13, %vm14923_vm5  ;;  %11099 = vmatpush3.bf16.msra.mxu1 %v12203_v7 }
 0x3d9   :  { %9148 = vmatmul.mubr.msk.f32.gmra.mrb[152].mxu0 %vm2309_vm12, %v17256_v16  ;;  %11809 = vmatprep.subr.bf16.mxu0 %v11808_v21  ;;  %vm2712_vm12 = vcmp.lt.s32.totalorder %v2680_v62, 128  ;;  %v2688_v21 = vadd.s32 2, %v13362_v13  ;;  %v2752_v13 = vadd.s32 2, %v13427_v23  ;;  %v2690_v62 = vadd.s32 2, %v13514_v18 }
 0x3da   :  { %11811 = vmatpush3.bf16.msra.mxu0 %v17617_v22  ;;  %9149 = vmatprep.mubr.msk.f32.mxu0 %vm2312_vm7, %v17256_v16  ;;  %vm2313_vm7 = vmand %vm2281_vm2, %vm14906_vm8  ;;  %vm2697_vm8 = vcmp.ge.s32.totalorder %v2681_v60, 0  ;;  %vm17156_vm2 = vcmp.eq.s32.totalorder %v12816_v26, %v14929_v20  ;;  %v2754_v18 = vadd.s32 2, %v13568_v19  ;;  %v2691_v22 = vadd.s32 2, %v17557_v27 }
 0x3db   :  { %v11096_v54 = vpop.f32.mrb[156].mxu1  ;;  %11813 = vmatprep.subr.bf16.mxu0 %v11812_v36  ;;  %vm14942_vm9 = vmand %vm2696_vm11, %vm2712_vm12  ;;  %vm2763_vm12 = vcmp.eq.s32.totalorder %v12824_v31, %v14949_v52  ;;  %v2755_v19 = vadd.s32 2, %v13673_v14  ;;  %v2692_v27 = vadd.s32 2, %v13726_v40  ;;  %v2756_v14 = vadd.s32 2, %v13771_v63  ;;  %11100 = vmatprep.subr.bf16.mxu1 %v12204_v10 }
 0x3dc   :  { %v2665_v55 = vpop.f32.mrb[157].mxu1  ;;  %vm2793_vm13 = vmand %vm2761_vm3, %vm14942_vm9  ;;  %vm17152_vm3 = vcmp.eq.s32.totalorder %v12816_v26, %v14949_v52  ;;  %v2693_v40 = vadd.s32 2, %v13826_v56  ;;  %v2757_v63 = vadd.s32 2, %v13869_v0  ;;  %v2694_v56 = vadd.s32 2, %v13915_v61  ;;  %11101 = vmatpush3.bf16.msra.mxu1 %v12204_v10 }
 0x3dd   :  { %9150 = vmatmul.mubr.msk.f32.gmra.mrb[154].mxu0 %vm2311_vm10, %v17256_v16  ;;  %v11097_v9 = vpop.f32.mrb[158].mxu1  ;;  %vm2713_vm10 = vcmp.lt.s32.totalorder %v2681_v60, 128  ;;  %v2758_v0 = vadd.s32 2, %v13944_v33  ;;  %v2695_v61 = vadd.s32 2, %v13974_v44  ;;  %v2759_v33 = vadd.s32 2, %v14009_v41 }
 0x3de   :  { %v11820_v34 = vpack.c.bf16 %v11097_v9, %v11096_v54  ;;  %v2668_v32 = vpop.f32.mrb[159].mxu1  ;;  %11815 = vmatpush3.bf16.msra.mxu0 %v17620_v42  ;;  %9151 = vmatprep.mubr.msk.f32.mxu0 %vm2314_vm6, %v17256_v16  ;;  %vm2315_vm6 = vmand %vm2283_vm0, %vm14923_vm5  ;;  %vm2698_vm5 = vcmp.ge.s32.totalorder %v2682_v25, 0 }
 0x3df   :  { %v11816_v49 = vpack.c.bf16 %v2668_v32, %v2665_v55  ;;  %vm14963_vm11 = vmand %vm2697_vm8, %vm2713_vm10  ;;  %vm2765_vm10 = vcmp.eq.s32.totalorder %v12824_v31, %v14970_v47  ;;  %vm2727_vm1 = vcmp.lt.s32.totalorder %v2695_v61, 128  ;;  %vm2791_vm4 = vcmp.eq.s32.totalorder %v12824_v31, %v2759_v33 }
 0x3e0   :  { %vm2795_vm0 = vmand %vm2763_vm12, %vm14963_vm11 }
 0x3e1   :  { %9152 = vmatmul.mubr.msk.f32.gmra.mrb[156].mxu0 %vm2313_vm7, %v17256_v16  ;;  %11817 = vmatprep.subr.bf16.mxu0 %v11816_v49  ;;  %vm2714_vm7 = vcmp.lt.s32.totalorder %v2682_v25, 128 }
 0x3e2   :  { %11819 = vmatpush3.bf16.msra.mxu0 %v17623_v39  ;;  %9153 = vmatprep.mubr.msk.f32.mxu0 %vm2316_vm14, %v17256_v16  ;;  %vm2792_vm14 = vmand %vm17156_vm2, %vm14942_vm9  ;;  %vm2699_vm9 = vcmp.ge.s32.totalorder %v2683_v24, 0  ;;  %vm2720_vm2 = vcmp.lt.s32.totalorder %v2688_v21, 128 }
 0x3e3   :  { %11821 = vmatprep.subr.bf16.mxu0 %v11820_v34  ;;  %vm14987_vm8 = vmand %vm2698_vm5, %vm2714_vm7  ;;  %vm17153_vm5 = vcmp.eq.s32.totalorder %v12816_v26, %v14970_v47  ;;  %v17651_v34 = vld [vmem:[#allocation2_spill] sm:$0xff] }
 0x3e4   :  { %vm2797_vm12 = vmand %vm2765_vm10, %vm14987_vm8 }
 0x3e5   :  { %9154 = vmatmul.mubr.msk.f32.gmra.mrb[158].mxu0 %vm2315_vm6, %v17256_v16  ;;  %vm2715_vm6 = vcmp.lt.s32.totalorder %v2683_v24, 128  ;;  %vm2796_vm10 = vmand %vm17153_vm5, %vm14987_vm8  ;;  %vm2717_vm8 = vcmp.lt.s32.totalorder %v2685_v3, 128 }
 0x3e6   :  { %11823 = vmatpush3.bf16.msra.mxu0 %v17626_v1  ;;  %9174 = vmatprep.mubr.msk.f32.mxu0 %vm2793_vm13, %v17256_v16  ;;  %vm2794_vm13 = vmand %vm17152_vm3, %vm14963_vm11  ;;  %vm2716_vm11 = vcmp.lt.s32.totalorder %v2684_v11, 128  ;;  %v17653_v1 = vld [vmem:[#allocation3_spill] sm:$0xff] }
 0x3e7   :  { %vm15008_vm7 = vmand %vm2699_vm9, %vm2715_vm6  ;;  %vm17154_vm6 = vcmp.eq.s32.totalorder %v12816_v26, %v14994_v8 }
 0x3e9   :  { %9175 = vmatmul.mubr.msk.f32.vlgmr.msra.gmra.mrb[160].mxu0 %vm2792_vm14, %v17256_v16  ;;  %vm2767_vm14 = vcmp.eq.s32.totalorder %v12824_v31, %v14994_v8 }
 0x3ea   :  { %9176 = vmatprep.mubr.msk.f32.mxu0 %vm2795_vm0, %v17256_v16  ;;  %vm2700_vm0 = vcmp.ge.s32.totalorder %v2684_v11, 0  ;;  %vm2799_vm9 = vmand %vm2767_vm14, %vm15008_vm7 }
 0x3eb   :  { %vm15029_vm3 = vmand %vm2700_vm0, %vm2716_vm11  ;;  %vm17155_vm11 = vcmp.eq.s32.totalorder %v12816_v26, %v15015_v4 }
 0x3ec   :  { %vm2798_vm14 = vmand %vm17154_vm6, %vm15008_vm7  ;;  %vm2718_vm7 = vcmp.lt.s32.totalorder %v2686_v59, 128 }
 0x3ed   :  { %9177 = vmatmul.mubr.msk.f32.gmra.mrb[162].mxu0 %vm2794_vm13, %v17256_v16  ;;  %vm2769_vm13 = vcmp.eq.s32.totalorder %v12824_v31, %v15015_v4 }
 0x3ee   :  { %9178 = vmatprep.mubr.msk.f32.mxu0 %vm2797_vm12, %v17256_v16  ;;  %vm2701_vm12 = vcmp.ge.s32.totalorder %v2685_v3, 0  ;;  %vm2801_vm0 = vmand %vm2769_vm13, %vm15029_vm3 }
 0x3ef   :  { %vm15050_vm5 = vmand %vm2701_vm12, %vm2717_vm8  ;;  %vm17157_vm8 = vcmp.eq.s32.totalorder %v12816_v26, %v15036_v50 }
 0x3f0   :  { %vm2800_vm13 = vmand %vm17155_vm11, %vm15029_vm3  ;;  %vm2719_vm3 = vcmp.lt.s32.totalorder %v2687_v6, 128 }
 0x3f1   :  { %9179 = vmatmul.mubr.msk.f32.gmra.mrb[164].mxu0 %vm2796_vm10, %v17256_v16  ;;  %vm2771_vm10 = vcmp.eq.s32.totalorder %v12824_v31, %v15036_v50 }
 0x3f2   :  { %9180 = vmatprep.mubr.msk.f32.mxu0 %vm2799_vm9, %v17256_v16  ;;  %vm2702_vm9 = vcmp.ge.s32.totalorder %v2686_v59, 0  ;;  %vm2803_vm12 = vmand %vm2771_vm10, %vm15050_vm5  ;;  %v17654_v59 = vld [vmem:[#allocation6_spill] sm:$0xff] }
 0x3f3   :  { %vm15071_vm6 = vmand %vm2702_vm9, %vm2718_vm7  ;;  %vm17158_vm7 = vcmp.eq.s32.totalorder %v12816_v26, %v15057_v51 }
 0x3f4   :  { %vm2802_vm10 = vmand %vm17157_vm8, %vm15050_vm5  ;;  %vm2721_vm8 = vcmp.lt.s32.totalorder %v2689_v2, 128 }
 0x3f5   :  { %9181 = vmatmul.mubr.msk.f32.gmra.mrb[166].mxu0 %vm2798_vm14, %v17256_v16  ;;  %vm2773_vm14 = vcmp.eq.s32.totalorder %v12824_v31, %v15057_v51  ;;  %vm2804_vm5 = vmand %vm17158_vm7, %vm15071_vm6  ;;  %vm2722_vm7 = vcmp.lt.s32.totalorder %v2690_v62, 128 }
 0x3f6   :  { %9182 = vmatprep.mubr.msk.f32.mxu0 %vm2801_vm0, %v17256_v16  ;;  %vm2703_vm0 = vcmp.ge.s32.totalorder %v2687_v6, 0  ;;  %vm2805_vm9 = vmand %vm2773_vm14, %vm15071_vm6 }
 0x3f7   :  { %vm15092_vm11 = vmand %vm2703_vm0, %vm2719_vm3  ;;  %vm17159_vm0 = vcmp.eq.s32.totalorder %v12816_v26, %v15078_v15 }
 0x3f9   :  { %9183 = vmatmul.mubr.msk.f32.gmra.mrb[168].mxu0 %vm2800_vm13, %v17256_v16  ;;  %vm2775_vm13 = vcmp.eq.s32.totalorder %v12824_v31, %v15078_v15 }
 0x3fa   :  { %9184 = vmatprep.mubr.msk.f32.mxu0 %vm2803_vm12, %v17256_v16  ;;  %vm2704_vm12 = vcmp.ge.s32.totalorder %v2688_v21, 0  ;;  %vm2807_vm14 = vmand %vm2775_vm13, %vm15092_vm11  ;;  %vm2776_vm13 = vcmp.eq.s32.totalorder %v12816_v26, %v2752_v13 }
 0x3fb   :  { %vm15111_vm3 = vmand %vm2704_vm12, %vm2720_vm2 }
 0x3fc   :  { %vm2806_vm2 = vmand %vm17159_vm0, %vm15092_vm11  ;;  %vm2707_vm0 = vcmp.ge.s32.totalorder %v2691_v22, 0 }
 0x3fd   :  { %9185 = vmatmul.mubr.msk.f32.gmra.mrb[170].mxu0 %vm2802_vm10, %v17256_v16  ;;  %vm2777_vm10 = vcmp.eq.s32.totalorder %v12824_v31, %v2752_v13  ;;  %vm2808_vm11 = vmand %vm2776_vm13, %vm15111_vm3  ;;  %vm2780_vm13 = vcmp.eq.s32.totalorder %v12816_v26, %v2754_v18  ;;  %v17655_v13 = vld [vmem:[#allocation5_spill] sm:$0xff] }
 0x3fe   :  { %9186 = vmatprep.mubr.msk.f32.mxu0 %vm2805_vm9, %v17256_v16  ;;  %vm2705_vm9 = vcmp.ge.s32.totalorder %v2689_v2, 0  ;;  %vm2809_vm6 = vmand %vm2777_vm10, %vm15111_vm3  ;;  %vm2778_vm10 = vcmp.eq.s32.totalorder %v12816_v26, %v2753_v17 }
 0x3ff   :  { %vm15128_vm12 = vmand %vm2705_vm9, %vm2721_vm8 }
 0x400   :  { %vm2810_vm3 = vmand %vm2778_vm10, %vm15128_vm12  ;;  %vm2782_vm10 = vcmp.eq.s32.totalorder %v12816_v26, %v2755_v19 }
 0x401   :  { %9187 = vmatmul.mubr.msk.f32.gmra.mrb[172].mxu0 %vm2804_vm5, %v17256_v16  ;;  %vm2779_vm5 = vcmp.eq.s32.totalorder %v12824_v31, %v2753_v17 }
 0x402   :  { %9188 = vmatprep.mubr.msk.f32.mxu0 %vm2807_vm14, %v17256_v16  ;;  %vm2706_vm14 = vcmp.ge.s32.totalorder %v2690_v62, 0  ;;  %vm2811_vm8 = vmand %vm2779_vm5, %vm15128_vm12 }
 0x403   :  { %vm15142_vm9 = vmand %vm2706_vm14, %vm2722_vm7  ;;  %vm2783_vm14 = vcmp.eq.s32.totalorder %v12824_v31, %v2755_v19 }
 0x404   :  { %vm2812_vm12 = vmand %vm2780_vm13, %vm15142_vm9 }
 0x405   :  { %9189 = vmatmul.mubr.msk.f32.gmra.mrb[174].mxu0 %vm2806_vm2, %v17256_v16  ;;  %vm2781_vm2 = vcmp.eq.s32.totalorder %v12824_v31, %v2754_v18 }
 0x406   :  { %9190 = vmatprep.mubr.msk.f32.mxu0 %vm2809_vm6, %v17256_v16  ;;  %vm2723_vm6 = vcmp.lt.s32.totalorder %v2691_v22, 128  ;;  %vm2813_vm7 = vmand %vm2781_vm2, %vm15142_vm9 }
 0x407   :  { %vm15156_vm5 = vmand %vm2707_vm0, %vm2723_vm6  ;;  %vm2785_vm6 = vcmp.eq.s32.totalorder %v12824_v31, %v2756_v14 }
 0x408   :  { %vm2815_vm0 = vmand %vm2783_vm14, %vm15156_vm5  ;;  %vm2784_vm14 = vcmp.eq.s32.totalorder %v12816_v26, %v2756_v14 }
 0x409   :  { %9191 = vmatmul.mubr.msk.f32.gmra.mrb[176].mxu0 %vm2808_vm11, %v17256_v16  ;;  %vm2708_vm11 = vcmp.ge.s32.totalorder %v2692_v27, 0  ;;  %vm2814_vm9 = vmand %vm2782_vm10, %vm15156_vm5 }
 0x40a   :  { %9192 = vmatprep.mubr.msk.f32.mxu0 %vm2811_vm8, %v17256_v16  ;;  %vm2724_vm8 = vcmp.lt.s32.totalorder %v2692_v27, 128  ;;  %v17657_v27 = vld [vmem:[#allocation7_spill] sm:$0xff] }
 0x40b   :  { %vm15170_vm2 = vmand %vm2708_vm11, %vm2724_vm8  ;;  %vm2787_vm8 = vcmp.eq.s32.totalorder %v12824_v31, %v2757_v63 }
 0x40c   :  { %vm2817_vm13 = vmand %vm2785_vm6, %vm15170_vm2  ;;  %vm2786_vm6 = vcmp.eq.s32.totalorder %v12816_v26, %v2757_v63  ;;  %v17658_v63 = vld [vmem:[#allocation10_spill] sm:$0xff] }
 0x40d   :  { %9193 = vmatmul.mubr.msk.f32.gmra.mrb[178].mxu0 %vm2810_vm3, %v17256_v16  ;;  %vm2709_vm3 = vcmp.ge.s32.totalorder %v2693_v40, 0  ;;  %vm2816_vm5 = vmand %vm2784_vm14, %vm15170_vm2  ;;  %vm2788_vm14 = vcmp.eq.s32.totalorder %v12816_v26, %v2758_v0 }
 0x40e   :  { %9194 = vmatprep.mubr.msk.f32.mxu0 %vm2813_vm7, %v17256_v16  ;;  %vm2725_vm7 = vcmp.lt.s32.totalorder %v2693_v40, 128 }
 0x40f   :  { %vm15184_vm11 = vmand %vm2709_vm3, %vm2725_vm7  ;;  %vm2789_vm7 = vcmp.eq.s32.totalorder %v12824_v31, %v2758_v0 }
 0x410   :  { %vm2819_vm10 = vmand %vm2787_vm8, %vm15184_vm11 }
 0x411   :  { %9195 = vmatmul.mubr.msk.f32.gmra.mrb[180].mxu0 %vm2812_vm12, %v17256_v16  ;;  %vm2710_vm12 = vcmp.ge.s32.totalorder %v2694_v56, 0 }
 0x412   :  { %9196 = vmatprep.mubr.msk.f32.mxu0 %vm2815_vm0, %v17256_v16  ;;  %vm2726_vm0 = vcmp.lt.s32.totalorder %v2694_v56, 128 }
 0x413   :  { %vm2742_vm3 = vmand %vm2710_vm12, %vm2726_vm0 }
 0x414   :  { %vm2821_vm2 = vmand %vm2789_vm7, %vm2742_vm3 }
 0x415   :  { %9197 = vmatmul.mubr.msk.f32.gmra.mrb[182].mxu0 %vm2814_vm9, %v17256_v16  ;;  %vm2711_vm9 = vcmp.ge.s32.totalorder %v2695_v61, 0  ;;  %vm2820_vm12 = vmand %vm2788_vm14, %vm2742_vm3 }
 0x416   :  { %9198 = vmatprep.mubr.msk.f32.mxu0 %vm2817_vm13, %v17256_v16  ;;  %vm2818_vm13 = vmand %vm2786_vm6, %vm15184_vm11  ;;  %vm17162_vm11 = vcmask 261120  }
 0x417   :  { %vm2743_vm8 = vmand %vm2711_vm9, %vm2727_vm1 }
 0x418   :  { %vm2823_vm0 = vmand %vm2791_vm4, %vm2743_vm8 }
 0x419   :  { %9199 = vmatmul.mubr.msk.f32.gmra.mrb[184].mxu0 %vm2816_vm5, %v17256_v16  ;;  %vm2790_vm5 = vcmp.eq.s32.totalorder %v12816_v26, %v2759_v33  ;;  %v17659_v33 = vld [vmem:[#allocation11_spill] sm:$0xff] }
 0x41a   :  { %9200 = vmatprep.mubr.msk.f32.mxu0 %vm2819_vm10, %v17256_v16  ;;  %vm2822_vm10 = vmand %vm2790_vm5, %vm2743_vm8 }
 0x41d   :  { %9201 = vmatmul.mubr.msk.f32.gmra.mrb[186].mxu0 %vm2818_vm13, %v17256_v16 }
 0x41e   :  { %9202 = vmatprep.mubr.msk.f32.mxu0 %vm2821_vm2, %v17256_v16 }
 0x421   :  { %9203 = vmatmul.mubr.msk.f32.gmra.mrb[188].mxu0 %vm2820_vm12, %v17256_v16 }
 0x422   :  { %9204 = vmatprep.mubr.msk.f32.mxu0 %vm2823_vm0, %v17256_v16 }
 0x425   :  { %9205 = vmatmul.mubr.msk.f32.gmra.mrb[190].mxu0 %vm2822_vm10, %v17256_v16 }
 0x43c   :  { %v10182_v44 = vpop.f32.mrb[96].mxu0 }
 0x43d   :  { %v10183_v41 = vpop.f32.mrb[97].mxu0 }
 0x43e   :  { %v10184_v60 = vadd.f32 %v10183_v41, %v10182_v44 }
 0x440   :  { %v15213_v31 = vadd.f32 %v10184_v60, %v17651_v34  ;;  %v10185_v32 = vpop.f32.mrb[98].mxu0 }
 0x441   :  { %v10186_v42 = vpop.f32.mrb[99].mxu0 }
 0x442   :  { %v10187_v49 = vadd.f32 %v10186_v42, %v10185_v32  ;;  %v17660_v32 = vld [vmem:[#allocation36_spill] sm:$0xff] }
 0x444   :  { %v15216_v25 = vadd.f32 %v10187_v49, %v17652_v46  ;;  %v10188_v39 = vpop.f32.mrb[100].mxu0 }
 0x445   :  { %v10189_v35 = vpop.f32.mrb[101].mxu0 }
 0x446   :  { %v10190_v24 = vadd.f32 %v10189_v35, %v10188_v39  ;;  %v17661_v35 = vld [vmem:[#allocation37_spill] sm:$0xff] }
 0x448   :  { %v15219_v53 = vadd.f32 %v10190_v24, %v17653_v1  ;;  %v10191_v11 = vpop.f32.mrb[102].mxu0 }
 0x449   :  { %v10192_v43 = vpop.f32.mrb[103].mxu0 }
 0x44a   :  { %v10193_v3 = vadd.f32 %v10192_v43, %v10191_v11 }
 0x44c   :  { %v15225_v36 = vadd.f32 %v10193_v3, %v17654_v59  ;;  %v10194_v6 = vpop.f32.mrb[104].mxu0  ;;  %v17662_v3 = vld [vmem:[#allocation38_spill] sm:$0xff] }
 0x44d   :  { %v10195_v58 = vpop.f32.mrb[105].mxu0 }
 0x44e   :  { %v10196_v21 = vadd.f32 %v10195_v58, %v10194_v6 }
 0x450   :  { %v15231_v2 = vadd.f32 %v10196_v21, %v17655_v13  ;;  %v10197_v23 = vpop.f32.mrb[106].mxu0  ;;  %v17663_v21 = vld [vmem:[#allocation39_spill] sm:$0xff] }
 0x451   :  { %v10198_v17 = vpop.f32.mrb[107].mxu0 }
 0x452   :  { %v10199_v62 = vadd.f32 %v10198_v17, %v10197_v23 }
 0x454   :  { %v15234_v18 = vadd.f32 %v10199_v62, %v17656_v37  ;;  %v10200_v22 = vpop.f32.mrb[108].mxu0  ;;  %v17664_v62 = vld [vmem:[#allocation40_spill] sm:$0xff] }
 0x455   :  { %v10201_v54 = vpop.f32.mrb[109].mxu0 }
 0x456   :  { %v10202_v19 = vadd.f32 %v10201_v54, %v10200_v22 }
 0x458   :  { %v15237_v55 = vadd.f32 %v10202_v19, %v17657_v27  ;;  %v10203_v14 = vpop.f32.mrb[110].mxu0  ;;  %v17665_v27 = vld [vmem:[#allocation41_spill] sm:$0xff] }
 0x459   :  { %v10204_v40 = vpop.f32.mrb[111].mxu0 }
 0x45a   :  { %v10205_v30 = vadd.f32 %v10204_v40, %v10203_v14 }
 0x45c   :  { %v15240_v56 = vadd.f32 %v10205_v30, %v17658_v63  ;;  %v10206_v9 = vpop.f32.mrb[112].mxu0 }
 0x45d   :  { %v10207_v0 = vpop.f32.mrb[113].mxu0 }
 0x45e   :  { %v10208_v61 = vadd.f32 %v10207_v0, %v10206_v9  ;;  %v17666_v9 = vld [vmem:[#allocation42_spill] sm:$0xff] }
 0x460   :  { %v15243_v44 = vadd.f32 %v10208_v61, %v17659_v33  ;;  %v10209_v41 = vpop.f32.mrb[114].mxu0 }
 0x461   :  { %v10210_v60 = vpop.f32.mrb[115].mxu0 }
 0x462   :  { %v10211_v34 = vadd.f32 %v10210_v60, %v10209_v41 }
 0x464   :  { %v15246_v42 = vadd.f32 %v10211_v34, %v17660_v32  ;;  %v10212_v49 = vpop.f32.mrb[116].mxu0 }
 0x465   :  { %v10213_v46 = vpop.f32.mrb[117].mxu0 }
 0x466   :  { %v10214_v39 = vadd.f32 %v10213_v46, %v10212_v49  ;;  %v15272_v46 = vld [vmem:[%s17054_s5 + $0x10] sm:$0xff]  }
 0x467   :  { %11118 = vmatprep.subr.bf16.mxu1 %v15272_v46 }
 0x468   :  { %v15249_v24 = vadd.f32 %v10214_v39, %v17661_v35  ;;  %v10215_v1 = vpop.f32.mrb[118].mxu0 }
 0x469   :  { %v10216_v11 = vpop.f32.mrb[119].mxu0 }
 0x46a   :  { %v10217_v43 = vadd.f32 %v10216_v11, %v10215_v1 }
 0x46c   :  { %v15252_v7 = vadd.f32 %v10217_v43, %v17662_v3  ;;  %v10218_v59 = vpop.f32.mrb[120].mxu0 }
 0x46d   :  { %v10219_v6 = vpop.f32.mrb[121].mxu0 }
 0x46e   :  { %v10220_v58 = vadd.f32 %v10219_v6, %v10218_v59 }
 0x470   :  { %v15255_v10 = vadd.f32 %v10220_v58, %v17663_v21  ;;  %v10221_v13 = vpop.f32.mrb[122].mxu0 }
 0x471   :  { %v10222_v23 = vpop.f32.mrb[123].mxu0 }
 0x472   :  { %v10223_v17 = vadd.f32 %v10222_v23, %v10221_v13 }
 0x474   :  { %v15258_v37 = vadd.f32 %v10223_v17, %v17664_v62  ;;  %v10224_v22 = vpop.f32.mrb[124].mxu0 }
 0x475   :  { %v10225_v54 = vpop.f32.mrb[125].mxu0 }
 0x476   :  { %v10226_v19 = vadd.f32 %v10225_v54, %v10224_v22 }
 0x478   :  { %v15261_v14 = vadd.f32 %v10226_v19, %v17665_v27  ;;  %v10227_v40 = vpop.f32.mrb[126].mxu0 }
 0x479   :  { %v10228_v30 = vpop.f32.mrb[127].mxu0 }
 0x47a   :  { %v10229_v63 = vadd.f32 %v10228_v30, %v10227_v40 }
 0x47c   :  { %v15264_v0 = vadd.f32 %v10229_v63, %v17666_v9  ;;  %v10279_v61 = vpop.f32.mrb[128].mxu0 }
 0x47d   :  { %v10280_v33 = vpop.f32.mrb[129].mxu0 }
 0x47e   :  { %v10281_v41 = vadd.f32 %v10280_v33, %v10279_v61 }
 0x480   :  { %v15267_v60 = vadd.f32 %v10281_v41, %v15213_v31  ;;  %v10282_v34 = vpop.f32.mrb[130].mxu0 }
 0x481   :  { %v10283_v32 = vpop.f32.mrb[131].mxu0 }
 0x482   :  { %v10284_v49 = vadd.f32 %v10283_v32, %v10282_v34 }
 0x484   :  { %v15275_v39 = vadd.f32 %v10284_v49, %v15216_v25  ;;  %v10285_v35 = vpop.f32.mrb[132].mxu0 }
 0x485   :  { %v10286_v1 = vpop.f32.mrb[133].mxu0 }
 0x486   :  { %v10287_v11 = vadd.f32 %v10286_v1, %v10285_v35 }
 0x488   :  { %v15279_v43 = vadd.f32 %v10287_v11, %v15219_v53  ;;  %v10288_v31 = vpop.f32.mrb[134].mxu0 }
 0x489   :  { %v10289_v3 = vpop.f32.mrb[135].mxu0 }
 0x48a   :  { %v10290_v59 = vadd.f32 %v10289_v3, %v10288_v31 }
 0x48c   :  { %v15282_v6 = vadd.f32 %v10290_v59, %v15225_v36  ;;  %v10291_v58 = vpop.f32.mrb[136].mxu0 }
 0x48d   :  { %v10292_v21 = vpop.f32.mrb[137].mxu0 }
 0x48e   :  { %v10293_v13 = vadd.f32 %v10292_v21, %v10291_v58 }
 0x490   :  { %v15285_v25 = vadd.f32 %v10293_v13, %v15231_v2  ;;  %v10294_v23 = vpop.f32.mrb[138].mxu0 }
 0x491   :  { %v10295_v17 = vpop.f32.mrb[139].mxu0 }
 0x492   :  { %v10296_v62 = vadd.f32 %v10295_v17, %v10294_v23 }
 0x494   :  { %v15288_v22 = vadd.f32 %v10296_v62, %v15234_v18  ;;  %v10297_v53 = vpop.f32.mrb[140].mxu0 }
 0x495   :  { %v10298_v54 = vpop.f32.mrb[141].mxu0 }
 0x496   :  { %v10299_v19 = vadd.f32 %v10298_v54, %v10297_v53 }
 0x498   :  { %v15291_v27 = vadd.f32 %v10299_v19, %v15237_v55  ;;  %v10300_v36 = vpop.f32.mrb[142].mxu0 }
 0x499   :  { %v10301_v40 = vpop.f32.mrb[143].mxu0 }
 0x49a   :  { %v10302_v30 = vadd.f32 %v10301_v40, %v10300_v36 }
 0x49c   :  { %v15294_v63 = vadd.f32 %v10302_v30, %v15240_v56  ;;  %v10303_v2 = vpop.f32.mrb[144].mxu0 }
 0x49d   :  { %v10304_v9 = vpop.f32.mrb[145].mxu0 }
 0x49e   :  { %v10305_v61 = vadd.f32 %v10304_v9, %v10303_v2 }
 0x4a0   :  { %v15297_v33 = vadd.f32 %v10305_v61, %v15243_v44  ;;  %v10306_v18 = vpop.f32.mrb[146].mxu0 }
 0x4a1   :  { %v10307_v41 = vpop.f32.mrb[147].mxu0 }
 0x4a2   :  { %v10308_v34 = vadd.f32 %v10307_v41, %v10306_v18 }
 0x4a4   :  { %v15300_v32 = vadd.f32 %v10308_v34, %v15246_v42  ;;  %v10309_v55 = vpop.f32.mrb[148].mxu0 }
 0x4a5   :  { %v10310_v49 = vpop.f32.mrb[149].mxu0 }
 0x4a6   :  { %v10311_v35 = vadd.f32 %v10310_v49, %v10309_v55 }
 0x4a8   :  { %v15303_v1 = vadd.f32 %v10311_v35, %v15249_v24  ;;  %v10312_v56 = vpop.f32.mrb[150].mxu0 }
 0x4a9   :  { %v10313_v11 = vpop.f32.mrb[151].mxu0 }
 0x4aa   :  { %v10314_v31 = vadd.f32 %v10313_v11, %v10312_v56 }
 0x4ac   :  { %v15306_v3 = vadd.f32 %v10314_v31, %v15252_v7  ;;  %v10315_v44 = vpop.f32.mrb[152].mxu0 }
 0x4ad   :  { %v10316_v59 = vpop.f32.mrb[153].mxu0 }
 0x4ae   :  { %v10317_v58 = vadd.f32 %v10316_v59, %v10315_v44 }
 0x4b0   :  { %v15309_v21 = vadd.f32 %v10317_v58, %v15255_v10  ;;  %v10318_v42 = vpop.f32.mrb[154].mxu0 }
 0x4b1   :  { %v10319_v13 = vpop.f32.mrb[155].mxu0 }
 0x4b2   :  { %v10320_v23 = vadd.f32 %v10319_v13, %v10318_v42 }
 0x4b4   :  { %v15312_v17 = vadd.f32 %v10320_v23, %v15258_v37  ;;  %v10321_v24 = vpop.f32.mrb[156].mxu0  ;;  %v15323_v37 = vld [vmem:[%s17055_s4] ss:$0 sm:$0xff] }
 0x4b5   :  { %v10322_v62 = vpop.f32.mrb[157].mxu0 }
 0x4b6   :  { %v10323_v53 = vadd.f32 %v10322_v62, %v10321_v24 }
 0x4b8   :  { %v15315_v54 = vadd.f32 %v10323_v53, %v15261_v14  ;;  %v10324_v7 = vpop.f32.mrb[158].mxu0 }
 0x4b9   :  { %v10325_v19 = vpop.f32.mrb[159].mxu0 }
 0x4ba   :  { %v10326_v36 = vadd.f32 %v10325_v19, %v10324_v7 }
 0x4bc   :  { %v15318_v40 = vadd.f32 %v10326_v36, %v15264_v0  ;;  %v10376_v10 = vpop.f32.mrb[160].mxu0 }
 0x4bd   :  { %v10377_v30 = vpop.f32.mrb[161].mxu0 }
 0x4be   :  { %v10378_v2 = vadd.f32 %v10377_v30, %v10376_v10 }
 0x4c0   :  { %v3001_v9 = vadd.f32 %v10378_v2, %v15267_v60  ;;  %v10379_v61 = vpop.f32.mrb[162].mxu0 }
 0x4c1   :  { %v10380_v18 = vpop.f32.mrb[163].mxu0 }
 0x4c2   :  { %v3024_v14 = vadd.f32 %v15323_v37, %v3001_v9  ;;  %v10381_v41 = vadd.f32 %v10380_v18, %v10379_v61 }
 0x4c4   :  { %v3002_v34 = vadd.f32 %v10381_v41, %v15275_v39  ;;  %v10382_v55 = vpop.f32.mrb[164].mxu0  ;;  %v3056_v49 = vmul.f32 0.2, %v3024_v14  ;;  %vm3040_vm4 = vcmp.gt.f32.partialorder %v3024_v14, 0.0 }
 0x4c5   :  { %v10383_v0 = vpop.f32.mrb[165].mxu0 }
 0x4c6   :  { %v3025_v35 = vadd.f32 %v15323_v37, %v3002_v34  ;;  %v10384_v56 = vadd.f32 %v10383_v0, %v10382_v55  ;;  %v3072_v59 = vsel %vm3040_vm4, %v3024_v14, %v3056_v49  ;;  %v12206_v14 = vld [vmem:[%s17054_s5 + $0x18] sm:$0xff]  }
 0x4c8   :  { %vm3041_vm1 = vcmp.gt.f32.partialorder %v3025_v35, 0.0  ;;  %v3057_v11 = vmul.f32 0.2, %v3025_v35  ;;  %v3003_v31 = vadd.f32 %v10384_v56, %v15279_v43  ;;  %v10385_v44 = vpop.f32.mrb[166].mxu0 }
 0x4c9   :  { %v10386_v60 = vpop.f32.mrb[167].mxu0 }
 0x4ca   :  { %v3073_v58 = vsel %vm3041_vm1, %v3025_v35, %v3057_v11  ;;  %v3026_v42 = vadd.f32 %v15323_v37, %v3003_v31  ;;  %v10387_v13 = vadd.f32 %v10386_v60, %v10385_v44  ;;  %v15352_v35 = vld [vmem:[%s17054_s5 + $0x20] sm:$0xff]  }
 0x4cb   :  { %v15331_v39 = vpack.c.bf16 %v3073_v58, %v3072_v59 }
 0x4cc   :  { %v3004_v23 = vadd.f32 %v10387_v13, %v15282_v6  ;;  %v10388_v24 = vpop.f32.mrb[168].mxu0  ;;  %v3058_v53 = vmul.f32 0.2, %v3026_v42  ;;  %vm3042_vm6 = vcmp.gt.f32.partialorder %v3026_v42, 0.0 }
 0x4cd   :  { %v10389_v62 = vpop.f32.mrb[169].mxu0  ;;  %11102 = vmatprep.mubr.msk.bf16.mxu1 %vm17162_vm11, %v15331_v39 }
 0x4ce   :  { %v3027_v43 = vadd.f32 %v15323_v37, %v3004_v23  ;;  %v10390_v7 = vadd.f32 %v10389_v62, %v10388_v24  ;;  %v3074_v2 = vsel %vm3042_vm6, %v3026_v42, %v3058_v53 }
 0x4d0   :  { %vm3043_vm3 = vcmp.gt.f32.partialorder %v3027_v43, 0.0  ;;  %v3059_v19 = vmul.f32 0.2, %v3027_v43  ;;  %v3005_v36 = vadd.f32 %v10390_v7, %v15285_v25  ;;  %v10391_v10 = vpop.f32.mrb[170].mxu0 }
 0x4d1   :  { %v10392_v30 = vpop.f32.mrb[171].mxu0 }
 0x4d2   :  { %v3075_v9 = vsel %vm3043_vm3, %v3027_v43, %v3059_v19  ;;  %v3028_v6 = vadd.f32 %v15323_v37, %v3005_v36  ;;  %v10393_v61 = vadd.f32 %v10392_v30, %v10391_v10 }
 0x4d3   :  { %v15339_v18 = vpack.c.bf16 %v3075_v9, %v3074_v2 }
 0x4d4   :  { %v3006_v41 = vadd.f32 %v10393_v61, %v15288_v22  ;;  %v10394_v34 = vpop.f32.mrb[172].mxu0  ;;  %v3060_v25 = vmul.f32 0.2, %v3028_v6  ;;  %vm3044_vm7 = vcmp.gt.f32.partialorder %v3028_v6, 0.0 }
 0x4d5   :  { %v10395_v55 = vpop.f32.mrb[173].mxu0  ;;  %11103 = vmatmul.mubr.msk.bf16.vlgmr.msra.gmra.mrb[160].mxu1 %vm17162_vm11, %v15339_v18 }
 0x4d6   :  { %v3029_v0 = vadd.f32 %v15323_v37, %v3006_v41  ;;  %v10396_v49 = vadd.f32 %v10395_v55, %v10394_v34  ;;  %11119 = vmatpush3.bf16.msra.mxu1 %v15272_v46  ;;  %v3076_v44 = vsel %vm3044_vm7, %v3028_v6, %v3060_v25 }
 0x4d7   :  { %11120 = vmatprep.subr.bf16.mxu1 %v12206_v14 }
 0x4d8   :  { %vm3045_vm9 = vcmp.gt.f32.partialorder %v3029_v0, 0.0  ;;  %v3061_v22 = vmul.f32 0.2, %v3029_v0  ;;  %v3007_v56 = vadd.f32 %v10396_v49, %v15291_v27  ;;  %v10397_v11 = vpop.f32.mrb[174].mxu0 }
 0x4d9   :  { %v10398_v31 = vpop.f32.mrb[175].mxu0 }
 0x4da   :  { %v3077_v60 = vsel %vm3045_vm9, %v3029_v0, %v3061_v22  ;;  %v3030_v59 = vadd.f32 %v15323_v37, %v3007_v56  ;;  %v10399_v58 = vadd.f32 %v10398_v31, %v10397_v11  ;;  %11121 = vmatpush3.bf16.msra.mxu1 %v12206_v14 }
 0x4db   :  { %v15356_v46 = vpack.c.bf16 %v3077_v60, %v3076_v44  ;;  %11226 = vmatprep.subr.bf16.mxu1 %v15352_v35 }
 0x4dc   :  { %v3008_v42 = vadd.f32 %v10399_v58, %v15294_v63  ;;  %v10400_v13 = vpop.f32.mrb[176].mxu0  ;;  %v3062_v27 = vmul.f32 0.2, %v3030_v59  ;;  %vm3046_vm13 = vcmp.gt.f32.partialorder %v3030_v59, 0.0 }
 0x4dd   :  { %v10401_v23 = vpop.f32.mrb[177].mxu0  ;;  %11106 = vmatprep.mubr.msk.bf16.mxu1 %vm17162_vm11, %v15356_v46 }
 0x4de   :  { %v3031_v24 = vadd.f32 %v15323_v37, %v3008_v42  ;;  %v10402_v62 = vadd.f32 %v10401_v23, %v10400_v13  ;;  %v3078_v36 = vsel %vm3046_vm13, %v3030_v59, %v3062_v27 }
 0x4e0   :  { %vm3047_vm2 = vcmp.gt.f32.partialorder %v3031_v24, 0.0  ;;  %v3063_v53 = vmul.f32 0.2, %v3031_v24  ;;  %v3009_v43 = vadd.f32 %v10402_v62, %v15297_v33  ;;  %v10403_v7 = vpop.f32.mrb[178].mxu0 }
 0x4e1   :  { %v10404_v19 = vpop.f32.mrb[179].mxu0 }
 0x4e2   :  { %v3079_v10 = vsel %vm3047_vm2, %v3031_v24, %v3063_v53  ;;  %v3032_v63 = vadd.f32 %v15323_v37, %v3009_v43  ;;  %v10405_v30 = vadd.f32 %v10404_v19, %v10403_v7 }
 0x4e3   :  { %v15365_v2 = vpack.c.bf16 %v3079_v10, %v3078_v36 }
 0x4e4   :  { %v3010_v9 = vadd.f32 %v10405_v30, %v15300_v32  ;;  %v10406_v6 = vpop.f32.mrb[180].mxu0  ;;  %v3064_v14 = vmul.f32 0.2, %v3032_v63  ;;  %vm3048_vm14 = vcmp.gt.f32.partialorder %v3032_v63, 0.0 }
 0x4e5   :  { %v10407_v61 = vpop.f32.mrb[181].mxu0  ;;  %11107 = vmatmul.mubr.msk.bf16.gmra.mrb[164].mxu1 %vm17162_vm11, %v15365_v2 }
 0x4e6   :  { %v3033_v41 = vadd.f32 %v15323_v37, %v3010_v9  ;;  %v10408_v33 = vadd.f32 %v10407_v61, %v10406_v6  ;;  %v3080_v49 = vsel %vm3048_vm14, %v3032_v63, %v3064_v14 }
 0x4e8   :  { %vm3049_vm8 = vcmp.gt.f32.partialorder %v3033_v41, 0.0  ;;  %v3065_v34 = vmul.f32 0.2, %v3033_v41  ;;  %v3011_v55 = vadd.f32 %v10408_v33, %v15303_v1  ;;  %v10409_v25 = vpop.f32.mrb[182].mxu0 }
 0x4e9   :  { %v10410_v0 = vpop.f32.mrb[183].mxu0 }
 0x4ea   :  { %v3081_v22 = vsel %vm3049_vm8, %v3033_v41, %v3065_v34  ;;  %v3034_v32 = vadd.f32 %v15323_v37, %v3011_v55  ;;  %v10411_v56 = vadd.f32 %v10410_v0, %v10409_v25 }
 0x4eb   :  { %v15373_v11 = vpack.c.bf16 %v3081_v22, %v3080_v49 }
 0x4ec   :  { %v3012_v31 = vadd.f32 %v10411_v56, %v15306_v3  ;;  %v10412_v44 = vpop.f32.mrb[184].mxu0  ;;  %v3066_v59 = vmul.f32 0.2, %v3034_v32  ;;  %vm3050_vm12 = vcmp.gt.f32.partialorder %v3034_v32, 0.0  ;;  %v12211_v56 = vld [vmem:[%s17054_s5 + $0x40] sm:$0xff]  }
 0x4ed   :  { %v10413_v60 = vpop.f32.mrb[185].mxu0  ;;  %11110 = vmatprep.mubr.msk.bf16.mxu1 %vm17162_vm11, %v15373_v11 }
 0x4ee   :  { %v3035_v58 = vadd.f32 %v15323_v37, %v3012_v31  ;;  %v10414_v1 = vadd.f32 %v10413_v60, %v10412_v44  ;;  %v3082_v24 = vsel %vm3050_vm12, %v3034_v32, %v3066_v59  ;;  %v12212_v31 = vld [vmem:[%s17054_s5 + $0x48] sm:$0xff]   ;;  %v17667_v44 = vld [vmem:[#allocation9_spill] sm:$0xff] }
 0x4ef   :  { %v3234_v60 = vand.u32 31, %v17667_v44 }
 0x4f0   :  { %vm3051_vm0 = vcmp.gt.f32.partialorder %v3035_v58, 0.0  ;;  %v3067_v42 = vmul.f32 0.2, %v3035_v58  ;;  %v3013_v13 = vadd.f32 %v10414_v1, %v15309_v21  ;;  %v10415_v23 = vpop.f32.mrb[186].mxu0 }
 0x4f1   :  { %v10416_v27 = vpop.f32.mrb[187].mxu0 }
 0x4f2   :  { %v3083_v62 = vsel %vm3051_vm0, %v3035_v58, %v3067_v42  ;;  %v3036_v3 = vadd.f32 %v15323_v37, %v3013_v13  ;;  %v10417_v53 = vadd.f32 %v10416_v27, %v10415_v23 }
 0x4f3   :  { %v15381_v43 = vpack.c.bf16 %v3083_v62, %v3082_v24 }
 0x4f4   :  { %v3014_v7 = vadd.f32 %v10417_v53, %v15312_v17  ;;  %v10418_v19 = vpop.f32.mrb[188].mxu0  ;;  %v3068_v10 = vmul.f32 0.2, %v3036_v3  ;;  %vm3052_vm5 = vcmp.gt.f32.partialorder %v3036_v3, 0.0 }
 0x4f5   :  { %v10419_v36 = vpop.f32.mrb[189].mxu0  ;;  %11111 = vmatmul.mubr.msk.bf16.gmra.mrb[168].mxu1 %vm17162_vm11, %v15381_v43 }
 0x4f6   :  { %v3037_v63 = vadd.f32 %v15323_v37, %v3014_v7  ;;  %v10420_v21 = vadd.f32 %v10419_v36, %v10418_v19  ;;  %v3084_v14 = vsel %vm3052_vm5, %v3036_v3, %v3068_v10 }
 0x4f8   :  { %vm3053_vm10 = vcmp.gt.f32.partialorder %v3037_v63, 0.0  ;;  %v3069_v30 = vmul.f32 0.2, %v3037_v63  ;;  %v3015_v9 = vadd.f32 %v10420_v21, %v15315_v54  ;;  %v10421_v6 = vpop.f32.mrb[190].mxu0 }
 0x4f9   :  { %v10422_v61 = vpop.f32.mrb[191].mxu0 }
 0x4fa   :  { %v3085_v41 = vsel %vm3053_vm10, %v3037_v63, %v3069_v30  ;;  %v3038_v17 = vadd.f32 %v15323_v37, %v3015_v9  ;;  %v10423_v33 = vadd.f32 %v10422_v61, %v10421_v6 }
 0x4fb   :  { %v3094_v34 = vpack.c.bf16 %v3085_v41, %v3084_v14 }
 0x4fc   :  { %v3016_v55 = vadd.f32 %v10423_v33, %v15318_v40  ;;  %v3070_v25 = vmul.f32 0.2, %v3038_v17  ;;  %vm3054_vm4 = vcmp.gt.f32.partialorder %v3038_v17, 0.0  ;;  %v12208_v40 = vld [vmem:[%s17054_s5 + $0x28] sm:$0xff]  }
 0x4fd   :  { %11114 = vmatprep.mubr.msk.bf16.mxu1 %vm17162_vm11, %v3094_v34 }
 0x4fe   :  { %v3039_v0 = vadd.f32 %v15323_v37, %v3016_v55  ;;  %v3086_v22 = vsel %vm3054_vm4, %v3038_v17, %v3070_v25  ;;  %v12209_v37 = vld [vmem:[%s17054_s5 + $0x30] sm:$0xff]  }
 0x500   :  { %vm3055_vm1 = vcmp.gt.f32.partialorder %v3039_v0, 0.0  ;;  %v3071_v49 = vmul.f32 0.2, %v3039_v0 }
 0x502   :  { %v3087_v54 = vsel %vm3055_vm1, %v3039_v0, %v3071_v49 }
 0x503   :  { %v3095_v32 = vpack.c.bf16 %v3087_v54, %v3086_v22 }
 0x505   :  { %11115 = vmatmul.mubr.msk.bf16.gmra.mrb[172].mxu1 %vm17162_vm11, %v3095_v32 }
 0x506   :  { %11122 = vmatprep.mubr.msk.bf16.mxu1 %vm17162_vm11, %v15331_v39 }
 0x50d   :  { %11123 = vmatmul.mubr.msk.bf16.vlgmr.msra.gmra.mrb[176].mxu1 %vm17162_vm11, %v15339_v18 }
 0x50e   :  { %11126 = vmatprep.mubr.msk.bf16.mxu1 %vm17162_vm11, %v15356_v46  ;;  %11227 = vmatpush3.bf16.msra.mxu1 %v15352_v35  ;;  %v12210_v35 = vld [vmem:[%s17054_s5 + $0x38] sm:$0xff]  }
 0x50f   :  { %11228 = vmatprep.subr.bf16.mxu1 %v12208_v40 }
 0x512   :  { %11229 = vmatpush3.bf16.msra.mxu1 %v12208_v40  ;;  %v17670_v40 = vld [vmem:[#allocation14_spill] sm:$0xff] }
 0x513   :  { %11290 = vmatprep.subr.bf16.mxu1 %v12209_v37 }
 0x515   :  { %11127 = vmatmul.mubr.msk.bf16.gmra.mrb[180].mxu1 %vm17162_vm11, %v15365_v2 }
 0x516   :  { %11130 = vmatprep.mubr.msk.bf16.mxu1 %vm17162_vm11, %v15373_v11 }
 0x51d   :  { %11131 = vmatmul.mubr.msk.bf16.gmra.mrb[184].mxu1 %vm17162_vm11, %v15381_v43 }
 0x51e   :  { %11134 = vmatprep.mubr.msk.bf16.mxu1 %vm17162_vm11, %v3094_v34 }
 0x525   :  { %11135 = vmatmul.mubr.msk.bf16.gmra.mrb[188].mxu1 %vm17162_vm11, %v3095_v32 }
 0x526   :  { %11230 = vmatprep.mubr.msk.bf16.mxu1 %vm17162_vm11, %v15331_v39 }
 0x52d   :  { %11231 = vmatmul.mubr.msk.bf16.vlgmr.msra.gmra.mrb[192].mxu1 %vm17162_vm11, %v15339_v18 }
 0x52e   :  { %11234 = vmatprep.mubr.msk.bf16.mxu1 %vm17162_vm11, %v15356_v46  ;;  %11291 = vmatpush3.bf16.msra.mxu1 %v12209_v37  ;;  %v3235_v37 = vand.u32 31, %v17670_v40 }
 0x52f   :  { %11292 = vmatprep.subr.bf16.mxu1 %v12210_v35 }
 0x532   :  { %11293 = vmatpush3.bf16.msra.mxu1 %v12210_v35 }
 0x533   :  { %11354 = vmatprep.subr.bf16.mxu1 %v12211_v56 }
 0x535   :  { %11235 = vmatmul.mubr.msk.bf16.gmra.mrb[196].mxu1 %vm17162_vm11, %v15365_v2 }
 0x536   :  { %11238 = vmatprep.mubr.msk.bf16.mxu1 %vm17162_vm11, %v15373_v11 }
 0x53d   :  { %11239 = vmatmul.mubr.msk.bf16.gmra.mrb[200].mxu1 %vm17162_vm11, %v15381_v43 }
 0x53e   :  { %11242 = vmatprep.mubr.msk.bf16.mxu1 %vm17162_vm11, %v3094_v34 }
 0x545   :  { %11243 = vmatmul.mubr.msk.bf16.gmra.mrb[204].mxu1 %vm17162_vm11, %v3095_v32 }
 0x546   :  { %11294 = vmatprep.mubr.msk.bf16.mxu1 %vm17162_vm11, %v15331_v39 }
 0x54d   :  { %11295 = vmatmul.mubr.msk.bf16.vlgmr.msra.gmra.mrb[208].mxu1 %vm17162_vm11, %v15339_v18 }
 0x54e   :  { %11298 = vmatprep.mubr.msk.bf16.mxu1 %vm17162_vm11, %v15356_v46  ;;  %11355 = vmatpush3.bf16.msra.mxu1 %v12211_v56 }
 0x54f   :  { %11356 = vmatprep.subr.bf16.mxu1 %v12212_v31 }
 0x552   :  { %11357 = vmatpush3.bf16.msra.mxu1 %v12212_v31 }
 0x555   :  { %11299 = vmatmul.mubr.msk.bf16.gmra.mrb[212].mxu1 %vm17162_vm11, %v15365_v2 }
 0x556   :  { %11302 = vmatprep.mubr.msk.bf16.mxu1 %vm17162_vm11, %v15373_v11 }
 0x55d   :  { %11303 = vmatmul.mubr.msk.bf16.gmra.mrb[216].mxu1 %vm17162_vm11, %v15381_v43 }
 0x55e   :  { %11306 = vmatprep.mubr.msk.bf16.mxu1 %vm17162_vm11, %v3094_v34 }
 0x565   :  { %11307 = vmatmul.mubr.msk.bf16.gmra.mrb[220].mxu1 %vm17162_vm11, %v3095_v32 }
 0x566   :  { %11358 = vmatprep.mubr.msk.bf16.mxu1 %vm17162_vm11, %v15331_v39  ;;  %v15465_v39 = vmul.u32 2, %v3234_v60  ;;  %v15490_v60 = vmul.u32 2, %v3235_v37 }
 0x56d   :  { %11359 = vmatmul.mubr.msk.bf16.vlgmr.msra.gmra.mrb[224].mxu1 %vm17162_vm11, %v15339_v18  ;;  %v3412_v18 = vadd.s32 4294967295, %v15465_v39 }
 0x56e   :  { %11362 = vmatprep.mubr.msk.bf16.mxu1 %vm17162_vm11, %v15356_v46  ;;  %v17668_v46 = vld [vmem:[#allocation12_spill] sm:$0xff] }
 0x56f   :  { %vm3420_vm6 = vcmp.ge.s32.totalorder %v3412_v18, 0  ;;  %vm3428_vm3 = vcmp.lt.s32.totalorder %v3412_v18, 64  ;;  %vm17669_vm9 = vcmp.eq.s32.totalorder %v12816_v26, %v17668_v46  ;;  %v17671_v18 = vld [vmem:[#allocation15_spill] sm:$0xff] }
 0x570   :  { %vm3436_vm7 = vmand %vm3420_vm6, %vm3428_vm3 }
 0x571   :  { %vm3444_vm13 = vmand %vm17669_vm9, %vm3436_vm7 }
 0x572   :  { %11170 = vmatprep.mubr.msk.f32.mxu0 %vm3444_vm13, %v17256_v16 }
 0x575   :  { %11363 = vmatmul.mubr.msk.bf16.gmra.mrb[228].mxu1 %vm17162_vm11, %v15365_v2 }
 0x576   :  { %11366 = vmatprep.mubr.msk.bf16.mxu1 %vm17162_vm11, %v15373_v11 }
 0x57d   :  { %11367 = vmatmul.mubr.msk.bf16.gmra.mrb[232].mxu1 %vm17162_vm11, %v15381_v43 }
 0x57e   :  { %11370 = vmatprep.mubr.msk.bf16.mxu1 %vm17162_vm11, %v3094_v34 }
 0x585   :  { %11371 = vmatmul.mubr.msk.bf16.gmra.mrb[236].mxu1 %vm17162_vm11, %v3095_v32 }
 0x5a8   :  { %v11104_v2 = vpop.f32.mrb[160].mxu1 }
 0x5a9   :  { %v3171_v11 = vpop.f32.mrb[161].mxu1 }
 0x5aa   :  { %v11105_v59 = vpop.f32.mrb[162].mxu1 }
 0x5ab   :  { %v15473_v58 = vpack.c.bf16 %v11105_v59, %v11104_v2  ;;  %v3174_v1 = vpop.f32.mrb[163].mxu1  ;;  %v3236_v2 = vand.u32 31, %v17671_v18 }
 0x5ac   :  { %v15475_v42 = vpack.c.bf16 %v3174_v1, %v3171_v11  ;;  %v17672_v1 = vld [vmem:[#allocation16_spill] sm:$0xff] }
 0x5b8   :  { %v11108_v13 = vpop.f32.mrb[164].mxu1 }
 0x5b9   :  { %v3187_v23 = vpop.f32.mrb[165].mxu1 }
 0x5ba   :  { %v11109_v27 = vpop.f32.mrb[166].mxu1 }
 0x5bb   :  { %v15477_v24 = vpack.c.bf16 %v11109_v27, %v11108_v13  ;;  %v3190_v62 = vpop.f32.mrb[167].mxu1  ;;  %v3237_v13 = vand.u32 31, %v17672_v1  ;;  %v17673_v27 = vld [vmem:[#allocation17_spill] sm:$0xff] }
 0x5bc   :  { %v15479_v3 = vpack.c.bf16 %v3190_v62, %v3187_v23  ;;  %v3238_v62 = vand.u32 31, %v17673_v27 }
 0x5c8   :  { %v11112_v53 = vpop.f32.mrb[168].mxu1 }
 0x5c9   :  { %v3203_v43 = vpop.f32.mrb[169].mxu1 }
 0x5ca   :  { %v11113_v7 = vpop.f32.mrb[170].mxu1 }
 0x5cb   :  { %v15481_v19 = vpack.c.bf16 %v11113_v7, %v11112_v53  ;;  %v3206_v36 = vpop.f32.mrb[171].mxu1  ;;  %v3413_v53 = vadd.s32 4294967295, %v15490_v60  ;;  %v15498_v7 = vmul.u32 2, %v3237_v13 }
 0x5cc   :  { %v15483_v10 = vpack.c.bf16 %v3206_v36, %v3203_v43  ;;  %v15496_v43 = vmul.u32 2, %v3236_v2 }
 0x5cd   :  { %vm3421_vm2 = vcmp.ge.s32.totalorder %v3413_v53, 0  ;;  %vm3429_vm14 = vcmp.lt.s32.totalorder %v3413_v53, 64 }
 0x5ce   :  { %vm3437_vm8 = vmand %vm3421_vm2, %vm3429_vm14 }
 0x5d8   :  { %v11116_v63 = vpop.f32.mrb[172].mxu1 }
 0x5d9   :  { %v3219_v21 = vpop.f32.mrb[173].mxu1 }
 0x5da   :  { %v11117_v30 = vpop.f32.mrb[174].mxu1 }
 0x5db   :  { %v15485_v9 = vpack.c.bf16 %v11117_v30, %v11116_v63  ;;  %v3222_v6 = vpop.f32.mrb[175].mxu1  ;;  %v15500_v63 = vmul.u32 2, %v3238_v62 }
 0x5dc   :  { %v15487_v61 = vpack.c.bf16 %v3222_v6, %v3219_v21  ;;  %v17674_v21 = vld [vmem:[#allocation21_spill] sm:$0xff] }
 0x5dd   :  { %v3239_v30 = vand.u32 31, %v17674_v21  ;;  %v17683_v21 = vld [vmem:[#allocation24_spill] sm:$0xff] }
 0x5e0   :  { %v11124_v14 = vpop.f32.mrb[176].mxu1 }
 0x5e1   :  { %v3349_v41 = vpop.f32.mrb[177].mxu1 }
 0x5e2   :  { %v11125_v17 = vpop.f32.mrb[178].mxu1 }
 0x5e3   :  { %v11828_v33 = vpack.c.bf16 %v11125_v17, %v11124_v14  ;;  %v3352_v34 = vpop.f32.mrb[179].mxu1  ;;  %v17675_v14 = vld [vmem:[#allocation23_spill] sm:$0xff] }
 0x5e4   :  { %v11824_v55 = vpack.c.bf16 %v3352_v34, %v3349_v41  ;;  %v3240_v41 = vand.u32 31, %v17675_v14  ;;  %v17687_v14 = vld [vmem:[#allocation27_spill] sm:$0xff] }
 0x5e6   :  { %11825 = vmatprep.subr.bf16.mxu0 %v11824_v55 }
 0x5e7   :  { %11827 = vmatpush3.bf16.msra.mxu0 %v11824_v55 }
 0x5e8   :  { %v11128_v25 = vpop.f32.mrb[180].mxu1  ;;  %11829 = vmatprep.subr.bf16.mxu0 %v11828_v33 }
 0x5e9   :  { %v3365_v0 = vpop.f32.mrb[181].mxu1 }
 0x5ea   :  { %v11129_v49 = vpop.f32.mrb[182].mxu1 }
 0x5eb   :  { %v11836_v22 = vpack.c.bf16 %v11129_v49, %v11128_v25  ;;  %v3368_v54 = vpop.f32.mrb[183].mxu1  ;;  %11831 = vmatpush3.bf16.msra.mxu0 %v11828_v33  ;;  %v3414_v33 = vadd.s32 4294967295, %v15496_v43  ;;  %v3415_v25 = vadd.s32 4294967295, %v15498_v7  ;;  %v3416_v49 = vadd.s32 4294967295, %v15500_v63 }
 0x5ec   :  { %v11832_v32 = vpack.c.bf16 %v3368_v54, %v3365_v0  ;;  %v15509_v54 = vmul.u32 2, %v3240_v41 }
 0x5ed   :  { %vm3422_vm12 = vcmp.ge.s32.totalorder %v3414_v33, 0  ;;  %vm3430_vm0 = vcmp.lt.s32.totalorder %v3414_v33, 64  ;;  %vm3423_vm5 = vcmp.ge.s32.totalorder %v3415_v25, 0  ;;  %vm3431_vm10 = vcmp.lt.s32.totalorder %v3415_v25, 64  ;;  %v17691_v25 = vld [vmem:[#allocation29_spill] sm:$0xff] }
 0x5ee   :  { %11833 = vmatprep.subr.bf16.mxu0 %v11832_v32  ;;  %vm3424_vm6 = vcmp.ge.s32.totalorder %v3416_v49, 0  ;;  %vm3432_vm3 = vcmp.lt.s32.totalorder %v3416_v49, 64  ;;  %vm3438_vm7 = vmand %vm3422_vm12, %vm3430_vm0  ;;  %vm17684_vm0 = vcmp.eq.s32.totalorder %v12816_v26, %v17683_v21  ;;  %v17693_v49 = vld [vmem:[#allocation31_spill] sm:$0xff] }
 0x5ef   :  { %11835 = vmatpush3.bf16.msra.mxu0 %v11832_v32  ;;  %v17676_v32 = vld [vmem:[#allocation25_spill] sm:$0xff]  ;;  %vm3439_vm9 = vmand %vm3423_vm5, %vm3431_vm10 }
 0x5f0   :  { %v11132_v35 = vpop.f32.mrb[184].mxu1  ;;  %11837 = vmatprep.subr.bf16.mxu0 %v11836_v22  ;;  %v3241_v37 = vand.u32 31, %v17676_v32  ;;  %vm3440_vm13 = vmand %vm3424_vm6, %vm3432_vm3  ;;  %vm17688_vm6 = vcmp.eq.s32.totalorder %v12816_v26, %v17687_v14  ;;  %v3254_v14 = vadd.s32 4294967294, %v15500_v63 }
 0x5f1   :  { %v3381_v56 = vpop.f32.mrb[185].mxu1  ;;  %vm15545_vm3 = vmand %vm17688_vm6, %vm3440_vm13  ;;  %vm17692_vm13 = vcmp.eq.s32.totalorder %v12816_v26, %v17691_v25 }
 0x5f2   :  { %v11133_v31 = vpop.f32.mrb[186].mxu1  ;;  %v15521_v13 = vmul.u32 2, %v3241_v37  ;;  %v3251_v37 = vadd.s32 4294967294, %v15490_v60 }
 0x5f3   :  { %v11844_v11 = vpack.c.bf16 %v11133_v31, %v11132_v35  ;;  %v3384_v59 = vpop.f32.mrb[187].mxu1  ;;  %11839 = vmatpush3.bf16.msra.mxu0 %v11836_v22  ;;  %v15507_v22 = vmul.u32 2, %v3239_v30  ;;  %v17697_v31 = vld [vmem:[#allocation13_spill] sm:$0xff] }
 0x5f4   :  { %v11840_v23 = vpack.c.bf16 %v3384_v59, %v3381_v56  ;;  %v17677_v56 = vld [vmem:[#allocation18_spill] sm:$0xff]  ;;  %v3418_v59 = vadd.s32 4294967295, %v15509_v54 }
 0x5f5   :  { %vm17678_vm4 = vcmp.eq.s32.totalorder %v12816_v26, %v17677_v56  ;;  %v3417_v2 = vadd.s32 4294967295, %v15507_v22 }
 0x5f6   :  { %11841 = vmatprep.subr.bf16.mxu0 %v11840_v23  ;;  %vm15515_vm1 = vmand %vm17678_vm4, %vm3437_vm8  ;;  %vm3426_vm5 = vcmp.ge.s32.totalorder %v3418_v59, 0  ;;  %vm3434_vm10 = vcmp.lt.s32.totalorder %v3418_v59, 64 }
 0x5f7   :  { %11843 = vmatpush3.bf16.msra.mxu0 %v11840_v23  ;;  %vm3425_vm8 = vcmp.ge.s32.totalorder %v3417_v2, 0  ;;  %vm3433_vm12 = vcmp.lt.s32.totalorder %v3417_v2, 64  ;;  %vm15534_vm4 = vmand %vm17684_vm0, %vm3439_vm9 }
 0x5f8   :  { %v11136_v36 = vpop.f32.mrb[188].mxu1  ;;  %11845 = vmatprep.subr.bf16.mxu0 %v11844_v11  ;;  %vm3442_vm9 = vmand %vm3426_vm5, %vm3434_vm10 }
 0x5f9   :  { %v3397_v6 = vpop.f32.mrb[189].mxu1 }
 0x5fa   :  { %v11137_v17 = vpop.f32.mrb[190].mxu1 }
 0x5fb   :  { %v11852_v34 = vpack.c.bf16 %v11137_v17, %v11136_v36  ;;  %v3400_v55 = vpop.f32.mrb[191].mxu1  ;;  %11847 = vmatpush3.bf16.msra.mxu0 %v11844_v11  ;;  %v17681_v36 = vld [vmem:[#allocation20_spill] sm:$0xff]  ;;  %v3250_v17 = vadd.s32 4294967294, %v15465_v39 }
 0x5fc   :  { %v11848_v0 = vpack.c.bf16 %v3400_v55, %v3397_v6  ;;  %vm17682_vm2 = vcmp.eq.s32.totalorder %v12816_v26, %v17681_v36  ;;  %v3419_v6 = vadd.s32 4294967295, %v15521_v13 }
 0x5fd   :  { %vm3446_vm14 = vmand %vm17682_vm2, %vm3438_vm7  ;;  %vm3258_vm6 = vcmp.ge.s32.totalorder %v3250_v17, 0  ;;  %vm3266_vm11 = vcmp.lt.s32.totalorder %v3250_v17, 64 }
 0x5fe   :  { %11849 = vmatprep.subr.bf16.mxu0 %v11848_v0  ;;  %vm3441_vm7 = vmand %vm3425_vm8, %vm3433_vm12  ;;  %vm3435_vm2 = vcmp.lt.s32.totalorder %v3419_v6, 64 }
 0x5ff   :  { %11851 = vmatpush3.bf16.msra.mxu0 %v11848_v0  ;;  %vm3449_vm0 = vmand %vm17692_vm13, %vm3441_vm7 }
 0x600   :  { %11853 = vmatprep.subr.bf16.mxu0 %v11852_v34  ;;  %v11232_v35 = vpop.f32.mrb[192].mxu1 }
 0x601   :  { %v3721_v11 = vpop.f32.mrb[193].mxu1 }
 0x602   :  { %v11233_v23 = vpop.f32.mrb[194].mxu1 }
 0x603   :  { %v15523_v27 = vpack.c.bf16 %v11233_v23, %v11232_v35  ;;  %11855 = vmatpush3.bf16.msra.mxu0 %v11852_v34  ;;  %v3724_v62 = vpop.f32.mrb[195].mxu1 }
 0x604   :  { %v15525_v53 = vpack.c.bf16 %v3724_v62, %v3721_v11  ;;  %11857 = vmatprep.subr.bf16.mxu0 %v15475_v42  ;;  %v12213_v62 = vld [vmem:[%s17056_s7] sm:$0xff]  }
 0x605   :  { %11418 = vmatprep.subr.bf16.mxu1 %v12213_v62 }
 0x606   :  { %11171 = vmatmul.mubr.msk.f32.vlgmr.msra.gmra.mrb[192].mxu0 %vm15515_vm1, %v17256_v16  ;;  %vm3427_vm1 = vcmp.ge.s32.totalorder %v3419_v6, 0  ;;  %v3253_v6 = vadd.s32 4294967294, %v15498_v7  ;;  %11419 = vmatpush3.bf16.msra.mxu1 %v12213_v62  ;;  %v17709_v62 = vld [vmem:[#allocation28_spill] sm:$0xff] }
 0x607   :  { %11859 = vmatpush3.bf16.msra.mxu0 %v15475_v42  ;;  %11173 = vmatprep.mubr.msk.f32.mxu0 %vm3446_vm14, %v17256_v16  ;;  %vm17694_vm14 = vcmp.eq.s32.totalorder %v12816_v26, %v17693_v49  ;;  %vm3443_vm12 = vmand %vm3427_vm1, %vm3435_vm2 }
 0x608   :  { %11861 = vmatprep.subr.bf16.mxu0 %v15473_v58  ;;  %v11236_v33 = vpop.f32.mrb[196].mxu1  ;;  %vm3450_vm8 = vmand %vm17694_vm14, %vm3442_vm9  ;;  %vm3267_vm9 = vcmp.lt.s32.totalorder %v3251_v37, 64  ;;  %vm3261_vm13 = vcmp.ge.s32.totalorder %v3253_v6, 0  ;;  %vm3262_vm14 = vcmp.ge.s32.totalorder %v3254_v14, 0 }
 0x609   :  { %v3737_v34 = vpop.f32.mrb[197].mxu1 }
 0x60a   :  { %v11237_v55 = vpop.f32.mrb[198].mxu1  ;;  %11174 = vmatmul.mubr.msk.f32.gmra.mrb[194].mxu0 %vm15534_vm4, %v17256_v16  ;;  %vm3274_vm4 = vmand %vm3258_vm6, %vm3266_vm11  ;;  %vm3259_vm11 = vcmp.ge.s32.totalorder %v3251_v37, 0  ;;  %v3256_v37 = vadd.s32 4294967294, %v15509_v54 }
 0x60b   :  { %v15559_v42 = vpack.c.bf16 %v11237_v55, %v11236_v33  ;;  %11863 = vmatpush3.bf16.msra.mxu0 %v15473_v58  ;;  %v3740_v0 = vpop.f32.mrb[199].mxu1  ;;  %11176 = vmatprep.mubr.msk.f32.mxu0 %vm15545_vm3, %v17256_v16  ;;  %v17695_v58 = vld [vmem:[#allocation33_spill] sm:$0xff]  ;;  %vm17698_vm3 = vcmp.eq.s32.totalorder %v12816_v26, %v17697_v31  ;;  %v3255_v33 = vadd.s32 4294967294, %v15507_v22  ;;  %vm3275_vm6 = vmand %vm3259_vm11, %vm3267_vm9 }
 0x60c   :  { %v15568_v32 = vpack.c.bf16 %v3740_v0, %v3737_v34  ;;  %11865 = vmatprep.subr.bf16.mxu0 %v15479_v3  ;;  %vm17696_vm5 = vcmp.eq.s32.totalorder %v12816_v26, %v17695_v58  ;;  %vm3282_vm7 = vmand %vm17698_vm3, %vm3274_vm4  ;;  %v17699_v0 = vld [vmem:[#allocation19_spill] sm:$0xff]  ;;  %vm3270_vm4 = vcmp.lt.s32.totalorder %v3254_v14, 64 }
 0x60d   :  { %vm3451_vm10 = vmand %vm17696_vm5, %vm3443_vm12  ;;  %vm3263_vm9 = vcmp.ge.s32.totalorder %v3255_v33, 0 }
 0x60e   :  { %11177 = vmatmul.mubr.msk.f32.gmra.mrb[196].mxu0 %vm3449_vm0, %v17256_v16  ;;  %vm3269_vm0 = vcmp.lt.s32.totalorder %v3253_v6, 64  ;;  %vm3278_vm3 = vmand %vm3262_vm14, %vm3270_vm4  ;;  %vm17710_vm14 = vcmp.eq.s32.totalorder %v12816_v26, %v17709_v62 }
 0x60f   :  { %11867 = vmatpush3.bf16.msra.mxu0 %v15479_v3  ;;  %11179 = vmatprep.mubr.msk.f32.mxu0 %vm3450_vm8, %v17256_v16  ;;  %v3252_v3 = vadd.s32 4294967294, %v15496_v43  ;;  %vm17700_vm8 = vcmp.eq.s32.totalorder %v12816_v26, %v17699_v0 }
 0x610   :  { %11869 = vmatprep.subr.bf16.mxu0 %v15477_v24  ;;  %v11240_v35 = vpop.f32.mrb[200].mxu1  ;;  %vm15612_vm12 = vmand %vm17700_vm8, %vm3275_vm6  ;;  %vm3272_vm6 = vcmp.lt.s32.totalorder %v3256_v37, 64 }
 0x611   :  { %v3753_v2 = vpop.f32.mrb[201].mxu1  ;;  %vm3260_vm1 = vcmp.ge.s32.totalorder %v3252_v3, 0  ;;  %vm3268_vm2 = vcmp.lt.s32.totalorder %v3252_v3, 64  ;;  %v17705_v3 = vld [vmem:[#allocation26_spill] sm:$0xff]  ;;  %vm15645_vm8 = vmand %vm17710_vm14, %vm3278_vm3 }
 0x612   :  { %v11241_v11 = vpop.f32.mrb[202].mxu1  ;;  %11180 = vmatmul.mubr.msk.f32.gmra.mrb[198].mxu0 %vm3451_vm10, %v17256_v16  ;;  %vm3276_vm5 = vmand %vm3260_vm1, %vm3268_vm2  ;;  %vm3271_vm1 = vcmp.lt.s32.totalorder %v3255_v33, 64  ;;  %vm17706_vm2 = vcmp.eq.s32.totalorder %v12816_v26, %v17705_v3 }
 0x613   :  { %v15584_v59 = vpack.c.bf16 %v11241_v11, %v11240_v35  ;;  %11871 = vmatpush3.bf16.msra.mxu0 %v15477_v24  ;;  %v3756_v23 = vpop.f32.mrb[203].mxu1  ;;  %11214 = vmatprep.mubr.msk.f32.mxu0 %vm3282_vm7, %v17256_v16  ;;  %vm3277_vm10 = vmand %vm3261_vm13, %vm3269_vm0  ;;  %v17703_v11 = vld [vmem:[#allocation22_spill] sm:$0xff]  ;;  %vm3264_vm0 = vcmp.ge.s32.totalorder %v3256_v37, 0 }
 0x614   :  { %v15591_v30 = vpack.c.bf16 %v3756_v23, %v3753_v2  ;;  %11873 = vmatprep.subr.bf16.mxu0 %v15483_v10  ;;  %vm17704_vm7 = vcmp.eq.s32.totalorder %v12816_v26, %v17703_v11  ;;  %vm15634_vm13 = vmand %vm17706_vm2, %vm3277_vm10  ;;  %vm3784_vm2 = vcmp.ge.s32.totalorder %v15465_v39, 0 }
 0x615   :  { %vm3284_vm11 = vmand %vm17704_vm7, %vm3276_vm5 }
 0x616   :  { %vm3279_vm4 = vmand %vm3263_vm9, %vm3271_vm1 }
 0x617   :  { %11875 = vmatpush3.bf16.msra.mxu0 %v15483_v10  ;;  %vm3280_vm5 = vmand %vm3264_vm0, %vm3272_vm6 }
 0x618   :  { %11877 = vmatprep.subr.bf16.mxu0 %v15481_v19  ;;  %v11244_v24 = vpop.f32.mrb[204].mxu1 }
 0x619   :  { %v3769_v41 = vpop.f32.mrb[205].mxu1 }
 0x61a   :  { %v11245_v17 = vpop.f32.mrb[206].mxu1 }
 0x61b   :  { %v15599_v34 = vpack.c.bf16 %v11245_v17, %v11244_v24  ;;  %11879 = vmatpush3.bf16.msra.mxu0 %v15481_v19  ;;  %v3772_v55 = vpop.f32.mrb[207].mxu1  ;;  %v17713_v17 = vld [vmem:[#allocation30_spill] sm:$0xff] }
 0x61c   :  { %v15604_v25 = vpack.c.bf16 %v3772_v55, %v3769_v41  ;;  %11881 = vmatprep.subr.bf16.mxu0 %v15487_v61  ;;  %v17715_v55 = vld [vmem:[#allocation32_spill] sm:$0xff] }
 0x61d   :  { %vm17716_vm9 = vcmp.eq.s32.totalorder %v12816_v26, %v17715_v55 }
 0x61e   :  { %vm3288_vm1 = vmand %vm17716_vm9, %vm3280_vm5  ;;  %vm3793_vm5 = vcmp.lt.s32.totalorder %v15490_v60, 64 }
 0x61f   :  { %11883 = vmatpush3.bf16.msra.mxu0 %v15487_v61 }
 0x620   :  { %11885 = vmatprep.subr.bf16.mxu0 %v15485_v9  ;;  %v11296_v10 = vpop.f32.mrb[208].mxu1 }
 0x621   :  { %v3988_v19 = vpop.f32.mrb[209].mxu1 }
 0x622   :  { %v11297_v58 = vpop.f32.mrb[210].mxu1 }
 0x623   :  { %v15621_v61 = vpack.c.bf16 %v11297_v58, %v11296_v10  ;;  %11887 = vmatpush3.bf16.msra.mxu0 %v15485_v9  ;;  %v3991_v35 = vpop.f32.mrb[211].mxu1  ;;  %v3257_v9 = vadd.s32 4294967294, %v15521_v13 }
 0x624   :  { %v15625_v2 = vpack.c.bf16 %v3991_v35, %v3988_v19  ;;  %11889 = vmatprep.subr.bf16.mxu0 %v15525_v53 }
 0x625   :  { %vm3265_vm10 = vcmp.ge.s32.totalorder %v3257_v9, 0  ;;  %vm3273_vm7 = vcmp.lt.s32.totalorder %v3257_v9, 64 }
 0x626   :  { %11215 = vmatmul.mubr.msk.f32.vlgmr.msra.gmra.mrb[192].mxu0 %vm15612_vm12, %v17256_v16  ;;  %vm17714_vm12 = vcmp.eq.s32.totalorder %v12816_v26, %v17713_v17 }
 0x627   :  { %11891 = vmatpush3.bf16.msra.mxu0 %v15525_v53  ;;  %11217 = vmatprep.mubr.msk.f32.mxu0 %vm3284_vm11, %v17256_v16  ;;  %vm3287_vm3 = vmand %vm17714_vm12, %vm3279_vm4  ;;  %vm3792_vm11 = vcmp.lt.s32.totalorder %v15465_v39, 64  ;;  %vm3785_vm4 = vcmp.ge.s32.totalorder %v15490_v60, 0  ;;  %vm3794_vm12 = vcmp.lt.s32.totalorder %v15496_v43, 64 }
 0x628   :  { %11893 = vmatprep.subr.bf16.mxu0 %v15523_v27  ;;  %v11300_v14 = vpop.f32.mrb[212].mxu1  ;;  %vm3800_vm0 = vmand %vm3784_vm2, %vm3792_vm11  ;;  %vm3795_vm2 = vcmp.lt.s32.totalorder %v15498_v7, 64  ;;  %vm17719_vm11 = vcmp.eq.s32.totalorder %v12816_v26, %v12960_v38 }
 0x629   :  { %v4004_v24 = vpop.f32.mrb[213].mxu1 }
 0x62a   :  { %v11301_v41 = vpop.f32.mrb[214].mxu1  ;;  %11218 = vmatmul.mubr.msk.f32.gmra.mrb[194].mxu0 %vm15634_vm13, %v17256_v16  ;;  %vm3281_vm13 = vmand %vm3265_vm10, %vm3273_vm7  ;;  %vm3786_vm7 = vcmp.ge.s32.totalorder %v15496_v43, 0 }
 0x62b   :  { %v15660_v53 = vpack.c.bf16 %v11301_v41, %v11300_v14  ;;  %11895 = vmatpush3.bf16.msra.mxu0 %v15523_v27  ;;  %v4007_v33 = vpop.f32.mrb[215].mxu1  ;;  %11220 = vmatprep.mubr.msk.f32.mxu0 %vm15645_vm8, %v17256_v16  ;;  %v17717_v27 = vld [vmem:[#allocation34_spill] sm:$0xff]  ;;  %vm3808_vm8 = vmand %vm17163_vm15, %vm3800_vm0 }
 0x62c   :  { %v15669_v10 = vpack.c.bf16 %v4007_v33, %v4004_v24  ;;  %11897 = vmatprep.subr.bf16.mxu0 %v15568_v32  ;;  %vm17718_vm6 = vcmp.eq.s32.totalorder %v12816_v26, %v17717_v27  ;;  %vm3801_vm10 = vmand %vm3785_vm4, %vm3793_vm5  ;;  %vm3789_vm5 = vcmp.ge.s32.totalorder %v15507_v22, 0  ;;  %v4051_v27 = vadd.s32 1, %v15465_v39 }
 0x62d   :  { %vm3289_vm14 = vmand %vm17718_vm6, %vm3281_vm13  ;;  %vm3796_vm13 = vcmp.lt.s32.totalorder %v15500_v63, 64 }
 0x62e   :  { %11221 = vmatmul.mubr.msk.f32.gmra.mrb[196].mxu0 %vm3287_vm3, %v17256_v16  ;;  %vm3787_vm3 = vcmp.ge.s32.totalorder %v15498_v7, 0  ;;  %vm15709_vm9 = vmand %vm17719_vm11, %vm3801_vm10  ;;  %vm3797_vm10 = vcmp.lt.s32.totalorder %v15507_v22, 64  ;;  %vm17726_vm11 = vcmp.eq.s32.totalorder %v12816_v26, %v13069_v12 }
 0x62f   :  { %11899 = vmatpush3.bf16.msra.mxu0 %v15568_v32  ;;  %11223 = vmatprep.mubr.msk.f32.mxu0 %vm3288_vm1, %v17256_v16  ;;  %vm3788_vm1 = vcmp.ge.s32.totalorder %v15500_v63, 0  ;;  %vm3802_vm0 = vmand %vm3786_vm7, %vm3794_vm12  ;;  %vm17723_vm7 = vcmp.eq.s32.totalorder %v12816_v26, %v13009_v45 }
 0x630   :  { %11901 = vmatprep.subr.bf16.mxu0 %v15559_v42  ;;  %v11304_v49 = vpop.f32.mrb[216].mxu1  ;;  %vm3803_vm6 = vmand %vm3787_vm3, %vm3795_vm2  ;;  %vm3790_vm3 = vcmp.ge.s32.totalorder %v15509_v54, 0  ;;  %vm3798_vm2 = vcmp.lt.s32.totalorder %v15509_v54, 64 }
 0x631   :  { %v4020_v19 = vpop.f32.mrb[217].mxu1  ;;  %vm15729_vm12 = vmand %vm17723_vm7, %vm3803_vm6  ;;  %vm3799_vm6 = vcmp.lt.s32.totalorder %v15521_v13, 64 }
 0x632   :  { %v11305_v37 = vpop.f32.mrb[218].mxu1  ;;  %11224 = vmatmul.mubr.msk.f32.gmra.mrb[198].mxu0 %vm3289_vm14, %v17256_v16  ;;  %vm3804_vm14 = vmand %vm3788_vm1, %vm3796_vm13 }
 0x633   :  { %v15683_v58 = vpack.c.bf16 %v11305_v37, %v11304_v49  ;;  %11903 = vmatpush3.bf16.msra.mxu0 %v15559_v42  ;;  %v4023_v32 = vpop.f32.mrb[219].mxu1  ;;  %11278 = vmatprep.mubr.msk.f32.mxu0 %vm3808_vm8, %v17256_v16  ;;  %vm17722_vm8 = vcmp.eq.s32.totalorder %v12816_v26, %v12966_v57  ;;  %vm15741_vm1 = vmand %vm17726_vm11, %vm3804_vm14  ;;  %vm17729_vm14 = vcmp.eq.s32.totalorder %v12816_v26, %v13158_v5 }
 0x634   :  { %v15687_v35 = vpack.c.bf16 %v4023_v32, %v4020_v19  ;;  %11905 = vmatprep.subr.bf16.mxu0 %v15591_v30  ;;  %vm3810_vm4 = vmand %vm17722_vm8, %vm3802_vm0 }
 0x635   :  { %vm3805_vm13 = vmand %vm3789_vm5, %vm3797_vm10  ;;  %vm4067_vm5 = vcmp.lt.s32.totalorder %v4051_v27, 64  ;;  %vm17730_vm10 = vcmp.eq.s32.totalorder %v12816_v26, %v13227_v48  ;;  %v17732_v48 = vld [vmem:[#allocation35_spill] sm:$0xff] }
 0x636   :  { %vm3806_vm0 = vmand %vm3790_vm3, %vm3798_vm2  ;;  %vm17731_vm2 = vcmp.eq.s32.totalorder %v12816_v26, %v13318_v29 }
 0x637   :  { %11907 = vmatpush3.bf16.msra.mxu0 %v15591_v30  ;;  %vm3813_vm8 = vmand %vm17729_vm14, %vm3805_vm13 }
 0x638   :  { %11909 = vmatprep.subr.bf16.mxu0 %v15584_v59  ;;  %v11308_v23 = vpop.f32.mrb[220].mxu1  ;;  %vm3814_vm7 = vmand %vm17730_vm10, %vm3806_vm0 }
 0x639   :  { %v4036_v9 = vpop.f32.mrb[221].mxu1 }
 0x63a   :  { %v11309_v62 = vpop.f32.mrb[222].mxu1 }
 0x63b   :  { %v15694_v6 = vpack.c.bf16 %v11309_v62, %v11308_v23  ;;  %11911 = vmatpush3.bf16.msra.mxu0 %v15584_v59  ;;  %v4039_v42 = vpop.f32.mrb[223].mxu1  ;;  %v4052_v62 = vadd.s32 1, %v15490_v60 }
 0x63c   :  { %v15697_v14 = vpack.c.bf16 %v4039_v42, %v4036_v9  ;;  %11913 = vmatprep.subr.bf16.mxu0 %v15604_v25 }
 0x63d   :  { %vm4060_vm0 = vcmp.ge.s32.totalorder %v4052_v62, 0 }
 0x63f   :  { %11915 = vmatpush3.bf16.msra.mxu0 %v15604_v25 }
 0x640   :  { %11917 = vmatprep.subr.bf16.mxu0 %v15599_v34  ;;  %v11360_v30 = vpop.f32.mrb[224].mxu1 }
 0x641   :  { %v4263_v24 = vpop.f32.mrb[225].mxu1 }
 0x642   :  { %v11361_v25 = vpop.f32.mrb[226].mxu1 }
 0x643   :  { %v15715_v41 = vpack.c.bf16 %v11361_v25, %v11360_v30  ;;  %11919 = vmatpush3.bf16.msra.mxu0 %v15599_v34  ;;  %v4266_v17 = vpop.f32.mrb[227].mxu1  ;;  %v17736_v34 = vmov 0 }
 0x644   :  { %v15718_v33 = vpack.c.bf16 %v4266_v17, %v4263_v24  ;;  %11921 = vmatprep.subr.bf16.mxu0 %v15625_v2  ;;  %v4054_v17 = vadd.s32 1, %v15498_v7 }
 0x646   :  { %11279 = vmatmul.mubr.msk.f32.vlgmr.msra.gmra.mrb[192].mxu0 %vm15709_vm9, %v17256_v16  ;;  %vm3791_vm9 = vcmp.ge.s32.totalorder %v15521_v13, 0 }
 0x647   :  { %11923 = vmatpush3.bf16.msra.mxu0 %v15625_v2  ;;  %11281 = vmatprep.mubr.msk.f32.mxu0 %vm3810_vm4, %v17256_v16  ;;  %vm4059_vm4 = vcmp.ge.s32.totalorder %v4051_v27, 0  ;;  %v4056_v27 = vadd.s32 1, %v15507_v22 }
 0x648   :  { %11925 = vmatprep.subr.bf16.mxu0 %v15621_v61  ;;  %v11364_v49 = vpop.f32.mrb[228].mxu1  ;;  %vm4075_vm3 = vmand %vm4059_vm4, %vm4067_vm5  ;;  %vm4062_vm4 = vcmp.ge.s32.totalorder %v4054_v17, 0  ;;  %vm4070_vm5 = vcmp.lt.s32.totalorder %v4054_v17, 64 }
 0x649   :  { %v4279_v19 = vpop.f32.mrb[229].mxu1 }
 0x64a   :  { %v11365_v12 = vpop.f32.mrb[230].mxu1  ;;  %11282 = vmatmul.mubr.msk.f32.gmra.mrb[194].mxu0 %vm15729_vm12, %v17256_v16  ;;  %vm3807_vm12 = vmand %vm3791_vm9, %vm3799_vm6  ;;  %vm4068_vm9 = vcmp.lt.s32.totalorder %v4052_v62, 64 }
 0x64b   :  { %v15757_v2 = vpack.c.bf16 %v11365_v12, %v11364_v49  ;;  %11927 = vmatpush3.bf16.msra.mxu0 %v15621_v61  ;;  %v4282_v37 = vpop.f32.mrb[231].mxu1  ;;  %11284 = vmatprep.mubr.msk.f32.mxu0 %vm15741_vm1, %v17256_v16  ;;  %vm3815_vm11 = vmand %vm17731_vm2, %vm3807_vm12  ;;  %vm17733_vm1 = vcmp.eq.s32.totalorder %v12816_v26, %v17732_v48  ;;  %v4057_v49 = vadd.s32 1, %v15509_v54  ;;  %v4058_v12 = vadd.s32 1, %v15521_v13 }
 0x64c   :  { %v15766_v32 = vpack.c.bf16 %v4282_v37, %v4279_v19  ;;  %11929 = vmatprep.subr.bf16.mxu0 %v15669_v10  ;;  %vm4083_vm13 = vmand %vm17733_vm1, %vm4075_vm3  ;;  %v17740_v19 = vld [vmem:[#allocation45_spill] sm:$0xff]  ;;  %v4326_v37 = vadd.s32 2, %v15465_v39  ;;  %v17747_v39 = vld [vmem:[#allocation48_spill] sm:$0xff] }
 0x64d   :  { %vm4076_vm6 = vmand %vm4060_vm0, %vm4068_vm9  ;;  %vm4064_vm9 = vcmp.ge.s32.totalorder %v4056_v27, 0 }
 0x64e   :  { %11285 = vmatmul.mubr.msk.f32.gmra.mrb[196].mxu0 %vm3813_vm8, %v17256_v16 }
 0x64f   :  { %11931 = vmatpush3.bf16.msra.mxu0 %v15669_v10  ;;  %11287 = vmatprep.mubr.msk.f32.mxu0 %vm3814_vm7, %v17256_v16 }
 0x650   :  { %11933 = vmatprep.subr.bf16.mxu0 %v15660_v53  ;;  %v11368_v5 = vpop.f32.mrb[232].mxu1 }
 0x651   :  { %v4295_v61 = vpop.f32.mrb[233].mxu1 }
 0x652   :  { %v11369_v23 = vpop.f32.mrb[234].mxu1  ;;  %11288 = vmatmul.mubr.msk.f32.gmra.mrb[198].mxu0 %vm3815_vm11, %v17256_v16  ;;  %vm4078_vm11 = vmand %vm4062_vm4, %vm4070_vm5 }
 0x653   :  { %v15780_v9 = vpack.c.bf16 %v11369_v23, %v11368_v5  ;;  %11935 = vmatpush3.bf16.msra.mxu0 %v15660_v53  ;;  %v4298_v10 = vpop.f32.mrb[235].mxu1  ;;  %11342 = vmatprep.mubr.msk.f32.mxu0 %vm4083_vm13, %v17256_v16  ;;  %v4053_v53 = vadd.s32 1, %v15496_v43  ;;  %v17745_v5 = vld [vmem:[#allocation47_spill] sm:$0xff]  ;;  %v12222_v23 = vld [vmem:[%s17056_s7 + $0x60] sm:$0xff]  }
 0x654   :  { %v15784_v29 = vpack.c.bf16 %v4298_v10, %v4295_v61  ;;  %11937 = vmatprep.subr.bf16.mxu0 %v15687_v35  ;;  %v4329_v61 = vadd.s32 2, %v15498_v7  ;;  %v12214_v7 = vld [vmem:[%s17056_s7 + $0x40] sm:$0xff]  }
 0x655   :  { %vm4061_vm14 = vcmp.ge.s32.totalorder %v4053_v53, 0  ;;  %vm4069_vm8 = vcmp.lt.s32.totalorder %v4053_v53, 64 }
 0x656   :  { %vm4077_vm2 = vmand %vm4061_vm14, %vm4069_vm8  ;;  %vm4073_vm14 = vcmp.lt.s32.totalorder %v4057_v49, 64 }
 0x657   :  { %11939 = vmatpush3.bf16.msra.mxu0 %v15687_v35  ;;  %v4055_v35 = vadd.s32 1, %v15500_v63 }
 0x658   :  { %11941 = vmatprep.subr.bf16.mxu0 %v15683_v58  ;;  %v11372_v42 = vpop.f32.mrb[236].mxu1 }
 0x659   :  { %v4311_v30 = vpop.f32.mrb[237].mxu1  ;;  %vm4063_vm12 = vcmp.ge.s32.totalorder %v4055_v35, 0  ;;  %vm4071_vm3 = vcmp.lt.s32.totalorder %v4055_v35, 64 }
 0x65a   :  { %v11373_v59 = vpop.f32.mrb[238].mxu1  ;;  %vm4079_vm1 = vmand %vm4063_vm12, %vm4071_vm3 }
 0x65b   :  { %v15791_v24 = vpack.c.bf16 %v11373_v59, %v11372_v42  ;;  %11943 = vmatpush3.bf16.msra.mxu0 %v15683_v58  ;;  %v4314_v25 = vpop.f32.mrb[239].mxu1  ;;  %v17734_v58 = vld [vmem:[#allocation43_spill] sm:$0xff] }
 0x65c   :  { %v15795_v55 = vpack.c.bf16 %v4314_v25, %v4311_v30  ;;  %11945 = vmatprep.subr.bf16.mxu0 %v15697_v14  ;;  %vm17735_vm10 = vcmp.eq.s32.totalorder %v12816_v26, %v17734_v58 }
 0x65d   :  { %vm15804_vm7 = vmand %vm17735_vm10, %vm4076_vm6  ;;  %vm4072_vm6 = vcmp.lt.s32.totalorder %v4056_v27, 64  ;;  %vm17741_vm10 = vcmp.eq.s32.totalorder %v12816_v26, %v17740_v19 }
 0x65e   :  { %v17737_v34 = vsel %vm15804_vm7, 4294967295, %v17736_v34  ;;  %vm4086_vm15 = vmand %vm17741_vm10, %vm4078_vm11  ;;  %vm4065_vm7 = vcmp.ge.s32.totalorder %v4057_v49, 0  ;;  %vm4074_vm11 = vcmp.lt.s32.totalorder %v4058_v12, 64 }
 0x65f   :  { %11947 = vmatpush3.bf16.msra.mxu0 %v15697_v14  ;;  %v17738_v14 = vld [vmem:[#allocation44_spill] sm:$0xff]  ;;  %vm17742_vm8 = vnez %v17737_v34  ;;  %vm4080_vm12 = vmand %vm4064_vm9, %vm4072_vm6 }
 0x660   :  { %11949 = vmatprep.subr.bf16.mxu0 %v15694_v6  ;;  %vm17739_vm13 = vcmp.eq.s32.totalorder %v12816_v26, %v17738_v14  ;;  %vm4081_vm3 = vmand %vm4065_vm7, %vm4073_vm14 }
 0x661   :  { %vm4085_vm0 = vmand %vm17739_vm13, %vm4077_vm2  ;;  %vm4066_vm2 = vcmp.ge.s32.totalorder %v4058_v12, 0  ;;  %vm17746_vm13 = vcmp.eq.s32.totalorder %v12816_v26, %v17745_v5 }
 0x662   :  { %vm4088_vm10 = vmand %vm17746_vm13, %vm4080_vm12 }
 0x663   :  { %11951 = vmatpush3.bf16.msra.mxu0 %v15694_v6  ;;  %v17743_v6 = vld [vmem:[#allocation46_spill] sm:$0xff]  ;;  %vm4082_vm7 = vmand %vm4066_vm2, %vm4074_vm11 }
 0x664   :  { %11953 = vmatprep.subr.bf16.mxu0 %v15718_v33  ;;  %vm17744_vm4 = vcmp.eq.s32.totalorder %v12816_v26, %v17743_v6 }
 0x665   :  { %vm4087_vm5 = vmand %vm17744_vm4, %vm4079_vm1  ;;  %vm4342_vm1 = vcmp.lt.s32.totalorder %v4326_v37, 64  ;;  %vm17751_vm4 = vcmp.eq.s32.totalorder %v12816_v26, %v14929_v20 }
 0x666   :  { %11343 = vmatmul.mubr.msk.f32.vlgmr.msra.gmra.mrb[192].mxu0 %vm17742_vm8, %v17256_v16  ;;  %vm4334_vm8 = vcmp.ge.s32.totalorder %v4326_v37, 0 }
 0x667   :  { %11955 = vmatpush3.bf16.msra.mxu0 %v15718_v33  ;;  %11345 = vmatprep.mubr.msk.f32.mxu0 %vm4085_vm0, %v17256_v16  ;;  %vm17748_vm0 = vcmp.eq.s32.totalorder %v12816_v26, %v17747_v39  ;;  %vm4350_vm6 = vmand %vm4334_vm8, %vm4342_vm1  ;;  %v17749_v33 = vld [vmem:[#allocation49_spill] sm:$0xff]  ;;  %vm4345_vm8 = vcmp.lt.s32.totalorder %v4329_v61, 64  ;;  %vm17752_vm1 = vcmp.eq.s32.totalorder %v12816_v26, %v14949_v52 }
 0x668   :  { %11957 = vmatprep.subr.bf16.mxu0 %v15715_v41  ;;  %vm4089_vm9 = vmand %vm17748_vm0, %vm4081_vm3 }
 0x66a   :  { %11346 = vmatmul.mubr.msk.f32.gmra.mrb[194].mxu0 %vm4086_vm15, %v17256_v16  ;;  %vm17750_vm15 = vcmp.eq.s32.totalorder %v12816_v26, %v17749_v33 }
 0x66b   :  { %11959 = vmatpush3.bf16.msra.mxu0 %v15715_v41  ;;  %11348 = vmatprep.mubr.msk.f32.mxu0 %vm4087_vm5, %v17256_v16  ;;  %vm4090_vm14 = vmand %vm17750_vm15, %vm4082_vm7  ;;  %v4327_v41 = vadd.s32 2, %v15490_v60  ;;  %v17753_v60 = vmov 0 }
 0x66c   :  { %11961 = vmatprep.subr.bf16.mxu0 %v15766_v32  ;;  %vm4358_vm5 = vmand %vm17751_vm4, %vm4350_vm6  ;;  %vm17755_vm4 = vcmp.eq.s32.totalorder %v12816_v26, %v14970_v47 }
 0x66d   :  { %vm4335_vm12 = vcmp.ge.s32.totalorder %v4327_v41, 0  ;;  %vm4343_vm3 = vcmp.lt.s32.totalorder %v4327_v41, 64 }
 0x66e   :  { %11349 = vmatmul.mubr.msk.f32.gmra.mrb[196].mxu0 %vm4088_vm10, %v17256_v16  ;;  %vm4351_vm2 = vmand %vm4335_vm12, %vm4343_vm3  ;;  %vm4337_vm10 = vcmp.ge.s32.totalorder %v4329_v61, 0  ;;  %v12223_v61 = vld [vmem:[%s17056_s7 + $0x28] sm:$0xff]  }
 0x66f   :  { %11963 = vmatpush3.bf16.msra.mxu0 %v15766_v32  ;;  %11351 = vmatprep.mubr.msk.f32.mxu0 %vm4089_vm9, %v17256_v16  ;;  %v4328_v32 = vadd.s32 2, %v15496_v43  ;;  %vm15866_vm0 = vmand %vm17752_vm1, %vm4351_vm2  ;;  %v4331_v43 = vadd.s32 2, %v15507_v22  ;;  %vm17756_vm2 = vcmp.eq.s32.totalorder %v12816_v26, %v14994_v8  ;;  %v4333_v22 = vadd.s32 2, %v15521_v13  ;;  %v12221_v13 = vld [vmem:[%s17056_s7 + $0x20] sm:$0xff]  }
 0x670   :  { %11965 = vmatprep.subr.bf16.mxu0 %v15757_v2  ;;  %v17754_v60 = vsel %vm15866_vm0, 4294967295, %v17753_v60  ;;  %vm4353_vm15 = vmand %vm4337_vm10, %vm4345_vm8  ;;  %vm17758_vm10 = vcmp.eq.s32.totalorder %v12816_v26, %v15015_v4  ;;  %v12215_v4 = vld [vmem:[%s17056_s7 + $0x8] sm:$0xff]  }
 0x671   :  { %vm4336_vm11 = vcmp.ge.s32.totalorder %v4328_v32, 0  ;;  %vm4344_vm13 = vcmp.lt.s32.totalorder %v4328_v32, 64  ;;  %vm4339_vm12 = vcmp.ge.s32.totalorder %v4331_v43, 0  ;;  %vm4347_vm3 = vcmp.lt.s32.totalorder %v4331_v43, 64  ;;  %vm4361_vm1 = vmand %vm17756_vm2, %vm4353_vm15  ;;  %11420 = vmatprep.subr.bf16.mxu1 %v12215_v4 }
 0x672   :  { %11352 = vmatmul.mubr.msk.f32.gmra.mrb[198].mxu0 %vm4090_vm14, %v17256_v16  ;;  %vm4352_vm6 = vmand %vm4336_vm11, %vm4344_vm13  ;;  %vm17757_vm13 = vnez %v17754_v60  ;;  %vm17759_vm15 = vcmp.eq.s32.totalorder %v12816_v26, %v15036_v50  ;;  %v12216_v50 = vld [vmem:[%s17056_s7 + $0x48] sm:$0xff]   ;;  %11421 = vmatpush3.bf16.msra.mxu1 %v12215_v4 }
 0x673   :  { %11967 = vmatpush3.bf16.msra.mxu0 %v15757_v2  ;;  %11406 = vmatprep.mubr.msk.f32.mxu0 %vm4358_vm5, %v17256_v16  ;;  %v4330_v2 = vadd.s32 2, %v15500_v63  ;;  %v4332_v63 = vadd.s32 2, %v15509_v54  ;;  %vm4360_vm5 = vmand %vm17755_vm4, %vm4352_vm6  ;;  %vm4341_vm6 = vcmp.ge.s32.totalorder %v4333_v22, 0  ;;  %vm4349_vm4 = vcmp.lt.s32.totalorder %v4333_v22, 64  ;;  %v12220_v54 = vld [vmem:[%s17056_s7 + $0x58] sm:$0xff]  }
 0x674   :  { %11969 = vmatprep.subr.bf16.mxu0 %v15784_v29 }
 0x675   :  { %vm4338_vm9 = vcmp.ge.s32.totalorder %v4330_v2, 0  ;;  %vm4346_vm7 = vcmp.lt.s32.totalorder %v4330_v2, 64  ;;  %vm4340_vm0 = vcmp.ge.s32.totalorder %v4332_v63, 0  ;;  %vm4348_vm11 = vcmp.lt.s32.totalorder %v4332_v63, 64  ;;  %v12224_v2 = vld [vmem:[%s17056_s7 + $0x68] sm:$0xff]  }
 0x676   :  { %vm4354_vm14 = vmand %vm4338_vm9, %vm4346_vm7 }
 0x677   :  { %11971 = vmatpush3.bf16.msra.mxu0 %v15784_v29  ;;  %vm4362_vm8 = vmand %vm17758_vm10, %vm4354_vm14 }
 0x678   :  { %11973 = vmatprep.subr.bf16.mxu0 %v15780_v9  ;;  %vm4355_vm9 = vmand %vm4339_vm12, %vm4347_vm3 }
 0x679   :  { %vm4356_vm7 = vmand %vm4340_vm0, %vm4348_vm11  ;;  %vm17761_vm0 = vcmp.eq.s32.totalorder %v12816_v26, %v15078_v15  ;;  %v12219_v15 = vld [vmem:[%s17056_s7 + $0x18] sm:$0xff]  }
 0x67a   :  { %vm4363_vm2 = vmand %vm17759_vm15, %vm4355_vm9 }
 0x67b   :  { %11975 = vmatpush3.bf16.msra.mxu0 %v15780_v9  ;;  %vm4357_vm14 = vmand %vm4341_vm6, %vm4349_vm4  ;;  %v9313_v9 = vld [vmem:[%s17057_s6] ss:$0 sm:$0xff] }
 0x67c   :  { %11977 = vmatprep.subr.bf16.mxu0 %v15795_v55 }
 0x67f   :  { %11979 = vmatpush3.bf16.msra.mxu0 %v15795_v55 }
 0x680   :  { %11981 = vmatprep.subr.bf16.mxu0 %v15791_v24 }
 0x683   :  { %11983 = vmatpush3.bf16.msra.mxu0 %v15791_v24 }
 0x684   :  { %11494 = vmatprep.subr.bf16.mxu0 %v12214_v7 }
 0x686   :  { %11407 = vmatmul.mubr.msk.f32.vlgmr.msra.gmra.mrb[192].mxu0 %vm17757_vm13, %v17256_v16  ;;  %vm17760_vm13 = vcmp.eq.s32.totalorder %v12816_v26, %v15057_v51  ;;  %v12217_v51 = vld [vmem:[%s17056_s7 + $0x10] sm:$0xff]  }
 0x687   :  { %11409 = vmatprep.mubr.msk.f32.mxu0 %vm4360_vm5, %v17256_v16  ;;  %11495 = vmatpush3.bf16.msra.mxu0 %v12214_v7  ;;  %vm4364_vm10 = vmand %vm17760_vm13, %vm4356_vm7 }
 0x688   :  { %vm4365_vm5 = vmand %vm17761_vm0, %vm4357_vm14  ;;  %11496 = vmatprep.subr.bf16.mxu0 %v12216_v50  ;;  %11422 = vmatprep.subr.bf16.mxu1 %v12217_v51 }
 0x689   :  { %11423 = vmatpush3.bf16.msra.mxu1 %v12217_v51 }
 0x68a   :  { %11410 = vmatmul.mubr.msk.f32.gmra.mrb[194].mxu0 %vm4361_vm1, %v17256_v16  ;;  %11424 = vmatprep.subr.bf16.mxu1 %v12219_v15  ;;  %vm4562_vm1 = vcmask 523264  }
 0x68b   :  { %11412 = vmatprep.mubr.msk.f32.mxu0 %vm4362_vm8, %v17256_v16  ;;  %11497 = vmatpush3.bf16.msra.mxu0 %v12216_v50 }
 0x68d   :  { %11425 = vmatpush3.bf16.msra.mxu1 %v12219_v15  ;;  %v12225_v15 = vld [vmem:[%s17056_s7 + $0x30] sm:$0xff]  }
 0x68e   :  { %11413 = vmatmul.mubr.msk.f32.gmra.mrb[196].mxu0 %vm4363_vm2, %v17256_v16  ;;  %11434 = vmatprep.subr.bf16.mxu1 %v12221_v13 }
 0x68f   :  { %11415 = vmatprep.mubr.msk.f32.mxu0 %vm4364_vm10, %v17256_v16  ;;  %vm17762_vm10 = vcmp.eq.s32.totalorder %v12816_v26, %v17668_v46 }
 0x692   :  { %11416 = vmatmul.mubr.msk.f32.gmra.mrb[198].mxu0 %vm4365_vm5, %v17256_v16  ;;  %v12218_v16 = vld [vmem:[%s17056_s7 + $0x50] sm:$0xff]  }
 0x693   :  { %11498 = vmatprep.subr.bf16.mxu0 %v12218_v16 }
 0x694   :  { %11499 = vmatpush3.bf16.msra.mxu0 %v12218_v16 }
 0x695   :  { %11500 = vmatprep.subr.bf16.mxu0 %v12220_v54 }
 0x698   :  { %11501 = vmatpush3.bf16.msra.mxu0 %v12220_v54  ;;  %v12226_v54 = vld [vmem:[%s17056_s7 + $0x70] sm:$0xff]  }
 0x699   :  { %11532 = vmatprep.subr.bf16.mxu0 %v12222_v23 }
 0x759   :  { %v11408_v10 = vpop.f32.mrb[192].mxu0 }
 0x75a   :  { %v4495_v29 = vadd.f32 %v11408_v10, %v9313_v9  ;;  %v4440_v62 = vpop.f32.mrb[193].mxu0 }
 0x75b   :  { %v4494_v42 = vadd.f32 %v9313_v9, %v4440_v62  ;;  %v12228_v62 = vld [vmem:[%s17056_s7 + $0x78] sm:$0xff]  }
 0x75c   :  { %vm4503_vm12 = vcmp.gt.f32.partialorder %v4495_v29, 0.0  ;;  %v4511_v30 = vmul.f32 0.2, %v4495_v29 }
 0x75d   :  { %vm4502_vm3 = vcmp.gt.f32.partialorder %v4494_v42, 0.0  ;;  %v4510_v59 = vmul.f32 0.2, %v4494_v42  ;;  %v11411_v53 = vpop.f32.mrb[194].mxu0 }
 0x75e   :  { %v4519_v24 = vsel %vm4503_vm12, %v4495_v29, %v4511_v30  ;;  %v4497_v25 = vadd.f32 %v11411_v53, %v9313_v9  ;;  %v4450_v17 = vpop.f32.mrb[195].mxu0  ;;  %v12230_v30 = vld [vmem:[%s17056_s7 + $0x88] sm:$0xff]   ;;  %v12232_v53 = vld [vmem:[%s17056_s7 + $0x98] sm:$0xff]  }
 0x75f   :  { %v4518_v55 = vsel %vm4502_vm3, %v4494_v42, %v4510_v59  ;;  %v4496_v35 = vadd.f32 %v9313_v9, %v4450_v17  ;;  %v12229_v42 = vld [vmem:[%s17056_s7 + $0x80] sm:$0xff]   ;;  %v12231_v59 = vld [vmem:[%s17056_s7 + $0x90] sm:$0xff]  }
 0x760   :  { %v15931_v34 = vpack.c.bf16 %v4519_v24, %v4518_v55  ;;  %vm4505_vm11 = vcmp.gt.f32.partialorder %v4497_v25, 0.0  ;;  %v4513_v27 = vmul.f32 0.2, %v4497_v25  ;;  %v4640_v24 = vand.u32 15, %v17667_v44 }
 0x761   :  { %vm4504_vm8 = vcmp.gt.f32.partialorder %v4496_v35, 0.0  ;;  %v4512_v49 = vmul.f32 0.2, %v4496_v35  ;;  %v11414_v12 = vpop.f32.mrb[196].mxu0  ;;  %v12483_v55 = vmov 0.0  }
 0x762   :  { %v4521_v6 = vsel %vm4505_vm11, %v4497_v25, %v4513_v27  ;;  %v4499_v37 = vadd.f32 %v11414_v12, %v9313_v9  ;;  %v4460_v5 = vpop.f32.mrb[197].mxu0  ;;  %11426 = vmatprep.mubr.msk.bf16.mxu1 %vm4562_vm1, %v15931_v34  ;;  %11502 = vmatprep.mubr.msk.bf16.mxu0 %vm4562_vm1, %v15931_v34  ;;  %v15996_v25 = vmul.u32 2, %v4640_v24  ;;  %v12238_v27 = vld [vmem:[%s17058_s9 + $0x4] ss:$8 sps:$4 sm:$0xff]   ;;  %v12244_v12 = vld [vmem:[%s17058_s9 + $0x14] ss:$8 sps:$4 sm:$0xff]  }
 0x763   :  { %v4520_v39 = vsel %vm4504_vm8, %v4496_v35, %v4512_v49  ;;  %v4498_v33 = vadd.f32 %v9313_v9, %v4460_v5  ;;  %v12242_v49 = vld [vmem:[%s17058_s9 + $0x10] ss:$8 sps:$4 sm:$0xff]   ;;  %v12256_v5 = vld [vmem:[%s17058_s9 + $0x34] ss:$8 sps:$4 sm:$0xff]  }
 0x764   :  { %v15937_v41 = vpack.c.bf16 %v4521_v6, %v4520_v39  ;;  %vm4507_vm9 = vcmp.gt.f32.partialorder %v4499_v37, 0.0  ;;  %v4515_v32 = vmul.f32 0.2, %v4499_v37  ;;  %v4770_v17 = vadd.s32 4294967295, %v15996_v25  ;;  %v12250_v6 = vld [vmem:[%s17058_s9 + $0x24] ss:$8 sps:$4 sm:$0xff]  }
 0x765   :  { %vm4506_vm7 = vcmp.gt.f32.partialorder %v4498_v33, 0.0  ;;  %v4514_v60 = vmul.f32 0.2, %v4498_v33  ;;  %v11417_v43 = vpop.f32.mrb[198].mxu0  ;;  %v12254_v39 = vld [vmem:[%s17058_s9 + $0x30] ss:$8 sps:$4 sm:$0xff]  }
 0x766   :  { %v4523_v7 = vsel %vm4507_vm9, %v4499_v37, %v4515_v32  ;;  %v4501_v63 = vadd.f32 %v11417_v43, %v9313_v9  ;;  %v4470_v22 = vpop.f32.mrb[199].mxu0  ;;  %11427 = vmatmul.mubr.msk.bf16.vlgmr.msra.gmra.mrb[240].mxu1 %vm4562_vm1, %v15937_v41  ;;  %11503 = vmatmul.mubr.msk.bf16.vlgmr.msra.gmra.mrb[200].mxu0 %vm4562_vm1, %v15937_v41  ;;  %vm4774_vm15 = vcmp.ge.s32.totalorder %v4770_v17, 0  ;;  %vm4778_vm2 = vcmp.lt.s32.totalorder %v4770_v17, 32  ;;  %v12248_v37 = vld [vmem:[%s17058_s9 + $0x20] ss:$8 sps:$4 sm:$0xff]  }
 0x767   :  { %v4522_v4 = vsel %vm4506_vm7, %v4498_v33, %v4514_v60  ;;  %v4500_v50 = vadd.f32 %v9313_v9, %v4470_v22  ;;  %11435 = vmatpush3.bf16.msra.mxu1 %v12221_v13  ;;  %11533 = vmatpush3.bf16.msra.mxu0 %v12222_v23  ;;  %v12227_v9 = vld [vmem:[%s17056_s7 + $0x38] sm:$0xff]   ;;  %vm4782_vm13 = vmand %vm4774_vm15, %vm4778_vm2  ;;  %v12262_v33 = vld [vmem:[%s17058_s9 + $0x44] ss:$8 sps:$4 sm:$0xff]  }
 0x768   :  { %v4528_v51 = vpack.c.bf16 %v4523_v7, %v4522_v4  ;;  %vm4509_vm6 = vcmp.gt.f32.partialorder %v4501_v63, 0.0  ;;  %v4517_v16 = vmul.f32 0.2, %v4501_v63  ;;  %11436 = vmatprep.subr.bf16.mxu1 %v12223_v61  ;;  %11534 = vmatprep.subr.bf16.mxu0 %v12224_v2  ;;  %vm4786_vm14 = vmand %vm17762_vm10, %vm4782_vm13  ;;  %v12268_v32 = vld [vmem:[%s17058_s9 + $0x54] ss:$8 sps:$4 sm:$0xff]   ;;  %vm17764_vm10 = vcmp.eq.s32.totalorder %v12816_v26, %v17681_v36 }
 0x769   :  { %vm4508_vm4 = vcmp.gt.f32.partialorder %v4500_v50, 0.0  ;;  %v4516_v10 = vmul.f32 0.2, %v4500_v50  ;;  %v4790_v35 = vsel %vm4786_vm14, 1.0, %v12483_v55 }
 0x76a   :  { %v4525_v29 = vsel %vm4509_vm6, %v4501_v63, %v4517_v16  ;;  %11430 = vmatprep.mubr.msk.bf16.mxu1 %vm4562_vm1, %v4528_v51  ;;  %11506 = vmatprep.mubr.msk.bf16.mxu0 %vm4562_vm1, %v4528_v51  ;;  %vm17763_vm6 = vcmp.eq.s32.totalorder %v12816_v26, %v17677_v56 }
 0x76b   :  { %v4524_v13 = vsel %vm4508_vm4, %v4500_v50, %v4516_v10  ;;  %11437 = vmatpush3.bf16.msra.mxu1 %v12223_v61  ;;  %11535 = vmatpush3.bf16.msra.mxu0 %v12224_v2  ;;  %v12266_v61 = vld [vmem:[%s17058_s9 + $0x50] ss:$8 sps:$4 sm:$0xff]  }
 0x76c   :  { %v4529_v23 = vpack.c.bf16 %v4525_v29, %v4524_v13  ;;  %11438 = vmatprep.subr.bf16.mxu1 %v12225_v15  ;;  %11536 = vmatprep.subr.bf16.mxu0 %v12226_v54 }
 0x76e   :  { %11431 = vmatmul.mubr.msk.bf16.gmra.mrb[244].mxu1 %vm4562_vm1, %v4529_v23  ;;  %11507 = vmatmul.mubr.msk.bf16.gmra.mrb[204].mxu0 %vm4562_vm1, %v4529_v23 }
 0x76f   :  { %11439 = vmatpush3.bf16.msra.mxu1 %v12225_v15  ;;  %11442 = vmatprep.mubr.msk.bf16.mxu1 %vm4562_vm1, %v15931_v34 }
 0x770   :  { %11537 = vmatpush3.bf16.msra.mxu0 %v12226_v54  ;;  %11540 = vmatprep.mubr.msk.bf16.mxu0 %vm4562_vm1, %v15931_v34 }
 0x771   :  { %11440 = vmatprep.subr.bf16.mxu1 %v12227_v9  ;;  %11538 = vmatprep.subr.bf16.mxu0 %v12228_v62 }
 0x773   :  { %11441 = vmatpush3.bf16.msra.mxu1 %v12227_v9 }
 0x774   :  { %11539 = vmatpush3.bf16.msra.mxu0 %v12228_v62 }
 0x775   :  { %11570 = vmatprep.subr.bf16.mxu0 %v12229_v42 }
 0x776   :  { %11443 = vmatmul.mubr.msk.bf16.vlgmr.msra.gmra.mrb[248].mxu1 %vm4562_vm1, %v15937_v41 }
 0x777   :  { %11541 = vmatmul.mubr.msk.bf16.vlgmr.msra.gmra.mrb[208].mxu0 %vm4562_vm1, %v15937_v41  ;;  %11446 = vmatprep.mubr.msk.bf16.mxu1 %vm4562_vm1, %v4528_v51 }
 0x778   :  { %11544 = vmatprep.mubr.msk.bf16.mxu0 %vm4562_vm1, %v4528_v51  ;;  %11571 = vmatpush3.bf16.msra.mxu0 %v12229_v42 }
 0x779   :  { %11572 = vmatprep.subr.bf16.mxu0 %v12230_v30 }
 0x77c   :  { %11573 = vmatpush3.bf16.msra.mxu0 %v12230_v30 }
 0x77d   :  { %11574 = vmatprep.subr.bf16.mxu0 %v12231_v59 }
 0x77e   :  { %11447 = vmatmul.mubr.msk.bf16.gmra.mrb[252].mxu1 %vm4562_vm1, %v4529_v23 }
 0x77f   :  { %11545 = vmatmul.mubr.msk.bf16.gmra.mrb[212].mxu0 %vm4562_vm1, %v4529_v23  ;;  %11466 = vmatprep.mubr.msk.f32.mxu1 %vm4562_vm1, %v4790_v35  ;;  %v4641_v35 = vand.u32 15, %v17670_v40 }
 0x780   :  { %11575 = vmatpush3.bf16.msra.mxu0 %v12231_v59  ;;  %11578 = vmatprep.mubr.msk.bf16.mxu0 %vm4562_vm1, %v15931_v34  ;;  %v12236_v34 = vld [vmem:[%s17058_s9] ss:$8 sps:$4 sm:$0xff]  }
 0x781   :  { %11576 = vmatprep.subr.bf16.mxu0 %v12232_v53 }
 0x784   :  { %11577 = vmatpush3.bf16.msra.mxu0 %v12232_v53 }
 0x785   :  { %5774 = vmatprep.subr.bf16.mxu0 %v12238_v27 }
 0x787   :  { %11579 = vmatmul.mubr.msk.bf16.vlgmr.msra.gmra.mrb[216].mxu0 %vm4562_vm1, %v15937_v41  ;;  %v12260_v41 = vld [vmem:[%s17058_s9 + $0x40] ss:$8 sps:$4 sm:$0xff]  }
 0x788   :  { %11582 = vmatprep.mubr.msk.bf16.mxu0 %vm4562_vm1, %v4528_v51  ;;  %5775 = vmatpush1.bf16.msra.mxu0 %v12236_v34  ;;  %v4642_v34 = vand.u32 15, %v17671_v18 }
 0x789   :  { %5776 = vmatprep.subr.bf16.mxu0 %v12244_v12  ;;  %v4643_v12 = vand.u32 15, %v17672_v1 }
 0x78c   :  { %5777 = vmatpush1.bf16.msra.mxu0 %v12242_v49  ;;  %v16058_v49 = vmul.u32 2, %v4641_v35 }
 0x78d   :  { %5778 = vmatprep.subr.bf16.mxu0 %v12250_v6 }
 0x78e   :  { %v4771_v18 = vadd.s32 4294967295, %v16058_v49  ;;  %v4649_v36 = vadd.s32 4294967294, %v16058_v49 }
 0x78f   :  { %11583 = vmatmul.mubr.msk.bf16.gmra.mrb[220].mxu0 %vm4562_vm1, %v4529_v23 }
 0x790   :  { %5779 = vmatpush1.bf16.msra.mxu0 %v12248_v37  ;;  %vm4775_vm0 = vcmp.ge.s32.totalorder %v4771_v18, 0  ;;  %vm4779_vm5 = vcmp.lt.s32.totalorder %v4771_v18, 32 }
 0x791   :  { %5780 = vmatprep.subr.bf16.mxu0 %v12256_v5  ;;  %vm4783_vm11 = vmand %vm4775_vm0, %vm4779_vm5  ;;  %vm17765_vm5 = vcmp.eq.s32.totalorder %v12816_v26, %v17683_v21 }
 0x792   :  { %vm4787_vm4 = vmand %vm17763_vm6, %vm4783_vm11 }
 0x794   :  { %5781 = vmatpush1.bf16.msra.mxu0 %v12254_v39 }
 0x795   :  { %5782 = vmatprep.subr.bf16.mxu0 %v12262_v33 }
 0x798   :  { %5783 = vmatpush1.bf16.msra.mxu0 %v12260_v41 }
 0x799   :  { %5784 = vmatprep.subr.bf16.mxu0 %v12268_v32 }
 0x79c   :  { %5785 = vmatpush1.bf16.msra.mxu0 %v12266_v61  ;;  %v16061_v61 = vmul.u32 2, %v4642_v34 }
 0x79e   :  { %v4772_v1 = vadd.s32 4294967295, %v16061_v61 }
 0x7a0   :  { %vm4776_vm12 = vcmp.ge.s32.totalorder %v4772_v1, 0  ;;  %vm4780_vm3 = vcmp.lt.s32.totalorder %v4772_v1, 32 }
 0x7a1   :  { %vm4784_vm7 = vmand %vm4776_vm12, %vm4780_vm3  ;;  %vm17766_vm3 = vcmp.eq.s32.totalorder %v12816_v26, %v17697_v31 }
 0x7a2   :  { %vm4788_vm14 = vmand %vm17764_vm10, %vm4784_vm7  ;;  %vm17767_vm10 = vcmp.eq.s32.totalorder %v12816_v26, %v17699_v0 }
 0x839   :  { %v11428_v2 = vpop.f32.mrb[240].mxu1  ;;  %v11504_v60 = vpop.f32.mrb[200].mxu0 }
 0x83a   :  { %v4609_v43 = vpop.f32.mrb[241].mxu1  ;;  %v5055_v7 = vpop.f32.mrb[201].mxu0 }
 0x83b   :  { %v11429_v63 = vpop.f32.mrb[242].mxu1  ;;  %v11505_v22 = vpop.f32.mrb[202].mxu0 }
 0x83c   :  { %v16040_v4 = vpack.c.bf16 %v11429_v63, %v11428_v2  ;;  %v16042_v50 = vpack.c.bf16 %v11505_v22, %v11504_v60  ;;  %v4612_v51 = vpop.f32.mrb[243].mxu1  ;;  %v5058_v16 = vpop.f32.mrb[203].mxu0 }
 0x83d   :  { %v16044_v15 = vpack.c.bf16 %v4612_v51, %v4609_v43  ;;  %v16046_v54 = vpack.c.bf16 %v5058_v16, %v5055_v7  ;;  %v16066_v7 = vmul.u32 2, %v4643_v12 }
 0x83f   :  { %v4773_v51 = vadd.s32 4294967295, %v16066_v7  ;;  %v4651_v18 = vadd.s32 4294967294, %v16066_v7 }
 0x841   :  { %v11432_v10 = vpop.f32.mrb[244].mxu1  ;;  %v11508_v29 = vpop.f32.mrb[204].mxu0  ;;  %vm4777_vm8 = vcmp.ge.s32.totalorder %v4773_v51, 0  ;;  %vm4781_vm9 = vcmp.lt.s32.totalorder %v4773_v51, 32 }
 0x842   :  { %v4625_v13 = vpop.f32.mrb[245].mxu1  ;;  %v5071_v23 = vpop.f32.mrb[205].mxu0  ;;  %vm4785_vm13 = vmand %vm4777_vm8, %vm4781_vm9  ;;  %vm4653_vm8 = vcmp.ge.s32.totalorder %v4649_v36, 0  ;;  %vm4657_vm9 = vcmp.lt.s32.totalorder %v4649_v36, 32  ;;  %v12272_v36 = vld [vmem:[%s17058_s9 + $0x60] ss:$8 sps:$4 sm:$0xff]  }
 0x843   :  { %v11433_v9 = vpop.f32.mrb[246].mxu1  ;;  %v11509_v62 = vpop.f32.mrb[206].mxu0  ;;  %vm4789_vm12 = vmand %vm17765_vm5, %vm4785_vm13  ;;  %vm5090_vm5 = vcmp.lt.s32.totalorder %v15996_v25, 32 }
 0x844   :  { %v16048_v42 = vpack.c.bf16 %v11433_v9, %v11432_v10  ;;  %v16050_v30 = vpack.c.bf16 %v11509_v62, %v11508_v29  ;;  %v4628_v59 = vpop.f32.mrb[247].mxu1  ;;  %v5074_v53 = vpop.f32.mrb[207].mxu0  ;;  %v4793_v21 = vsel %vm4789_vm12, 1.0, %v12483_v55 }
 0x845   :  { %v16052_v24 = vpack.c.bf16 %v4628_v59, %v4625_v13  ;;  %v16054_v17 = vpack.c.bf16 %v5074_v53, %v5071_v23  ;;  %v4648_v59 = vadd.s32 4294967294, %v15996_v25 }
 0x847   :  { %vm4652_vm15 = vcmp.ge.s32.totalorder %v4648_v59, 0  ;;  %vm4656_vm2 = vcmp.lt.s32.totalorder %v4648_v59, 32 }
 0x848   :  { %vm4660_vm0 = vmand %vm4652_vm15, %vm4656_vm2  ;;  %vm4655_vm15 = vcmp.ge.s32.totalorder %v4651_v18, 0  ;;  %vm4659_vm2 = vcmp.lt.s32.totalorder %v4651_v18, 32  ;;  %v12283_v18 = vld [vmem:[%s17058_s9 + $0x104] ss:$8 sps:$4 sm:$0xff]  }
 0x849   :  { %v11444_v27 = vpop.f32.mrb[248].mxu1  ;;  %vm4664_vm11 = vmand %vm17766_vm3, %vm4660_vm0  ;;  %vm5086_vm0 = vcmp.ge.s32.totalorder %v15996_v25, 0  ;;  %vm17768_vm3 = vcmp.eq.s32.totalorder %v12816_v26, %v17703_v11 }
 0x84a   :  { %v11542_v6 = vpop.f32.mrb[208].mxu0  ;;  %v4739_v37 = vpop.f32.mrb[249].mxu1  ;;  %vm4663_vm12 = vmand %vm4655_vm15, %vm4659_vm2  ;;  %vm5087_vm15 = vcmp.ge.s32.totalorder %v16058_v49, 0  ;;  %vm5091_vm2 = vcmp.lt.s32.totalorder %v16058_v49, 32 }
 0x84b   :  { %v5274_v5 = vpop.f32.mrb[209].mxu0  ;;  %v11445_v39 = vpop.f32.mrb[250].mxu1 }
 0x84c   :  { %v11988_v33 = vpack.c.bf16 %v11445_v39, %v11444_v27  ;;  %v11543_v41 = vpop.f32.mrb[210].mxu0  ;;  %v4742_v32 = vpop.f32.mrb[251].mxu1 }
 0x84d   :  { %v16063_v2 = vpack.c.bf16 %v11543_v41, %v11542_v6  ;;  %v11984_v60 = vpack.c.bf16 %v4742_v32, %v4739_v37  ;;  %v5277_v43 = vpop.f32.mrb[211].mxu0  ;;  %v4791_v37 = vsel %vm4787_vm4, 1.0, %v12483_v55  ;;  %v4792_v41 = vsel %vm4788_vm14, 1.0, %v12483_v55  ;;  %vm4661_vm4 = vmand %vm4653_vm8, %vm4657_vm9 }
 0x84e   :  { %v16068_v63 = vpack.c.bf16 %v5277_v43, %v5274_v5  ;;  %v4668_v43 = vsel %vm4664_vm11, 1.0, %v12483_v55  ;;  %vm4665_vm14 = vmand %vm17767_vm10, %vm4661_vm4  ;;  %vm17769_vm9 = vcmp.eq.s32.totalorder %v12816_v26, %v17705_v3  ;;  %vm5092_vm10 = vcmp.lt.s32.totalorder %v16061_v61, 32 }
 0x84f   :  { %11985 = vmatprep.subr.bf16.mxu1 %v11984_v60  ;;  %vm5094_vm8 = vmand %vm5086_vm0, %vm5090_vm5  ;;  %vm5089_vm0 = vcmp.ge.s32.totalorder %v16066_v7, 0  ;;  %vm5093_vm5 = vcmp.lt.s32.totalorder %v16066_v7, 32 }
 0x850   :  { %11987 = vmatpush3.bf16.msra.mxu1 %v11984_v60  ;;  %v4650_v60 = vadd.s32 4294967294, %v16061_v61 }
 0x851   :  { %v11448_v22 = vpop.f32.mrb[252].mxu1  ;;  %11989 = vmatprep.subr.bf16.mxu1 %v11988_v33 }
 0x852   :  { %v11546_v16 = vpop.f32.mrb[212].mxu0  ;;  %v4755_v10 = vpop.f32.mrb[253].mxu1  ;;  %vm4654_vm7 = vcmp.ge.s32.totalorder %v4650_v60, 0  ;;  %vm4658_vm6 = vcmp.lt.s32.totalorder %v4650_v60, 32  ;;  %v12280_v60 = vld [vmem:[%s17058_s9 + $0x74] ss:$8 sps:$4 sm:$0xff]  }
 0x853   :  { %v5290_v29 = vpop.f32.mrb[213].mxu0  ;;  %v11449_v13 = vpop.f32.mrb[254].mxu1  ;;  %vm4662_vm13 = vmand %vm4654_vm7, %vm4658_vm6  ;;  %vm17770_vm6 = vcmp.eq.s32.totalorder %v12816_v26, %v17512_v28 }
 0x854   :  { %v11996_v23 = vpack.c.bf16 %v11449_v13, %v11448_v22  ;;  %v11547_v9 = vpop.f32.mrb[214].mxu0  ;;  %v4758_v62 = vpop.f32.mrb[255].mxu1  ;;  %11991 = vmatpush3.bf16.msra.mxu1 %v11988_v33  ;;  %vm4666_vm11 = vmand %vm17768_vm3, %vm4662_vm13  ;;  %vm5088_vm13 = vcmp.ge.s32.totalorder %v16061_v61, 0  ;;  %vm17771_vm3 = vcmp.eq.s32.totalorder %v12816_v26, %v12960_v38  ;;  %v5529_v13 = vadd.s32 2, %v16058_v49 }
 0x855   :  { %v16073_v53 = vpack.c.bf16 %v11547_v9, %v11546_v16  ;;  %v11992_v35 = vpack.c.bf16 %v4758_v62, %v4755_v10  ;;  %v5293_v34 = vpop.f32.mrb[215].mxu0  ;;  %vm4667_vm7 = vmand %vm17769_vm9, %vm4663_vm12  ;;  %v12233_v9 = vld [vmem:[%s17058_s9 + $0x80] ss:$8 sps:$4 sm:$0xff]  }
 0x856   :  { %v16075_v27 = vpack.c.bf16 %v5293_v34, %v5290_v29  ;;  %vm5098_vm4 = vmand %vm17770_vm6, %vm5094_vm8  ;;  %v4671_v11 = vsel %vm4667_vm7, 1.0, %v12483_v55  ;;  %vm17772_vm6 = vcmp.eq.s32.totalorder %v12816_v26, %v12966_v57  ;;  %v5308_v29 = vadd.s32 1, %v16066_v7  ;;  %v12253_v34 = vld [vmem:[%s17058_s9 + $0xb4] ss:$8 sps:$4 sm:$0xff]  }
 0x857   :  { %11993 = vmatprep.subr.bf16.mxu1 %v11992_v35  ;;  %v5102_v3 = vsel %vm5098_vm4, 1.0, %v12483_v55  ;;  %vm5096_vm12 = vmand %vm5088_vm13, %vm5092_vm10  ;;  %vm17774_vm10 = vcmp.eq.s32.totalorder %v12816_v26, %v17732_v48 }
 0x858   :  { %11995 = vmatpush3.bf16.msra.mxu1 %v11992_v35  ;;  %vm5097_vm7 = vmand %vm5089_vm0, %vm5093_vm5  ;;  %v12245_v35 = vld [vmem:[%s17058_s9 + $0xa0] ss:$8 sps:$4 sm:$0xff]  }
 0x859   :  { %11997 = vmatprep.subr.bf16.mxu1 %v11996_v23  ;;  %vm5100_vm4 = vmand %vm17772_vm6, %vm5096_vm12  ;;  %vm17775_vm6 = vcmp.eq.s32.totalorder %v12816_v26, %v17734_v58 }
 0x85a   :  { %v11580_v12 = vpop.f32.mrb[216].mxu0 }
 0x85b   :  { %v5497_v6 = vpop.f32.mrb[217].mxu0 }
 0x85c   :  { %v11581_v5 = vpop.f32.mrb[218].mxu0  ;;  %11999 = vmatpush3.bf16.msra.mxu1 %v11996_v23 }
 0x85d   :  { %v16087_v39 = vpack.c.bf16 %v11581_v5, %v11580_v12  ;;  %v5500_v33 = vpop.f32.mrb[219].mxu0  ;;  %12001 = vmatprep.subr.bf16.mxu1 %v16044_v15  ;;  %v12259_v12 = vld [vmem:[%s17058_s9 + $0xc4] ss:$8 sps:$4 sm:$0xff]   ;;  %v12263_v5 = vld [vmem:[%s17058_s9 + $0xd0] ss:$8 sps:$4 sm:$0xff]  }
 0x85e   :  { %v16092_v32 = vpack.c.bf16 %v5500_v33, %v5497_v6  ;;  %v12257_v6 = vld [vmem:[%s17058_s9 + $0xc0] ss:$8 sps:$4 sm:$0xff]  }
 0x85f   :  { %11467 = vmatmul.mubr.msk.f32.vlgmr.msra.gmra.mrb[0].mxu1 %vm4562_vm1, %v4791_v37  ;;  %v12265_v37 = vld [vmem:[%s17058_s9 + $0xd4] ss:$8 sps:$4 sm:$0xff]   ;;  %v12269_v33 = vld [vmem:[%s17058_s9 + $0xe0] ss:$8 sps:$4 sm:$0xff]  }
 0x860   :  { %12003 = vmatpush3.bf16.msra.mxu1 %v16044_v15  ;;  %11469 = vmatprep.mubr.msk.f32.mxu1 %vm4562_vm1, %v4792_v41  ;;  %v12274_v41 = vld [vmem:[%s17058_s9 + $0x64] ss:$8 sps:$4 sm:$0xff]  }
 0x861   :  { %12005 = vmatprep.subr.bf16.mxu1 %v16040_v4  ;;  %5786 = vmatprep.subr.bf16.mxu0 %v12274_v41  ;;  %v12319_v41 = vld [vmem:[%s17058_s9 + $0x244] ss:$8 sps:$4 sm:$0xff]  }
 0x862   :  { %v11584_v1 = vpop.f32.mrb[220].mxu0  ;;  %5787 = vmatpush1.bf16.msra.mxu0 %v12272_v36  ;;  %v12317_v36 = vld [vmem:[%s17058_s9 + $0x240] ss:$8 sps:$4 sm:$0xff]  }
 0x863   :  { %v5513_v22 = vpop.f32.mrb[221].mxu0  ;;  %11470 = vmatmul.mubr.msk.f32.gmra.mrb[2].mxu1 %vm4562_vm1, %v4793_v21  ;;  %v12275_v21 = vld [vmem:[%s17058_s9 + $0xf0] ss:$8 sps:$4 sm:$0xff]   ;;  %5788 = vmatprep.subr.bf16.mxu0 %v12280_v60  ;;  %v12325_v60 = vld [vmem:[%s17058_s9 + $0x264] ss:$8 sps:$4 sm:$0xff]  }
 0x864   :  { %v11585_v51 = vpop.f32.mrb[222].mxu0  ;;  %12007 = vmatpush3.bf16.msra.mxu1 %v16040_v4  ;;  %11488 = vmatprep.mubr.msk.f32.mxu1 %vm4562_vm1, %v4668_v43  ;;  %v4669_v4 = vsel %vm4665_vm14, 1.0, %v12483_v55  ;;  %vm5095_vm14 = vmand %vm5087_vm15, %vm5091_vm2  ;;  %vm17773_vm2 = vcmp.eq.s32.totalorder %v12816_v26, %v13009_v45  ;;  %v5307_v45 = vadd.s32 1, %v16061_v61  ;;  %v12278_v43 = vld [vmem:[%s17058_s9 + $0x70] ss:$8 sps:$4 sm:$0xff]  }
 0x865   :  { %v16108_v15 = vpack.c.bf16 %v11585_v51, %v11584_v1  ;;  %v5516_v16 = vpop.f32.mrb[223].mxu0  ;;  %12009 = vmatprep.subr.bf16.mxu1 %v16052_v24  ;;  %vm5101_vm13 = vmand %vm17773_vm2, %vm5097_vm7  ;;  %v12484_v1 = vmov 0  }
 0x866   :  { %v16111_v10 = vpack.c.bf16 %v5516_v16, %v5513_v22  ;;  %v5105_v57 = vsel %vm5101_vm13, 1.0, %v12483_v55  ;;  %vm5311_vm12 = vcmp.ge.s32.totalorder %v5307_v45, 0  ;;  %5789 = vmatpush1.bf16.msra.mxu0 %v12278_v43  ;;  %5806 = vmatprep.mubr.bf16.mxu0 %v12484_v1  ;;  %v9406_v22 = vld [vmem:[%s17059_s8] ss:$0 sm:$0xff] }
 0x867   :  { %v12323_v43 = vld [vmem:[%s17058_s9 + $0x260] ss:$8 sps:$4 sm:$0xff]  }
 0x868   :  { %12011 = vmatpush3.bf16.msra.mxu1 %v16052_v24  ;;  %v4670_v24 = vsel %vm4666_vm11, 1.0, %v12483_v55  ;;  %vm5099_vm11 = vmand %vm17771_vm3, %vm5095_vm14  ;;  %vm5315_vm3 = vcmp.lt.s32.totalorder %v5307_v45, 32 }
 0x869   :  { %12013 = vmatprep.subr.bf16.mxu1 %v16048_v42  ;;  %vm5319_vm7 = vmand %vm5311_vm12, %vm5315_vm3  ;;  %vm17778_vm3 = vcmp.eq.s32.totalorder %v12816_v26, %v14929_v20 }
 0x86c   :  { %12015 = vmatpush3.bf16.msra.mxu1 %v16048_v42  ;;  %v5104_v42 = vsel %vm5100_vm4, 1.0, %v12483_v55 }
 0x86d   :  { %12017 = vmatprep.subr.bf16.mxu1 %v16046_v54 }
 0x86f   :  { %11489 = vmatmul.mubr.msk.f32.vlgmr.msra.gmra.mrb[0].mxu1 %vm4562_vm1, %v4669_v4 }
 0x870   :  { %12019 = vmatpush3.bf16.msra.mxu1 %v16046_v54  ;;  %11491 = vmatprep.mubr.msk.f32.mxu1 %vm4562_vm1, %v4670_v24  ;;  %v5305_v54 = vadd.s32 1, %v15996_v25 }
 0x871   :  { %12021 = vmatprep.subr.bf16.mxu1 %v16042_v50 }
 0x872   :  { %vm5309_vm8 = vcmp.ge.s32.totalorder %v5305_v54, 0  ;;  %vm5313_vm9 = vcmp.lt.s32.totalorder %v5305_v54, 32 }
 0x873   :  { %11492 = vmatmul.mubr.msk.f32.gmra.mrb[2].mxu1 %vm4562_vm1, %v4671_v11  ;;  %vm5317_vm15 = vmand %vm5309_vm8, %vm5313_vm9  ;;  %vm5312_vm8 = vcmp.ge.s32.totalorder %v5308_v29, 0  ;;  %vm5316_vm9 = vcmp.lt.s32.totalorder %v5308_v29, 32  ;;  %v12286_v29 = vld [vmem:[%s17058_s9 + $0x114] ss:$8 sps:$4 sm:$0xff]  }
 0x874   :  { %12023 = vmatpush3.bf16.msra.mxu1 %v16042_v50  ;;  %11526 = vmatprep.mubr.msk.f32.mxu1 %vm4562_vm1, %v5102_v3  ;;  %v5103_v50 = vsel %vm5099_vm11, 1.0, %v12483_v55  ;;  %vm5321_vm14 = vmand %vm17774_vm10, %vm5317_vm15  ;;  %vm17776_vm10 = vcmp.eq.s32.totalorder %v12816_v26, %v17738_v14 }
 0x875   :  { %12025 = vmatprep.subr.bf16.mxu1 %v16054_v17  ;;  %vm5320_vm13 = vmand %vm5312_vm8, %vm5316_vm9  ;;  %vm5533_vm8 = vcmp.ge.s32.totalorder %v5529_v13, 0  ;;  %vm5537_vm9 = vcmp.lt.s32.totalorder %v5529_v13, 32  ;;  %v12284_v13 = vld [vmem:[%s17058_s9 + $0x110] ss:$8 sps:$4 sm:$0xff]  }
 0x878   :  { %12027 = vmatpush3.bf16.msra.mxu1 %v16054_v17  ;;  %v5306_v17 = vadd.s32 1, %v16058_v49  ;;  %v5531_v49 = vadd.s32 2, %v16066_v7 }
 0x879   :  { %12029 = vmatprep.subr.bf16.mxu1 %v16050_v30 }
 0x87a   :  { %vm5310_vm0 = vcmp.ge.s32.totalorder %v5306_v17, 0  ;;  %vm5314_vm5 = vcmp.lt.s32.totalorder %v5306_v17, 32 }
 0x87b   :  { %vm5318_vm11 = vmand %vm5310_vm0, %vm5314_vm5  ;;  %vm17777_vm5 = vcmp.eq.s32.totalorder %v12816_v26, %v17740_v19  ;;  %v5530_v19 = vadd.s32 2, %v16061_v61  ;;  %v12235_v61 = vld [vmem:[%s17058_s9 + $0x84] ss:$8 sps:$4 sm:$0xff]  }
 0x87c   :  { %12031 = vmatpush3.bf16.msra.mxu1 %v16050_v30  ;;  %v5325_v30 = vsel %vm5321_vm14, 1.0, %v12483_v55  ;;  %vm5322_vm4 = vmand %vm17775_vm6, %vm5318_vm11 }
 0x87d   :  { %12033 = vmatprep.subr.bf16.mxu1 %v16068_v63  ;;  %vm5323_vm14 = vmand %vm17776_vm10, %vm5319_vm7  ;;  %vm5534_vm7 = vcmp.ge.s32.totalorder %v5530_v19, 0  ;;  %vm5538_vm6 = vcmp.lt.s32.totalorder %v5530_v19, 32  ;;  %vm17779_vm10 = vcmp.eq.s32.totalorder %v12816_v26, %v14949_v52  ;;  %v12289_v19 = vld [vmem:[%s17058_s9 + $0x124] ss:$8 sps:$4 sm:$0xff]  }
 0x87e   :  { %vm5324_vm12 = vmand %vm17777_vm5, %vm5320_vm13  ;;  %vm17780_vm5 = vcmp.eq.s32.totalorder %v12816_v26, %v14970_v47  ;;  %v12241_v47 = vld [vmem:[%s17058_s9 + $0x94] ss:$8 sps:$4 sm:$0xff]  }
 0x87f   :  { %11527 = vmatmul.mubr.msk.f32.vlgmr.msra.gmra.mrb[0].mxu1 %vm4562_vm1, %v5103_v50  ;;  %v5328_v14 = vsel %vm5324_vm12, 1.0, %v12483_v55  ;;  %vm5542_vm13 = vmand %vm5534_vm7, %vm5538_vm6 }
 0x880   :  { %12035 = vmatpush3.bf16.msra.mxu1 %v16068_v63  ;;  %11529 = vmatprep.mubr.msk.f32.mxu1 %vm4562_vm1, %v5104_v42  ;;  %v5528_v63 = vadd.s32 2, %v15996_v25  ;;  %v5326_v25 = vsel %vm5322_vm4, 1.0, %v12483_v55  ;;  %vm5541_vm4 = vmand %vm5533_vm8, %vm5537_vm9 }
 0x881   :  { %12037 = vmatprep.subr.bf16.mxu1 %v16063_v2  ;;  %vm5546_vm12 = vmand %vm17780_vm5, %vm5542_vm13 }
 0x882   :  { %vm5532_vm15 = vcmp.ge.s32.totalorder %v5528_v63, 0  ;;  %vm5536_vm2 = vcmp.lt.s32.totalorder %v5528_v63, 32  ;;  %v5550_v62 = vsel %vm5546_vm12, 1.0, %v12483_v55 }
 0x883   :  { %11530 = vmatmul.mubr.msk.f32.gmra.mrb[2].mxu1 %vm4562_vm1, %v5105_v57  ;;  %vm5540_vm0 = vmand %vm5532_vm15, %vm5536_vm2  ;;  %vm5535_vm15 = vcmp.ge.s32.totalorder %v5531_v49, 0  ;;  %vm5539_vm2 = vcmp.lt.s32.totalorder %v5531_v49, 32  ;;  %v12281_v57 = vld [vmem:[%s17058_s9 + $0x100] ss:$8 sps:$4 sm:$0xff]   ;;  %v12292_v49 = vld [vmem:[%s17058_s9 + $0x134] ss:$8 sps:$4 sm:$0xff]  }
 0x884   :  { %12039 = vmatpush3.bf16.msra.mxu1 %v16063_v2  ;;  %11564 = vmatprep.mubr.msk.f32.mxu1 %vm4562_vm1, %v5325_v30  ;;  %v5327_v2 = vsel %vm5323_vm14, 1.0, %v12483_v55  ;;  %vm5544_vm11 = vmand %vm17778_vm3, %vm5540_vm0  ;;  %vm17781_vm3 = vcmp.eq.s32.totalorder %v12816_v26, %v14994_v8  ;;  %v12247_v8 = vld [vmem:[%s17058_s9 + $0xa4] ss:$8 sps:$4 sm:$0xff]  }
 0x885   :  { %12041 = vmatprep.subr.bf16.mxu1 %v16075_v27  ;;  %v5548_v23 = vsel %vm5544_vm11, 1.0, %v12483_v55  ;;  %vm5545_vm14 = vmand %vm17779_vm10, %vm5541_vm4  ;;  %vm17782_vm10 = vcmp.eq.s32.totalorder %v12816_v26, %v17668_v46 }
 0x886   :  { %vm5543_vm0 = vmand %vm5535_vm15, %vm5539_vm2  ;;  %v5549_v7 = vsel %vm5545_vm14, 1.0, %v12483_v55 }
 0x887   :  { %vm5547_vm11 = vmand %vm17781_vm3, %vm5543_vm0  ;;  %vm17783_vm3 = vcmp.eq.s32.totalorder %v12816_v26, %v17677_v56 }
 0x888   :  { %12043 = vmatpush3.bf16.msra.mxu1 %v16075_v27  ;;  %v5551_v59 = vsel %vm5547_vm11, 1.0, %v12483_v55  ;;  %v12251_v27 = vld [vmem:[%s17058_s9 + $0xb0] ss:$8 sps:$4 sm:$0xff]  }
 0x889   :  { %12045 = vmatprep.subr.bf16.mxu1 %v16073_v53 }
 0x88c   :  { %12047 = vmatpush3.bf16.msra.mxu1 %v16073_v53  ;;  %v12239_v53 = vld [vmem:[%s17058_s9 + $0x90] ss:$8 sps:$4 sm:$0xff]  }
 0x88d   :  { %12049 = vmatprep.subr.bf16.mxu1 %v16092_v32 }
 0x88f   :  { %11565 = vmatmul.mubr.msk.f32.vlgmr.msra.gmra.mrb[0].mxu1 %vm4562_vm1, %v5326_v25 }
 0x890   :  { %12051 = vmatpush3.bf16.msra.mxu1 %v16092_v32  ;;  %11567 = vmatprep.mubr.msk.f32.mxu1 %vm4562_vm1, %v5327_v2  ;;  %v12277_v32 = vld [vmem:[%s17058_s9 + $0xf4] ss:$8 sps:$4 sm:$0xff]  }
 0x891   :  { %12053 = vmatprep.subr.bf16.mxu1 %v16087_v39 }
 0x893   :  { %11568 = vmatmul.mubr.msk.f32.gmra.mrb[2].mxu1 %vm4562_vm1, %v5328_v14 }
 0x894   :  { %12055 = vmatpush3.bf16.msra.mxu1 %v16087_v39  ;;  %11602 = vmatprep.mubr.msk.f32.mxu1 %vm4562_vm1, %v5548_v23  ;;  %v12271_v39 = vld [vmem:[%s17058_s9 + $0xe4] ss:$8 sps:$4 sm:$0xff]   ;;  %v12287_v23 = vld [vmem:[%s17058_s9 + $0x120] ss:$8 sps:$4 sm:$0xff]  }
 0x895   :  { %12057 = vmatprep.subr.bf16.mxu1 %v16111_v10 }
 0x898   :  { %12059 = vmatpush3.bf16.msra.mxu1 %v16111_v10 }
 0x899   :  { %12061 = vmatprep.subr.bf16.mxu1 %v16108_v15 }
 0x89c   :  { %12063 = vmatpush3.bf16.msra.mxu1 %v16108_v15 }
 0x89d   :  { %5940 = vmatprep.subr.bf16.mxu1 %v12235_v61  ;;  %v12290_v61 = vld [vmem:[%s17058_s9 + $0x130] ss:$8 sps:$4 sm:$0xff]  }
 0x89f   :  { %11603 = vmatmul.mubr.msk.f32.vlgmr.msra.gmra.mrb[0].mxu1 %vm4562_vm1, %v5549_v7  ;;  %v12295_v7 = vld [vmem:[%s17058_s9 + $0x144] ss:$8 sps:$4 sm:$0xff]  }
 0x8a0   :  { %11605 = vmatprep.mubr.msk.f32.mxu1 %vm4562_vm1, %v5550_v62  ;;  %5941 = vmatpush1.bf16.msra.mxu1 %v12233_v9  ;;  %v12293_v9 = vld [vmem:[%s17058_s9 + $0x140] ss:$8 sps:$4 sm:$0xff]   ;;  %v12298_v62 = vld [vmem:[%s17058_s9 + $0x154] ss:$8 sps:$4 sm:$0xff]  }
 0x8a1   :  { %5942 = vmatprep.subr.bf16.mxu1 %v12241_v47  ;;  %v12296_v47 = vld [vmem:[%s17058_s9 + $0x150] ss:$8 sps:$4 sm:$0xff]  }
 0x8a3   :  { %11606 = vmatmul.mubr.msk.f32.gmra.mrb[2].mxu1 %vm4562_vm1, %v5551_v59  ;;  %v12301_v59 = vld [vmem:[%s17058_s9 + $0x164] ss:$8 sps:$4 sm:$0xff]  }
 0x8a4   :  { %5943 = vmatpush1.bf16.msra.mxu1 %v12239_v53  ;;  %5972 = vmatprep.mubr.bf16.mxu1 %v12484_v1  ;;  %v12299_v53 = vld [vmem:[%s17058_s9 + $0x160] ss:$8 sps:$4 sm:$0xff]  }
 0x8a5   :  { %5944 = vmatprep.subr.bf16.mxu1 %v12247_v8  ;;  %v12304_v8 = vld [vmem:[%s17058_s9 + $0x174] ss:$8 sps:$4 sm:$0xff]  }
 0x8a8   :  { %5945 = vmatpush1.bf16.msra.mxu1 %v12245_v35  ;;  %v12302_v35 = vld [vmem:[%s17058_s9 + $0x170] ss:$8 sps:$4 sm:$0xff]  }
 0x8a9   :  { %5946 = vmatprep.subr.bf16.mxu1 %v12253_v34  ;;  %v12307_v34 = vld [vmem:[%s17058_s9 + $0x204] ss:$8 sps:$4 sm:$0xff]  }
 0x8ac   :  { %5947 = vmatpush1.bf16.msra.mxu1 %v12251_v27  ;;  %v12305_v27 = vld [vmem:[%s17058_s9 + $0x200] ss:$8 sps:$4 sm:$0xff]  }
 0x8ad   :  { %5948 = vmatprep.subr.bf16.mxu1 %v12259_v12  ;;  %v12310_v12 = vld [vmem:[%s17058_s9 + $0x214] ss:$8 sps:$4 sm:$0xff]  }
 0x8b0   :  { %5949 = vmatpush1.bf16.msra.mxu1 %v12257_v6  ;;  %v12308_v6 = vld [vmem:[%s17058_s9 + $0x210] ss:$8 sps:$4 sm:$0xff]  }
 0x8b1   :  { %5950 = vmatprep.subr.bf16.mxu1 %v12265_v37  ;;  %v12313_v37 = vld [vmem:[%s17058_s9 + $0x224] ss:$8 sps:$4 sm:$0xff]  }
 0x8b4   :  { %5951 = vmatpush1.bf16.msra.mxu1 %v12263_v5  ;;  %v12311_v5 = vld [vmem:[%s17058_s9 + $0x220] ss:$8 sps:$4 sm:$0xff]  }
 0x8b5   :  { %5952 = vmatprep.subr.bf16.mxu1 %v12271_v39  ;;  %v12316_v39 = vld [vmem:[%s17058_s9 + $0x234] ss:$8 sps:$4 sm:$0xff]  }
 0x8b8   :  { %5953 = vmatpush1.bf16.msra.mxu1 %v12269_v33  ;;  %v12314_v33 = vld [vmem:[%s17058_s9 + $0x230] ss:$8 sps:$4 sm:$0xff]  }
 0x8b9   :  { %5954 = vmatprep.subr.bf16.mxu1 %v12277_v32  ;;  %v12322_v32 = vld [vmem:[%s17058_s9 + $0x254] ss:$8 sps:$4 sm:$0xff]  }
 0x8bc   :  { %5955 = vmatpush1.bf16.msra.mxu1 %v12275_v21  ;;  %v12320_v21 = vld [vmem:[%s17058_s9 + $0x250] ss:$8 sps:$4 sm:$0xff]  }
 0x8bd   :  { %6268 = vmatprep.subr.bf16.mxu1 %v12283_v18  ;;  %v12328_v18 = vld [vmem:[%s17058_s9 + $0x274] ss:$8 sps:$4 sm:$0xff]  }
 0x972   :  { %v11604_v51 = vpop.f32.mrb[0].mxu1 }
 0x973   :  { %v5661_v15 = vadd.f32 %v11604_v51, %v9406_v22  ;;  %v5630_v16 = vpop.f32.mrb[1].mxu1  ;;  %v5827_v51 = vand.u32 7, %v17667_v44 }
 0x974   :  { %v5660_v10 = vadd.f32 %v9406_v22, %v5630_v16  ;;  %v5828_v16 = vand.u32 7, %v17670_v40 }
 0x975   :  { %vm5665_vm1 = vcmp.gt.f32.partialorder %v5661_v15, 0.0  ;;  %v5669_v4 = vmul.f32 0.2, %v5661_v15 }
 0x976   :  { %vm5664_vm8 = vcmp.gt.f32.partialorder %v5660_v10, 0.0  ;;  %v5668_v24 = vmul.f32 0.2, %v5660_v10  ;;  %v11607_v11 = vpop.f32.mrb[2].mxu1 }
 0x977   :  { %v5673_v3 = vsel %vm5665_vm1, %v5661_v15, %v5669_v4  ;;  %v5663_v54 = vadd.f32 %v11607_v11, %v9406_v22  ;;  %v5640_v50 = vpop.f32.mrb[3].mxu1  ;;  %v16412_v15 = vmul.u32 2, %v5827_v51 }
 0x978   :  { %v5672_v42 = vsel %vm5664_vm8, %v5660_v10, %v5668_v24  ;;  %v5662_v17 = vadd.f32 %v9406_v22, %v5640_v50  ;;  %v12326_v22 = vld [vmem:[%s17058_s9 + $0x270] ss:$8 sps:$4 sm:$0xff]   ;;  %vm17784_vm8 = vcmask 261120  }
 0x979   :  { %v16302_v45 = vpack.c.bf16 %v5673_v3, %v5672_v42  ;;  %vm5667_vm9 = vcmp.gt.f32.partialorder %v5663_v54, 0.0  ;;  %v5671_v30 = vmul.f32 0.2, %v5663_v54  ;;  %v5993_v50 = vadd.s32 4294967295, %v16412_v15 }
 0x97a   :  { %vm5666_vm7 = vcmp.gt.f32.partialorder %v5662_v17, 0.0  ;;  %v5670_v63 = vmul.f32 0.2, %v5662_v17  ;;  %v16416_v42 = vmul.u32 2, %v5828_v16  ;;  %v12337_v16 = vld [vmem:[%s17058_s9 + $0x1a4] ss:$8 sps:$4 sm:$0xff]  }
 0x97b   :  { %v5675_v25 = vsel %vm5667_vm9, %v5663_v54, %v5671_v30  ;;  %5807 = vmatmul.mubr.bf16.vlgmr.msra.gmra.mrb[224].mxu0 %v16302_v45  ;;  %5973 = vmatmul.mubr.bf16.vlgmr.msra.gmra.mrb[4].mxu1 %v16302_v45  ;;  %vm5995_vm6 = vcmp.ge.s32.totalorder %v5993_v50, 0  ;;  %vm5997_vm4 = vcmp.lt.s32.totalorder %v5993_v50, 16 }
 0x97c   :  { %v5674_v2 = vsel %vm5666_vm7, %v5662_v17, %v5670_v63  ;;  %6269 = vmatpush1.bf16.msra.mxu1 %v12281_v57  ;;  %5816 = vmatprep.mubr.bf16.mxu0 %v12484_v1  ;;  %v5994_v40 = vadd.s32 4294967295, %v16416_v42  ;;  %vm5999_vm15 = vmand %vm5995_vm6, %vm5997_vm4  ;;  %vm17785_vm6 = vcmp.eq.s32.totalorder %v12816_v26, %v17697_v31 }
 0x97d   :  { %v16313_v14 = vpack.c.bf16 %v5675_v25, %v5674_v2  ;;  %6270 = vmatprep.subr.bf16.mxu1 %v12286_v29  ;;  %5982 = vmatprep.mubr.bf16.mxu1 %v12484_v1  ;;  %vm6001_vm14 = vmand %vm17782_vm10, %vm5999_vm15 }
 0x97e   :  { %vm5996_vm2 = vcmp.ge.s32.totalorder %v5994_v40, 0  ;;  %vm5998_vm13 = vcmp.lt.s32.totalorder %v5994_v40, 16  ;;  %v12347_v40 = vld [vmem:[%s17058_s9 + $0x1e0] ss:$8 sps:$4 sm:$0xff]  }
 0x97f   :  { %vm6000_vm0 = vmand %vm5996_vm2, %vm5998_vm13  ;;  %vm17787_vm13 = vcmp.eq.s32.totalorder %v12816_v26, %v17699_v0 }
 0x980   :  { %6271 = vmatpush1.bf16.msra.mxu1 %v12284_v13  ;;  %vm6002_vm11 = vmand %vm17783_vm3, %vm6000_vm0 }
 0x981   :  { %6272 = vmatprep.subr.bf16.mxu1 %v12289_v19  ;;  %v6004_v46 = vsel %vm6002_vm11, 1.0, %v12483_v55  ;;  %vm17786_vm2 = vmmov %vm17784_vm8  ;;  %vm6322_vm11 = vcmp.ge.s32.totalorder %v16416_v42, 0 }
 0x982   :  { %vm17789_vm0 = vmmov %vm17786_vm2 }
 0x983   :  { %5817 = vmatmul.mubr.bf16.gmra.mrb[228].mxu0 %v16313_v14  ;;  %5983 = vmatmul.mubr.bf16.gmra.mrb[8].mxu1 %v16313_v14 }
 0x984   :  { %6273 = vmatpush1.bf16.msra.mxu1 %v12287_v23  ;;  %6300 = vmatprep.mubr.bf16.mxu1 %v12484_v1 }
 0x985   :  { %6274 = vmatprep.subr.bf16.mxu1 %v12292_v49  ;;  %6075 = vmatprep.mubr.f32.mxu0 %v12483_v55 }
 0x988   :  { %6275 = vmatpush1.bf16.msra.mxu1 %v12290_v61 }
 0x989   :  { %6276 = vmatprep.subr.bf16.mxu1 %v12295_v7  ;;  %v5831_v7 = vadd.s32 4294967294, %v16412_v15 }
 0x98b   :  { %vm5833_vm5 = vcmp.ge.s32.totalorder %v5831_v7, 0  ;;  %vm5835_vm12 = vcmp.lt.s32.totalorder %v5831_v7, 16  ;;  %v12350_v7 = vld [vmem:[%s17058_s9 + $0x1f0] ss:$8 sps:$4 sm:$0xff]  }
 0x98c   :  { %6277 = vmatpush1.bf16.msra.mxu1 %v12293_v9  ;;  %vm5837_vm1 = vmand %vm5833_vm5, %vm5835_vm12  ;;  %vm6321_vm5 = vcmp.ge.s32.totalorder %v16412_v15, 0  ;;  %vm6323_vm12 = vcmp.lt.s32.totalorder %v16412_v15, 16 }
 0x98d   :  { %6278 = vmatprep.subr.bf16.mxu1 %v12298_v62  ;;  %vm5839_vm4 = vmand %vm17785_vm6, %vm5837_vm1  ;;  %vm6324_vm1 = vcmp.lt.s32.totalorder %v16416_v42, 16  ;;  %vm17791_vm6 = vcmp.eq.s32.totalorder %v12816_v26, %v12960_v38  ;;  %v12335_v38 = vld [vmem:[%s17058_s9 + $0x1a0] ss:$8 sps:$4 sm:$0xff]  }
 0x98e   :  { %v5841_v56 = vsel %vm5839_vm4, 1.0, %v12483_v55  ;;  %vm6325_vm3 = vmand %vm6321_vm5, %vm6323_vm12  ;;  %vm17794_vm12 = vcmp.eq.s32.totalorder %v12816_v26, %v17732_v48 }
 0x990   :  { %6279 = vmatpush1.bf16.msra.mxu1 %v12296_v47 }
 0x991   :  { %6280 = vmatprep.subr.bf16.mxu1 %v12301_v59 }
 0x994   :  { %6281 = vmatpush1.bf16.msra.mxu1 %v12299_v53 }
 0x995   :  { %6282 = vmatprep.subr.bf16.mxu1 %v12304_v8 }
 0x998   :  { %6283 = vmatpush1.bf16.msra.mxu1 %v12302_v35  ;;  %v5832_v35 = vadd.s32 4294967294, %v16416_v42 }
 0x999   :  { %6764 = vmatprep.subr.bf16.mxu1 %v12307_v34  ;;  %v6003_v34 = vsel %vm6001_vm14, 1.0, %v12483_v55  ;;  %vm17788_vm14 = vmmov %vm17786_vm2 }
 0x99a   :  { %vm5834_vm9 = vcmp.ge.s32.totalorder %v5832_v35, 0  ;;  %vm5836_vm7 = vcmp.lt.s32.totalorder %v5832_v35, 16  ;;  %v12370_v35 = vld [vmem:[%s17060_s11 + $0x60] sm:$0xff]  }
 0x99b   :  { %6301 = vmatmul.mubr.bf16.vlgmr.msra.gmra.mrb[12].mxu1 %v16302_v45  ;;  %vm5838_vm15 = vmand %vm5834_vm9, %vm5836_vm7 }
 0x99c   :  { %6765 = vmatpush1.bf16.msra.mxu1 %v12305_v27  ;;  %6310 = vmatprep.mubr.bf16.mxu1 %v12484_v1  ;;  %vm5840_vm10 = vmand %vm17787_vm13, %vm5838_vm15 }
 0x99d   :  { %6766 = vmatprep.subr.bf16.mxu1 %v12310_v12  ;;  %v5842_v27 = vsel %vm5840_vm10, 1.0, %v12483_v55  ;;  %vm6326_vm7 = vmand %vm6322_vm11, %vm6324_vm1 }
 0x99e   :  { %vm6328_vm4 = vmand %vm17791_vm6, %vm6326_vm7 }
 0x99f   :  { %vm17792_vm15 = vmmov %vm17789_vm0  ;;  %v6330_v51 = vsel %vm6328_vm4, 1.0, %v12483_v55 }
 0x9a0   :  { %6767 = vmatpush1.bf16.msra.mxu1 %v12308_v6 }
 0x9a1   :  { %6768 = vmatprep.subr.bf16.mxu1 %v12313_v37 }
 0x9a3   :  { %6311 = vmatmul.mubr.bf16.gmra.mrb[16].mxu1 %v16313_v14 }
 0x9a4   :  { %6769 = vmatpush1.bf16.msra.mxu1 %v12311_v5  ;;  %6796 = vmatprep.mubr.bf16.mxu1 %v12484_v1 }
 0x9a5   :  { %6770 = vmatprep.subr.bf16.mxu1 %v12316_v39 }
 0x9a8   :  { %6771 = vmatpush1.bf16.msra.mxu1 %v12314_v33 }
 0x9a9   :  { %6772 = vmatprep.subr.bf16.mxu1 %v12319_v41 }
 0x9ac   :  { %6773 = vmatpush1.bf16.msra.mxu1 %v12317_v36 }
 0x9ad   :  { %6774 = vmatprep.subr.bf16.mxu1 %v12322_v32 }
 0x9b0   :  { %6775 = vmatpush1.bf16.msra.mxu1 %v12320_v21 }
 0x9b1   :  { %6776 = vmatprep.subr.bf16.mxu1 %v12325_v60  ;;  %v12331_v60 = vld [vmem:[%s17058_s9 + $0x184] ss:$8 sps:$4 sm:$0xff]  }
 0x9b4   :  { %6777 = vmatpush1.bf16.msra.mxu1 %v12323_v43  ;;  %v12329_v43 = vld [vmem:[%s17058_s9 + $0x180] ss:$8 sps:$4 sm:$0xff]  }
 0x9b5   :  { %6778 = vmatprep.subr.bf16.mxu1 %v12328_v18 }
 0x9b8   :  { %6779 = vmatpush1.bf16.msra.mxu1 %v12326_v22  ;;  %v12334_v22 = vld [vmem:[%s17058_s9 + $0x194] ss:$8 sps:$4 sm:$0xff]  }
 0x9bb   :  { %6797 = vmatmul.mubr.bf16.vlgmr.msra.gmra.mrb[20].mxu1 %v16302_v45 }
 0x9bc   :  { %6806 = vmatprep.mubr.bf16.mxu1 %v12484_v1 }
 0x9c3   :  { %6807 = vmatmul.mubr.bf16.gmra.mrb[24].mxu1 %v16313_v14 }
 0xa4e   :  { %v5808_v10 = vpop.f32.mrb[224].mxu0  ;;  %v5974_v4 = vpop.f32.mrb[4].mxu1 }
 0xa4f   :  { %v5810_v24 = vpop.f32.mrb[225].mxu0  ;;  %v5976_v11 = vpop.f32.mrb[5].mxu1 }
 0xa50   :  { %v5812_v3 = vpop.f32.mrb[226].mxu0  ;;  %v5978_v54 = vpop.f32.mrb[6].mxu1 }
 0xa51   :  { %v12074_v17 = vpack.c.bf16 %v5812_v3, %v5808_v10  ;;  %v12066_v57 = vpack.c.bf16 %v5978_v54, %v5974_v4  ;;  %v5814_v30 = vpop.f32.mrb[227].mxu0  ;;  %v5980_v29 = vpop.f32.mrb[7].mxu1  ;;  %v12340_v10 = vld [vmem:[%s17058_s9 + $0x1b4] ss:$8 sps:$4 sm:$0xff]   ;;  %v12338_v4 = vld [vmem:[%s17058_s9 + $0x1b0] ss:$8 sps:$4 sm:$0xff]  }
 0xa52   :  { %v12072_v63 = vpack.c.bf16 %v5814_v30, %v5810_v24  ;;  %v12064_v25 = vpack.c.bf16 %v5980_v29, %v5976_v11  ;;  %v12343_v24 = vld [vmem:[%s17058_s9 + $0x1c4] ss:$8 sps:$4 sm:$0xff]   ;;  %v12341_v11 = vld [vmem:[%s17058_s9 + $0x1c0] ss:$8 sps:$4 sm:$0xff]   ;;  %v12346_v54 = vld [vmem:[%s17058_s9 + $0x1d4] ss:$8 sps:$4 sm:$0xff]  }
 0xa53   :  { %v12344_v29 = vld [vmem:[%s17058_s9 + $0x1d0] ss:$8 sps:$4 sm:$0xff]  }
 0xa54   :  { %12065 = vmatprep.subr.bf16.mxu0 %v12064_v25  ;;  %v12349_v25 = vld [vmem:[%s17058_s9 + $0x1e4] ss:$8 sps:$4 sm:$0xff]  }
 0xa55   :  { %12067 = vmatpush1.bf16.msra.mxu0 %v12066_v57 }
 0xa56   :  { %v5818_v2 = vpop.f32.mrb[228].mxu0  ;;  %v5984_v13 = vpop.f32.mrb[8].mxu1 }
 0xa57   :  { %v5820_v19 = vpop.f32.mrb[229].mxu0  ;;  %v5986_v23 = vpop.f32.mrb[9].mxu1 }
 0xa58   :  { %v5822_v49 = vpop.f32.mrb[230].mxu0  ;;  %v5988_v61 = vpop.f32.mrb[10].mxu1 }
 0xa59   :  { %v12078_v9 = vpack.c.bf16 %v5822_v49, %v5818_v2  ;;  %v12070_v62 = vpack.c.bf16 %v5988_v61, %v5984_v13  ;;  %v5824_v47 = vpop.f32.mrb[231].mxu0  ;;  %v5990_v59 = vpop.f32.mrb[11].mxu1  ;;  %v12352_v13 = vld [vmem:[%s17058_s9 + $0x1f4] ss:$8 sps:$4 sm:$0xff]  }
 0xa5a   :  { %v12076_v53 = vpack.c.bf16 %v5824_v47, %v5820_v19  ;;  %v12068_v8 = vpack.c.bf16 %v5990_v59, %v5986_v23  ;;  %v12356_v47 = vld [vmem:[%s17060_s11] sm:$0xff]   ;;  %v12364_v59 = vld [vmem:[%s17060_s11 + $0x10] sm:$0xff]  }
 0xa5c   :  { %12069 = vmatprep.subr.bf16.mxu0 %v12068_v8  ;;  %v12368_v8 = vld [vmem:[%s17060_s11 + $0x18] sm:$0xff]  }
 0xa5d   :  { %12071 = vmatpush1.bf16.msra.mxu0 %v12070_v62  ;;  %v12354_v62 = vld [vmem:[%s17060_s11 + $0x40] sm:$0xff]  }
 0xa5e   :  { %12073 = vmatprep.subr.bf16.mxu0 %v12072_v63  ;;  %10694 = vmatprep.subr.bf16.mxu1 %v12354_v62 }
 0xa5f   :  { %10695 = vmatpush3.bf16.msra.mxu1 %v12356_v47 }
 0xa60   :  { %9455 = vmatmul.mubr.msk.f32.vlgmr.msra.gmra.mrb[232].mxu0 %vm17784_vm8, %v6003_v34  ;;  %vm17790_vm8 = vcmp.eq.s32.totalorder %v12816_v26, %v17512_v28  ;;  %v12332_v28 = vld [vmem:[%s17058_s9 + $0x190] ss:$8 sps:$4 sm:$0xff]   ;;  %v12372_v34 = vld [vmem:[%s17060_s11 + $0x20] sm:$0xff]  }
 0xa61   :  { %12075 = vmatpush1.bf16.msra.mxu0 %v12074_v17  ;;  %6081 = vmatprep.mubr.f32.mxu0 %v12483_v55  ;;  %vm6327_vm9 = vmand %vm17790_vm8, %vm6325_vm3 }
 0xa62   :  { %12077 = vmatprep.subr.bf16.mxu0 %v12076_v53  ;;  %v6329_v18 = vsel %vm6327_vm9, 1.0, %v12483_v55  ;;  %v12366_v53 = vld [vmem:[%s17060_s11 + $0x58] sm:$0xff]   ;;  %vm17795_vm9 = vcmp.eq.s32.totalorder %v12816_v26, %v17734_v58  ;;  %v12353_v58 = vld [vmem:[%s17060_s11 + $0xc0] sm:$0xff]  }
 0xa64   :  { %9456 = vmatmul.mubr.msk.f32.gmra.mrb[234].mxu0 %vm17786_vm2, %v6004_v46  ;;  %vm17793_vm2 = vmmov %vm17789_vm0 }
 0xa65   :  { %12079 = vmatpush1.bf16.msra.mxu0 %v12078_v9  ;;  %6158 = vmatprep.mubr.f32.mxu0 %v12483_v55  ;;  %vm17796_vm4 = vmmov %vm17793_vm2 }
 0xa68   :  { %9457 = vmatmul.mubr.msk.f32.vlgmr.msra.gmra.mrb[232].mxu0 %vm17788_vm14, %v5841_v56 }
 0xa69   :  { %6164 = vmatprep.mubr.f32.mxu0 %v12483_v55 }
 0xa6c   :  { %9458 = vmatmul.mubr.msk.f32.gmra.mrb[234].mxu0 %vm17789_vm0, %v5842_v27 }
 0xa6d   :  { %6401 = vmatprep.mubr.f32.mxu0 %v12483_v55 }
 0xa6e   :  { %v6302_v31 = vpop.f32.mrb[12].mxu1 }
 0xa6f   :  { %v6304_v12 = vpop.f32.mrb[13].mxu1 }
 0xa70   :  { %v6306_v6 = vpop.f32.mrb[14].mxu1 }
 0xa71   :  { %v12082_v37 = vpack.c.bf16 %v6306_v6, %v6302_v31  ;;  %v6308_v5 = vpop.f32.mrb[15].mxu1  ;;  %v6568_v31 = vadd.s32 1, %v16412_v15 }
 0xa72   :  { %v12080_v39 = vpack.c.bf16 %v6308_v5, %v6304_v12  ;;  %v6569_v5 = vadd.s32 1, %v16416_v42 }
 0xa73   :  { %vm6570_vm13 = vcmp.ge.s32.totalorder %v6568_v31, 0  ;;  %vm6572_vm10 = vcmp.lt.s32.totalorder %v6568_v31, 16 }
 0xa74   :  { %12081 = vmatprep.subr.bf16.mxu0 %v12080_v39  ;;  %vm6574_vm14 = vmand %vm6570_vm13, %vm6572_vm10  ;;  %vm6571_vm0 = vcmp.ge.s32.totalorder %v6569_v5, 0  ;;  %vm6573_vm5 = vcmp.lt.s32.totalorder %v6569_v5, 16  ;;  %vm17797_vm13 = vcmp.eq.s32.totalorder %v12816_v26, %v14929_v20  ;;  %v12355_v20 = vld [vmem:[%s17060_s11 + $0x80] sm:$0xff]   ;;  %v12388_v5 = vld [vmem:[%s17060_s11 + $0x108] sm:$0xff]  }
 0xa75   :  { %12083 = vmatpush1.bf16.msra.mxu0 %v12082_v37  ;;  %vm6576_vm3 = vmand %vm17794_vm12, %vm6574_vm14 }
 0xa76   :  { %v6312_v0 = vpop.f32.mrb[16].mxu1  ;;  %vm6575_vm11 = vmand %vm6571_vm0, %vm6573_vm5  ;;  %vm17799_vm5 = vcmp.eq.s32.totalorder %v12816_v26, %v14949_v52  ;;  %v12361_v52 = vld [vmem:[%s17060_s11 + $0xd0] sm:$0xff]  }
 0xa77   :  { %v6314_v33 = vpop.f32.mrb[17].mxu1  ;;  %vm6577_vm7 = vmand %vm17795_vm9, %vm6575_vm11 }
 0xa78   :  { %v6316_v41 = vpop.f32.mrb[18].mxu1  ;;  %v6579_v48 = vsel %vm6577_vm7, 1.0, %v12483_v55  ;;  %vm17798_vm0 = vmmov %vm17796_vm4 }
 0xa79   :  { %v12086_v36 = vpack.c.bf16 %v6316_v41, %v6312_v0  ;;  %v6318_v32 = vpop.f32.mrb[19].mxu1  ;;  %v6817_v41 = vadd.s32 2, %v16412_v15  ;;  %vm17801_vm11 = vmmov %vm17798_vm0 }
 0xa7a   :  { %v12084_v21 = vpack.c.bf16 %v6318_v32, %v6314_v33 }
 0xa7b   :  { %vm6819_vm1 = vcmp.ge.s32.totalorder %v6817_v41, 0  ;;  %vm6821_vm8 = vcmp.lt.s32.totalorder %v6817_v41, 16  ;;  %v12392_v41 = vld [vmem:[%s17060_s11 + $0x118] sm:$0xff]  }
 0xa7c   :  { %12085 = vmatprep.subr.bf16.mxu0 %v12084_v21  ;;  %vm6823_vm6 = vmand %vm6819_vm1, %vm6821_vm8 }
 0xa7d   :  { %12087 = vmatpush1.bf16.msra.mxu0 %v12086_v36  ;;  %vm6825_vm10 = vmand %vm17797_vm13, %vm6823_vm6  ;;  %vm12486_vm6 = vmmov 0  }
 0xa7e   :  { %6515 = vmatprep.subr.bf16.mxu0 %v12331_v60  ;;  %v6818_v60 = vadd.s32 2, %v16416_v42  ;;  %v6827_v15 = vsel %vm6825_vm10, 1.0, %v12483_v55  ;;  %v12357_v42 = vld [vmem:[%s17060_s11 + $0xc8] sm:$0xff]  }
 0xa80   :  { %9491 = vmatmul.mubr.msk.f32.vlgmr.msra.gmra.mrb[232].mxu0 %vm17792_vm15, %v6329_v18  ;;  %vm6820_vm15 = vcmp.ge.s32.totalorder %v6818_v60, 0 }
 0xa81   :  { %6516 = vmatpush1.bf16.msra.mxu0 %v12329_v43  ;;  %6407 = vmatprep.mubr.f32.mxu0 %v12483_v55  ;;  %v6578_v43 = vsel %vm6576_vm3, 1.0, %v12483_v55  ;;  %vm17800_vm3 = vmmov %vm17798_vm0 }
 0xa82   :  { %6517 = vmatprep.subr.bf16.mxu0 %v12334_v22  ;;  %v12359_v22 = vld [vmem:[%s17060_s11 + $0x88] sm:$0xff]  }
 0xa84   :  { %9492 = vmatmul.mubr.msk.f32.gmra.mrb[234].mxu0 %vm17793_vm2, %v6330_v51  ;;  %vm6822_vm2 = vcmp.lt.s32.totalorder %v6818_v60, 16  ;;  %v12365_v51 = vld [vmem:[%s17060_s11 + $0xd8] sm:$0xff]   ;;  %v12396_v60 = vld [vmem:[%s17060_s11 + $0x128] sm:$0xff]  }
 0xa85   :  { %6518 = vmatpush1.bf16.msra.mxu0 %v12332_v28  ;;  %6547 = vmatprep.mubr.bf16.mxu0 %v12484_v1  ;;  %vm6824_vm14 = vmand %vm6820_vm15, %vm6822_vm2  ;;  %v12363_v28 = vld [vmem:[%s17060_s11 + $0x90] sm:$0xff]   ;;  %vm17802_vm2 = vcmask 130048  }
 0xa86   :  { %6519 = vmatprep.subr.bf16.mxu0 %v12337_v16  ;;  %vm6826_vm12 = vmand %vm17799_vm5, %vm6824_vm14  ;;  %v12367_v16 = vld [vmem:[%s17060_s11 + $0x98] sm:$0xff]  }
 0xa87   :  { %v6828_v18 = vsel %vm6826_vm12, 1.0, %v12483_v55  ;;  %vm17803_vm13 = vmmov %vm17802_vm2 }
 0xa88   :  { %vm17804_vm14 = vmmov %vm17802_vm2 }
 0xa89   :  { %6520 = vmatpush1.bf16.msra.mxu0 %v12335_v38  ;;  %v12369_v38 = vld [vmem:[%s17060_s11 + $0xe0] sm:$0xff]   ;;  %vm17805_vm5 = vmmov %vm17802_vm2 }
 0xa8a   :  { %6521 = vmatprep.subr.bf16.mxu0 %v12340_v10  ;;  %v12371_v10 = vld [vmem:[%s17060_s11 + $0xa0] sm:$0xff]  }
 0xa8d   :  { %6522 = vmatpush1.bf16.msra.mxu0 %v12338_v4  ;;  %v12373_v4 = vld [vmem:[%s17060_s11 + $0xe8] sm:$0xff]  }
 0xa8e   :  { %v16491_v3 = vpop.f32.mrb[20].mxu1  ;;  %6523 = vmatprep.subr.bf16.mxu0 %v12343_v24  ;;  %v12374_v24 = vld [vmem:[%s17060_s11 + $0x68] sm:$0xff]  }
 0xa8f   :  { %v16496_v50 = vpop.f32.mrb[21].mxu1 }
 0xa90   :  { %v16498_v17 = vpop.f32.mrb[22].mxu1 }
 0xa91   :  { %v12098_v57 = vpack.c.bf16 %v16498_v17, %v16491_v3  ;;  %6524 = vmatpush1.bf16.msra.mxu0 %v12341_v11  ;;  %v16502_v30 = vpop.f32.mrb[23].mxu1  ;;  %v12375_v11 = vld [vmem:[%s17060_s11 + $0xa8] sm:$0xff]   ;;  %v12379_v17 = vld [vmem:[%s17060_s11 + $0xb0] sm:$0xff]  }
 0xa92   :  { %v12096_v63 = vpack.c.bf16 %v16502_v30, %v16496_v50  ;;  %6525 = vmatprep.subr.bf16.mxu0 %v12346_v54  ;;  %v12376_v3 = vld [vmem:[%s17060_s11 + $0x28] sm:$0xff]   ;;  %v12377_v54 = vld [vmem:[%s17060_s11 + $0xf0] sm:$0xff]   ;;  %v12381_v30 = vld [vmem:[%s17060_s11 + $0xf8] sm:$0xff]  }
 0xa93   :  { %v12378_v50 = vld [vmem:[%s17060_s11 + $0x70] sm:$0xff]  }
 0xa95   :  { %6526 = vmatpush1.bf16.msra.mxu0 %v12344_v29  ;;  %v12382_v29 = vld [vmem:[%s17060_s11 + $0x78] sm:$0xff]  }
 0xa96   :  { %v16515_v2 = vpop.f32.mrb[24].mxu1  ;;  %6527 = vmatprep.subr.bf16.mxu0 %v12349_v25  ;;  %v12384_v25 = vld [vmem:[%s17060_s11 + $0x38] sm:$0xff]  }
 0xa97   :  { %v16520_v19 = vpop.f32.mrb[25].mxu1 }
 0xa98   :  { %v16522_v23 = vpop.f32.mrb[26].mxu1 }
 0xa99   :  { %v12102_v49 = vpack.c.bf16 %v16522_v23, %v16515_v2  ;;  %6528 = vmatpush1.bf16.msra.mxu0 %v12347_v40  ;;  %v16526_v61 = vpop.f32.mrb[27].mxu1  ;;  %v12385_v40 = vld [vmem:[%s17060_s11 + $0x140] sm:$0xff]   ;;  %v6920_v2 = vsub.s32 0, %v17667_v44 }
 0xa9a   :  { %v12100_v9 = vpack.c.bf16 %v16526_v61, %v16520_v19  ;;  %6529 = vmatprep.subr.bf16.mxu0 %v12352_v13  ;;  %v6916_v13 = vld [vmem:[%s17061_s10] sm:$0x3]  ;;  %v6924_v19 = vsub.s32 1, %v17667_v44 }
 0xa9b   :  { %v6921_v23 = vrot.slane %v6916_v13, %v6920_v2 }
 0xa9d   :  { %6530 = vmatpush1.bf16.msra.mxu0 %v12350_v7 }
 0xaa0   :  { %6548 = vmatmul.mubr.bf16.vlgmr.msra.gmra.mrb[236].mxu0 %v16302_v45  ;;  %v12358_v45 = vld [vmem:[%s17060_s11 + $0x48] sm:$0xff]  }
 0xaa1   :  { %6557 = vmatprep.mubr.bf16.mxu0 %v12484_v1  ;;  %10696 = vmatprep.subr.bf16.mxu1 %v12358_v45  ;;  %v12360_v1 = vld [vmem:[%s17060_s11 + $0x8] sm:$0xff]  }
 0xaa2   :  { %10697 = vmatpush3.bf16.msra.mxu1 %v12360_v1 }
 0xaa8   :  { %6558 = vmatmul.mubr.bf16.gmra.mrb[240].mxu0 %v16313_v14  ;;  %v12362_v14 = vld [vmem:[%s17060_s11 + $0x50] sm:$0xff]  }
 0xaa9   :  { %6650 = vmatprep.mubr.f32.mxu0 %v12483_v55  ;;  %10698 = vmatprep.subr.bf16.mxu1 %v12362_v14 }
 0xaaa   :  { %10699 = vmatpush3.bf16.msra.mxu1 %v12364_v59 }
 0xaab   :  { %10700 = vmatprep.subr.bf16.mxu1 %v12366_v53 }
 0xaae   :  { %10701 = vmatpush3.bf16.msra.mxu1 %v12368_v8 }
 0xaaf   :  { %10702 = vmatprep.subr.bf16.mxu1 %v12370_v35 }
 0xab2   :  { %10703 = vmatpush3.bf16.msra.mxu1 %v12372_v34 }
 0xab3   :  { %10704 = vmatprep.subr.bf16.mxu1 %v12374_v24 }
 0xab6   :  { %10705 = vmatpush3.bf16.msra.mxu1 %v12376_v3 }
 0xab7   :  { %10706 = vmatprep.subr.bf16.mxu1 %v12378_v50 }
 0xb73   :  { %v6549_v46 = vpop.f32.mrb[236].mxu0 }
 0xb74   :  { %v6551_v56 = vpop.f32.mrb[237].mxu0 }
 0xb75   :  { %v6553_v27 = vpop.f32.mrb[238].mxu0 }
 0xb76   :  { %v12090_v12 = vpack.c.bf16 %v6553_v27, %v6549_v46  ;;  %v6555_v6 = vpop.f32.mrb[239].mxu0 }
 0xb77   :  { %v12088_v37 = vpack.c.bf16 %v6555_v6, %v6551_v56  ;;  %v12386_v6 = vld [vmem:[%s17060_s11 + $0x100] sm:$0xff]  }
 0xb79   :  { %12089 = vmatprep.subr.bf16.mxu0 %v12088_v37  ;;  %v12387_v37 = vld [vmem:[%s17060_s11 + $0x148] sm:$0xff]  }
 0xb7a   :  { %12091 = vmatpush1.bf16.msra.mxu0 %v12090_v12 }
 0xb7b   :  { %v6559_v39 = vpop.f32.mrb[240].mxu0 }
 0xb7c   :  { %v6561_v0 = vpop.f32.mrb[241].mxu0 }
 0xb7d   :  { %v6563_v33 = vpop.f32.mrb[242].mxu0 }
 0xb7e   :  { %v12094_v36 = vpack.c.bf16 %v6563_v33, %v6559_v39  ;;  %v6565_v32 = vpop.f32.mrb[243].mxu0  ;;  %v12389_v39 = vld [vmem:[%s17060_s11 + $0x150] sm:$0xff]   ;;  %v12391_v33 = vld [vmem:[%s17060_s11 + $0x158] sm:$0xff]  }
 0xb7f   :  { %v12092_v21 = vpack.c.bf16 %v6565_v32, %v6561_v0  ;;  %v12390_v0 = vld [vmem:[%s17060_s11 + $0x110] sm:$0xff]   ;;  %v12394_v32 = vld [vmem:[%s17060_s11 + $0x120] sm:$0xff]  }
 0xb81   :  { %12093 = vmatprep.subr.bf16.mxu0 %v12092_v21  ;;  %v12395_v21 = vld [vmem:[%s17060_s11 + $0x168] sm:$0xff]  }
 0xb82   :  { %12095 = vmatpush1.bf16.msra.mxu0 %v12094_v36  ;;  %v12393_v36 = vld [vmem:[%s17060_s11 + $0x160] sm:$0xff]  }
 0xb83   :  { %12097 = vmatprep.subr.bf16.mxu0 %v12096_v63  ;;  %v12383_v63 = vld [vmem:[%s17060_s11 + $0xb8] sm:$0xff]  }
 0xb85   :  { %9525 = vmatmul.mubr.msk.f32.vlgmr.msra.gmra.mrb[232].mxu0 %vm17796_vm4, %v6578_v43  ;;  %v12397_v43 = vld [vmem:[%s17060_s11 + $0x170] sm:$0xff]  }
 0xb86   :  { %12099 = vmatpush1.bf16.msra.mxu0 %v12098_v57  ;;  %6656 = vmatprep.mubr.f32.mxu0 %v12483_v55  ;;  %v12380_v57 = vld [vmem:[%s17060_s11 + $0x30] sm:$0xff]  }
 0xb87   :  { %12101 = vmatprep.subr.bf16.mxu0 %v12100_v9  ;;  %10707 = vmatpush3.bf16.msra.mxu1 %v12380_v57 }
 0xb88   :  { %10708 = vmatprep.subr.bf16.mxu1 %v12382_v29 }
 0xb89   :  { %9526 = vmatmul.mubr.msk.f32.gmra.mrb[234].mxu0 %vm17798_vm0, %v6579_v48  ;;  %v12398_v48 = vld [vmem:[%s17060_s11 + $0x130] sm:$0xff]  }
 0xb8a   :  { %12103 = vmatpush1.bf16.msra.mxu0 %v12102_v49  ;;  %6899 = vmatprep.mubr.f32.mxu0 %v12483_v55  ;;  %v6925_v49 = vrot.slane %v6916_v13, %v6924_v19  ;;  %v12401_v19 = vld [vmem:[%s17060_s11 + $0x1c0] sm:$0xff]  }
 0xb8b   :  { %10716 = vmatprep.subr.bf16.mxu0 %v12353_v58  ;;  %10709 = vmatpush3.bf16.msra.mxu1 %v12384_v25  ;;  %v12399_v58 = vld [vmem:[%s17060_s11 + $0x178] sm:$0xff]  }
 0xb8d   :  { %9559 = vmatmul.mubr.msk.f32.vlgmr.msra.gmra.mrb[232].mxu0 %vm17800_vm3, %v6827_v15  ;;  %v12400_v15 = vld [vmem:[%s17060_s11 + $0x138] sm:$0xff]   ;;  %vm17806_vm3 = vmmov %vm17802_vm2 }
 0xb8e   :  { %6905 = vmatprep.mubr.f32.mxu0 %v12483_v55  ;;  %10717 = vmatpush3.bf16.msra.mxu0 %v12355_v20  ;;  %v12485_v20 = vmov 0.0|0.0  }
 0xb8f   :  { %10718 = vmatprep.subr.bf16.mxu0 %v12357_v42  ;;  %12104 = vmatprep.subr.bf16.mxu1 %v12485_v20  ;;  %v16742_v42 = vmul.u32 8, %v17667_v44 }
 0xb91   :  { %9560 = vmatmul.mubr.msk.f32.gmra.mrb[234].mxu0 %vm17801_vm11, %v6828_v18  ;;  %vm7116_vm15 = vcmp.eq.s32.totalorder %v12816_v26, %v16742_v42 }
 0xb92   :  { %10719 = vmatpush3.bf16.msra.mxu0 %v12359_v22  ;;  %v7117_v57 = vsel %vm7116_vm15, 1.0, %v12483_v55  ;;  %vm8930_vm15 = vcmask 254976  }
 0xb93   :  { %10720 = vmatprep.subr.bf16.mxu0 %v12361_v52 }
 0xb96   :  { %10721 = vmatpush3.bf16.msra.mxu0 %v12363_v28 }
 0xb97   :  { %10722 = vmatprep.subr.bf16.mxu0 %v12365_v51  ;;  %v7288_v51 = vadd.s32 1, %v16742_v42 }
 0xb99   :  { %vm7289_vm4 = vcmp.eq.s32.totalorder %v12816_v26, %v7288_v51  ;;  %v12420_v51 = vld [vmem:[%s17060_s11 + $0x208] sm:$0xff]  }
 0xb9a   :  { %10723 = vmatpush3.bf16.msra.mxu0 %v12367_v16  ;;  %v7290_v44 = vsel %vm7289_vm4, 1.0, %v12483_v55 }
 0xb9b   :  { %10724 = vmatprep.subr.bf16.mxu0 %v12369_v38 }
 0xb9e   :  { %10725 = vmatpush3.bf16.msra.mxu0 %v12371_v10 }
 0xb9f   :  { %10726 = vmatprep.subr.bf16.mxu0 %v12373_v4 }
 0xba2   :  { %10727 = vmatpush3.bf16.msra.mxu0 %v12375_v11 }
 0xba3   :  { %10728 = vmatprep.subr.bf16.mxu0 %v12377_v54 }
 0xba6   :  { %10729 = vmatpush3.bf16.msra.mxu0 %v12379_v17 }
 0xba7   :  { %10730 = vmatprep.subr.bf16.mxu0 %v12381_v30 }
 0xbaa   :  { %10731 = vmatpush3.bf16.msra.mxu0 %v12383_v63  ;;  %v7607_v63 = vadd.s32 2, %v16742_v42 }
 0xbab   :  { %10744 = vmatprep.subr.bf16.mxu0 %v12385_v40 }
 0xbac   :  { %vm7608_vm10 = vcmp.eq.s32.totalorder %v12816_v26, %v7607_v63 }
 0xc60   :  { %v6901_v61 = vpop.f32.mrb[232].mxu0 }
 0xc61   :  { %v6928_v7 = vadd.f32 %v6921_v23, %v6901_v61  ;;  %v6903_v9 = vpop.f32.mrb[233].mxu0  ;;  %v12402_v61 = vld [vmem:[%s17060_s11 + $0x180] sm:$0xff]  }
 0xc62   :  { %v6929_v62 = vadd.f32 %v6925_v49, %v6903_v9  ;;  %v12404_v9 = vld [vmem:[%s17060_s11 + $0x188] sm:$0xff]  }
 0xc63   :  { %v6936_v45 = vmul.f32 0.2, %v6928_v7  ;;  %vm6932_vm1 = vcmp.gt.f32.partialorder %v6928_v7, 0.0 }
 0xc64   :  { %v6907_v47 = vpop.f32.mrb[234].mxu0  ;;  %v6937_v59 = vmul.f32 0.2, %v6929_v62  ;;  %vm6933_vm8 = vcmp.gt.f32.partialorder %v6929_v62, 0.0 }
 0xc65   :  { %v6930_v1 = vadd.f32 %v6921_v23, %v6907_v47  ;;  %v6909_v14 = vpop.f32.mrb[235].mxu0  ;;  %v6940_v34 = vsel %vm6932_vm1, %v6928_v7, %v6936_v45  ;;  %v12403_v7 = vld [vmem:[%s17060_s11 + $0x1c8] sm:$0xff]   ;;  %v12406_v47 = vld [vmem:[%s17060_s11 + $0x190] sm:$0xff]   ;;  %v12407_v45 = vld [vmem:[%s17060_s11 + $0x1d8] sm:$0xff]  }
 0xc66   :  { %v6931_v53 = vadd.f32 %v6925_v49, %v6909_v14  ;;  %v6941_v56 = vsel %vm6933_vm8, %v6929_v62, %v6937_v59  ;;  %v7609_v49 = vsel %vm7608_vm10, 1.0, %v12483_v55  ;;  %v12405_v62 = vld [vmem:[%s17060_s11 + $0x1d0] sm:$0xff]   ;;  %v12409_v14 = vld [vmem:[%s17060_s11 + $0x1e0] sm:$0xff]   ;;  %vm17807_vm1 = vmmov %vm17802_vm2 }
 0xc67   :  { %vm6934_vm9 = vcmp.gt.f32.partialorder %v6930_v1, 0.0  ;;  %v6938_v8 = vmul.f32 0.2, %v6930_v1  ;;  %v12410_v59 = vld [vmem:[%s17060_s11 + $0x1a0] sm:$0xff]  }
 0xc68   :  { %vm6935_vm7 = vcmp.gt.f32.partialorder %v6931_v53, 0.0  ;;  %v6939_v35 = vmul.f32 0.2, %v6931_v53 }
 0xc69   :  { %v6942_v46 = vsel %vm6934_vm9, %v6930_v1, %v6938_v8  ;;  %v12408_v1 = vld [vmem:[%s17060_s11 + $0x198] sm:$0xff]   ;;  %v12412_v8 = vld [vmem:[%s17060_s11 + $0x1a8] sm:$0xff]   ;;  %vm17808_vm9 = vmmov %vm17807_vm1 }
 0xc6a   :  { %v16680_v27 = vpack.c.bf16 %v6942_v46, %v6940_v34  ;;  %v6943_v31 = vsel %vm6935_vm7, %v6931_v53, %v6939_v35  ;;  %v12411_v53 = vld [vmem:[%s17060_s11 + $0x1e8] sm:$0xff]   ;;  %v12413_v35 = vld [vmem:[%s17060_s11 + $0x1f0] sm:$0xff]   ;;  %v12415_v46 = vld [vmem:[%s17060_s11 + $0x1f8] sm:$0xff]  }
 0xc6b   :  { %v16682_v12 = vpack.c.bf16 %v6943_v31, %v6941_v56  ;;  %v12414_v34 = vld [vmem:[%s17060_s11 + $0x1b0] sm:$0xff]   ;;  %v12416_v56 = vld [vmem:[%s17060_s11 + $0x1b8] sm:$0xff]  }
 0xc6d   :  { %7106 = vmatprep.mubr.bf16.mxu1 %v16682_v12  ;;  %7279 = vmatprep.mubr.bf16.mxu0 %v16682_v12 }
 0xc6e   :  { %7107 = vmatmul.mubr.bf16.vlgmr.msra.gmra.mrb[28].mxu1 %v16680_v27  ;;  %7280 = vmatmul.mubr.bf16.vlgmr.msra.gmra.mrb[244].mxu0 %v16680_v27 }
 0xc6f   :  { %10745 = vmatpush3.bf16.msra.mxu0 %v12386_v6  ;;  %7598 = vmatprep.mubr.bf16.mxu0 %v16682_v12 }
 0xc70   :  { %10746 = vmatprep.subr.bf16.mxu0 %v12387_v37  ;;  %11612 = vmatprep.mubr.msk.f32.mxu1 %vm12486_vm6, %v12483_v55 }
 0xc73   :  { %10747 = vmatpush3.bf16.msra.mxu0 %v12388_v5 }
 0xc74   :  { %10748 = vmatprep.subr.bf16.mxu0 %v12389_v39 }
 0xc77   :  { %10749 = vmatpush3.bf16.msra.mxu0 %v12390_v0 }
 0xc78   :  { %10750 = vmatprep.subr.bf16.mxu0 %v12391_v33 }
 0xc7b   :  { %10751 = vmatpush3.bf16.msra.mxu0 %v12392_v41 }
 0xc7c   :  { %10752 = vmatprep.subr.bf16.mxu0 %v12393_v36 }
 0xc7f   :  { %10753 = vmatpush3.bf16.msra.mxu0 %v12394_v32 }
 0xc80   :  { %10754 = vmatprep.subr.bf16.mxu0 %v12395_v21  ;;  %v7854_v21 = vadd.s32 3, %v16742_v42 }
 0xc82   :  { %vm7855_vm0 = vcmp.eq.s32.totalorder %v12816_v26, %v7854_v21 }
 0xc83   :  { %10755 = vmatpush3.bf16.msra.mxu0 %v12396_v60 }
 0xc84   :  { %10756 = vmatprep.subr.bf16.mxu0 %v12397_v43 }
 0xc87   :  { %10757 = vmatpush3.bf16.msra.mxu0 %v12398_v48 }
 0xc88   :  { %10758 = vmatprep.subr.bf16.mxu0 %v12399_v58 }
 0xc8b   :  { %10759 = vmatpush3.bf16.msra.mxu0 %v12400_v15  ;;  %v12417_v15 = vld [vmem:[%s17060_s11 + $0x240] sm:$0xff]  }
 0xc8c   :  { %12113 = vmatprep.subr.bf16.mxu0 %v12485_v20 }
 0xc8e   :  { %7599 = vmatmul.mubr.bf16.vlgmr.msra.gmra.mrb[248].mxu0 %v16680_v27 }
 0xc8f   :  { %11633 = vmatprep.mubr.msk.f32.mxu0 %vm12486_vm6, %v12483_v55 }
 0xd41   :  { %v10710_v18 = vpop.f32.mrb[28].mxu1  ;;  %v10732_v22 = vpop.f32.mrb[244].mxu0 }
 0xd42   :  { %v10711_v52 = vpop.f32.mrb[29].mxu1  ;;  %v10733_v28 = vpop.f32.mrb[245].mxu0 }
 0xd43   :  { %v10712_v16 = vadd.f32 %v10711_v52, %v10710_v18  ;;  %v10734_v38 = vadd.f32 %v10733_v28, %v10732_v22  ;;  %v10713_v10 = vpop.f32.mrb[30].mxu1  ;;  %v10735_v4 = vpop.f32.mrb[246].mxu0  ;;  %v7856_v22 = vsel %vm7855_vm0, 1.0, %v12483_v55  ;;  %v12418_v52 = vld [vmem:[%s17060_s11 + $0x200] sm:$0xff]   ;;  %v12419_v28 = vld [vmem:[%s17060_s11 + $0x248] sm:$0xff]  }
 0xd44   :  { %v10714_v24 = vpop.f32.mrb[31].mxu1  ;;  %v10736_v11 = vpop.f32.mrb[247].mxu0 }
 0xd45   :  { %v10715_v3 = vadd.f32 %v10714_v24, %v10713_v10  ;;  %v10737_v54 = vadd.f32 %v10736_v11, %v10735_v4  ;;  %v12423_v10 = vld [vmem:[%s17060_s11 + $0x258] sm:$0xff]   ;;  %v12425_v24 = vld [vmem:[%s17060_s11 + $0x260] sm:$0xff]  }
 0xd46   :  { %v12424_v4 = vld [vmem:[%s17060_s11 + $0x218] sm:$0xff]   ;;  %v12426_v11 = vld [vmem:[%s17060_s11 + $0x220] sm:$0xff]  }
 0xd47   :  { %v12108_v50 = vpack.c.bf16 %v10715_v3, %v10712_v16  ;;  %v12105_v17 = vpack.c.bf16 %v10737_v54, %v10734_v38  ;;  %v12421_v16 = vld [vmem:[%s17060_s11 + $0x250] sm:$0xff]   ;;  %v12427_v3 = vld [vmem:[%s17060_s11 + $0x268] sm:$0xff]  }
 0xd48   :  { %v12422_v38 = vld [vmem:[%s17060_s11 + $0x210] sm:$0xff]   ;;  %v12428_v54 = vld [vmem:[%s17060_s11 + $0x228] sm:$0xff]  }
 0xd49   :  { %12106 = vmatpush3.bf16.msra.mxu1 %v12105_v17  ;;  %v12430_v17 = vld [vmem:[%s17060_s11 + $0x230] sm:$0xff]  }
 0xd4a   :  { %12107 = vmatprep.subr.bf16.mxu1 %v12485_v20 }
 0xd4c   :  { %11613 = vmatmul.mubr.msk.f32.vlgmr.msra.gmra.mrb[32].mxu1 %vm17802_vm2, %v7290_v44  ;;  %v12431_v44 = vld [vmem:[%s17060_s11 + $0x278] sm:$0xff]  }
 0xd4d   :  { %12109 = vmatpush3.bf16.msra.mxu1 %v12108_v50  ;;  %11619 = vmatprep.mubr.msk.f32.mxu1 %vm12486_vm6, %v12483_v55  ;;  %v12429_v50 = vld [vmem:[%s17060_s11 + $0x270] sm:$0xff]  }
 0xd4e   :  { %12110 = vmatprep.subr.bf16.mxu1 %v12485_v20 }
 0xd50   :  { %11620 = vmatmul.mubr.msk.f32.vlgmr.msra.gmra.mrb[34].mxu1 %vm17803_vm13, %v7117_v57  ;;  %v12432_v57 = vld [vmem:[%s17060_s11 + $0x238] sm:$0xff]  }
 0xd51   :  { %11626 = vmatprep.mubr.msk.f32.mxu1 %vm12486_vm6, %v12483_v55 }
 0xd61   :  { %v10760_v30 = vpop.f32.mrb[248].mxu0 }
 0xd62   :  { %v10761_v29 = vpop.f32.mrb[249].mxu0 }
 0xd63   :  { %v10762_v25 = vadd.f32 %v10761_v29, %v10760_v30  ;;  %v10763_v40 = vpop.f32.mrb[250].mxu0 }
 0xd64   :  { %v10764_v2 = vpop.f32.mrb[251].mxu0 }
 0xd65   :  { %v10765_v13 = vadd.f32 %v10764_v2, %v10763_v40  ;;  %v8101_v2 = vadd.s32 4, %v16742_v42 }
 0xd67   :  { %v12111_v23 = vpack.c.bf16 %v10765_v13, %v10762_v25  ;;  %vm8102_vm12 = vcmp.eq.s32.totalorder %v12816_v26, %v8101_v2 }
 0xd69   :  { %12112 = vmatpush3.bf16.msra.mxu1 %v12111_v23 }
 0xd6a   :  { %10769 = vmatprep.subr.bf16.mxu1 %v12401_v19 }
 0xd6c   :  { %11627 = vmatmul.mubr.msk.f32.vlgmr.msra.gmra.mrb[36].mxu1 %vm17804_vm14, %v7609_v49 }
 0xd6d   :  { %10770 = vmatpush3.bf16.msra.mxu1 %v12402_v61  ;;  %7845 = vmatprep.mubr.bf16.mxu1 %v16682_v12  ;;  %v12433_v61 = vld [vmem:[%s17060_s11 + $0x2c0] sm:$0xff]  }
 0xd6e   :  { %10771 = vmatprep.subr.bf16.mxu1 %v12403_v7 }
 0xd71   :  { %10772 = vmatpush3.bf16.msra.mxu1 %v12404_v9  ;;  %v8103_v9 = vsel %vm8102_vm12, 1.0, %v12483_v55 }
 0xd72   :  { %10773 = vmatprep.subr.bf16.mxu1 %v12405_v62  ;;  %v12434_v62 = vld [vmem:[%s17060_s11 + $0x280] sm:$0xff]  }
 0xd75   :  { %10774 = vmatpush3.bf16.msra.mxu1 %v12406_v47  ;;  %v12435_v47 = vld [vmem:[%s17060_s11 + $0x2c8] sm:$0xff]  }
 0xd76   :  { %10775 = vmatprep.subr.bf16.mxu1 %v12407_v45  ;;  %v12436_v45 = vld [vmem:[%s17060_s11 + $0x288] sm:$0xff]  }
 0xd79   :  { %10776 = vmatpush3.bf16.msra.mxu1 %v12408_v1  ;;  %v12437_v1 = vld [vmem:[%s17060_s11 + $0x2d0] sm:$0xff]  }
 0xd7a   :  { %10777 = vmatprep.subr.bf16.mxu1 %v12409_v14  ;;  %v12438_v14 = vld [vmem:[%s17060_s11 + $0x290] sm:$0xff]  }
 0xd7d   :  { %10778 = vmatpush3.bf16.msra.mxu1 %v12410_v59  ;;  %v12439_v59 = vld [vmem:[%s17060_s11 + $0x2d8] sm:$0xff]  }
 0xd7e   :  { %10779 = vmatprep.subr.bf16.mxu1 %v12411_v53  ;;  %v12440_v53 = vld [vmem:[%s17060_s11 + $0x298] sm:$0xff]  }
 0xd81   :  { %10780 = vmatpush3.bf16.msra.mxu1 %v12412_v8  ;;  %v12441_v8 = vld [vmem:[%s17060_s11 + $0x2e0] sm:$0xff]  }
 0xd82   :  { %10781 = vmatprep.subr.bf16.mxu1 %v12413_v35  ;;  %v12442_v35 = vld [vmem:[%s17060_s11 + $0x2a0] sm:$0xff]  }
 0xd85   :  { %10782 = vmatpush3.bf16.msra.mxu1 %v12414_v34  ;;  %v12443_v34 = vld [vmem:[%s17060_s11 + $0x2e8] sm:$0xff]  }
 0xd86   :  { %10783 = vmatprep.subr.bf16.mxu1 %v12415_v46  ;;  %v12444_v46 = vld [vmem:[%s17060_s11 + $0x2a8] sm:$0xff]  }
 0xd89   :  { %10784 = vmatpush3.bf16.msra.mxu1 %v12416_v56  ;;  %v12445_v56 = vld [vmem:[%s17060_s11 + $0x2f0] sm:$0xff]  }
 0xd8a   :  { %12116 = vmatprep.subr.bf16.mxu1 %v12485_v20 }
 0xd8c   :  { %7846 = vmatmul.mubr.bf16.vlgmr.msra.gmra.mrb[40].mxu1 %v16680_v27 }
 0xd8d   :  { %11640 = vmatprep.mubr.msk.f32.mxu1 %vm12486_vm6, %v12483_v55 }
 0xe1f   :  { %v7360_v31 = vpop.f32.mrb[32].mxu1 }
 0xe20   :  { %v11614_v6 = vpop.f32.mrb[33].mxu1 }
 0xe21   :  { %v12447_v6 = vld [vmem:[%s17060_s11 + $0x2f8] sm:$0xff]  }
 0xe23   :  { %v7433_v37 = vpop.f32.mrb[34].mxu1 }
 0xe24   :  { %v7434_v5 = vadd.f32 %v7433_v37, %v7360_v31  ;;  %v11621_v39 = vpop.f32.mrb[35].mxu1  ;;  %v12446_v31 = vld [vmem:[%s17060_s11 + $0x2b0] sm:$0xff]   ;;  %v12448_v37 = vld [vmem:[%s17060_s11 + $0x2b8] sm:$0xff]  }
 0xe3f   :  { %v7679_v0 = vpop.f32.mrb[36].mxu1 }
 0xe40   :  { %v7683_v33 = vadd.f32 %v7679_v0, %v7434_v5  ;;  %v11628_v41 = vpop.f32.mrb[37].mxu1 }
 0xe5f   :  { %v10785_v36 = vpop.f32.mrb[40].mxu1 }
 0xe60   :  { %v10786_v32 = vpop.f32.mrb[41].mxu1 }
 0xe61   :  { %v10787_v60 = vadd.f32 %v10786_v32, %v10785_v36  ;;  %v10788_v43 = vpop.f32.mrb[42].mxu1  ;;  %v8348_v36 = vadd.s32 5, %v16742_v42 }
 0xe62   :  { %v10789_v48 = vpop.f32.mrb[43].mxu1 }
 0xe63   :  { %v10790_v58 = vadd.f32 %v10789_v48, %v10788_v43  ;;  %vm8349_vm11 = vcmp.eq.s32.totalorder %v12816_v26, %v8348_v36  ;;  %v12449_v48 = vld [vmem:[%s17060_s11 + $0x340] sm:$0xff]  }
 0xe65   :  { %v12114_v18 = vpack.c.bf16 %v10790_v58, %v10787_v60 }
 0xe67   :  { %12115 = vmatpush3.bf16.msra.mxu0 %v12114_v18  ;;  %v12450_v18 = vld [vmem:[%s17060_s11 + $0x300] sm:$0xff]  }
 0xe68   :  { %10794 = vmatprep.subr.bf16.mxu0 %v12417_v15  ;;  %v8350_v15 = vsel %vm8349_vm11, 1.0, %v12483_v55 }
 0xe6a   :  { %11634 = vmatmul.mubr.msk.f32.vlgmr.msra.gmra.mrb[252].mxu0 %vm17805_vm5, %v7856_v22  ;;  %v12451_v22 = vld [vmem:[%s17060_s11 + $0x348] sm:$0xff]  }
 0xe6b   :  { %10795 = vmatpush3.bf16.msra.mxu0 %v12418_v52  ;;  %8092 = vmatprep.mubr.bf16.mxu0 %v16682_v12  ;;  %v12452_v52 = vld [vmem:[%s17060_s11 + $0x308] sm:$0xff]  }
 0xe6c   :  { %10796 = vmatprep.subr.bf16.mxu0 %v12419_v28  ;;  %v12453_v28 = vld [vmem:[%s17060_s11 + $0x350] sm:$0xff]  }
 0xe6f   :  { %10797 = vmatpush3.bf16.msra.mxu0 %v12420_v51  ;;  %v12454_v51 = vld [vmem:[%s17060_s11 + $0x310] sm:$0xff]  }
 0xe70   :  { %10798 = vmatprep.subr.bf16.mxu0 %v12421_v16  ;;  %v12455_v16 = vld [vmem:[%s17060_s11 + $0x358] sm:$0xff]  }
 0xe73   :  { %10799 = vmatpush3.bf16.msra.mxu0 %v12422_v38  ;;  %v12456_v38 = vld [vmem:[%s17060_s11 + $0x318] sm:$0xff]  }
 0xe74   :  { %10800 = vmatprep.subr.bf16.mxu0 %v12423_v10  ;;  %v12457_v10 = vld [vmem:[%s17060_s11 + $0x360] sm:$0xff]  }
 0xe77   :  { %10801 = vmatpush3.bf16.msra.mxu0 %v12424_v4  ;;  %v12458_v4 = vld [vmem:[%s17060_s11 + $0x320] sm:$0xff]  }
 0xe78   :  { %10802 = vmatprep.subr.bf16.mxu0 %v12425_v24  ;;  %v12459_v24 = vld [vmem:[%s17060_s11 + $0x368] sm:$0xff]  }
 0xe7b   :  { %10803 = vmatpush3.bf16.msra.mxu0 %v12426_v11  ;;  %v12460_v11 = vld [vmem:[%s17060_s11 + $0x328] sm:$0xff]  }
 0xe7c   :  { %10804 = vmatprep.subr.bf16.mxu0 %v12427_v3  ;;  %v12461_v3 = vld [vmem:[%s17060_s11 + $0x370] sm:$0xff]  }
 0xe7f   :  { %10805 = vmatpush3.bf16.msra.mxu0 %v12428_v54  ;;  %v12462_v54 = vld [vmem:[%s17060_s11 + $0x330] sm:$0xff]  }
 0xe80   :  { %10806 = vmatprep.subr.bf16.mxu0 %v12429_v50  ;;  %v12463_v50 = vld [vmem:[%s17060_s11 + $0x378] sm:$0xff]  }
 0xe83   :  { %10807 = vmatpush3.bf16.msra.mxu0 %v12430_v17  ;;  %v12464_v17 = vld [vmem:[%s17060_s11 + $0x338] sm:$0xff]  }
 0xe84   :  { %10808 = vmatprep.subr.bf16.mxu0 %v12431_v44 }
 0xe87   :  { %10809 = vmatpush3.bf16.msra.mxu0 %v12432_v57 }
 0xe88   :  { %12119 = vmatprep.subr.bf16.mxu0 %v12485_v20 }
 0xe8a   :  { %8093 = vmatmul.mubr.bf16.vlgmr.msra.gmra.mrb[0].mxu0 %v16680_v27 }
 0xe8b   :  { %11647 = vmatprep.mubr.msk.f32.mxu0 %vm12486_vm6, %v12483_v55 }
 0xf3d   :  { %v7926_v30 = vpop.f32.mrb[252].mxu0 }
 0xf3e   :  { %v7930_v29 = vadd.f32 %v7926_v30, %v7683_v33  ;;  %v11635_v63 = vpop.f32.mrb[253].mxu0 }
 0xf5d   :  { %v10810_v25 = vpop.f32.mrb[0].mxu0 }
 0xf5e   :  { %v10811_v40 = vpop.f32.mrb[1].mxu0 }
 0xf5f   :  { %v10812_v13 = vadd.f32 %v10811_v40, %v10810_v25  ;;  %v10813_v19 = vpop.f32.mrb[2].mxu0  ;;  %v8595_v25 = vadd.s32 6, %v16742_v42 }
 0xf60   :  { %v10814_v23 = vpop.f32.mrb[3].mxu0 }
 0xf61   :  { %v10815_v49 = vadd.f32 %v10814_v23, %v10813_v19  ;;  %vm8596_vm8 = vcmp.eq.s32.totalorder %v12816_v26, %v8595_v25 }
 0xf63   :  { %v12117_v7 = vpack.c.bf16 %v10815_v49, %v10812_v13  ;;  %v8597_v49 = vsel %vm8596_vm8, 1.0, %v12483_v55 }
 0xf65   :  { %12118 = vmatpush3.bf16.msra.mxu1 %v12117_v7  ;;  %v12467_v7 = vld [vmem:[%s17060_s11 + $0x3c8] sm:$0xff]  }
 0xf66   :  { %10819 = vmatprep.subr.bf16.mxu1 %v12433_v61  ;;  %v12466_v61 = vld [vmem:[%s17060_s11 + $0x380] sm:$0xff]  }
 0xf68   :  { %11641 = vmatmul.mubr.msk.f32.vlgmr.msra.gmra.mrb[38].mxu1 %vm17806_vm3, %v8103_v9  ;;  %v12468_v9 = vld [vmem:[%s17060_s11 + $0x388] sm:$0xff]  }
 0xf69   :  { %10820 = vmatpush3.bf16.msra.mxu1 %v12434_v62  ;;  %8339 = vmatprep.mubr.bf16.mxu1 %v16682_v12  ;;  %v12469_v62 = vld [vmem:[%s17060_s11 + $0x3d0] sm:$0xff]  }
 0xf6a   :  { %10821 = vmatprep.subr.bf16.mxu1 %v12435_v47  ;;  %v12470_v47 = vld [vmem:[%s17060_s11 + $0x390] sm:$0xff]  }
 0xf6d   :  { %10822 = vmatpush3.bf16.msra.mxu1 %v12436_v45  ;;  %v12471_v45 = vld [vmem:[%s17060_s11 + $0x3d8] sm:$0xff]  }
 0xf6e   :  { %10823 = vmatprep.subr.bf16.mxu1 %v12437_v1  ;;  %v12473_v1 = vld [vmem:[%s17060_s11 + $0x3e0] sm:$0xff]  }
 0xf71   :  { %10824 = vmatpush3.bf16.msra.mxu1 %v12438_v14  ;;  %v12474_v14 = vld [vmem:[%s17060_s11 + $0x3a0] sm:$0xff]  }
 0xf72   :  { %10825 = vmatprep.subr.bf16.mxu1 %v12439_v59  ;;  %v12475_v59 = vld [vmem:[%s17060_s11 + $0x3e8] sm:$0xff]  }
 0xf75   :  { %10826 = vmatpush3.bf16.msra.mxu1 %v12440_v53  ;;  %v12476_v53 = vld [vmem:[%s17060_s11 + $0x3a8] sm:$0xff]  }
 0xf76   :  { %10827 = vmatprep.subr.bf16.mxu1 %v12441_v8  ;;  %v12477_v8 = vld [vmem:[%s17060_s11 + $0x3f0] sm:$0xff]  }
 0xf79   :  { %10828 = vmatpush3.bf16.msra.mxu1 %v12442_v35  ;;  %v12478_v35 = vld [vmem:[%s17060_s11 + $0x3b0] sm:$0xff]  }
 0xf7a   :  { %10829 = vmatprep.subr.bf16.mxu1 %v12443_v34  ;;  %v12479_v34 = vld [vmem:[%s17060_s11 + $0x3f8] sm:$0xff]  }
 0xf7d   :  { %10830 = vmatpush3.bf16.msra.mxu1 %v12444_v46  ;;  %v12480_v46 = vld [vmem:[%s17060_s11 + $0x3b8] sm:$0xff]  }
 0xf7e   :  { %10831 = vmatprep.subr.bf16.mxu1 %v12445_v56 }
 0xf81   :  { %10832 = vmatpush3.bf16.msra.mxu1 %v12446_v31 }
 0xf82   :  { %10833 = vmatprep.subr.bf16.mxu1 %v12447_v6 }
 0xf85   :  { %10834 = vmatpush3.bf16.msra.mxu1 %v12448_v37 }
 0xf86   :  { %12122 = vmatprep.subr.bf16.mxu1 %v12485_v20 }
 0xf88   :  { %8340 = vmatmul.mubr.bf16.vlgmr.msra.gmra.mrb[44].mxu1 %v16680_v27 }
 0xf89   :  { %11654 = vmatprep.mubr.msk.f32.mxu1 %vm12486_vm6, %v12483_v55 }
0x103b   :  { %v8173_v5 = vpop.f32.mrb[38].mxu1 }
0x103c   :  { %v8177_v39 = vadd.f32 %v8173_v5, %v7930_v29  ;;  %v11642_v0 = vpop.f32.mrb[39].mxu1 }
0x105b   :  { %v10835_v33 = vpop.f32.mrb[44].mxu1 }
0x105c   :  { %v10836_v41 = vpop.f32.mrb[45].mxu1 }
0x105d   :  { %v10837_v32 = vadd.f32 %v10836_v41, %v10835_v33  ;;  %v10838_v21 = vpop.f32.mrb[46].mxu1 }
0x105e   :  { %v10839_v60 = vpop.f32.mrb[47].mxu1 }
0x105f   :  { %v10840_v43 = vadd.f32 %v10839_v60, %v10838_v21  ;;  %v9921_v60 = vld [vmem:[%s17062_s12] ss:$0 sm:$0xff] }
0x1061   :  { %v12120_v58 = vpack.c.bf16 %v10840_v43, %v10837_v32 }
0x1063   :  { %12121 = vmatpush3.bf16.msra.mxu0 %v12120_v58 }
0x1064   :  { %10844 = vmatprep.subr.bf16.mxu0 %v12449_v48 }
0x1066   :  { %11648 = vmatmul.mubr.msk.f32.vlgmr.msra.gmra.mrb[254].mxu0 %vm17807_vm1, %v8350_v15 }
0x1067   :  { %10845 = vmatpush3.bf16.msra.mxu0 %v12450_v18  ;;  %8586 = vmatprep.mubr.bf16.mxu0 %v16682_v12 }
0x1068   :  { %10846 = vmatprep.subr.bf16.mxu0 %v12451_v22 }
0x106b   :  { %10847 = vmatpush3.bf16.msra.mxu0 %v12452_v52 }
0x106c   :  { %10848 = vmatprep.subr.bf16.mxu0 %v12453_v28 }
0x106f   :  { %10849 = vmatpush3.bf16.msra.mxu0 %v12454_v51 }
0x1070   :  { %10850 = vmatprep.subr.bf16.mxu0 %v12455_v16 }
0x1073   :  { %10851 = vmatpush3.bf16.msra.mxu0 %v12456_v38 }
0x1074   :  { %10852 = vmatprep.subr.bf16.mxu0 %v12457_v10 }
0x1077   :  { %10853 = vmatpush3.bf16.msra.mxu0 %v12458_v4 }
0x1078   :  { %10854 = vmatprep.subr.bf16.mxu0 %v12459_v24 }
0x107b   :  { %10855 = vmatpush3.bf16.msra.mxu0 %v12460_v11 }
0x107c   :  { %10856 = vmatprep.subr.bf16.mxu0 %v12461_v3 }
0x107f   :  { %10857 = vmatpush3.bf16.msra.mxu0 %v12462_v54 }
0x1080   :  { %10858 = vmatprep.subr.bf16.mxu0 %v12463_v50 }
0x1083   :  { %10859 = vmatpush3.bf16.msra.mxu0 %v12464_v17 }
0x1084   :  { %12125 = vmatprep.subr.bf16.mxu0 %v12485_v20  ;;  %v12465_v20 = vld [vmem:[%s17060_s11 + $0x3c0] sm:$0xff]  }
0x1086   :  { %8587 = vmatmul.mubr.bf16.vlgmr.msra.gmra.mrb[4].mxu0 %v16680_v27 }
0x1087   :  { %11661 = vmatprep.mubr.msk.f32.mxu0 %vm12486_vm6, %v12483_v55  ;;  %vm17809_vm6 = vmmov %vm17807_vm1 }
0x1139   :  { %v8420_v44 = vpop.f32.mrb[254].mxu0 }
0x113a   :  { %v8424_v57 = vadd.f32 %v8420_v44, %v8177_v39  ;;  %v11649_v30 = vpop.f32.mrb[255].mxu0  ;;  %v8842_v39 = vadd.s32 7, %v16742_v42 }
0x113c   :  { %vm8843_vm7 = vcmp.eq.s32.totalorder %v12816_v26, %v8842_v39 }
0x113d   :  { %v8844_v21 = vsel %vm8843_vm7, 1.0, %v12483_v55 }
0x1159   :  { %v10860_v29 = vpop.f32.mrb[4].mxu0 }
0x115a   :  { %v10861_v63 = vpop.f32.mrb[5].mxu0 }
0x115b   :  { %v10862_v40 = vadd.f32 %v10861_v63, %v10860_v29  ;;  %v10863_v2 = vpop.f32.mrb[6].mxu0 }
0x115c   :  { %v10864_v13 = vpop.f32.mrb[7].mxu0 }
0x115d   :  { %v10865_v19 = vadd.f32 %v10864_v13, %v10863_v2 }
0x115f   :  { %v12123_v23 = vpack.c.bf16 %v10865_v19, %v10862_v40 }
0x1161   :  { %12124 = vmatpush3.bf16.msra.mxu1 %v12123_v23 }
0x1162   :  { %10869 = vmatprep.subr.bf16.mxu1 %v12465_v20 }
0x1164   :  { %11655 = vmatmul.mubr.msk.f32.vlgmr.msra.gmra.mrb[48].mxu1 %vm17808_vm9, %v8597_v49 }
0x1165   :  { %10870 = vmatpush3.bf16.msra.mxu1 %v12466_v61  ;;  %8833 = vmatprep.mubr.bf16.mxu1 %v16682_v12  ;;  %v12472_v12 = vld [vmem:[%s17060_s11 + $0x398] sm:$0xff]  }
0x1166   :  { %10871 = vmatprep.subr.bf16.mxu1 %v12467_v7 }
0x1169   :  { %10872 = vmatpush3.bf16.msra.mxu1 %v12468_v9 }
0x116a   :  { %10873 = vmatprep.subr.bf16.mxu1 %v12469_v62 }
0x116d   :  { %10874 = vmatpush3.bf16.msra.mxu1 %v12470_v47 }
0x116e   :  { %10875 = vmatprep.subr.bf16.mxu1 %v12471_v45 }
0x1171   :  { %10876 = vmatpush3.bf16.msra.mxu1 %v12472_v12 }
0x1172   :  { %10877 = vmatprep.subr.bf16.mxu1 %v12473_v1 }
0x1175   :  { %10878 = vmatpush3.bf16.msra.mxu1 %v12474_v14 }
0x1176   :  { %10879 = vmatprep.subr.bf16.mxu1 %v12475_v59 }
0x1179   :  { %10880 = vmatpush3.bf16.msra.mxu1 %v12476_v53 }
0x117a   :  { %10881 = vmatprep.subr.bf16.mxu1 %v12477_v8 }
0x117d   :  { %10882 = vmatpush3.bf16.msra.mxu1 %v12478_v35 }
0x117e   :  { %10883 = vmatprep.subr.bf16.mxu1 %v12479_v34 }
0x1181   :  { %10884 = vmatpush3.bf16.msra.mxu1 %v12480_v46 }
0x1184   :  { %8834 = vmatmul.mubr.bf16.vlgmr.msra.gmra.mrb[52].mxu1 %v16680_v27 }
0x1237   :  { %v8667_v56 = vpop.f32.mrb[48].mxu1 }
0x1238   :  { %v8671_v31 = vadd.f32 %v8667_v56, %v8424_v57  ;;  %v11656_v6 = vpop.f32.mrb[49].mxu1 }
0x1257   :  { %v10885_v37 = vpop.f32.mrb[52].mxu1 }
0x1258   :  { %v10886_v5 = vpop.f32.mrb[53].mxu1 }
0x1259   :  { %v10887_v0 = vadd.f32 %v10886_v5, %v10885_v37  ;;  %v10888_v33 = vpop.f32.mrb[54].mxu1 }
0x125a   :  { %v10889_v41 = vpop.f32.mrb[55].mxu1 }
0x125b   :  { %v10890_v36 = vadd.f32 %v10889_v41, %v10888_v33 }
0x125d   :  { %v12126_v32 = vpack.c.bf16 %v10890_v36, %v10887_v0 }
0x125f   :  { %12127 = vmatpush3.bf16.msra.mxu0 %v12126_v32 }
0x1262   :  { %11662 = vmatmul.mubr.msk.f32.vlgmr.msra.gmra.mrb[8].mxu0 %vm17809_vm6, %v8844_v21 }
0x1335   :  { %v8914_v27 = vpop.f32.mrb[8].mxu0 }
0x1336   :  { %v8918_v43 = vadd.f32 %v8914_v27, %v8671_v31  ;;  %v11663_v48 = vpop.f32.mrb[9].mxu0 }
0x1338   :  { %v8926_v42 = vadd.f32 %v9921_v60, %v8918_v43 }
0x133a   :  { %vm8927_vm4 = vcmp.gt.f32.partialorder %v8926_v42, 0.0  ;;  %v8928_v58 = vmul.f32 0.2, %v8926_v42 }
0x133c   :  { %v8929_v15 = vsel %vm8927_vm4, %v8926_v42, %v8928_v58 }
0x133d   :  { %8931 = vst.msk [vmem:[%s17063_s13] sm:$0x3] %vm8930_vm15, %v8929_v15 }

</bundles_post_ra>
